<compile_context>
chip_gen: v7x
topology: tpu7x:2x2x1
jax: 0.10.0
libtpu: 0.0.40
codegen_flags: <defaults>
</compile_context>

<pallas_src>
import numpy as np

import jax
import jax.numpy as jnp
from jax.experimental import pallas as pl
from jax.experimental.pallas import tpu as pltpu


# ----------------------------------------------------------------------------
# Static gather-index table for the in-kernel implicit im2col of layer c3.
#
# Layer-3 input (= pooled layer-1 output) columns:  m1 = r14*14 + c14.
# Layer-3 conv output columns (pre-pool) are ordered so that
#   - the 4 pooling phases are contiguous 25-column blocks, and
#   - within a block the pooled positions are ordered rc = r5*5 + c5
#     (exactly the tap order conv c5 consumes later):
#   m2 = (pr*2 + pc)*25 + r5*5 + c5, with r10 = 2*r5 + pr, c10 = 2*c5 + pc.
# For conv tap (i, j) the source column is (r10 + i)*14 + (c10 + j).
# ----------------------------------------------------------------------------
def _conv3_gather_indices():
    idx = np.zeros((25, 1, 100), np.int32)
    for i in range(5):
        for j in range(5):
            t = i * 5 + j
            for pr in range(2):
                for pc in range(2):
                    for r5 in range(5):
                        for c5 in range(5):
                            m2 = (pr * 2 + pc) * 25 + r5 * 5 + c5
                            r14 = 2 * r5 + pr + i
                            c14 = 2 * c5 + pc + j
                            idx[t, 0, m2] = r14 * 14 + c14
    return idx


_CONV3_IDX_NP = _conv3_gather_indices()


# ----------------------------------------------------------------------------
# The fused kernel: one grid step == one image, everything in VMEM.
# ----------------------------------------------------------------------------
def _lenet5_fused_kernel(cols1_ref, idx3_ref,
                         w1_ref, b1_ref, w3_ref, b3_ref,
                         w5_ref, b5_ref, w6_ref, b6_ref, w7_ref, b7_ref,
                         out_ref):
    """Shapes (per grid step):
      cols1_ref: (1, 4, 25, 196) bf16  layer-1 patches, split by pooling phase
      idx3_ref : (25, 1, 100)   int32  per-tap gather indices for c3 im2col
      w1: (16,25) bf16  b1: (16,1) f32
      w3: (25,50,16) bf16 (per-tap)  b3: (50,1) f32
      w5: (25,120,50) bf16 (per-tap) b5: (120,1) f32
      w6: (84,120) bf16  b6: (84,1) f32
      w7: (34,84)  bf16  b7: (34,1) f32
      out_ref: (1, 34, 1) f32
    """
    f32 = jnp.float32
    bf16 = jnp.bfloat16

    def mm(a, b):
        return jnp.dot(a, b, preferred_element_type=f32)

    # ---- c1 + relu1 + s2: conv per pooling phase, pool == max over phases ----
    w1 = w1_ref[...]                                        # (16, 25)
    z1 = mm(w1, cols1_ref[0, 0])                            # (16, 196) f32
    for p in range(1, 4):
        z1 = jnp.maximum(z1, mm(w1, cols1_ref[0, p]))
    a2 = jnp.maximum(z1 + b1_ref[...], 0.0)                 # (16, 196) pooled l1
    a2_bf = a2.astype(bf16)

    # ---- c3 + relu3 + s4: implicit im2col via one-hot gathers + per-tap MXU ----
    row_ids = jax.lax.broadcasted_iota(jnp.int32, (196, 1), 0)
    acc3 = jnp.zeros((50, 100), f32)
    for t in range(25):
        onehot = jnp.where(row_ids == idx3_ref[t], 1.0, 0.0).astype(bf16)  # (196,100)
        gathered = mm(a2_bf, onehot).astype(bf16)           # (16, 100)
        acc3 = acc3 + mm(w3_ref[t], gathered)               # (50, 100)
    # the 4 pooling phases are contiguous 25-column blocks of acc3
    z3 = jnp.maximum(jnp.maximum(acc3[:, 0:25], acc3[:, 25:50]),
                     jnp.maximum(acc3[:, 50:75], acc3[:, 75:100]))
    a4 = jnp.maximum(z3 + b3_ref[...], 0.0)                 # (50, 25) pooled l3
    a4_bf = a4.astype(bf16)

    # ---- c5 + relu5: 5x5 conv over a 5x5 map == full contraction, per tap ----
    acc5 = jnp.zeros((120, 1), f32)
    for t in range(25):
        acc5 = acc5 + mm(w5_ref[t], a4_bf[:, t:t + 1])      # (120,50) @ (50,1)
    a5 = jnp.maximum(acc5 + b5_ref[...], 0.0)               # (120, 1) == flatten

    # ---- f6 + relu6, f7 ----
    a6 = jnp.maximum(mm(w6_ref[...], a5.astype(bf16)) + b6_ref[...], 0.0)  # (84,1)
    z7 = mm(w7_ref[...], a6.astype(bf16)) + b7_ref[...]                    # (34,1)

    out_ref[0] = z7


# ----------------------------------------------------------------------------
# Wrapper glue
# ----------------------------------------------------------------------------
def _layer1_phase_patches(img):
    """img (B,1,32,32) f32 -> (B, 4, 25, 196) bf16.

    out[b, pr*2+pc, i*5+j, r*14+c] = img[b, 0, 2*r + pr + i, 2*c + pc + j]
    i.e. the 5x5 patch feeding conv-c1 output pixel (2r+pr, 2c+pc), grouped by
    the 2x2 maxpool phase (pr, pc) so the pool can be fused inside the kernel.
    """
    B = img.shape[0]
    x = img[:, 0]                                            # (B, 32, 32)
    phases = []
    for pr in range(2):
        for pc in range(2):
            taps = []
            for i in range(5):
                for j in range(5):
                    patch = x[:, pr + i:pr + i + 28:2, pc + j:pc + j + 28:2]
                    taps.append(patch.reshape(B, 196))       # (B, 196)
            phases.append(jnp.stack(taps, axis=1))           # (B, 25, 196)
    return jnp.stack(phases, axis=1).astype(jnp.bfloat16)    # (B, 4, 25, 196)


def lenet5_forward(params, img):
    B = img.shape[0]
    f32, bf16 = jnp.float32, jnp.bfloat16

    cols1 = _layer1_phase_patches(img)                       # (B, 4, 25, 196)
    idx3 = jnp.asarray(_CONV3_IDX_NP)                        # (25, 1, 100)

    # Per-tap conv weight layouts, bf16 operands for the MXU, f32 biases.
    w1 = params["c1_w"].reshape(16, 25).astype(bf16)
    w3 = jnp.transpose(params["c3_w"], (2, 3, 0, 1)).reshape(25, 50, 16).astype(bf16)
    w5 = jnp.transpose(params["c5_w"], (2, 3, 0, 1)).reshape(25, 120, 50).astype(bf16)
    w6 = params["f6_w"].astype(bf16)
    w7 = params["f7_w"].astype(bf16)
    b1 = params["c1_b"].reshape(16, 1).astype(f32)
    b3 = params["c3_b"].reshape(50, 1).astype(f32)
    b5 = params["c5_b"].reshape(120, 1).astype(f32)
    b6 = params["f6_b"].reshape(84, 1).astype(f32)
    b7 = params["f7_b"].reshape(34, 1).astype(f32)

    def full_spec(shape):
        return pl.BlockSpec(shape, lambda b: (0,) * len(shape))

    flops = 2 * B * (16 * 25 * 784            # c1 (all 4 phases)
                     + 25 * 16 * 196 * 100    # in-kernel one-hot gathers
                     + 50 * 400 * 100         # c3
                     + 120 * 1250             # c5
                     + 84 * 120 + 34 * 84)    # f6, f7
    bytes_accessed = (cols1.size * 2 + idx3.size * 4
                      + (w1.size + w3.size + w5.size + w6.size + w7.size) * 2
                      + (b1.size + b3.size + b5.size + b6.size + b7.size) * 4
                      + B * 34 * 4)

    out = pl.pallas_call(
        _lenet5_fused_kernel,
        out_shape=jax.ShapeDtypeStruct((B, 34, 1), f32),
        grid=(B,),
        in_specs=[
            pl.BlockSpec((1, 4, 25, 196), lambda b: (b, 0, 0, 0)),
            full_spec((25, 1, 100)),
            full_spec((16, 25)), full_spec((16, 1)),
            full_spec((25, 50, 16)), full_spec((50, 1)),
            full_spec((25, 120, 50)), full_spec((120, 1)),
            full_spec((84, 120)), full_spec((84, 1)),
            full_spec((34, 84)), full_spec((34, 1)),
        ],
        out_specs=pl.BlockSpec((1, 34, 1), lambda b: (b, 0, 0)),
        compiler_params=pltpu.CompilerParams(
            dimension_semantics=("parallel",)),
        cost_estimate=pl.CostEstimate(
            flops=flops, transcendentals=0, bytes_accessed=bytes_accessed),
    )(cols1, idx3, w1, b1, w3, b3, w5, b5, w6, b6, w7, b7)

    return out[:, :, 0]                                      # (B, 34)


# ----------------------------------------------------------------------------
# Deterministic parameter init (PyTorch-like uniform(-1/sqrt(fan_in), +..))
# ----------------------------------------------------------------------------
def _init_conv(key, cout, cin, kh, kw):
    k1, k2 = jax.random.split(key)
    fan_in = cin * kh * kw
    bound = 1.0 / jnp.sqrt(fan_in)
    w = jax.random.uniform(k1, (cout, cin, kh, kw), jnp.float32, -bound, bound)
    b = jax.random.uniform(k2, (cout,), jnp.float32, -bound, bound)
    return w, b


def _init_linear(key, out_f, in_f):
    k1, k2 = jax.random.split(key)
    bound = 1.0 / jnp.sqrt(in_f)
    w = jax.random.uniform(k1, (out_f, in_f), jnp.float32, -bound, bound)
    b = jax.random.uniform(k2, (out_f,), jnp.float32, -bound, bound)
    return w, b


def init_lenet5_params(key):
    keys = jax.random.split(key, 5)
    params = {}
    params["c1_w"], params["c1_b"] = _init_conv(keys[0], 16, 1, 5, 5)
    params["c3_w"], params["c3_b"] = _init_conv(keys[1], 50, 16, 5, 5)
    params["c5_w"], params["c5_b"] = _init_conv(keys[2], 120, 50, 5, 5)
    params["f6_w"], params["f6_b"] = _init_linear(keys[3], 84, 120)
    params["f7_w"], params["f7_b"] = _init_linear(keys[4], 34, 84)
    return params


if __name__ == "__main__":
    key = jax.random.PRNGKey(0)
    pkey, xkey = jax.random.split(key)

    params = init_lenet5_params(pkey)
    # LeNet5 mandates 1x32x32 inputs; small batch = 2.
    img = jax.random.normal(xkey, (2, 1, 32, 32), jnp.float32)

    out = jax.jit(lenet5_forward)(params, img)
    out = jax.block_until_ready(out)
    assert out.shape == (2, 34), out.shape
    print("KERNEL_OK")
</pallas_src>

<mosaic_0001>
module attributes {stable_mosaic.version = 11 : i64} {
  func.func @_lenet5_fused_kernel(%arg0: i32, %arg1: memref<1x4x25x196xbf16, #tpu.memory_space<vmem>>, %arg2: memref<25x1x100xi32, #tpu.memory_space<vmem>>, %arg3: memref<16x25xbf16, #tpu.memory_space<vmem>>, %arg4: memref<16x1xf32, #tpu.memory_space<vmem>>, %arg5: memref<25x50x16xbf16, #tpu.memory_space<vmem>>, %arg6: memref<50x1xf32, #tpu.memory_space<vmem>>, %arg7: memref<25x120x50xbf16, #tpu.memory_space<vmem>>, %arg8: memref<120x1xf32, #tpu.memory_space<vmem>>, %arg9: memref<84x120xbf16, #tpu.memory_space<vmem>>, %arg10: memref<84x1xf32, #tpu.memory_space<vmem>>, %arg11: memref<34x84xbf16, #tpu.memory_space<vmem>>, %arg12: memref<34x1xf32, #tpu.memory_space<vmem>>, %arg13: memref<1x34x1xf32, #tpu.memory_space<vmem>>) attributes {dimension_semantics = [#tpu.dimension_semantics<parallel>], iteration_bounds = array<i64: 2>, scalar_prefetch = 0 : i64, scratch_operands = 0 : i64, tpu.core_type = #tpu.core_type<tc>, window_params = [{transform_indices = @transform_0, window_bounds = array<i64: 1, 4, 25, 196>}, {pipeline_mode = #tpu.pipeline_mode<synchronous>, transform_indices = @transform_1, window_bounds = array<i64: 25, 1, 100>}, {pipeline_mode = #tpu.pipeline_mode<synchronous>, transform_indices = @transform_2, window_bounds = array<i64: 16, 25>}, {pipeline_mode = #tpu.pipeline_mode<synchronous>, transform_indices = @transform_3, window_bounds = array<i64: 16, 1>}, {pipeline_mode = #tpu.pipeline_mode<synchronous>, transform_indices = @transform_4, window_bounds = array<i64: 25, 50, 16>}, {pipeline_mode = #tpu.pipeline_mode<synchronous>, transform_indices = @transform_5, window_bounds = array<i64: 50, 1>}, {pipeline_mode = #tpu.pipeline_mode<synchronous>, transform_indices = @transform_6, window_bounds = array<i64: 25, 120, 50>}, {pipeline_mode = #tpu.pipeline_mode<synchronous>, transform_indices = @transform_7, window_bounds = array<i64: 120, 1>}, {pipeline_mode = #tpu.pipeline_mode<synchronous>, transform_indices = @transform_8, window_bounds = array<i64: 84, 120>}, {pipeline_mode = #tpu.pipeline_mode<synchronous>, transform_indices = @transform_9, window_bounds = array<i64: 84, 1>}, {pipeline_mode = #tpu.pipeline_mode<synchronous>, transform_indices = @transform_10, window_bounds = array<i64: 34, 84>}, {pipeline_mode = #tpu.pipeline_mode<synchronous>, transform_indices = @transform_11, window_bounds = array<i64: 34, 1>}, {transform_indices = @transform_12, window_bounds = array<i64: 1, 34, 1>}]} {
    %c0 = arith.constant 0 : index
    %c0_0 = arith.constant 0 : index
    %0 = vector.load %arg3[%c0, %c0_0] : memref<16x25xbf16, #tpu.memory_space<vmem>>, vector<16x25xbf16>
    %c0_1 = arith.constant 0 : index
    %c0_2 = arith.constant 0 : index
    %c0_3 = arith.constant 0 : index
    %c0_4 = arith.constant 0 : index
    %1 = vector.load %arg1[%c0_1, %c0_2, %c0_3, %c0_4] : memref<1x4x25x196xbf16, #tpu.memory_space<vmem>>, vector<1x1x25x196xbf16>
    %2 = vector.shape_cast %1 : vector<1x1x25x196xbf16> to vector<25x196xbf16>
    %cst = arith.constant dense<0.000000e+00> : vector<16x196xf32>
    %3 = tpu.matmul %0, %2, %cst {dimension_numbers = #tpu.dot_dimension_numbers<[1], [0], [0], [1], [0, 0, 1, 1], [], []>} : vector<16x25xbf16>, vector<25x196xbf16>, vector<16x196xf32> -> vector<16x196xf32>
    %c0_5 = arith.constant 0 : index
    %c1 = arith.constant 1 : index
    %c0_6 = arith.constant 0 : index
    %c0_7 = arith.constant 0 : index
    %4 = vector.load %arg1[%c0_5, %c1, %c0_6, %c0_7] : memref<1x4x25x196xbf16, #tpu.memory_space<vmem>>, vector<1x1x25x196xbf16>
    %5 = vector.shape_cast %4 : vector<1x1x25x196xbf16> to vector<25x196xbf16>
    %cst_8 = arith.constant dense<0.000000e+00> : vector<16x196xf32>
    %6 = tpu.matmul %0, %5, %cst_8 {dimension_numbers = #tpu.dot_dimension_numbers<[1], [0], [0], [1], [0, 0, 1, 1], [], []>} : vector<16x25xbf16>, vector<25x196xbf16>, vector<16x196xf32> -> vector<16x196xf32>
    %7 = arith.maximumf %3, %6 : vector<16x196xf32>
    %c0_9 = arith.constant 0 : index
    %c2 = arith.constant 2 : index
    %c0_10 = arith.constant 0 : index
    %c0_11 = arith.constant 0 : index
    %8 = vector.load %arg1[%c0_9, %c2, %c0_10, %c0_11] : memref<1x4x25x196xbf16, #tpu.memory_space<vmem>>, vector<1x1x25x196xbf16>
    %9 = vector.shape_cast %8 : vector<1x1x25x196xbf16> to vector<25x196xbf16>
    %cst_12 = arith.constant dense<0.000000e+00> : vector<16x196xf32>
    %10 = tpu.matmul %0, %9, %cst_12 {dimension_numbers = #tpu.dot_dimension_numbers<[1], [0], [0], [1], [0, 0, 1, 1], [], []>} : vector<16x25xbf16>, vector<25x196xbf16>, vector<16x196xf32> -> vector<16x196xf32>
    %11 = arith.maximumf %7, %10 : vector<16x196xf32>
    %c0_13 = arith.constant 0 : index
    %c3 = arith.constant 3 : index
    %c0_14 = arith.constant 0 : index
    %c0_15 = arith.constant 0 : index
    %12 = vector.load %arg1[%c0_13, %c3, %c0_14, %c0_15] : memref<1x4x25x196xbf16, #tpu.memory_space<vmem>>, vector<1x1x25x196xbf16>
    %13 = vector.shape_cast %12 : vector<1x1x25x196xbf16> to vector<25x196xbf16>
    %cst_16 = arith.constant dense<0.000000e+00> : vector<16x196xf32>
    %14 = tpu.matmul %0, %13, %cst_16 {dimension_numbers = #tpu.dot_dimension_numbers<[1], [0], [0], [1], [0, 0, 1, 1], [], []>} : vector<16x25xbf16>, vector<25x196xbf16>, vector<16x196xf32> -> vector<16x196xf32>
    %15 = arith.maximumf %11, %14 : vector<16x196xf32>
    %c0_17 = arith.constant 0 : index
    %c0_18 = arith.constant 0 : index
    %16 = vector.load %arg4[%c0_17, %c0_18] : memref<16x1xf32, #tpu.memory_space<vmem>>, vector<16x1xf32>
    %17 = vector.broadcast %16 : vector<16x1xf32> to vector<16x196xf32>
    %18 = arith.addf %15, %17 : vector<16x196xf32>
    %cst_19 = arith.constant 0.000000e+00 : f32
    %19 = vector.broadcast %cst_19 : f32 to vector<16x196xf32>
    %20 = arith.maximumf %18, %19 : vector<16x196xf32>
    %21 = arith.truncf %20 : vector<16x196xf32> to vector<16x196xbf16>
    %22 = tpu.iota {dimensions = array<i32: 0>} : vector<196x1xi32>
    %cst_20 = arith.constant 0.000000e+00 : f32
    %23 = vector.broadcast %cst_20 : f32 to vector<50x100xf32>
    %c0_21 = arith.constant 0 : index
    %c0_22 = arith.constant 0 : index
    %c0_23 = arith.constant 0 : index
    %24 = vector.load %arg2[%c0_21, %c0_22, %c0_23] : memref<25x1x100xi32, #tpu.memory_space<vmem>>, vector<1x1x100xi32>
    %25 = vector.shape_cast %24 : vector<1x1x100xi32> to vector<1x100xi32>
    %26 = vector.broadcast %22 : vector<196x1xi32> to vector<196x100xi32>
    %27 = vector.broadcast %25 : vector<1x100xi32> to vector<196x100xi32>
    %28 = arith.cmpi eq, %26, %27 : vector<196x100xi32>
    %cst_24 = arith.constant 1.000000e+00 : f32
    %cst_25 = arith.constant 0.000000e+00 : f32
    %29 = vector.broadcast %cst_24 : f32 to vector<196x100xf32>
    %30 = vector.broadcast %cst_25 : f32 to vector<196x100xf32>
    %31 = arith.select %28, %29, %30 : vector<196x100xi1>, vector<196x100xf32>
    %32 = arith.truncf %31 : vector<196x100xf32> to vector<196x100xbf16>
    %cst_26 = arith.constant dense<0.000000e+00> : vector<16x100xf32>
    %33 = tpu.matmul %21, %32, %cst_26 {dimension_numbers = #tpu.dot_dimension_numbers<[1], [0], [0], [1], [0, 0, 1, 1], [], []>} : vector<16x196xbf16>, vector<196x100xbf16>, vector<16x100xf32> -> vector<16x100xf32>
    %34 = arith.truncf %33 : vector<16x100xf32> to vector<16x100xbf16>
    %c0_27 = arith.constant 0 : index
    %c0_28 = arith.constant 0 : index
    %c0_29 = arith.constant 0 : index
    %35 = vector.load %arg5[%c0_27, %c0_28, %c0_29] : memref<25x50x16xbf16, #tpu.memory_space<vmem>>, vector<1x50x16xbf16>
    %36 = vector.shape_cast %35 : vector<1x50x16xbf16> to vector<50x16xbf16>
    %cst_30 = arith.constant dense<0.000000e+00> : vector<50x100xf32>
    %37 = tpu.matmul %36, %34, %cst_30 {dimension_numbers = #tpu.dot_dimension_numbers<[1], [0], [0], [1], [0, 0, 1, 1], [], []>} : vector<50x16xbf16>, vector<16x100xbf16>, vector<50x100xf32> -> vector<50x100xf32>
    %38 = arith.addf %23, %37 : vector<50x100xf32>
    %c1_31 = arith.constant 1 : index
    %c0_32 = arith.constant 0 : index
    %c0_33 = arith.constant 0 : index
    %39 = vector.load %arg2[%c1_31, %c0_32, %c0_33] : memref<25x1x100xi32, #tpu.memory_space<vmem>>, vector<1x1x100xi32>
    %40 = vector.shape_cast %39 : vector<1x1x100xi32> to vector<1x100xi32>
    %41 = vector.broadcast %22 : vector<196x1xi32> to vector<196x100xi32>
    %42 = vector.broadcast %40 : vector<1x100xi32> to vector<196x100xi32>
    %43 = arith.cmpi eq, %41, %42 : vector<196x100xi32>
    %cst_34 = arith.constant 1.000000e+00 : f32
    %cst_35 = arith.constant 0.000000e+00 : f32
    %44 = vector.broadcast %cst_34 : f32 to vector<196x100xf32>
    %45 = vector.broadcast %cst_35 : f32 to vector<196x100xf32>
    %46 = arith.select %43, %44, %45 : vector<196x100xi1>, vector<196x100xf32>
    %47 = arith.truncf %46 : vector<196x100xf32> to vector<196x100xbf16>
    %cst_36 = arith.constant dense<0.000000e+00> : vector<16x100xf32>
    %48 = tpu.matmul %21, %47, %cst_36 {dimension_numbers = #tpu.dot_dimension_numbers<[1], [0], [0], [1], [0, 0, 1, 1], [], []>} : vector<16x196xbf16>, vector<196x100xbf16>, vector<16x100xf32> -> vector<16x100xf32>
    %49 = arith.truncf %48 : vector<16x100xf32> to vector<16x100xbf16>
    %c1_37 = arith.constant 1 : index
    %c0_38 = arith.constant 0 : index
    %c0_39 = arith.constant 0 : index
    %50 = vector.load %arg5[%c1_37, %c0_38, %c0_39] : memref<25x50x16xbf16, #tpu.memory_space<vmem>>, vector<1x50x16xbf16>
    %51 = vector.shape_cast %50 : vector<1x50x16xbf16> to vector<50x16xbf16>
    %cst_40 = arith.constant dense<0.000000e+00> : vector<50x100xf32>
    %52 = tpu.matmul %51, %49, %cst_40 {dimension_numbers = #tpu.dot_dimension_numbers<[1], [0], [0], [1], [0, 0, 1, 1], [], []>} : vector<50x16xbf16>, vector<16x100xbf16>, vector<50x100xf32> -> vector<50x100xf32>
    %53 = arith.addf %38, %52 : vector<50x100xf32>
    %c2_41 = arith.constant 2 : index
    %c0_42 = arith.constant 0 : index
    %c0_43 = arith.constant 0 : index
    %54 = vector.load %arg2[%c2_41, %c0_42, %c0_43] : memref<25x1x100xi32, #tpu.memory_space<vmem>>, vector<1x1x100xi32>
    %55 = vector.shape_cast %54 : vector<1x1x100xi32> to vector<1x100xi32>
    %56 = vector.broadcast %22 : vector<196x1xi32> to vector<196x100xi32>
    %57 = vector.broadcast %55 : vector<1x100xi32> to vector<196x100xi32>
    %58 = arith.cmpi eq, %56, %57 : vector<196x100xi32>
    %cst_44 = arith.constant 1.000000e+00 : f32
    %cst_45 = arith.constant 0.000000e+00 : f32
    %59 = vector.broadcast %cst_44 : f32 to vector<196x100xf32>
    %60 = vector.broadcast %cst_45 : f32 to vector<196x100xf32>
    %61 = arith.select %58, %59, %60 : vector<196x100xi1>, vector<196x100xf32>
    %62 = arith.truncf %61 : vector<196x100xf32> to vector<196x100xbf16>
    %cst_46 = arith.constant dense<0.000000e+00> : vector<16x100xf32>
    %63 = tpu.matmul %21, %62, %cst_46 {dimension_numbers = #tpu.dot_dimension_numbers<[1], [0], [0], [1], [0, 0, 1, 1], [], []>} : vector<16x196xbf16>, vector<196x100xbf16>, vector<16x100xf32> -> vector<16x100xf32>
    %64 = arith.truncf %63 : vector<16x100xf32> to vector<16x100xbf16>
    %c2_47 = arith.constant 2 : index
    %c0_48 = arith.constant 0 : index
    %c0_49 = arith.constant 0 : index
    %65 = vector.load %arg5[%c2_47, %c0_48, %c0_49] : memref<25x50x16xbf16, #tpu.memory_space<vmem>>, vector<1x50x16xbf16>
    %66 = vector.shape_cast %65 : vector<1x50x16xbf16> to vector<50x16xbf16>
    %cst_50 = arith.constant dense<0.000000e+00> : vector<50x100xf32>
    %67 = tpu.matmul %66, %64, %cst_50 {dimension_numbers = #tpu.dot_dimension_numbers<[1], [0], [0], [1], [0, 0, 1, 1], [], []>} : vector<50x16xbf16>, vector<16x100xbf16>, vector<50x100xf32> -> vector<50x100xf32>
    %68 = arith.addf %53, %67 : vector<50x100xf32>
    %c3_51 = arith.constant 3 : index
    %c0_52 = arith.constant 0 : index
    %c0_53 = arith.constant 0 : index
    %69 = vector.load %arg2[%c3_51, %c0_52, %c0_53] : memref<25x1x100xi32, #tpu.memory_space<vmem>>, vector<1x1x100xi32>
    %70 = vector.shape_cast %69 : vector<1x1x100xi32> to vector<1x100xi32>
    %71 = vector.broadcast %22 : vector<196x1xi32> to vector<196x100xi32>
    %72 = vector.broadcast %70 : vector<1x100xi32> to vector<196x100xi32>
    %73 = arith.cmpi eq, %71, %72 : vector<196x100xi32>
    %cst_54 = arith.constant 1.000000e+00 : f32
    %cst_55 = arith.constant 0.000000e+00 : f32
    %74 = vector.broadcast %cst_54 : f32 to vector<196x100xf32>
    %75 = vector.broadcast %cst_55 : f32 to vector<196x100xf32>
    %76 = arith.select %73, %74, %75 : vector<196x100xi1>, vector<196x100xf32>
    %77 = arith.truncf %76 : vector<196x100xf32> to vector<196x100xbf16>
    %cst_56 = arith.constant dense<0.000000e+00> : vector<16x100xf32>
    %78 = tpu.matmul %21, %77, %cst_56 {dimension_numbers = #tpu.dot_dimension_numbers<[1], [0], [0], [1], [0, 0, 1, 1], [], []>} : vector<16x196xbf16>, vector<196x100xbf16>, vector<16x100xf32> -> vector<16x100xf32>
    %79 = arith.truncf %78 : vector<16x100xf32> to vector<16x100xbf16>
    %c3_57 = arith.constant 3 : index
    %c0_58 = arith.constant 0 : index
    %c0_59 = arith.constant 0 : index
    %80 = vector.load %arg5[%c3_57, %c0_58, %c0_59] : memref<25x50x16xbf16, #tpu.memory_space<vmem>>, vector<1x50x16xbf16>
    %81 = vector.shape_cast %80 : vector<1x50x16xbf16> to vector<50x16xbf16>
    %cst_60 = arith.constant dense<0.000000e+00> : vector<50x100xf32>
    %82 = tpu.matmul %81, %79, %cst_60 {dimension_numbers = #tpu.dot_dimension_numbers<[1], [0], [0], [1], [0, 0, 1, 1], [], []>} : vector<50x16xbf16>, vector<16x100xbf16>, vector<50x100xf32> -> vector<50x100xf32>
    %83 = arith.addf %68, %82 : vector<50x100xf32>
    %c4 = arith.constant 4 : index
    %c0_61 = arith.constant 0 : index
    %c0_62 = arith.constant 0 : index
    %84 = vector.load %arg2[%c4, %c0_61, %c0_62] : memref<25x1x100xi32, #tpu.memory_space<vmem>>, vector<1x1x100xi32>
    %85 = vector.shape_cast %84 : vector<1x1x100xi32> to vector<1x100xi32>
    %86 = vector.broadcast %22 : vector<196x1xi32> to vector<196x100xi32>
    %87 = vector.broadcast %85 : vector<1x100xi32> to vector<196x100xi32>
    %88 = arith.cmpi eq, %86, %87 : vector<196x100xi32>
    %cst_63 = arith.constant 1.000000e+00 : f32
    %cst_64 = arith.constant 0.000000e+00 : f32
    %89 = vector.broadcast %cst_63 : f32 to vector<196x100xf32>
    %90 = vector.broadcast %cst_64 : f32 to vector<196x100xf32>
    %91 = arith.select %88, %89, %90 : vector<196x100xi1>, vector<196x100xf32>
    %92 = arith.truncf %91 : vector<196x100xf32> to vector<196x100xbf16>
    %cst_65 = arith.constant dense<0.000000e+00> : vector<16x100xf32>
    %93 = tpu.matmul %21, %92, %cst_65 {dimension_numbers = #tpu.dot_dimension_numbers<[1], [0], [0], [1], [0, 0, 1, 1], [], []>} : vector<16x196xbf16>, vector<196x100xbf16>, vector<16x100xf32> -> vector<16x100xf32>
    %94 = arith.truncf %93 : vector<16x100xf32> to vector<16x100xbf16>
    %c4_66 = arith.constant 4 : index
    %c0_67 = arith.constant 0 : index
    %c0_68 = arith.constant 0 : index
    %95 = vector.load %arg5[%c4_66, %c0_67, %c0_68] : memref<25x50x16xbf16, #tpu.memory_space<vmem>>, vector<1x50x16xbf16>
    %96 = vector.shape_cast %95 : vector<1x50x16xbf16> to vector<50x16xbf16>
    %cst_69 = arith.constant dense<0.000000e+00> : vector<50x100xf32>
    %97 = tpu.matmul %96, %94, %cst_69 {dimension_numbers = #tpu.dot_dimension_numbers<[1], [0], [0], [1], [0, 0, 1, 1], [], []>} : vector<50x16xbf16>, vector<16x100xbf16>, vector<50x100xf32> -> vector<50x100xf32>
    %98 = arith.addf %83, %97 : vector<50x100xf32>
    %c5 = arith.constant 5 : index
    %c0_70 = arith.constant 0 : index
    %c0_71 = arith.constant 0 : index
    %99 = vector.load %arg2[%c5, %c0_70, %c0_71] : memref<25x1x100xi32, #tpu.memory_space<vmem>>, vector<1x1x100xi32>
    %100 = vector.shape_cast %99 : vector<1x1x100xi32> to vector<1x100xi32>
    %101 = vector.broadcast %22 : vector<196x1xi32> to vector<196x100xi32>
    %102 = vector.broadcast %100 : vector<1x100xi32> to vector<196x100xi32>
    %103 = arith.cmpi eq, %101, %102 : vector<196x100xi32>
    %cst_72 = arith.constant 1.000000e+00 : f32
    %cst_73 = arith.constant 0.000000e+00 : f32
    %104 = vector.broadcast %cst_72 : f32 to vector<196x100xf32>
    %105 = vector.broadcast %cst_73 : f32 to vector<196x100xf32>
    %106 = arith.select %103, %104, %105 : vector<196x100xi1>, vector<196x100xf32>
    %107 = arith.truncf %106 : vector<196x100xf32> to vector<196x100xbf16>
    %cst_74 = arith.constant dense<0.000000e+00> : vector<16x100xf32>
    %108 = tpu.matmul %21, %107, %cst_74 {dimension_numbers = #tpu.dot_dimension_numbers<[1], [0], [0], [1], [0, 0, 1, 1], [], []>} : vector<16x196xbf16>, vector<196x100xbf16>, vector<16x100xf32> -> vector<16x100xf32>
    %109 = arith.truncf %108 : vector<16x100xf32> to vector<16x100xbf16>
    %c5_75 = arith.constant 5 : index
    %c0_76 = arith.constant 0 : index
    %c0_77 = arith.constant 0 : index
    %110 = vector.load %arg5[%c5_75, %c0_76, %c0_77] : memref<25x50x16xbf16, #tpu.memory_space<vmem>>, vector<1x50x16xbf16>
    %111 = vector.shape_cast %110 : vector<1x50x16xbf16> to vector<50x16xbf16>
    %cst_78 = arith.constant dense<0.000000e+00> : vector<50x100xf32>
    %112 = tpu.matmul %111, %109, %cst_78 {dimension_numbers = #tpu.dot_dimension_numbers<[1], [0], [0], [1], [0, 0, 1, 1], [], []>} : vector<50x16xbf16>, vector<16x100xbf16>, vector<50x100xf32> -> vector<50x100xf32>
    %113 = arith.addf %98, %112 : vector<50x100xf32>
    %c6 = arith.constant 6 : index
    %c0_79 = arith.constant 0 : index
    %c0_80 = arith.constant 0 : index
    %114 = vector.load %arg2[%c6, %c0_79, %c0_80] : memref<25x1x100xi32, #tpu.memory_space<vmem>>, vector<1x1x100xi32>
    %115 = vector.shape_cast %114 : vector<1x1x100xi32> to vector<1x100xi32>
    %116 = vector.broadcast %22 : vector<196x1xi32> to vector<196x100xi32>
    %117 = vector.broadcast %115 : vector<1x100xi32> to vector<196x100xi32>
    %118 = arith.cmpi eq, %116, %117 : vector<196x100xi32>
    %cst_81 = arith.constant 1.000000e+00 : f32
    %cst_82 = arith.constant 0.000000e+00 : f32
    %119 = vector.broadcast %cst_81 : f32 to vector<196x100xf32>
    %120 = vector.broadcast %cst_82 : f32 to vector<196x100xf32>
    %121 = arith.select %118, %119, %120 : vector<196x100xi1>, vector<196x100xf32>
    %122 = arith.truncf %121 : vector<196x100xf32> to vector<196x100xbf16>
    %cst_83 = arith.constant dense<0.000000e+00> : vector<16x100xf32>
    %123 = tpu.matmul %21, %122, %cst_83 {dimension_numbers = #tpu.dot_dimension_numbers<[1], [0], [0], [1], [0, 0, 1, 1], [], []>} : vector<16x196xbf16>, vector<196x100xbf16>, vector<16x100xf32> -> vector<16x100xf32>
    %124 = arith.truncf %123 : vector<16x100xf32> to vector<16x100xbf16>
    %c6_84 = arith.constant 6 : index
    %c0_85 = arith.constant 0 : index
    %c0_86 = arith.constant 0 : index
    %125 = vector.load %arg5[%c6_84, %c0_85, %c0_86] : memref<25x50x16xbf16, #tpu.memory_space<vmem>>, vector<1x50x16xbf16>
    %126 = vector.shape_cast %125 : vector<1x50x16xbf16> to vector<50x16xbf16>
    %cst_87 = arith.constant dense<0.000000e+00> : vector<50x100xf32>
    %127 = tpu.matmul %126, %124, %cst_87 {dimension_numbers = #tpu.dot_dimension_numbers<[1], [0], [0], [1], [0, 0, 1, 1], [], []>} : vector<50x16xbf16>, vector<16x100xbf16>, vector<50x100xf32> -> vector<50x100xf32>
    %128 = arith.addf %113, %127 : vector<50x100xf32>
    %c7 = arith.constant 7 : index
    %c0_88 = arith.constant 0 : index
    %c0_89 = arith.constant 0 : index
    %129 = vector.load %arg2[%c7, %c0_88, %c0_89] : memref<25x1x100xi32, #tpu.memory_space<vmem>>, vector<1x1x100xi32>
    %130 = vector.shape_cast %129 : vector<1x1x100xi32> to vector<1x100xi32>
    %131 = vector.broadcast %22 : vector<196x1xi32> to vector<196x100xi32>
    %132 = vector.broadcast %130 : vector<1x100xi32> to vector<196x100xi32>
    %133 = arith.cmpi eq, %131, %132 : vector<196x100xi32>
    %cst_90 = arith.constant 1.000000e+00 : f32
    %cst_91 = arith.constant 0.000000e+00 : f32
    %134 = vector.broadcast %cst_90 : f32 to vector<196x100xf32>
    %135 = vector.broadcast %cst_91 : f32 to vector<196x100xf32>
    %136 = arith.select %133, %134, %135 : vector<196x100xi1>, vector<196x100xf32>
    %137 = arith.truncf %136 : vector<196x100xf32> to vector<196x100xbf16>
    %cst_92 = arith.constant dense<0.000000e+00> : vector<16x100xf32>
    %138 = tpu.matmul %21, %137, %cst_92 {dimension_numbers = #tpu.dot_dimension_numbers<[1], [0], [0], [1], [0, 0, 1, 1], [], []>} : vector<16x196xbf16>, vector<196x100xbf16>, vector<16x100xf32> -> vector<16x100xf32>
    %139 = arith.truncf %138 : vector<16x100xf32> to vector<16x100xbf16>
    %c7_93 = arith.constant 7 : index
    %c0_94 = arith.constant 0 : index
    %c0_95 = arith.constant 0 : index
    %140 = vector.load %arg5[%c7_93, %c0_94, %c0_95] : memref<25x50x16xbf16, #tpu.memory_space<vmem>>, vector<1x50x16xbf16>
    %141 = vector.shape_cast %140 : vector<1x50x16xbf16> to vector<50x16xbf16>
    %cst_96 = arith.constant dense<0.000000e+00> : vector<50x100xf32>
    %142 = tpu.matmul %141, %139, %cst_96 {dimension_numbers = #tpu.dot_dimension_numbers<[1], [0], [0], [1], [0, 0, 1, 1], [], []>} : vector<50x16xbf16>, vector<16x100xbf16>, vector<50x100xf32> -> vector<50x100xf32>
    %143 = arith.addf %128, %142 : vector<50x100xf32>
    %c8 = arith.constant 8 : index
    %c0_97 = arith.constant 0 : index
    %c0_98 = arith.constant 0 : index
    %144 = vector.load %arg2[%c8, %c0_97, %c0_98] : memref<25x1x100xi32, #tpu.memory_space<vmem>>, vector<1x1x100xi32>
    %145 = vector.shape_cast %144 : vector<1x1x100xi32> to vector<1x100xi32>
    %146 = vector.broadcast %22 : vector<196x1xi32> to vector<196x100xi32>
    %147 = vector.broadcast %145 : vector<1x100xi32> to vector<196x100xi32>
    %148 = arith.cmpi eq, %146, %147 : vector<196x100xi32>
    %cst_99 = arith.constant 1.000000e+00 : f32
    %cst_100 = arith.constant 0.000000e+00 : f32
    %149 = vector.broadcast %cst_99 : f32 to vector<196x100xf32>
    %150 = vector.broadcast %cst_100 : f32 to vector<196x100xf32>
    %151 = arith.select %148, %149, %150 : vector<196x100xi1>, vector<196x100xf32>
    %152 = arith.truncf %151 : vector<196x100xf32> to vector<196x100xbf16>
    %cst_101 = arith.constant dense<0.000000e+00> : vector<16x100xf32>
    %153 = tpu.matmul %21, %152, %cst_101 {dimension_numbers = #tpu.dot_dimension_numbers<[1], [0], [0], [1], [0, 0, 1, 1], [], []>} : vector<16x196xbf16>, vector<196x100xbf16>, vector<16x100xf32> -> vector<16x100xf32>
    %154 = arith.truncf %153 : vector<16x100xf32> to vector<16x100xbf16>
    %c8_102 = arith.constant 8 : index
    %c0_103 = arith.constant 0 : index
    %c0_104 = arith.constant 0 : index
    %155 = vector.load %arg5[%c8_102, %c0_103, %c0_104] : memref<25x50x16xbf16, #tpu.memory_space<vmem>>, vector<1x50x16xbf16>
    %156 = vector.shape_cast %155 : vector<1x50x16xbf16> to vector<50x16xbf16>
    %cst_105 = arith.constant dense<0.000000e+00> : vector<50x100xf32>
    %157 = tpu.matmul %156, %154, %cst_105 {dimension_numbers = #tpu.dot_dimension_numbers<[1], [0], [0], [1], [0, 0, 1, 1], [], []>} : vector<50x16xbf16>, vector<16x100xbf16>, vector<50x100xf32> -> vector<50x100xf32>
    %158 = arith.addf %143, %157 : vector<50x100xf32>
    %c9 = arith.constant 9 : index
    %c0_106 = arith.constant 0 : index
    %c0_107 = arith.constant 0 : index
    %159 = vector.load %arg2[%c9, %c0_106, %c0_107] : memref<25x1x100xi32, #tpu.memory_space<vmem>>, vector<1x1x100xi32>
    %160 = vector.shape_cast %159 : vector<1x1x100xi32> to vector<1x100xi32>
    %161 = vector.broadcast %22 : vector<196x1xi32> to vector<196x100xi32>
    %162 = vector.broadcast %160 : vector<1x100xi32> to vector<196x100xi32>
    %163 = arith.cmpi eq, %161, %162 : vector<196x100xi32>
    %cst_108 = arith.constant 1.000000e+00 : f32
    %cst_109 = arith.constant 0.000000e+00 : f32
    %164 = vector.broadcast %cst_108 : f32 to vector<196x100xf32>
    %165 = vector.broadcast %cst_109 : f32 to vector<196x100xf32>
    %166 = arith.select %163, %164, %165 : vector<196x100xi1>, vector<196x100xf32>
    %167 = arith.truncf %166 : vector<196x100xf32> to vector<196x100xbf16>
    %cst_110 = arith.constant dense<0.000000e+00> : vector<16x100xf32>
    %168 = tpu.matmul %21, %167, %cst_110 {dimension_numbers = #tpu.dot_dimension_numbers<[1], [0], [0], [1], [0, 0, 1, 1], [], []>} : vector<16x196xbf16>, vector<196x100xbf16>, vector<16x100xf32> -> vector<16x100xf32>
    %169 = arith.truncf %168 : vector<16x100xf32> to vector<16x100xbf16>
    %c9_111 = arith.constant 9 : index
    %c0_112 = arith.constant 0 : index
    %c0_113 = arith.constant 0 : index
    %170 = vector.load %arg5[%c9_111, %c0_112, %c0_113] : memref<25x50x16xbf16, #tpu.memory_space<vmem>>, vector<1x50x16xbf16>
    %171 = vector.shape_cast %170 : vector<1x50x16xbf16> to vector<50x16xbf16>
    %cst_114 = arith.constant dense<0.000000e+00> : vector<50x100xf32>
    %172 = tpu.matmul %171, %169, %cst_114 {dimension_numbers = #tpu.dot_dimension_numbers<[1], [0], [0], [1], [0, 0, 1, 1], [], []>} : vector<50x16xbf16>, vector<16x100xbf16>, vector<50x100xf32> -> vector<50x100xf32>
    %173 = arith.addf %158, %172 : vector<50x100xf32>
    %c10 = arith.constant 10 : index
    %c0_115 = arith.constant 0 : index
    %c0_116 = arith.constant 0 : index
    %174 = vector.load %arg2[%c10, %c0_115, %c0_116] : memref<25x1x100xi32, #tpu.memory_space<vmem>>, vector<1x1x100xi32>
    %175 = vector.shape_cast %174 : vector<1x1x100xi32> to vector<1x100xi32>
    %176 = vector.broadcast %22 : vector<196x1xi32> to vector<196x100xi32>
    %177 = vector.broadcast %175 : vector<1x100xi32> to vector<196x100xi32>
    %178 = arith.cmpi eq, %176, %177 : vector<196x100xi32>
    %cst_117 = arith.constant 1.000000e+00 : f32
    %cst_118 = arith.constant 0.000000e+00 : f32
    %179 = vector.broadcast %cst_117 : f32 to vector<196x100xf32>
    %180 = vector.broadcast %cst_118 : f32 to vector<196x100xf32>
    %181 = arith.select %178, %179, %180 : vector<196x100xi1>, vector<196x100xf32>
    %182 = arith.truncf %181 : vector<196x100xf32> to vector<196x100xbf16>
    %cst_119 = arith.constant dense<0.000000e+00> : vector<16x100xf32>
    %183 = tpu.matmul %21, %182, %cst_119 {dimension_numbers = #tpu.dot_dimension_numbers<[1], [0], [0], [1], [0, 0, 1, 1], [], []>} : vector<16x196xbf16>, vector<196x100xbf16>, vector<16x100xf32> -> vector<16x100xf32>
    %184 = arith.truncf %183 : vector<16x100xf32> to vector<16x100xbf16>
    %c10_120 = arith.constant 10 : index
    %c0_121 = arith.constant 0 : index
    %c0_122 = arith.constant 0 : index
    %185 = vector.load %arg5[%c10_120, %c0_121, %c0_122] : memref<25x50x16xbf16, #tpu.memory_space<vmem>>, vector<1x50x16xbf16>
    %186 = vector.shape_cast %185 : vector<1x50x16xbf16> to vector<50x16xbf16>
    %cst_123 = arith.constant dense<0.000000e+00> : vector<50x100xf32>
    %187 = tpu.matmul %186, %184, %cst_123 {dimension_numbers = #tpu.dot_dimension_numbers<[1], [0], [0], [1], [0, 0, 1, 1], [], []>} : vector<50x16xbf16>, vector<16x100xbf16>, vector<50x100xf32> -> vector<50x100xf32>
    %188 = arith.addf %173, %187 : vector<50x100xf32>
    %c11 = arith.constant 11 : index
    %c0_124 = arith.constant 0 : index
    %c0_125 = arith.constant 0 : index
    %189 = vector.load %arg2[%c11, %c0_124, %c0_125] : memref<25x1x100xi32, #tpu.memory_space<vmem>>, vector<1x1x100xi32>
    %190 = vector.shape_cast %189 : vector<1x1x100xi32> to vector<1x100xi32>
    %191 = vector.broadcast %22 : vector<196x1xi32> to vector<196x100xi32>
    %192 = vector.broadcast %190 : vector<1x100xi32> to vector<196x100xi32>
    %193 = arith.cmpi eq, %191, %192 : vector<196x100xi32>
    %cst_126 = arith.constant 1.000000e+00 : f32
    %cst_127 = arith.constant 0.000000e+00 : f32
    %194 = vector.broadcast %cst_126 : f32 to vector<196x100xf32>
    %195 = vector.broadcast %cst_127 : f32 to vector<196x100xf32>
    %196 = arith.select %193, %194, %195 : vector<196x100xi1>, vector<196x100xf32>
    %197 = arith.truncf %196 : vector<196x100xf32> to vector<196x100xbf16>
    %cst_128 = arith.constant dense<0.000000e+00> : vector<16x100xf32>
    %198 = tpu.matmul %21, %197, %cst_128 {dimension_numbers = #tpu.dot_dimension_numbers<[1], [0], [0], [1], [0, 0, 1, 1], [], []>} : vector<16x196xbf16>, vector<196x100xbf16>, vector<16x100xf32> -> vector<16x100xf32>
    %199 = arith.truncf %198 : vector<16x100xf32> to vector<16x100xbf16>
    %c11_129 = arith.constant 11 : index
    %c0_130 = arith.constant 0 : index
    %c0_131 = arith.constant 0 : index
    %200 = vector.load %arg5[%c11_129, %c0_130, %c0_131] : memref<25x50x16xbf16, #tpu.memory_space<vmem>>, vector<1x50x16xbf16>
    %201 = vector.shape_cast %200 : vector<1x50x16xbf16> to vector<50x16xbf16>
    %cst_132 = arith.constant dense<0.000000e+00> : vector<50x100xf32>
    %202 = tpu.matmul %201, %199, %cst_132 {dimension_numbers = #tpu.dot_dimension_numbers<[1], [0], [0], [1], [0, 0, 1, 1], [], []>} : vector<50x16xbf16>, vector<16x100xbf16>, vector<50x100xf32> -> vector<50x100xf32>
    %203 = arith.addf %188, %202 : vector<50x100xf32>
    %c12 = arith.constant 12 : index
    %c0_133 = arith.constant 0 : index
    %c0_134 = arith.constant 0 : index
    %204 = vector.load %arg2[%c12, %c0_133, %c0_134] : memref<25x1x100xi32, #tpu.memory_space<vmem>>, vector<1x1x100xi32>
    %205 = vector.shape_cast %204 : vector<1x1x100xi32> to vector<1x100xi32>
    %206 = vector.broadcast %22 : vector<196x1xi32> to vector<196x100xi32>
    %207 = vector.broadcast %205 : vector<1x100xi32> to vector<196x100xi32>
    %208 = arith.cmpi eq, %206, %207 : vector<196x100xi32>
    %cst_135 = arith.constant 1.000000e+00 : f32
    %cst_136 = arith.constant 0.000000e+00 : f32
    %209 = vector.broadcast %cst_135 : f32 to vector<196x100xf32>
    %210 = vector.broadcast %cst_136 : f32 to vector<196x100xf32>
    %211 = arith.select %208, %209, %210 : vector<196x100xi1>, vector<196x100xf32>
    %212 = arith.truncf %211 : vector<196x100xf32> to vector<196x100xbf16>
    %cst_137 = arith.constant dense<0.000000e+00> : vector<16x100xf32>
    %213 = tpu.matmul %21, %212, %cst_137 {dimension_numbers = #tpu.dot_dimension_numbers<[1], [0], [0], [1], [0, 0, 1, 1], [], []>} : vector<16x196xbf16>, vector<196x100xbf16>, vector<16x100xf32> -> vector<16x100xf32>
    %214 = arith.truncf %213 : vector<16x100xf32> to vector<16x100xbf16>
    %c12_138 = arith.constant 12 : index
    %c0_139 = arith.constant 0 : index
    %c0_140 = arith.constant 0 : index
    %215 = vector.load %arg5[%c12_138, %c0_139, %c0_140] : memref<25x50x16xbf16, #tpu.memory_space<vmem>>, vector<1x50x16xbf16>
    %216 = vector.shape_cast %215 : vector<1x50x16xbf16> to vector<50x16xbf16>
    %cst_141 = arith.constant dense<0.000000e+00> : vector<50x100xf32>
    %217 = tpu.matmul %216, %214, %cst_141 {dimension_numbers = #tpu.dot_dimension_numbers<[1], [0], [0], [1], [0, 0, 1, 1], [], []>} : vector<50x16xbf16>, vector<16x100xbf16>, vector<50x100xf32> -> vector<50x100xf32>
    %218 = arith.addf %203, %217 : vector<50x100xf32>
    %c13 = arith.constant 13 : index
    %c0_142 = arith.constant 0 : index
    %c0_143 = arith.constant 0 : index
    %219 = vector.load %arg2[%c13, %c0_142, %c0_143] : memref<25x1x100xi32, #tpu.memory_space<vmem>>, vector<1x1x100xi32>
    %220 = vector.shape_cast %219 : vector<1x1x100xi32> to vector<1x100xi32>
    %221 = vector.broadcast %22 : vector<196x1xi32> to vector<196x100xi32>
    %222 = vector.broadcast %220 : vector<1x100xi32> to vector<196x100xi32>
    %223 = arith.cmpi eq, %221, %222 : vector<196x100xi32>
    %cst_144 = arith.constant 1.000000e+00 : f32
    %cst_145 = arith.constant 0.000000e+00 : f32
    %224 = vector.broadcast %cst_144 : f32 to vector<196x100xf32>
    %225 = vector.broadcast %cst_145 : f32 to vector<196x100xf32>
    %226 = arith.select %223, %224, %225 : vector<196x100xi1>, vector<196x100xf32>
    %227 = arith.truncf %226 : vector<196x100xf32> to vector<196x100xbf16>
    %cst_146 = arith.constant dense<0.000000e+00> : vector<16x100xf32>
    %228 = tpu.matmul %21, %227, %cst_146 {dimension_numbers = #tpu.dot_dimension_numbers<[1], [0], [0], [1], [0, 0, 1, 1], [], []>} : vector<16x196xbf16>, vector<196x100xbf16>, vector<16x100xf32> -> vector<16x100xf32>
    %229 = arith.truncf %228 : vector<16x100xf32> to vector<16x100xbf16>
    %c13_147 = arith.constant 13 : index
    %c0_148 = arith.constant 0 : index
    %c0_149 = arith.constant 0 : index
    %230 = vector.load %arg5[%c13_147, %c0_148, %c0_149] : memref<25x50x16xbf16, #tpu.memory_space<vmem>>, vector<1x50x16xbf16>
    %231 = vector.shape_cast %230 : vector<1x50x16xbf16> to vector<50x16xbf16>
    %cst_150 = arith.constant dense<0.000000e+00> : vector<50x100xf32>
    %232 = tpu.matmul %231, %229, %cst_150 {dimension_numbers = #tpu.dot_dimension_numbers<[1], [0], [0], [1], [0, 0, 1, 1], [], []>} : vector<50x16xbf16>, vector<16x100xbf16>, vector<50x100xf32> -> vector<50x100xf32>
    %233 = arith.addf %218, %232 : vector<50x100xf32>
    %c14 = arith.constant 14 : index
    %c0_151 = arith.constant 0 : index
    %c0_152 = arith.constant 0 : index
    %234 = vector.load %arg2[%c14, %c0_151, %c0_152] : memref<25x1x100xi32, #tpu.memory_space<vmem>>, vector<1x1x100xi32>
    %235 = vector.shape_cast %234 : vector<1x1x100xi32> to vector<1x100xi32>
    %236 = vector.broadcast %22 : vector<196x1xi32> to vector<196x100xi32>
    %237 = vector.broadcast %235 : vector<1x100xi32> to vector<196x100xi32>
    %238 = arith.cmpi eq, %236, %237 : vector<196x100xi32>
    %cst_153 = arith.constant 1.000000e+00 : f32
    %cst_154 = arith.constant 0.000000e+00 : f32
    %239 = vector.broadcast %cst_153 : f32 to vector<196x100xf32>
    %240 = vector.broadcast %cst_154 : f32 to vector<196x100xf32>
    %241 = arith.select %238, %239, %240 : vector<196x100xi1>, vector<196x100xf32>
    %242 = arith.truncf %241 : vector<196x100xf32> to vector<196x100xbf16>
    %cst_155 = arith.constant dense<0.000000e+00> : vector<16x100xf32>
    %243 = tpu.matmul %21, %242, %cst_155 {dimension_numbers = #tpu.dot_dimension_numbers<[1], [0], [0], [1], [0, 0, 1, 1], [], []>} : vector<16x196xbf16>, vector<196x100xbf16>, vector<16x100xf32> -> vector<16x100xf32>
    %244 = arith.truncf %243 : vector<16x100xf32> to vector<16x100xbf16>
    %c14_156 = arith.constant 14 : index
    %c0_157 = arith.constant 0 : index
    %c0_158 = arith.constant 0 : index
    %245 = vector.load %arg5[%c14_156, %c0_157, %c0_158] : memref<25x50x16xbf16, #tpu.memory_space<vmem>>, vector<1x50x16xbf16>
    %246 = vector.shape_cast %245 : vector<1x50x16xbf16> to vector<50x16xbf16>
    %cst_159 = arith.constant dense<0.000000e+00> : vector<50x100xf32>
    %247 = tpu.matmul %246, %244, %cst_159 {dimension_numbers = #tpu.dot_dimension_numbers<[1], [0], [0], [1], [0, 0, 1, 1], [], []>} : vector<50x16xbf16>, vector<16x100xbf16>, vector<50x100xf32> -> vector<50x100xf32>
    %248 = arith.addf %233, %247 : vector<50x100xf32>
    %c15 = arith.constant 15 : index
    %c0_160 = arith.constant 0 : index
    %c0_161 = arith.constant 0 : index
    %249 = vector.load %arg2[%c15, %c0_160, %c0_161] : memref<25x1x100xi32, #tpu.memory_space<vmem>>, vector<1x1x100xi32>
    %250 = vector.shape_cast %249 : vector<1x1x100xi32> to vector<1x100xi32>
    %251 = vector.broadcast %22 : vector<196x1xi32> to vector<196x100xi32>
    %252 = vector.broadcast %250 : vector<1x100xi32> to vector<196x100xi32>
    %253 = arith.cmpi eq, %251, %252 : vector<196x100xi32>
    %cst_162 = arith.constant 1.000000e+00 : f32
    %cst_163 = arith.constant 0.000000e+00 : f32
    %254 = vector.broadcast %cst_162 : f32 to vector<196x100xf32>
    %255 = vector.broadcast %cst_163 : f32 to vector<196x100xf32>
    %256 = arith.select %253, %254, %255 : vector<196x100xi1>, vector<196x100xf32>
    %257 = arith.truncf %256 : vector<196x100xf32> to vector<196x100xbf16>
    %cst_164 = arith.constant dense<0.000000e+00> : vector<16x100xf32>
    %258 = tpu.matmul %21, %257, %cst_164 {dimension_numbers = #tpu.dot_dimension_numbers<[1], [0], [0], [1], [0, 0, 1, 1], [], []>} : vector<16x196xbf16>, vector<196x100xbf16>, vector<16x100xf32> -> vector<16x100xf32>
    %259 = arith.truncf %258 : vector<16x100xf32> to vector<16x100xbf16>
    %c15_165 = arith.constant 15 : index
    %c0_166 = arith.constant 0 : index
    %c0_167 = arith.constant 0 : index
    %260 = vector.load %arg5[%c15_165, %c0_166, %c0_167] : memref<25x50x16xbf16, #tpu.memory_space<vmem>>, vector<1x50x16xbf16>
    %261 = vector.shape_cast %260 : vector<1x50x16xbf16> to vector<50x16xbf16>
    %cst_168 = arith.constant dense<0.000000e+00> : vector<50x100xf32>
    %262 = tpu.matmul %261, %259, %cst_168 {dimension_numbers = #tpu.dot_dimension_numbers<[1], [0], [0], [1], [0, 0, 1, 1], [], []>} : vector<50x16xbf16>, vector<16x100xbf16>, vector<50x100xf32> -> vector<50x100xf32>
    %263 = arith.addf %248, %262 : vector<50x100xf32>
    %c16 = arith.constant 16 : index
    %c0_169 = arith.constant 0 : index
    %c0_170 = arith.constant 0 : index
    %264 = vector.load %arg2[%c16, %c0_169, %c0_170] : memref<25x1x100xi32, #tpu.memory_space<vmem>>, vector<1x1x100xi32>
    %265 = vector.shape_cast %264 : vector<1x1x100xi32> to vector<1x100xi32>
    %266 = vector.broadcast %22 : vector<196x1xi32> to vector<196x100xi32>
    %267 = vector.broadcast %265 : vector<1x100xi32> to vector<196x100xi32>
    %268 = arith.cmpi eq, %266, %267 : vector<196x100xi32>
    %cst_171 = arith.constant 1.000000e+00 : f32
    %cst_172 = arith.constant 0.000000e+00 : f32
    %269 = vector.broadcast %cst_171 : f32 to vector<196x100xf32>
    %270 = vector.broadcast %cst_172 : f32 to vector<196x100xf32>
    %271 = arith.select %268, %269, %270 : vector<196x100xi1>, vector<196x100xf32>
    %272 = arith.truncf %271 : vector<196x100xf32> to vector<196x100xbf16>
    %cst_173 = arith.constant dense<0.000000e+00> : vector<16x100xf32>
    %273 = tpu.matmul %21, %272, %cst_173 {dimension_numbers = #tpu.dot_dimension_numbers<[1], [0], [0], [1], [0, 0, 1, 1], [], []>} : vector<16x196xbf16>, vector<196x100xbf16>, vector<16x100xf32> -> vector<16x100xf32>
    %274 = arith.truncf %273 : vector<16x100xf32> to vector<16x100xbf16>
    %c16_174 = arith.constant 16 : index
    %c0_175 = arith.constant 0 : index
    %c0_176 = arith.constant 0 : index
    %275 = vector.load %arg5[%c16_174, %c0_175, %c0_176] : memref<25x50x16xbf16, #tpu.memory_space<vmem>>, vector<1x50x16xbf16>
    %276 = vector.shape_cast %275 : vector<1x50x16xbf16> to vector<50x16xbf16>
    %cst_177 = arith.constant dense<0.000000e+00> : vector<50x100xf32>
    %277 = tpu.matmul %276, %274, %cst_177 {dimension_numbers = #tpu.dot_dimension_numbers<[1], [0], [0], [1], [0, 0, 1, 1], [], []>} : vector<50x16xbf16>, vector<16x100xbf16>, vector<50x100xf32> -> vector<50x100xf32>
    %278 = arith.addf %263, %277 : vector<50x100xf32>
    %c17 = arith.constant 17 : index
    %c0_178 = arith.constant 0 : index
    %c0_179 = arith.constant 0 : index
    %279 = vector.load %arg2[%c17, %c0_178, %c0_179] : memref<25x1x100xi32, #tpu.memory_space<vmem>>, vector<1x1x100xi32>
    %280 = vector.shape_cast %279 : vector<1x1x100xi32> to vector<1x100xi32>
    %281 = vector.broadcast %22 : vector<196x1xi32> to vector<196x100xi32>
    %282 = vector.broadcast %280 : vector<1x100xi32> to vector<196x100xi32>
    %283 = arith.cmpi eq, %281, %282 : vector<196x100xi32>
    %cst_180 = arith.constant 1.000000e+00 : f32
    %cst_181 = arith.constant 0.000000e+00 : f32
    %284 = vector.broadcast %cst_180 : f32 to vector<196x100xf32>
    %285 = vector.broadcast %cst_181 : f32 to vector<196x100xf32>
    %286 = arith.select %283, %284, %285 : vector<196x100xi1>, vector<196x100xf32>
    %287 = arith.truncf %286 : vector<196x100xf32> to vector<196x100xbf16>
    %cst_182 = arith.constant dense<0.000000e+00> : vector<16x100xf32>
    %288 = tpu.matmul %21, %287, %cst_182 {dimension_numbers = #tpu.dot_dimension_numbers<[1], [0], [0], [1], [0, 0, 1, 1], [], []>} : vector<16x196xbf16>, vector<196x100xbf16>, vector<16x100xf32> -> vector<16x100xf32>
    %289 = arith.truncf %288 : vector<16x100xf32> to vector<16x100xbf16>
    %c17_183 = arith.constant 17 : index
    %c0_184 = arith.constant 0 : index
    %c0_185 = arith.constant 0 : index
    %290 = vector.load %arg5[%c17_183, %c0_184, %c0_185] : memref<25x50x16xbf16, #tpu.memory_space<vmem>>, vector<1x50x16xbf16>
    %291 = vector.shape_cast %290 : vector<1x50x16xbf16> to vector<50x16xbf16>
    %cst_186 = arith.constant dense<0.000000e+00> : vector<50x100xf32>
    %292 = tpu.matmul %291, %289, %cst_186 {dimension_numbers = #tpu.dot_dimension_numbers<[1], [0], [0], [1], [0, 0, 1, 1], [], []>} : vector<50x16xbf16>, vector<16x100xbf16>, vector<50x100xf32> -> vector<50x100xf32>
    %293 = arith.addf %278, %292 : vector<50x100xf32>
    %c18 = arith.constant 18 : index
    %c0_187 = arith.constant 0 : index
    %c0_188 = arith.constant 0 : index
    %294 = vector.load %arg2[%c18, %c0_187, %c0_188] : memref<25x1x100xi32, #tpu.memory_space<vmem>>, vector<1x1x100xi32>
    %295 = vector.shape_cast %294 : vector<1x1x100xi32> to vector<1x100xi32>
    %296 = vector.broadcast %22 : vector<196x1xi32> to vector<196x100xi32>
    %297 = vector.broadcast %295 : vector<1x100xi32> to vector<196x100xi32>
    %298 = arith.cmpi eq, %296, %297 : vector<196x100xi32>
    %cst_189 = arith.constant 1.000000e+00 : f32
    %cst_190 = arith.constant 0.000000e+00 : f32
    %299 = vector.broadcast %cst_189 : f32 to vector<196x100xf32>
    %300 = vector.broadcast %cst_190 : f32 to vector<196x100xf32>
    %301 = arith.select %298, %299, %300 : vector<196x100xi1>, vector<196x100xf32>
    %302 = arith.truncf %301 : vector<196x100xf32> to vector<196x100xbf16>
    %cst_191 = arith.constant dense<0.000000e+00> : vector<16x100xf32>
    %303 = tpu.matmul %21, %302, %cst_191 {dimension_numbers = #tpu.dot_dimension_numbers<[1], [0], [0], [1], [0, 0, 1, 1], [], []>} : vector<16x196xbf16>, vector<196x100xbf16>, vector<16x100xf32> -> vector<16x100xf32>
    %304 = arith.truncf %303 : vector<16x100xf32> to vector<16x100xbf16>
    %c18_192 = arith.constant 18 : index
    %c0_193 = arith.constant 0 : index
    %c0_194 = arith.constant 0 : index
    %305 = vector.load %arg5[%c18_192, %c0_193, %c0_194] : memref<25x50x16xbf16, #tpu.memory_space<vmem>>, vector<1x50x16xbf16>
    %306 = vector.shape_cast %305 : vector<1x50x16xbf16> to vector<50x16xbf16>
    %cst_195 = arith.constant dense<0.000000e+00> : vector<50x100xf32>
    %307 = tpu.matmul %306, %304, %cst_195 {dimension_numbers = #tpu.dot_dimension_numbers<[1], [0], [0], [1], [0, 0, 1, 1], [], []>} : vector<50x16xbf16>, vector<16x100xbf16>, vector<50x100xf32> -> vector<50x100xf32>
    %308 = arith.addf %293, %307 : vector<50x100xf32>
    %c19 = arith.constant 19 : index
    %c0_196 = arith.constant 0 : index
    %c0_197 = arith.constant 0 : index
    %309 = vector.load %arg2[%c19, %c0_196, %c0_197] : memref<25x1x100xi32, #tpu.memory_space<vmem>>, vector<1x1x100xi32>
    %310 = vector.shape_cast %309 : vector<1x1x100xi32> to vector<1x100xi32>
    %311 = vector.broadcast %22 : vector<196x1xi32> to vector<196x100xi32>
    %312 = vector.broadcast %310 : vector<1x100xi32> to vector<196x100xi32>
    %313 = arith.cmpi eq, %311, %312 : vector<196x100xi32>
    %cst_198 = arith.constant 1.000000e+00 : f32
    %cst_199 = arith.constant 0.000000e+00 : f32
    %314 = vector.broadcast %cst_198 : f32 to vector<196x100xf32>
    %315 = vector.broadcast %cst_199 : f32 to vector<196x100xf32>
    %316 = arith.select %313, %314, %315 : vector<196x100xi1>, vector<196x100xf32>
    %317 = arith.truncf %316 : vector<196x100xf32> to vector<196x100xbf16>
    %cst_200 = arith.constant dense<0.000000e+00> : vector<16x100xf32>
    %318 = tpu.matmul %21, %317, %cst_200 {dimension_numbers = #tpu.dot_dimension_numbers<[1], [0], [0], [1], [0, 0, 1, 1], [], []>} : vector<16x196xbf16>, vector<196x100xbf16>, vector<16x100xf32> -> vector<16x100xf32>
    %319 = arith.truncf %318 : vector<16x100xf32> to vector<16x100xbf16>
    %c19_201 = arith.constant 19 : index
    %c0_202 = arith.constant 0 : index
    %c0_203 = arith.constant 0 : index
    %320 = vector.load %arg5[%c19_201, %c0_202, %c0_203] : memref<25x50x16xbf16, #tpu.memory_space<vmem>>, vector<1x50x16xbf16>
    %321 = vector.shape_cast %320 : vector<1x50x16xbf16> to vector<50x16xbf16>
    %cst_204 = arith.constant dense<0.000000e+00> : vector<50x100xf32>
    %322 = tpu.matmul %321, %319, %cst_204 {dimension_numbers = #tpu.dot_dimension_numbers<[1], [0], [0], [1], [0, 0, 1, 1], [], []>} : vector<50x16xbf16>, vector<16x100xbf16>, vector<50x100xf32> -> vector<50x100xf32>
    %323 = arith.addf %308, %322 : vector<50x100xf32>
    %c20 = arith.constant 20 : index
    %c0_205 = arith.constant 0 : index
    %c0_206 = arith.constant 0 : index
    %324 = vector.load %arg2[%c20, %c0_205, %c0_206] : memref<25x1x100xi32, #tpu.memory_space<vmem>>, vector<1x1x100xi32>
    %325 = vector.shape_cast %324 : vector<1x1x100xi32> to vector<1x100xi32>
    %326 = vector.broadcast %22 : vector<196x1xi32> to vector<196x100xi32>
    %327 = vector.broadcast %325 : vector<1x100xi32> to vector<196x100xi32>
    %328 = arith.cmpi eq, %326, %327 : vector<196x100xi32>
    %cst_207 = arith.constant 1.000000e+00 : f32
    %cst_208 = arith.constant 0.000000e+00 : f32
    %329 = vector.broadcast %cst_207 : f32 to vector<196x100xf32>
    %330 = vector.broadcast %cst_208 : f32 to vector<196x100xf32>
    %331 = arith.select %328, %329, %330 : vector<196x100xi1>, vector<196x100xf32>
    %332 = arith.truncf %331 : vector<196x100xf32> to vector<196x100xbf16>
    %cst_209 = arith.constant dense<0.000000e+00> : vector<16x100xf32>
    %333 = tpu.matmul %21, %332, %cst_209 {dimension_numbers = #tpu.dot_dimension_numbers<[1], [0], [0], [1], [0, 0, 1, 1], [], []>} : vector<16x196xbf16>, vector<196x100xbf16>, vector<16x100xf32> -> vector<16x100xf32>
    %334 = arith.truncf %333 : vector<16x100xf32> to vector<16x100xbf16>
    %c20_210 = arith.constant 20 : index
    %c0_211 = arith.constant 0 : index
    %c0_212 = arith.constant 0 : index
    %335 = vector.load %arg5[%c20_210, %c0_211, %c0_212] : memref<25x50x16xbf16, #tpu.memory_space<vmem>>, vector<1x50x16xbf16>
    %336 = vector.shape_cast %335 : vector<1x50x16xbf16> to vector<50x16xbf16>
    %cst_213 = arith.constant dense<0.000000e+00> : vector<50x100xf32>
    %337 = tpu.matmul %336, %334, %cst_213 {dimension_numbers = #tpu.dot_dimension_numbers<[1], [0], [0], [1], [0, 0, 1, 1], [], []>} : vector<50x16xbf16>, vector<16x100xbf16>, vector<50x100xf32> -> vector<50x100xf32>
    %338 = arith.addf %323, %337 : vector<50x100xf32>
    %c21 = arith.constant 21 : index
    %c0_214 = arith.constant 0 : index
    %c0_215 = arith.constant 0 : index
    %339 = vector.load %arg2[%c21, %c0_214, %c0_215] : memref<25x1x100xi32, #tpu.memory_space<vmem>>, vector<1x1x100xi32>
    %340 = vector.shape_cast %339 : vector<1x1x100xi32> to vector<1x100xi32>
    %341 = vector.broadcast %22 : vector<196x1xi32> to vector<196x100xi32>
    %342 = vector.broadcast %340 : vector<1x100xi32> to vector<196x100xi32>
    %343 = arith.cmpi eq, %341, %342 : vector<196x100xi32>
    %cst_216 = arith.constant 1.000000e+00 : f32
    %cst_217 = arith.constant 0.000000e+00 : f32
    %344 = vector.broadcast %cst_216 : f32 to vector<196x100xf32>
    %345 = vector.broadcast %cst_217 : f32 to vector<196x100xf32>
    %346 = arith.select %343, %344, %345 : vector<196x100xi1>, vector<196x100xf32>
    %347 = arith.truncf %346 : vector<196x100xf32> to vector<196x100xbf16>
    %cst_218 = arith.constant dense<0.000000e+00> : vector<16x100xf32>
    %348 = tpu.matmul %21, %347, %cst_218 {dimension_numbers = #tpu.dot_dimension_numbers<[1], [0], [0], [1], [0, 0, 1, 1], [], []>} : vector<16x196xbf16>, vector<196x100xbf16>, vector<16x100xf32> -> vector<16x100xf32>
    %349 = arith.truncf %348 : vector<16x100xf32> to vector<16x100xbf16>
    %c21_219 = arith.constant 21 : index
    %c0_220 = arith.constant 0 : index
    %c0_221 = arith.constant 0 : index
    %350 = vector.load %arg5[%c21_219, %c0_220, %c0_221] : memref<25x50x16xbf16, #tpu.memory_space<vmem>>, vector<1x50x16xbf16>
    %351 = vector.shape_cast %350 : vector<1x50x16xbf16> to vector<50x16xbf16>
    %cst_222 = arith.constant dense<0.000000e+00> : vector<50x100xf32>
    %352 = tpu.matmul %351, %349, %cst_222 {dimension_numbers = #tpu.dot_dimension_numbers<[1], [0], [0], [1], [0, 0, 1, 1], [], []>} : vector<50x16xbf16>, vector<16x100xbf16>, vector<50x100xf32> -> vector<50x100xf32>
    %353 = arith.addf %338, %352 : vector<50x100xf32>
    %c22 = arith.constant 22 : index
    %c0_223 = arith.constant 0 : index
    %c0_224 = arith.constant 0 : index
    %354 = vector.load %arg2[%c22, %c0_223, %c0_224] : memref<25x1x100xi32, #tpu.memory_space<vmem>>, vector<1x1x100xi32>
    %355 = vector.shape_cast %354 : vector<1x1x100xi32> to vector<1x100xi32>
    %356 = vector.broadcast %22 : vector<196x1xi32> to vector<196x100xi32>
    %357 = vector.broadcast %355 : vector<1x100xi32> to vector<196x100xi32>
    %358 = arith.cmpi eq, %356, %357 : vector<196x100xi32>
    %cst_225 = arith.constant 1.000000e+00 : f32
    %cst_226 = arith.constant 0.000000e+00 : f32
    %359 = vector.broadcast %cst_225 : f32 to vector<196x100xf32>
    %360 = vector.broadcast %cst_226 : f32 to vector<196x100xf32>
    %361 = arith.select %358, %359, %360 : vector<196x100xi1>, vector<196x100xf32>
    %362 = arith.truncf %361 : vector<196x100xf32> to vector<196x100xbf16>
    %cst_227 = arith.constant dense<0.000000e+00> : vector<16x100xf32>
    %363 = tpu.matmul %21, %362, %cst_227 {dimension_numbers = #tpu.dot_dimension_numbers<[1], [0], [0], [1], [0, 0, 1, 1], [], []>} : vector<16x196xbf16>, vector<196x100xbf16>, vector<16x100xf32> -> vector<16x100xf32>
    %364 = arith.truncf %363 : vector<16x100xf32> to vector<16x100xbf16>
    %c22_228 = arith.constant 22 : index
    %c0_229 = arith.constant 0 : index
    %c0_230 = arith.constant 0 : index
    %365 = vector.load %arg5[%c22_228, %c0_229, %c0_230] : memref<25x50x16xbf16, #tpu.memory_space<vmem>>, vector<1x50x16xbf16>
    %366 = vector.shape_cast %365 : vector<1x50x16xbf16> to vector<50x16xbf16>
    %cst_231 = arith.constant dense<0.000000e+00> : vector<50x100xf32>
    %367 = tpu.matmul %366, %364, %cst_231 {dimension_numbers = #tpu.dot_dimension_numbers<[1], [0], [0], [1], [0, 0, 1, 1], [], []>} : vector<50x16xbf16>, vector<16x100xbf16>, vector<50x100xf32> -> vector<50x100xf32>
    %368 = arith.addf %353, %367 : vector<50x100xf32>
    %c23 = arith.constant 23 : index
    %c0_232 = arith.constant 0 : index
    %c0_233 = arith.constant 0 : index
    %369 = vector.load %arg2[%c23, %c0_232, %c0_233] : memref<25x1x100xi32, #tpu.memory_space<vmem>>, vector<1x1x100xi32>
    %370 = vector.shape_cast %369 : vector<1x1x100xi32> to vector<1x100xi32>
    %371 = vector.broadcast %22 : vector<196x1xi32> to vector<196x100xi32>
    %372 = vector.broadcast %370 : vector<1x100xi32> to vector<196x100xi32>
    %373 = arith.cmpi eq, %371, %372 : vector<196x100xi32>
    %cst_234 = arith.constant 1.000000e+00 : f32
    %cst_235 = arith.constant 0.000000e+00 : f32
    %374 = vector.broadcast %cst_234 : f32 to vector<196x100xf32>
    %375 = vector.broadcast %cst_235 : f32 to vector<196x100xf32>
    %376 = arith.select %373, %374, %375 : vector<196x100xi1>, vector<196x100xf32>
    %377 = arith.truncf %376 : vector<196x100xf32> to vector<196x100xbf16>
    %cst_236 = arith.constant dense<0.000000e+00> : vector<16x100xf32>
    %378 = tpu.matmul %21, %377, %cst_236 {dimension_numbers = #tpu.dot_dimension_numbers<[1], [0], [0], [1], [0, 0, 1, 1], [], []>} : vector<16x196xbf16>, vector<196x100xbf16>, vector<16x100xf32> -> vector<16x100xf32>
    %379 = arith.truncf %378 : vector<16x100xf32> to vector<16x100xbf16>
    %c23_237 = arith.constant 23 : index
    %c0_238 = arith.constant 0 : index
    %c0_239 = arith.constant 0 : index
    %380 = vector.load %arg5[%c23_237, %c0_238, %c0_239] : memref<25x50x16xbf16, #tpu.memory_space<vmem>>, vector<1x50x16xbf16>
    %381 = vector.shape_cast %380 : vector<1x50x16xbf16> to vector<50x16xbf16>
    %cst_240 = arith.constant dense<0.000000e+00> : vector<50x100xf32>
    %382 = tpu.matmul %381, %379, %cst_240 {dimension_numbers = #tpu.dot_dimension_numbers<[1], [0], [0], [1], [0, 0, 1, 1], [], []>} : vector<50x16xbf16>, vector<16x100xbf16>, vector<50x100xf32> -> vector<50x100xf32>
    %383 = arith.addf %368, %382 : vector<50x100xf32>
    %c24 = arith.constant 24 : index
    %c0_241 = arith.constant 0 : index
    %c0_242 = arith.constant 0 : index
    %384 = vector.load %arg2[%c24, %c0_241, %c0_242] : memref<25x1x100xi32, #tpu.memory_space<vmem>>, vector<1x1x100xi32>
    %385 = vector.shape_cast %384 : vector<1x1x100xi32> to vector<1x100xi32>
    %386 = vector.broadcast %22 : vector<196x1xi32> to vector<196x100xi32>
    %387 = vector.broadcast %385 : vector<1x100xi32> to vector<196x100xi32>
    %388 = arith.cmpi eq, %386, %387 : vector<196x100xi32>
    %cst_243 = arith.constant 1.000000e+00 : f32
    %cst_244 = arith.constant 0.000000e+00 : f32
    %389 = vector.broadcast %cst_243 : f32 to vector<196x100xf32>
    %390 = vector.broadcast %cst_244 : f32 to vector<196x100xf32>
    %391 = arith.select %388, %389, %390 : vector<196x100xi1>, vector<196x100xf32>
    %392 = arith.truncf %391 : vector<196x100xf32> to vector<196x100xbf16>
    %cst_245 = arith.constant dense<0.000000e+00> : vector<16x100xf32>
    %393 = tpu.matmul %21, %392, %cst_245 {dimension_numbers = #tpu.dot_dimension_numbers<[1], [0], [0], [1], [0, 0, 1, 1], [], []>} : vector<16x196xbf16>, vector<196x100xbf16>, vector<16x100xf32> -> vector<16x100xf32>
    %394 = arith.truncf %393 : vector<16x100xf32> to vector<16x100xbf16>
    %c24_246 = arith.constant 24 : index
    %c0_247 = arith.constant 0 : index
    %c0_248 = arith.constant 0 : index
    %395 = vector.load %arg5[%c24_246, %c0_247, %c0_248] : memref<25x50x16xbf16, #tpu.memory_space<vmem>>, vector<1x50x16xbf16>
    %396 = vector.shape_cast %395 : vector<1x50x16xbf16> to vector<50x16xbf16>
    %cst_249 = arith.constant dense<0.000000e+00> : vector<50x100xf32>
    %397 = tpu.matmul %396, %394, %cst_249 {dimension_numbers = #tpu.dot_dimension_numbers<[1], [0], [0], [1], [0, 0, 1, 1], [], []>} : vector<50x16xbf16>, vector<16x100xbf16>, vector<50x100xf32> -> vector<50x100xf32>
    %398 = arith.addf %383, %397 : vector<50x100xf32>
    %399 = vector.extract_strided_slice %398 {offsets = [0, 0], sizes = [50, 25], strides = [1, 1]} : vector<50x100xf32> to vector<50x25xf32>
    %400 = vector.extract_strided_slice %398 {offsets = [0, 25], sizes = [50, 25], strides = [1, 1]} : vector<50x100xf32> to vector<50x25xf32>
    %401 = arith.maximumf %399, %400 : vector<50x25xf32>
    %402 = vector.extract_strided_slice %398 {offsets = [0, 50], sizes = [50, 25], strides = [1, 1]} : vector<50x100xf32> to vector<50x25xf32>
    %403 = vector.extract_strided_slice %398 {offsets = [0, 75], sizes = [50, 25], strides = [1, 1]} : vector<50x100xf32> to vector<50x25xf32>
    %404 = arith.maximumf %402, %403 : vector<50x25xf32>
    %405 = arith.maximumf %401, %404 : vector<50x25xf32>
    %c0_250 = arith.constant 0 : index
    %c0_251 = arith.constant 0 : index
    %406 = vector.load %arg6[%c0_250, %c0_251] : memref<50x1xf32, #tpu.memory_space<vmem>>, vector<50x1xf32>
    %407 = vector.broadcast %406 : vector<50x1xf32> to vector<50x25xf32>
    %408 = arith.addf %405, %407 : vector<50x25xf32>
    %cst_252 = arith.constant 0.000000e+00 : f32
    %409 = vector.broadcast %cst_252 : f32 to vector<50x25xf32>
    %410 = arith.maximumf %408, %409 : vector<50x25xf32>
    %411 = arith.truncf %410 : vector<50x25xf32> to vector<50x25xbf16>
    %cst_253 = arith.constant 0.000000e+00 : f32
    %412 = vector.broadcast %cst_253 : f32 to vector<120x1xf32>
    %c0_254 = arith.constant 0 : index
    %c0_255 = arith.constant 0 : index
    %c0_256 = arith.constant 0 : index
    %413 = vector.load %arg7[%c0_254, %c0_255, %c0_256] : memref<25x120x50xbf16, #tpu.memory_space<vmem>>, vector<1x120x50xbf16>
    %414 = vector.shape_cast %413 : vector<1x120x50xbf16> to vector<120x50xbf16>
    %415 = vector.extract_strided_slice %411 {offsets = [0, 0], sizes = [50, 1], strides = [1, 1]} : vector<50x25xbf16> to vector<50x1xbf16>
    %cst_257 = arith.constant dense<0.000000e+00> : vector<120x1xf32>
    %416 = tpu.matmul %414, %415, %cst_257 {dimension_numbers = #tpu.dot_dimension_numbers<[1], [0], [0], [1], [0, 0, 1, 1], [], []>} : vector<120x50xbf16>, vector<50x1xbf16>, vector<120x1xf32> -> vector<120x1xf32>
    %417 = arith.addf %412, %416 : vector<120x1xf32>
    %c1_258 = arith.constant 1 : index
    %c0_259 = arith.constant 0 : index
    %c0_260 = arith.constant 0 : index
    %418 = vector.load %arg7[%c1_258, %c0_259, %c0_260] : memref<25x120x50xbf16, #tpu.memory_space<vmem>>, vector<1x120x50xbf16>
    %419 = vector.shape_cast %418 : vector<1x120x50xbf16> to vector<120x50xbf16>
    %420 = vector.extract_strided_slice %411 {offsets = [0, 1], sizes = [50, 1], strides = [1, 1]} : vector<50x25xbf16> to vector<50x1xbf16>
    %cst_261 = arith.constant dense<0.000000e+00> : vector<120x1xf32>
    %421 = tpu.matmul %419, %420, %cst_261 {dimension_numbers = #tpu.dot_dimension_numbers<[1], [0], [0], [1], [0, 0, 1, 1], [], []>} : vector<120x50xbf16>, vector<50x1xbf16>, vector<120x1xf32> -> vector<120x1xf32>
    %422 = arith.addf %417, %421 : vector<120x1xf32>
    %c2_262 = arith.constant 2 : index
    %c0_263 = arith.constant 0 : index
    %c0_264 = arith.constant 0 : index
    %423 = vector.load %arg7[%c2_262, %c0_263, %c0_264] : memref<25x120x50xbf16, #tpu.memory_space<vmem>>, vector<1x120x50xbf16>
    %424 = vector.shape_cast %423 : vector<1x120x50xbf16> to vector<120x50xbf16>
    %425 = vector.extract_strided_slice %411 {offsets = [0, 2], sizes = [50, 1], strides = [1, 1]} : vector<50x25xbf16> to vector<50x1xbf16>
    %cst_265 = arith.constant dense<0.000000e+00> : vector<120x1xf32>
    %426 = tpu.matmul %424, %425, %cst_265 {dimension_numbers = #tpu.dot_dimension_numbers<[1], [0], [0], [1], [0, 0, 1, 1], [], []>} : vector<120x50xbf16>, vector<50x1xbf16>, vector<120x1xf32> -> vector<120x1xf32>
    %427 = arith.addf %422, %426 : vector<120x1xf32>
    %c3_266 = arith.constant 3 : index
    %c0_267 = arith.constant 0 : index
    %c0_268 = arith.constant 0 : index
    %428 = vector.load %arg7[%c3_266, %c0_267, %c0_268] : memref<25x120x50xbf16, #tpu.memory_space<vmem>>, vector<1x120x50xbf16>
    %429 = vector.shape_cast %428 : vector<1x120x50xbf16> to vector<120x50xbf16>
    %430 = vector.extract_strided_slice %411 {offsets = [0, 3], sizes = [50, 1], strides = [1, 1]} : vector<50x25xbf16> to vector<50x1xbf16>
    %cst_269 = arith.constant dense<0.000000e+00> : vector<120x1xf32>
    %431 = tpu.matmul %429, %430, %cst_269 {dimension_numbers = #tpu.dot_dimension_numbers<[1], [0], [0], [1], [0, 0, 1, 1], [], []>} : vector<120x50xbf16>, vector<50x1xbf16>, vector<120x1xf32> -> vector<120x1xf32>
    %432 = arith.addf %427, %431 : vector<120x1xf32>
    %c4_270 = arith.constant 4 : index
    %c0_271 = arith.constant 0 : index
    %c0_272 = arith.constant 0 : index
    %433 = vector.load %arg7[%c4_270, %c0_271, %c0_272] : memref<25x120x50xbf16, #tpu.memory_space<vmem>>, vector<1x120x50xbf16>
    %434 = vector.shape_cast %433 : vector<1x120x50xbf16> to vector<120x50xbf16>
    %435 = vector.extract_strided_slice %411 {offsets = [0, 4], sizes = [50, 1], strides = [1, 1]} : vector<50x25xbf16> to vector<50x1xbf16>
    %cst_273 = arith.constant dense<0.000000e+00> : vector<120x1xf32>
    %436 = tpu.matmul %434, %435, %cst_273 {dimension_numbers = #tpu.dot_dimension_numbers<[1], [0], [0], [1], [0, 0, 1, 1], [], []>} : vector<120x50xbf16>, vector<50x1xbf16>, vector<120x1xf32> -> vector<120x1xf32>
    %437 = arith.addf %432, %436 : vector<120x1xf32>
    %c5_274 = arith.constant 5 : index
    %c0_275 = arith.constant 0 : index
    %c0_276 = arith.constant 0 : index
    %438 = vector.load %arg7[%c5_274, %c0_275, %c0_276] : memref<25x120x50xbf16, #tpu.memory_space<vmem>>, vector<1x120x50xbf16>
    %439 = vector.shape_cast %438 : vector<1x120x50xbf16> to vector<120x50xbf16>
    %440 = vector.extract_strided_slice %411 {offsets = [0, 5], sizes = [50, 1], strides = [1, 1]} : vector<50x25xbf16> to vector<50x1xbf16>
    %cst_277 = arith.constant dense<0.000000e+00> : vector<120x1xf32>
    %441 = tpu.matmul %439, %440, %cst_277 {dimension_numbers = #tpu.dot_dimension_numbers<[1], [0], [0], [1], [0, 0, 1, 1], [], []>} : vector<120x50xbf16>, vector<50x1xbf16>, vector<120x1xf32> -> vector<120x1xf32>
    %442 = arith.addf %437, %441 : vector<120x1xf32>
    %c6_278 = arith.constant 6 : index
    %c0_279 = arith.constant 0 : index
    %c0_280 = arith.constant 0 : index
    %443 = vector.load %arg7[%c6_278, %c0_279, %c0_280] : memref<25x120x50xbf16, #tpu.memory_space<vmem>>, vector<1x120x50xbf16>
    %444 = vector.shape_cast %443 : vector<1x120x50xbf16> to vector<120x50xbf16>
    %445 = vector.extract_strided_slice %411 {offsets = [0, 6], sizes = [50, 1], strides = [1, 1]} : vector<50x25xbf16> to vector<50x1xbf16>
    %cst_281 = arith.constant dense<0.000000e+00> : vector<120x1xf32>
    %446 = tpu.matmul %444, %445, %cst_281 {dimension_numbers = #tpu.dot_dimension_numbers<[1], [0], [0], [1], [0, 0, 1, 1], [], []>} : vector<120x50xbf16>, vector<50x1xbf16>, vector<120x1xf32> -> vector<120x1xf32>
    %447 = arith.addf %442, %446 : vector<120x1xf32>
    %c7_282 = arith.constant 7 : index
    %c0_283 = arith.constant 0 : index
    %c0_284 = arith.constant 0 : index
    %448 = vector.load %arg7[%c7_282, %c0_283, %c0_284] : memref<25x120x50xbf16, #tpu.memory_space<vmem>>, vector<1x120x50xbf16>
    %449 = vector.shape_cast %448 : vector<1x120x50xbf16> to vector<120x50xbf16>
    %450 = vector.extract_strided_slice %411 {offsets = [0, 7], sizes = [50, 1], strides = [1, 1]} : vector<50x25xbf16> to vector<50x1xbf16>
    %cst_285 = arith.constant dense<0.000000e+00> : vector<120x1xf32>
    %451 = tpu.matmul %449, %450, %cst_285 {dimension_numbers = #tpu.dot_dimension_numbers<[1], [0], [0], [1], [0, 0, 1, 1], [], []>} : vector<120x50xbf16>, vector<50x1xbf16>, vector<120x1xf32> -> vector<120x1xf32>
    %452 = arith.addf %447, %451 : vector<120x1xf32>
    %c8_286 = arith.constant 8 : index
    %c0_287 = arith.constant 0 : index
    %c0_288 = arith.constant 0 : index
    %453 = vector.load %arg7[%c8_286, %c0_287, %c0_288] : memref<25x120x50xbf16, #tpu.memory_space<vmem>>, vector<1x120x50xbf16>
    %454 = vector.shape_cast %453 : vector<1x120x50xbf16> to vector<120x50xbf16>
    %455 = vector.extract_strided_slice %411 {offsets = [0, 8], sizes = [50, 1], strides = [1, 1]} : vector<50x25xbf16> to vector<50x1xbf16>
    %cst_289 = arith.constant dense<0.000000e+00> : vector<120x1xf32>
    %456 = tpu.matmul %454, %455, %cst_289 {dimension_numbers = #tpu.dot_dimension_numbers<[1], [0], [0], [1], [0, 0, 1, 1], [], []>} : vector<120x50xbf16>, vector<50x1xbf16>, vector<120x1xf32> -> vector<120x1xf32>
    %457 = arith.addf %452, %456 : vector<120x1xf32>
    %c9_290 = arith.constant 9 : index
    %c0_291 = arith.constant 0 : index
    %c0_292 = arith.constant 0 : index
    %458 = vector.load %arg7[%c9_290, %c0_291, %c0_292] : memref<25x120x50xbf16, #tpu.memory_space<vmem>>, vector<1x120x50xbf16>
    %459 = vector.shape_cast %458 : vector<1x120x50xbf16> to vector<120x50xbf16>
    %460 = vector.extract_strided_slice %411 {offsets = [0, 9], sizes = [50, 1], strides = [1, 1]} : vector<50x25xbf16> to vector<50x1xbf16>
    %cst_293 = arith.constant dense<0.000000e+00> : vector<120x1xf32>
    %461 = tpu.matmul %459, %460, %cst_293 {dimension_numbers = #tpu.dot_dimension_numbers<[1], [0], [0], [1], [0, 0, 1, 1], [], []>} : vector<120x50xbf16>, vector<50x1xbf16>, vector<120x1xf32> -> vector<120x1xf32>
    %462 = arith.addf %457, %461 : vector<120x1xf32>
    %c10_294 = arith.constant 10 : index
    %c0_295 = arith.constant 0 : index
    %c0_296 = arith.constant 0 : index
    %463 = vector.load %arg7[%c10_294, %c0_295, %c0_296] : memref<25x120x50xbf16, #tpu.memory_space<vmem>>, vector<1x120x50xbf16>
    %464 = vector.shape_cast %463 : vector<1x120x50xbf16> to vector<120x50xbf16>
    %465 = vector.extract_strided_slice %411 {offsets = [0, 10], sizes = [50, 1], strides = [1, 1]} : vector<50x25xbf16> to vector<50x1xbf16>
    %cst_297 = arith.constant dense<0.000000e+00> : vector<120x1xf32>
    %466 = tpu.matmul %464, %465, %cst_297 {dimension_numbers = #tpu.dot_dimension_numbers<[1], [0], [0], [1], [0, 0, 1, 1], [], []>} : vector<120x50xbf16>, vector<50x1xbf16>, vector<120x1xf32> -> vector<120x1xf32>
    %467 = arith.addf %462, %466 : vector<120x1xf32>
    %c11_298 = arith.constant 11 : index
    %c0_299 = arith.constant 0 : index
    %c0_300 = arith.constant 0 : index
    %468 = vector.load %arg7[%c11_298, %c0_299, %c0_300] : memref<25x120x50xbf16, #tpu.memory_space<vmem>>, vector<1x120x50xbf16>
    %469 = vector.shape_cast %468 : vector<1x120x50xbf16> to vector<120x50xbf16>
    %470 = vector.extract_strided_slice %411 {offsets = [0, 11], sizes = [50, 1], strides = [1, 1]} : vector<50x25xbf16> to vector<50x1xbf16>
    %cst_301 = arith.constant dense<0.000000e+00> : vector<120x1xf32>
    %471 = tpu.matmul %469, %470, %cst_301 {dimension_numbers = #tpu.dot_dimension_numbers<[1], [0], [0], [1], [0, 0, 1, 1], [], []>} : vector<120x50xbf16>, vector<50x1xbf16>, vector<120x1xf32> -> vector<120x1xf32>
    %472 = arith.addf %467, %471 : vector<120x1xf32>
    %c12_302 = arith.constant 12 : index
    %c0_303 = arith.constant 0 : index
    %c0_304 = arith.constant 0 : index
    %473 = vector.load %arg7[%c12_302, %c0_303, %c0_304] : memref<25x120x50xbf16, #tpu.memory_space<vmem>>, vector<1x120x50xbf16>
    %474 = vector.shape_cast %473 : vector<1x120x50xbf16> to vector<120x50xbf16>
    %475 = vector.extract_strided_slice %411 {offsets = [0, 12], sizes = [50, 1], strides = [1, 1]} : vector<50x25xbf16> to vector<50x1xbf16>
    %cst_305 = arith.constant dense<0.000000e+00> : vector<120x1xf32>
    %476 = tpu.matmul %474, %475, %cst_305 {dimension_numbers = #tpu.dot_dimension_numbers<[1], [0], [0], [1], [0, 0, 1, 1], [], []>} : vector<120x50xbf16>, vector<50x1xbf16>, vector<120x1xf32> -> vector<120x1xf32>
    %477 = arith.addf %472, %476 : vector<120x1xf32>
    %c13_306 = arith.constant 13 : index
    %c0_307 = arith.constant 0 : index
    %c0_308 = arith.constant 0 : index
    %478 = vector.load %arg7[%c13_306, %c0_307, %c0_308] : memref<25x120x50xbf16, #tpu.memory_space<vmem>>, vector<1x120x50xbf16>
    %479 = vector.shape_cast %478 : vector<1x120x50xbf16> to vector<120x50xbf16>
    %480 = vector.extract_strided_slice %411 {offsets = [0, 13], sizes = [50, 1], strides = [1, 1]} : vector<50x25xbf16> to vector<50x1xbf16>
    %cst_309 = arith.constant dense<0.000000e+00> : vector<120x1xf32>
    %481 = tpu.matmul %479, %480, %cst_309 {dimension_numbers = #tpu.dot_dimension_numbers<[1], [0], [0], [1], [0, 0, 1, 1], [], []>} : vector<120x50xbf16>, vector<50x1xbf16>, vector<120x1xf32> -> vector<120x1xf32>
    %482 = arith.addf %477, %481 : vector<120x1xf32>
    %c14_310 = arith.constant 14 : index
    %c0_311 = arith.constant 0 : index
    %c0_312 = arith.constant 0 : index
    %483 = vector.load %arg7[%c14_310, %c0_311, %c0_312] : memref<25x120x50xbf16, #tpu.memory_space<vmem>>, vector<1x120x50xbf16>
    %484 = vector.shape_cast %483 : vector<1x120x50xbf16> to vector<120x50xbf16>
    %485 = vector.extract_strided_slice %411 {offsets = [0, 14], sizes = [50, 1], strides = [1, 1]} : vector<50x25xbf16> to vector<50x1xbf16>
    %cst_313 = arith.constant dense<0.000000e+00> : vector<120x1xf32>
    %486 = tpu.matmul %484, %485, %cst_313 {dimension_numbers = #tpu.dot_dimension_numbers<[1], [0], [0], [1], [0, 0, 1, 1], [], []>} : vector<120x50xbf16>, vector<50x1xbf16>, vector<120x1xf32> -> vector<120x1xf32>
    %487 = arith.addf %482, %486 : vector<120x1xf32>
    %c15_314 = arith.constant 15 : index
    %c0_315 = arith.constant 0 : index
    %c0_316 = arith.constant 0 : index
    %488 = vector.load %arg7[%c15_314, %c0_315, %c0_316] : memref<25x120x50xbf16, #tpu.memory_space<vmem>>, vector<1x120x50xbf16>
    %489 = vector.shape_cast %488 : vector<1x120x50xbf16> to vector<120x50xbf16>
    %490 = vector.extract_strided_slice %411 {offsets = [0, 15], sizes = [50, 1], strides = [1, 1]} : vector<50x25xbf16> to vector<50x1xbf16>
    %cst_317 = arith.constant dense<0.000000e+00> : vector<120x1xf32>
    %491 = tpu.matmul %489, %490, %cst_317 {dimension_numbers = #tpu.dot_dimension_numbers<[1], [0], [0], [1], [0, 0, 1, 1], [], []>} : vector<120x50xbf16>, vector<50x1xbf16>, vector<120x1xf32> -> vector<120x1xf32>
    %492 = arith.addf %487, %491 : vector<120x1xf32>
    %c16_318 = arith.constant 16 : index
    %c0_319 = arith.constant 0 : index
    %c0_320 = arith.constant 0 : index
    %493 = vector.load %arg7[%c16_318, %c0_319, %c0_320] : memref<25x120x50xbf16, #tpu.memory_space<vmem>>, vector<1x120x50xbf16>
    %494 = vector.shape_cast %493 : vector<1x120x50xbf16> to vector<120x50xbf16>
    %495 = vector.extract_strided_slice %411 {offsets = [0, 16], sizes = [50, 1], strides = [1, 1]} : vector<50x25xbf16> to vector<50x1xbf16>
    %cst_321 = arith.constant dense<0.000000e+00> : vector<120x1xf32>
    %496 = tpu.matmul %494, %495, %cst_321 {dimension_numbers = #tpu.dot_dimension_numbers<[1], [0], [0], [1], [0, 0, 1, 1], [], []>} : vector<120x50xbf16>, vector<50x1xbf16>, vector<120x1xf32> -> vector<120x1xf32>
    %497 = arith.addf %492, %496 : vector<120x1xf32>
    %c17_322 = arith.constant 17 : index
    %c0_323 = arith.constant 0 : index
    %c0_324 = arith.constant 0 : index
    %498 = vector.load %arg7[%c17_322, %c0_323, %c0_324] : memref<25x120x50xbf16, #tpu.memory_space<vmem>>, vector<1x120x50xbf16>
    %499 = vector.shape_cast %498 : vector<1x120x50xbf16> to vector<120x50xbf16>
    %500 = vector.extract_strided_slice %411 {offsets = [0, 17], sizes = [50, 1], strides = [1, 1]} : vector<50x25xbf16> to vector<50x1xbf16>
    %cst_325 = arith.constant dense<0.000000e+00> : vector<120x1xf32>
    %501 = tpu.matmul %499, %500, %cst_325 {dimension_numbers = #tpu.dot_dimension_numbers<[1], [0], [0], [1], [0, 0, 1, 1], [], []>} : vector<120x50xbf16>, vector<50x1xbf16>, vector<120x1xf32> -> vector<120x1xf32>
    %502 = arith.addf %497, %501 : vector<120x1xf32>
    %c18_326 = arith.constant 18 : index
    %c0_327 = arith.constant 0 : index
    %c0_328 = arith.constant 0 : index
    %503 = vector.load %arg7[%c18_326, %c0_327, %c0_328] : memref<25x120x50xbf16, #tpu.memory_space<vmem>>, vector<1x120x50xbf16>
    %504 = vector.shape_cast %503 : vector<1x120x50xbf16> to vector<120x50xbf16>
    %505 = vector.extract_strided_slice %411 {offsets = [0, 18], sizes = [50, 1], strides = [1, 1]} : vector<50x25xbf16> to vector<50x1xbf16>
    %cst_329 = arith.constant dense<0.000000e+00> : vector<120x1xf32>
    %506 = tpu.matmul %504, %505, %cst_329 {dimension_numbers = #tpu.dot_dimension_numbers<[1], [0], [0], [1], [0, 0, 1, 1], [], []>} : vector<120x50xbf16>, vector<50x1xbf16>, vector<120x1xf32> -> vector<120x1xf32>
    %507 = arith.addf %502, %506 : vector<120x1xf32>
    %c19_330 = arith.constant 19 : index
    %c0_331 = arith.constant 0 : index
    %c0_332 = arith.constant 0 : index
    %508 = vector.load %arg7[%c19_330, %c0_331, %c0_332] : memref<25x120x50xbf16, #tpu.memory_space<vmem>>, vector<1x120x50xbf16>
    %509 = vector.shape_cast %508 : vector<1x120x50xbf16> to vector<120x50xbf16>
    %510 = vector.extract_strided_slice %411 {offsets = [0, 19], sizes = [50, 1], strides = [1, 1]} : vector<50x25xbf16> to vector<50x1xbf16>
    %cst_333 = arith.constant dense<0.000000e+00> : vector<120x1xf32>
    %511 = tpu.matmul %509, %510, %cst_333 {dimension_numbers = #tpu.dot_dimension_numbers<[1], [0], [0], [1], [0, 0, 1, 1], [], []>} : vector<120x50xbf16>, vector<50x1xbf16>, vector<120x1xf32> -> vector<120x1xf32>
    %512 = arith.addf %507, %511 : vector<120x1xf32>
    %c20_334 = arith.constant 20 : index
    %c0_335 = arith.constant 0 : index
    %c0_336 = arith.constant 0 : index
    %513 = vector.load %arg7[%c20_334, %c0_335, %c0_336] : memref<25x120x50xbf16, #tpu.memory_space<vmem>>, vector<1x120x50xbf16>
    %514 = vector.shape_cast %513 : vector<1x120x50xbf16> to vector<120x50xbf16>
    %515 = vector.extract_strided_slice %411 {offsets = [0, 20], sizes = [50, 1], strides = [1, 1]} : vector<50x25xbf16> to vector<50x1xbf16>
    %cst_337 = arith.constant dense<0.000000e+00> : vector<120x1xf32>
    %516 = tpu.matmul %514, %515, %cst_337 {dimension_numbers = #tpu.dot_dimension_numbers<[1], [0], [0], [1], [0, 0, 1, 1], [], []>} : vector<120x50xbf16>, vector<50x1xbf16>, vector<120x1xf32> -> vector<120x1xf32>
    %517 = arith.addf %512, %516 : vector<120x1xf32>
    %c21_338 = arith.constant 21 : index
    %c0_339 = arith.constant 0 : index
    %c0_340 = arith.constant 0 : index
    %518 = vector.load %arg7[%c21_338, %c0_339, %c0_340] : memref<25x120x50xbf16, #tpu.memory_space<vmem>>, vector<1x120x50xbf16>
    %519 = vector.shape_cast %518 : vector<1x120x50xbf16> to vector<120x50xbf16>
    %520 = vector.extract_strided_slice %411 {offsets = [0, 21], sizes = [50, 1], strides = [1, 1]} : vector<50x25xbf16> to vector<50x1xbf16>
    %cst_341 = arith.constant dense<0.000000e+00> : vector<120x1xf32>
    %521 = tpu.matmul %519, %520, %cst_341 {dimension_numbers = #tpu.dot_dimension_numbers<[1], [0], [0], [1], [0, 0, 1, 1], [], []>} : vector<120x50xbf16>, vector<50x1xbf16>, vector<120x1xf32> -> vector<120x1xf32>
    %522 = arith.addf %517, %521 : vector<120x1xf32>
    %c22_342 = arith.constant 22 : index
    %c0_343 = arith.constant 0 : index
    %c0_344 = arith.constant 0 : index
    %523 = vector.load %arg7[%c22_342, %c0_343, %c0_344] : memref<25x120x50xbf16, #tpu.memory_space<vmem>>, vector<1x120x50xbf16>
    %524 = vector.shape_cast %523 : vector<1x120x50xbf16> to vector<120x50xbf16>
    %525 = vector.extract_strided_slice %411 {offsets = [0, 22], sizes = [50, 1], strides = [1, 1]} : vector<50x25xbf16> to vector<50x1xbf16>
    %cst_345 = arith.constant dense<0.000000e+00> : vector<120x1xf32>
    %526 = tpu.matmul %524, %525, %cst_345 {dimension_numbers = #tpu.dot_dimension_numbers<[1], [0], [0], [1], [0, 0, 1, 1], [], []>} : vector<120x50xbf16>, vector<50x1xbf16>, vector<120x1xf32> -> vector<120x1xf32>
    %527 = arith.addf %522, %526 : vector<120x1xf32>
    %c23_346 = arith.constant 23 : index
    %c0_347 = arith.constant 0 : index
    %c0_348 = arith.constant 0 : index
    %528 = vector.load %arg7[%c23_346, %c0_347, %c0_348] : memref<25x120x50xbf16, #tpu.memory_space<vmem>>, vector<1x120x50xbf16>
    %529 = vector.shape_cast %528 : vector<1x120x50xbf16> to vector<120x50xbf16>
    %530 = vector.extract_strided_slice %411 {offsets = [0, 23], sizes = [50, 1], strides = [1, 1]} : vector<50x25xbf16> to vector<50x1xbf16>
    %cst_349 = arith.constant dense<0.000000e+00> : vector<120x1xf32>
    %531 = tpu.matmul %529, %530, %cst_349 {dimension_numbers = #tpu.dot_dimension_numbers<[1], [0], [0], [1], [0, 0, 1, 1], [], []>} : vector<120x50xbf16>, vector<50x1xbf16>, vector<120x1xf32> -> vector<120x1xf32>
    %532 = arith.addf %527, %531 : vector<120x1xf32>
    %c24_350 = arith.constant 24 : index
    %c0_351 = arith.constant 0 : index
    %c0_352 = arith.constant 0 : index
    %533 = vector.load %arg7[%c24_350, %c0_351, %c0_352] : memref<25x120x50xbf16, #tpu.memory_space<vmem>>, vector<1x120x50xbf16>
    %534 = vector.shape_cast %533 : vector<1x120x50xbf16> to vector<120x50xbf16>
    %535 = vector.extract_strided_slice %411 {offsets = [0, 24], sizes = [50, 1], strides = [1, 1]} : vector<50x25xbf16> to vector<50x1xbf16>
    %cst_353 = arith.constant dense<0.000000e+00> : vector<120x1xf32>
    %536 = tpu.matmul %534, %535, %cst_353 {dimension_numbers = #tpu.dot_dimension_numbers<[1], [0], [0], [1], [0, 0, 1, 1], [], []>} : vector<120x50xbf16>, vector<50x1xbf16>, vector<120x1xf32> -> vector<120x1xf32>
    %537 = arith.addf %532, %536 : vector<120x1xf32>
    %c0_354 = arith.constant 0 : index
    %c0_355 = arith.constant 0 : index
    %538 = vector.load %arg8[%c0_354, %c0_355] : memref<120x1xf32, #tpu.memory_space<vmem>>, vector<120x1xf32>
    %539 = arith.addf %537, %538 : vector<120x1xf32>
    %cst_356 = arith.constant 0.000000e+00 : f32
    %540 = vector.broadcast %cst_356 : f32 to vector<120x1xf32>
    %541 = arith.maximumf %539, %540 : vector<120x1xf32>
    %c0_357 = arith.constant 0 : index
    %c0_358 = arith.constant 0 : index
    %542 = vector.load %arg9[%c0_357, %c0_358] : memref<84x120xbf16, #tpu.memory_space<vmem>>, vector<84x120xbf16>
    %543 = arith.truncf %541 : vector<120x1xf32> to vector<120x1xbf16>
    %cst_359 = arith.constant dense<0.000000e+00> : vector<84x1xf32>
    %544 = tpu.matmul %542, %543, %cst_359 {dimension_numbers = #tpu.dot_dimension_numbers<[1], [0], [0], [1], [0, 0, 1, 1], [], []>} : vector<84x120xbf16>, vector<120x1xbf16>, vector<84x1xf32> -> vector<84x1xf32>
    %c0_360 = arith.constant 0 : index
    %c0_361 = arith.constant 0 : index
    %545 = vector.load %arg10[%c0_360, %c0_361] : memref<84x1xf32, #tpu.memory_space<vmem>>, vector<84x1xf32>
    %546 = arith.addf %544, %545 : vector<84x1xf32>
    %cst_362 = arith.constant 0.000000e+00 : f32
    %547 = vector.broadcast %cst_362 : f32 to vector<84x1xf32>
    %548 = arith.maximumf %546, %547 : vector<84x1xf32>
    %c0_363 = arith.constant 0 : index
    %c0_364 = arith.constant 0 : index
    %549 = vector.load %arg11[%c0_363, %c0_364] : memref<34x84xbf16, #tpu.memory_space<vmem>>, vector<34x84xbf16>
    %550 = arith.truncf %548 : vector<84x1xf32> to vector<84x1xbf16>
    %cst_365 = arith.constant dense<0.000000e+00> : vector<34x1xf32>
    %551 = tpu.matmul %549, %550, %cst_365 {dimension_numbers = #tpu.dot_dimension_numbers<[1], [0], [0], [1], [0, 0, 1, 1], [], []>} : vector<34x84xbf16>, vector<84x1xbf16>, vector<34x1xf32> -> vector<34x1xf32>
    %c0_366 = arith.constant 0 : index
    %c0_367 = arith.constant 0 : index
    %552 = vector.load %arg12[%c0_366, %c0_367] : memref<34x1xf32, #tpu.memory_space<vmem>>, vector<34x1xf32>
    %553 = arith.addf %551, %552 : vector<34x1xf32>
    %c0_368 = arith.constant 0 : index
    %c0_369 = arith.constant 0 : index
    %c0_370 = arith.constant 0 : index
    %554 = vector.load %arg13[%c0_368, %c0_369, %c0_370] : memref<1x34x1xf32, #tpu.memory_space<vmem>>, vector<1x34x1xf32>
    %555 = vector.shape_cast %554 : vector<1x34x1xf32> to vector<34x1xf32>
    %556 = vector.shape_cast %553 : vector<34x1xf32> to vector<1x34x1xf32>
    tpu.vector_store %arg13[%c0_368, %c0_369, %c0_370], %556 {strides = array<i32>} : memref<1x34x1xf32, #tpu.memory_space<vmem>>, vector<1x34x1xf32>,
    return
  }
  func.func @transform_0(%arg0: i32) -> (i32, i32, i32, i32) {
    %c0_i32 = arith.constant 0 : i32
    %c0_i32_0 = arith.constant 0 : i32
    %c0_i32_1 = arith.constant 0 : i32
    %c0_i32_2 = arith.constant 0 : i32
    return %arg0, %c0_i32, %c0_i32_0, %c0_i32_1 : i32, i32, i32, i32
  }
  func.func @transform_1(%arg0: i32) -> (i32, i32, i32) {
    %c0_i32 = arith.constant 0 : i32
    %c0_i32_0 = arith.constant 0 : i32
    %c0_i32_1 = arith.constant 0 : i32
    %c0_i32_2 = arith.constant 0 : i32
    return %c0_i32, %c0_i32_0, %c0_i32_1 : i32, i32, i32
  }
  func.func @transform_2(%arg0: i32) -> (i32, i32) {
    %c0_i32 = arith.constant 0 : i32
    %c0_i32_0 = arith.constant 0 : i32
    %c0_i32_1 = arith.constant 0 : i32
    return %c0_i32, %c0_i32_0 : i32, i32
  }
  func.func @transform_3(%arg0: i32) -> (i32, i32) {
    %c0_i32 = arith.constant 0 : i32
    %c0_i32_0 = arith.constant 0 : i32
    %c0_i32_1 = arith.constant 0 : i32
    return %c0_i32, %c0_i32_0 : i32, i32
  }
  func.func @transform_4(%arg0: i32) -> (i32, i32, i32) {
    %c0_i32 = arith.constant 0 : i32
    %c0_i32_0 = arith.constant 0 : i32
    %c0_i32_1 = arith.constant 0 : i32
    %c0_i32_2 = arith.constant 0 : i32
    return %c0_i32, %c0_i32_0, %c0_i32_1 : i32, i32, i32
  }
  func.func @transform_5(%arg0: i32) -> (i32, i32) {
    %c0_i32 = arith.constant 0 : i32
    %c0_i32_0 = arith.constant 0 : i32
    %c0_i32_1 = arith.constant 0 : i32
    return %c0_i32, %c0_i32_0 : i32, i32
  }
  func.func @transform_6(%arg0: i32) -> (i32, i32, i32) {
    %c0_i32 = arith.constant 0 : i32
    %c0_i32_0 = arith.constant 0 : i32
    %c0_i32_1 = arith.constant 0 : i32
    %c0_i32_2 = arith.constant 0 : i32
    return %c0_i32, %c0_i32_0, %c0_i32_1 : i32, i32, i32
  }
  func.func @transform_7(%arg0: i32) -> (i32, i32) {
    %c0_i32 = arith.constant 0 : i32
    %c0_i32_0 = arith.constant 0 : i32
    %c0_i32_1 = arith.constant 0 : i32
    return %c0_i32, %c0_i32_0 : i32, i32
  }
  func.func @transform_8(%arg0: i32) -> (i32, i32) {
    %c0_i32 = arith.constant 0 : i32
    %c0_i32_0 = arith.constant 0 : i32
    %c0_i32_1 = arith.constant 0 : i32
    return %c0_i32, %c0_i32_0 : i32, i32
  }
  func.func @transform_9(%arg0: i32) -> (i32, i32) {
    %c0_i32 = arith.constant 0 : i32
    %c0_i32_0 = arith.constant 0 : i32
    %c0_i32_1 = arith.constant 0 : i32
    return %c0_i32, %c0_i32_0 : i32, i32
  }
  func.func @transform_10(%arg0: i32) -> (i32, i32) {
    %c0_i32 = arith.constant 0 : i32
    %c0_i32_0 = arith.constant 0 : i32
    %c0_i32_1 = arith.constant 0 : i32
    return %c0_i32, %c0_i32_0 : i32, i32
  }
  func.func @transform_11(%arg0: i32) -> (i32, i32) {
    %c0_i32 = arith.constant 0 : i32
    %c0_i32_0 = arith.constant 0 : i32
    %c0_i32_1 = arith.constant 0 : i32
    return %c0_i32, %c0_i32_0 : i32, i32
  }
  func.func @transform_12(%arg0: i32) -> (i32, i32, i32) {
    %c0_i32 = arith.constant 0 : i32
    %c0_i32_0 = arith.constant 0 : i32
    %c0_i32_1 = arith.constant 0 : i32
    return %arg0, %c0_i32, %c0_i32_0 : i32, i32, i32
  }
}

</mosaic_0001>

<bundles_post_ra>
// kernel: lenet5_forward.1
= control target key start
LH: loop header
LB: loop body
LE: loop exit
PB: predicated region body
PF: predicated region fallthrough
CT: control target
= control target key end

     0   :  { %s16087_s21 = smov 0   ;;  %s20021_s0 = inlined_call_operand.vmem [shape: bf16[2,4,25,196], index: 0, kind: input, shape index: {}]   ;;  %s20022_s1 = inlined_call_operand.vmem [shape: s32[25,1,100], index: 1, kind: input, shape index: {}]   ;;  %s20023_s2 = inlined_call_operand.vmem [shape: bf16[16,25], index: 2, kind: input, shape index: {}]   ;;  %s20024_s3 = inlined_call_operand.vmem [shape: f32[16,1], index: 3, kind: input, shape index: {}]   ;;  %s20025_s4 = inlined_call_operand.vmem [shape: bf16[25,50,16], index: 4, kind: input, shape index: {}]   ;;  %s20026_s5 = inlined_call_operand.vmem [shape: f32[50,1], index: 5, kind: input, shape index: {}]   ;;  %s20027_s6 = inlined_call_operand.vmem [shape: bf16[25,120,50], index: 6, kind: input, shape index: {}]   ;;  %s20028_s7 = inlined_call_operand.vmem [shape: f32[120,1], index: 7, kind: input, shape index: {}]   ;;  %s20029_s8 = inlined_call_operand.vmem [shape: bf16[84,120], index: 8, kind: input, shape index: {}]   ;;  %s20030_s9 = inlined_call_operand.vmem [shape: f32[84,1], index: 9, kind: input, shape index: {}]   ;;  %s20031_s10 = inlined_call_operand.vmem [shape: bf16[34,84], index: 10, kind: input, shape index: {}]   ;;  %s20032_s11 = inlined_call_operand.vmem [shape: f32[34,1], index: 11, kind: input, shape index: {}]   ;;  %s20033_s12 = inlined_call_operand.vmem [shape: f32[2,34,1], index: 12, kind: output, shape index: {}]  }
   0x1 LB: > { %s11887_s22 = sadd.s32 4294967295, %s15989_s21   ;;  %p11891_p0 = scmp.ge.s32.totalorder %s15989_s21, 1  ;;  %s15989_s21 = sphi %s16087_s21, %s22_s21  }
   0x2   : > { %p362_p1 = scmp.lt.s32.totalorder %s15989_s21, 3 }
   0x4   : > { %p363_p2 = pnand %p11891_p0, %p362_p1 }
   0x5   : > { %p404_p3 = scmp.lt.s32.totalorder (!%p363_p2), %s11887_s22, 1  ;;  %vm448_vm0 = vcmask (!%p363_p2), 1043456   ;;  %v15991_v0 = vmov (!%p363_p2), 0   ;;  %v729_v1 = vld [vmem:[%s20024_s3] sm:$0xff] (!%p363_p2)  ;;  %vm449_vm1 = vcmask (!%p363_p2), 1044480   ;;  %v15992_v2 = vmov (!%p363_p2), 65535  }
   0x6   : > { %366 = sbr.rel (%p363_p2) target bundleno = 6853 (0x1ac5), region = 68  ;;  %490 = vmatprep.mubr.bf16.mxu0 (!%p363_p2), %v15991_v0  ;;  %562 = vmatprep.mubr.bf16.mxu1 (!%p363_p2), %v15991_v0  ;;  %v450_v3 = vsel (!%p363_p2), %vm448_vm0, 4294967295, %v15992_v2  ;;  %v730_v4 = vld [vmem:[%s20024_s3 + $0x8] sm:$0xff] (!%p363_p2)  ;;  %v751_v5 = vlaneseq (!%p363_p2)  ;;  %v15661_v18 = vld [vmem:[%s20023_s2] sm:$0xff] (!%p363_p2)   ;;  %vm444_vm2 = vcmask (!%p363_p2), 203776   ;;  %s15995_s27 = smov (!%p363_p2), 103  }
   0x7   : > { %15647 = vset.pattern.permute.xlu0 (!%p363_p2), %v15991_v0  ;;  %15648 = vset.pattern.permute.xlu1 (!%p363_p2), %v15991_v0  ;;  %v451_v8 = vsel (!%p363_p2), %vm449_vm1, %v450_v3, 0  ;;  %v16141_v31 = vld [vmem:[%s20022_s1] ss:$0 sm:$0xff] (!%p363_p2)  ;;  %v16148_v32 = vld [vmem:[%s20022_s1 + $0xc] ss:$0 sm:$0xff] (!%p363_p2)  ;;  %s15996_s24 = smov (!%p363_p2), 78  }
   0x8   : > { %733 = vperm.xlu0 (!%p363_p2), %15647, %v729_v1   ;;  %v16118_v11 = vshrl.u32 (!%p363_p2), %v751_v5, 7  ;;  %v15993_v47 = vmov (!%p363_p2), 1.0|1.0   ;;  %s15999_s13 = smov (!%p363_p2), 125   ;;  %s16000_s14 = smov (!%p363_p2), 124  }
   0x9   : > { %s16001_s15 = smov (!%p363_p2), 123   ;;  %s16002_s16 = smov (!%p363_p2), 122  }
   0xa   : > { %v16132_v25 = vadd.s32 (!%p363_p2), 8, %v16118_v11  ;;  %v16151_v33 = vadd.s32 (!%p363_p2), 16, %v16118_v11  ;;  %v16154_v34 = vadd.s32 (!%p363_p2), 24, %v16118_v11  ;;  %vm782_vm3 = vcmp.eq.s32.totalorder (!%p363_p2), %v16118_v11, %v16141_v31  ;;  %s16003_s17 = smov (!%p363_p2), 121   ;;  %s16004_s18 = smov (!%p363_p2), 120  }
   0xb   : > { %v16162_v38 = vadd.s32 (!%p363_p2), 32, %v16118_v11  ;;  %v16165_v39 = vadd.s32 (!%p363_p2), 40, %v16118_v11  ;;  %vm3449_vm5 = vcmp.eq.s32.totalorder (!%p363_p2), %v16118_v11, %v16148_v32  ;;  %v16177_v40 = vadd.s32 (!%p363_p2), 48, %v16118_v11  ;;  %s16005_s19 = smov (!%p363_p2), 119   ;;  %s16006_s20 = smov (!%p363_p2), 118  }
   0xc   : > { %738 = vperm.xlu0 (!%p363_p2), %15647, %v730_v4   ;;  %vm783_vm4 = vcmp.eq.s32.totalorder (!%p363_p2), %v16132_v25, %v16141_v31  ;;  %vm3450_vm6 = vcmp.eq.s32.totalorder (!%p363_p2), %v16132_v25, %v16148_v32  ;;  %vm784_vm7 = vcmp.eq.s32.totalorder (!%p363_p2), %v16151_v33, %v16141_v31  ;;  %vm785_vm8 = vcmp.eq.s32.totalorder (!%p363_p2), %v16154_v34, %v16141_v31  ;;  %s16007_s23 = smov (!%p363_p2), 117   ;;  %s16010_s26 = smov (!%p363_p2), 114  }
   0xd   : > { %s20061_s22 = smov (!%p404_p3, %s11887_s22), 1  ;;  %v16180_v41 = vadd.s32 56, %v16118_v11  ;;  %vm16182_vm9 = vmpackc.low %vm783_vm4, %vm782_vm3  ;;  %vm3451_vm10 = vcmp.eq.s32.totalorder %v16151_v33, %v16148_v32  ;;  %vm3452_vm11 = vcmp.eq.s32.totalorder %v16154_v34, %v16148_v32  ;;  %vm786_vm13 = vcmp.eq.s32.totalorder %v16162_v38, %v16141_v31  ;;  %s16012_s28 = smov 112  }
   0xe   : > { %s13750_s25 = sshll.u32 %s20061_s22, 7  ;;  %vm12426_vm12 = vmpackc.low %vm3450_vm6, %vm3449_vm5  ;;  %vm787_vm14 = vcmp.eq.s32.totalorder %v16165_v39, %v16141_v31  ;;  %v16197_v43 = vadd.s32 64, %v16118_v11  ;;  %v16200_v44 = vadd.s32 72, %v16118_v11  ;;  %vm3453_vm1 = vcmp.eq.s32.totalorder %v16162_v38, %v16148_v32  ;;  %s16013_s29 = smov 111  }
   0xf   : > { %s16112_s30 = scalar_lea.vmem %s20021_s0, %s13750_s25  ;;  %vm16208_vm15 = vmpackc.low %vm785_vm8, %vm784_vm7  ;;  %vm3454_vm3 = vcmp.eq.s32.totalorder %v16165_v39, %v16148_v32  ;;  %vm788_vm5 = vcmp.eq.s32.totalorder %v16177_v40, %v16141_v31  ;;  %vm789_vm6 = vcmp.eq.s32.totalorder %v16180_v41, %v16141_v31  ;;  %vm3455_vm7 = vcmp.eq.s32.totalorder %v16177_v40, %v16148_v32  ;;  %s16009_s25 = smov 115  }
  0x10   : > { %v15649_v6 = vld [vmem:[%s16112_s30 + $0x4] ss:$8 sps:$4 sm:$0xff]   ;;  %v15653_v9 = vld [vmem:[%s16112_s30] ss:$8 sps:$4 sm:$0xff]   ;;  %vm16218_vm4 = vmpackc.low %vm3452_vm11, %vm3451_vm10  ;;  %vm3456_vm8 = vcmp.eq.s32.totalorder %v16180_v41, %v16148_v32  ;;  %vm790_vm10 = vcmp.eq.s32.totalorder %v16197_v43, %v16141_v31  ;;  %vm791_vm11 = vcmp.eq.s32.totalorder %v16200_v44, %v16141_v31  ;;  %v16255_v50 = vadd.s32 80, %v16118_v11 }
  0x11   : > { %v15651_v7 = vld [vmem:[%s16112_s30 + $0x24] ss:$8 sps:$4 sm:$0xff]   ;;  %458 = vmatprep.subr.bf16.mxu0 %v15649_v6  ;;  %v15654_v10 = vld [vmem:[%s16112_s30 + $0x20] ss:$8 sps:$4 sm:$0xff]   ;;  %v16258_v51 = vadd.s32 88, %v16118_v11  ;;  %v16272_v53 = vadd.s32 96, %v16118_v11 }
  0x12   : > { %530 = vmatprep.subr.bf16.mxu1 %v15651_v7  ;;  %v15655_v12 = vld [vmem:[%s16112_s30 + $0x14] ss:$8 sps:$4 sm:$0x1f]   ;;  %459 = vmatpush1.bf16.msra.mxu0 %v15653_v9  ;;  %v15659_v15 = vld [vmem:[%s16112_s30 + $0x10] ss:$8 sps:$4 sm:$0x1f]  }
  0x13   : > { %531 = vmatpush1.bf16.msra.mxu1 %v15654_v10  ;;  %v15657_v13 = vld [vmem:[%s16112_s30 + $0x34] ss:$8 sps:$4 sm:$0x1f]   ;;  %v456_v14 = vand.u32 %v15655_v12, %v451_v8  ;;  %v15660_v16 = vld [vmem:[%s16112_s30 + $0x30] ss:$8 sps:$4 sm:$0x1f]   ;;  %v453_v20 = vand.u32 %v15659_v15, %v451_v8 }
  0x14   : > { %v528_v17 = vand.u32 %v15657_v13, %v451_v8  ;;  %v15664_v19 = vld [vmem:[%s16112_s30 + $0x44] ss:$8 sps:$4 sm:$0xff]   ;;  %v525_v21 = vand.u32 %v15660_v16, %v451_v8  ;;  %v15662_v22 = vld [vmem:[%s16112_s30 + $0x40] ss:$8 sps:$4 sm:$0xff]   ;;  %v16275_v54 = vadd.s32 104, %v16118_v11  ;;  %v16282_v56 = vadd.s32 112, %v16118_v11 }
  0x15   : > { %460 = vmatprep.subr.bf16.mxu0 %v456_v14  ;;  %v15665_v23 = vld [vmem:[%s16112_s30 + $0x60] ss:$8 sps:$4 sm:$0xff]   ;;  %v15667_v24 = vld [vmem:[%s16112_s30 + $0x64] ss:$8 sps:$4 sm:$0xff]   ;;  %v16285_v57 = vadd.s32 120, %v16118_v11  ;;  %v16394_v1 = vadd.s32 128, %v16118_v11 }
  0x16   : > { %532 = vmatprep.subr.bf16.mxu1 %v528_v17  ;;  %461 = vmatpush1.bf16.msra.mxu0 %v453_v20  ;;  %v15668_v26 = vld [vmem:[%s16112_s30 + $0x50] ss:$8 sps:$4 sm:$0x1f]   ;;  %v15670_v27 = vld [vmem:[%s16112_s30 + $0x54] ss:$8 sps:$4 sm:$0x1f]  }
  0x17   : > { %533 = vmatpush1.bf16.msra.mxu1 %v525_v21  ;;  %606 = vmatprep.subr.bf16.mxu0 %v15664_v19  ;;  %v15671_v28 = vld [vmem:[%s16112_s30 + $0x70] ss:$8 sps:$4 sm:$0x1f]   ;;  %v604_v29 = vand.u32 %v15670_v27, %v451_v8  ;;  %v15673_v30 = vld [vmem:[%s16112_s30 + $0x74] ss:$8 sps:$4 sm:$0x1f]   ;;  %v601_v36 = vand.u32 %v15668_v26, %v451_v8 }
  0x18   : > { %682 = vmatprep.subr.bf16.mxu1 %v15667_v24  ;;  %v680_v35 = vand.u32 %v15673_v30, %v451_v8  ;;  %v677_v37 = vand.u32 %v15671_v28, %v451_v8  ;;  %v16397_v2 = vadd.s32 136, %v16118_v11  ;;  %v16409_v3 = vadd.s32 144, %v16118_v11  ;;  %s15998_s30 = smov 126  }
  0x19   : > { %11900 = vmatmul.mubr.msk.bf16.vlgmr.msra.gmra.mrb[0].mxu0 %vm444_vm2, %v15661_v18  ;;  %v16412_v4 = vadd.s32 152, %v16118_v11  ;;  %v16427_v5 = vadd.s32 160, %v16118_v11  ;;  %v16430_v6 = vadd.s32 168, %v16118_v11  ;;  %v16445_v7 = vadd.s32 176, %v16118_v11 }
  0x1a   : > { %11909 = vmatmul.mubr.msk.bf16.vlgmr.msra.gmra.mrb[0].mxu1 %vm444_vm2, %v15661_v18  ;;  %607 = vmatpush1.bf16.msra.mxu0 %v15662_v22  ;;  %v16448_v8 = vadd.s32 184, %v16118_v11  ;;  %v16453_v9 = vadd.s32 192, %v16118_v11  ;;  %v15994_v10 = vmov 0.0  }
  0x1b   : > { %683 = vmatpush1.bf16.msra.mxu1 %v15665_v23  ;;  %608 = vmatprep.subr.bf16.mxu0 %v604_v29 }
  0x1c   : > { %638 = vmatprep.mubr.bf16.mxu0 %v15991_v0  ;;  %684 = vmatprep.subr.bf16.mxu1 %v680_v35 }
  0x1d   : > { %714 = vmatprep.mubr.bf16.mxu1 %v15991_v0 }
  0x1e   : > { %609 = vmatpush1.bf16.msra.mxu0 %v601_v36 }
  0x1f   : > { %685 = vmatpush1.bf16.msra.mxu1 %v677_v37  ;;  %853 = vmatprep.subr.bf16.mxu0 %v15991_v0 }
  0x20   : > { %3515 = vmatprep.subr.bf16.mxu1 %v15991_v0 }
  0x21   : > { %11918 = vmatmul.mubr.msk.bf16.vlgmr.msra.gmra.mrb[4].mxu0 %vm444_vm2, %v15661_v18 }
  0x22   : > { %11927 = vmatmul.mubr.msk.bf16.vlgmr.msra.gmra.mrb[4].mxu1 %vm444_vm2, %v15661_v18  ;;  %11930 = vmatpush1.bf16.msk.msra.mxu0 %vm16182_vm9, %v15993_v47  ;;  %vm16233_vm2 = vmpackc.low %vm787_vm14, %vm786_vm13  ;;  %vm3457_vm13 = vcmp.eq.s32.totalorder %v16197_v43, %v16148_v32  ;;  %vm3458_vm14 = vcmp.eq.s32.totalorder %v16200_v44, %v16148_v32 }
  0x23   : > { %12427 = vmatpush1.bf16.msk.msra.mxu1 %vm12426_vm12, %v15993_v47  ;;  %855 = vmatprep.subr.bf16.mxu0 %v15991_v0  ;;  %vm16246_vm9 = vmpackc.low %vm3454_vm3, %vm3453_vm1 }
  0x24   : > { %3517 = vmatprep.subr.bf16.mxu1 %v15991_v0  ;;  %vm16263_vm12 = vmpackc.low %vm789_vm6, %vm788_vm5  ;;  %vm3459_vm6 = vcmp.eq.s32.totalorder %v16255_v50, %v16148_v32 }
  0x25   : > { %vm16277_vm1 = vmpackc.low %vm3456_vm8, %vm3455_vm7  ;;  %vm3460_vm7 = vcmp.eq.s32.totalorder %v16258_v51, %v16148_v32 }
  0x26   : > { %11932 = vmatpush1.bf16.msk.msra.mxu0 %vm16208_vm15, %v15993_v47  ;;  %vm16301_vm3 = vmpackc.low %vm791_vm11, %vm790_vm10  ;;  %vm792_vm15 = vcmp.eq.s32.totalorder %v16255_v50, %v16141_v31  ;;  %vm794_vm11 = vcmp.eq.s32.totalorder %v16272_v53, %v16141_v31 }
  0x27   : > { %12429 = vmatpush1.bf16.msk.msra.mxu1 %vm16218_vm4, %v15993_v47  ;;  %857 = vmatprep.subr.bf16.mxu0 %v15991_v0  ;;  %vm16305_vm5 = vmpackc.low %vm3458_vm14, %vm3457_vm13  ;;  %vm793_vm4 = vcmp.eq.s32.totalorder %v16258_v51, %v16141_v31  ;;  %vm3462_vm13 = vcmp.eq.s32.totalorder %v16275_v54, %v16148_v32 }
  0x28   : > { %3519 = vmatprep.subr.bf16.mxu1 %v15991_v0  ;;  %vm16325_vm8 = vmpackc.low %vm793_vm4, %vm792_vm15  ;;  %vm796_vm4 = vcmp.eq.s32.totalorder %v16282_v56, %v16141_v31 }
  0x29   : > { %vm16329_vm10 = vmpackc.low %vm3460_vm7, %vm3459_vm6  ;;  %vm3464_vm6 = vcmp.eq.s32.totalorder %v16285_v57, %v16148_v32 }
  0x2a   : > { %11934 = vmatpush1.bf16.msk.msra.mxu0 %vm16233_vm2, %v15993_v47  ;;  %vm795_vm2 = vcmp.eq.s32.totalorder %v16275_v54, %v16141_v31 }
  0x2b   : > { %12431 = vmatpush1.bf16.msk.msra.mxu1 %vm16246_vm9, %v15993_v47  ;;  %859 = vmatprep.subr.bf16.mxu0 %v15991_v0  ;;  %vm3461_vm9 = vcmp.eq.s32.totalorder %v16272_v53, %v16148_v32  ;;  %vm16349_vm14 = vmpackc.low %vm795_vm2, %vm794_vm11 }
  0x2c   : > { %3521 = vmatprep.subr.bf16.mxu1 %v15991_v0  ;;  %vm16353_vm15 = vmpackc.low %vm3462_vm13, %vm3461_vm9  ;;  %vm800_vm13 = vcmp.eq.s32.totalorder %v16409_v3, %v16141_v31 }
  0x2e   : > { %11936 = vmatpush1.bf16.msk.msra.mxu0 %vm16263_vm12, %v15993_v47  ;;  %vm797_vm12 = vcmp.eq.s32.totalorder %v16285_v57, %v16141_v31 }
  0x2f   : > { %12433 = vmatpush1.bf16.msk.msra.mxu1 %vm16277_vm1, %v15993_v47  ;;  %861 = vmatprep.subr.bf16.mxu0 %v15991_v0  ;;  %vm3463_vm1 = vcmp.eq.s32.totalorder %v16282_v56, %v16148_v32  ;;  %vm11943_vm7 = vmpackc.low %vm797_vm12, %vm796_vm4  ;;  %vm3468_vm4 = vcmp.eq.s32.totalorder %v16412_v4, %v16148_v32 }
  0x30   : > { %3523 = vmatprep.subr.bf16.mxu1 %v15991_v0  ;;  %vm12440_vm11 = vmpackc.low %vm3464_vm6, %vm3463_vm1  ;;  %vm802_vm6 = vcmp.eq.s32.totalorder %v16427_v5, %v16141_v31 }
  0x32   : > { %11938 = vmatpush1.bf16.msk.msra.mxu0 %vm16301_vm3, %v15993_v47  ;;  %vm798_vm3 = vcmp.eq.s32.totalorder %v16394_v1, %v16141_v31 }
  0x33   : > { %12435 = vmatpush1.bf16.msk.msra.mxu1 %vm16305_vm5, %v15993_v47  ;;  %863 = vmatprep.subr.bf16.mxu0 %v15991_v0  ;;  %vm799_vm5 = vcmp.eq.s32.totalorder %v16397_v2, %v16141_v31 }
  0x34   : > { %3525 = vmatprep.subr.bf16.mxu1 %v15991_v0  ;;  %vm11945_vm2 = vmpackc.low %vm799_vm5, %vm798_vm3  ;;  %vm3470_vm3 = vcmp.eq.s32.totalorder %v16430_v6, %v16148_v32 }
  0x36   : > { %11940 = vmatpush1.bf16.msk.msra.mxu0 %vm16325_vm8, %v15993_v47  ;;  %vm3465_vm8 = vcmp.eq.s32.totalorder %v16394_v1, %v16148_v32 }
  0x37   : > { %12437 = vmatpush1.bf16.msk.msra.mxu1 %vm16329_vm10, %v15993_v47  ;;  %865 = vmatprep.subr.bf16.mxu0 %v15991_v0  ;;  %vm3466_vm10 = vcmp.eq.s32.totalorder %v16397_v2, %v16148_v32 }
  0x38   : > { %3527 = vmatprep.subr.bf16.mxu1 %v15991_v0  ;;  %vm12442_vm9 = vmpackc.low %vm3466_vm10, %vm3465_vm8  ;;  %vm804_vm10 = vcmp.eq.s32.totalorder %v16445_v7, %v16141_v31 }
  0x3a   : > { %11942 = vmatpush1.bf16.msk.msra.mxu0 %vm16349_vm14, %v15993_v47  ;;  %vm801_vm14 = vcmp.eq.s32.totalorder %v16412_v4, %v16141_v31 }
  0x3b   : > { %12439 = vmatpush1.bf16.msk.msra.mxu1 %vm16353_vm15, %v15993_v47  ;;  %867 = vmatprep.subr.bf16.mxu0 %v15991_v0  ;;  %vm3467_vm15 = vcmp.eq.s32.totalorder %v16409_v3, %v16148_v32  ;;  %vm11947_vm12 = vmpackc.low %vm801_vm14, %vm800_vm13  ;;  %vm3472_vm13 = vcmp.eq.s32.totalorder %v16448_v8, %v16148_v32 }
  0x3c   : > { %3529 = vmatprep.subr.bf16.mxu1 %v15991_v0  ;;  %vm12444_vm1 = vmpackc.low %vm3468_vm4, %vm3467_vm15  ;;  %vm806_vm15 = vcmp.eq.s32.totalorder %v16453_v9, %v16141_v31  ;;  %vm3473_vm4 = vcmp.eq.s32.totalorder %v16453_v9, %v16148_v32 }
  0x3d   : > { %v831_v12 = vsel %vm806_vm15, 1.0, %v15994_v10  ;;  %v3498_v13 = vsel %vm3473_vm4, 1.0, %v15994_v10 }
  0x3e   : > { %11944 = vmatpush1.bf16.msk.msra.mxu0 %vm11943_vm7, %v15993_v47  ;;  %vm803_vm7 = vcmp.eq.s32.totalorder %v16430_v6, %v16141_v31  ;;  %v844_v14 = vpack.c.bf16 %v831_v12, %v831_v12  ;;  %v3511_v15 = vpack.c.bf16 %v3498_v13, %v3498_v13 }
  0x3f   : > { %12441 = vmatpush1.bf16.msk.msra.mxu1 %vm12440_vm11, %v15993_v47  ;;  %869 = vmatprep.subr.bf16.mxu0 %v15991_v0  ;;  %vm3469_vm11 = vcmp.eq.s32.totalorder %v16427_v5, %v16148_v32  ;;  %vm11949_vm5 = vmpackc.low %vm803_vm7, %vm802_vm6 }
  0x40   : > { %3531 = vmatprep.subr.bf16.mxu1 %v15991_v0  ;;  %vm12446_vm8 = vmpackc.low %vm3470_vm3, %vm3469_vm11 }
  0x42   : > { %11946 = vmatpush1.bf16.msk.msra.mxu0 %vm11945_vm2, %v15993_v47  ;;  %vm805_vm2 = vcmp.eq.s32.totalorder %v16448_v8, %v16141_v31 }
  0x43   : > { %12443 = vmatpush1.bf16.msk.msra.mxu1 %vm12442_vm9, %v15993_v47  ;;  %871 = vmatprep.subr.bf16.mxu0 %v15991_v0  ;;  %vm3471_vm9 = vcmp.eq.s32.totalorder %v16445_v7, %v16148_v32  ;;  %vm11951_vm14 = vmpackc.low %vm805_vm2, %vm804_vm10 }
  0x44   : > { %3533 = vmatprep.subr.bf16.mxu1 %v15991_v0 }
  0x46   : > { %11948 = vmatpush1.bf16.msk.msra.mxu0 %vm11947_vm12, %v15993_v47  ;;  %vm12448_vm12 = vmpackc.low %vm3472_vm13, %vm3471_vm9 }
  0x47   : > { %12445 = vmatpush1.bf16.msk.msra.mxu1 %vm12444_vm1, %v15993_v47  ;;  %873 = vmatprep.subr.bf16.mxu0 %v15991_v0  ;;  %vm849_vm1 = vcmask 1041408  }
  0x48   : > { %3535 = vmatprep.subr.bf16.mxu1 %v15991_v0  ;;  %v851_v16 = vsel %vm849_vm1, %v844_v14, 0  ;;  %v3513_v17 = vsel %vm849_vm1, %v3511_v15, 0  ;;  %v16481_v14 = vld [vmem:[%s20022_s1 + $0x1] ss:$0 sm:$0xff] }
  0x49   : > { %vm908_vm6 = vcmp.eq.s32.totalorder %v16118_v11, %v16481_v14  ;;  %vm909_vm7 = vcmp.eq.s32.totalorder %v16132_v25, %v16481_v14  ;;  %vm910_vm2 = vcmp.eq.s32.totalorder %v16151_v33, %v16481_v14  ;;  %vm911_vm9 = vcmp.eq.s32.totalorder %v16154_v34, %v16481_v14 }
  0x4a   : > { %11950 = vmatpush1.bf16.msk.msra.mxu0 %vm11949_vm5, %v15993_v47  ;;  %vm845_vm5 = vcmask 556032   ;;  %vm11958_vm15 = vmpackc.low %vm911_vm9, %vm910_vm2  ;;  %vm915_vm2 = vcmp.eq.s32.totalorder %v16180_v41, %v16481_v14 }
  0x4b   : > { %12447 = vmatpush1.bf16.msk.msra.mxu1 %vm12446_vm8, %v15993_v47  ;;  %875 = vmatprep.subr.bf16.mxu0 %v15991_v0  ;;  %vm11956_vm8 = vmpackc.low %vm909_vm7, %vm908_vm6  ;;  %vm913_vm6 = vcmp.eq.s32.totalorder %v16165_v39, %v16481_v14 }
  0x4c   : > { %3537 = vmatprep.subr.bf16.mxu1 %v15991_v0 }
  0x4e   : > { %11952 = vmatpush1.bf16.msk.msra.mxu0 %vm11951_vm14, %v15993_v47 }
  0x4f   : > { %12449 = vmatpush1.bf16.msk.msra.mxu1 %vm12448_vm12, %v15993_v47  ;;  %877 = vmatprep.subr.bf16.mxu0 %v15991_v0  ;;  %vm912_vm12 = vcmp.eq.s32.totalorder %v16162_v38, %v16481_v14 }
  0x50   : > { %3539 = vmatprep.subr.bf16.mxu1 %v15991_v0 }
  0x52   : > { %878 = vmatpush1.bf16.msra.mxu0 %v851_v16  ;;  %v16486_v16 = vld [vmem:[%s20022_s1 + $0xd] ss:$0 sm:$0xff] }
  0x53   : > { %3540 = vmatpush1.bf16.msra.mxu1 %v3513_v17  ;;  %974 = vmatprep.subr.bf16.mxu0 %v15991_v0  ;;  %vm3672_vm11 = vcmp.eq.s32.totalorder %v16118_v11, %v16486_v16  ;;  %vm3673_vm3 = vcmp.eq.s32.totalorder %v16132_v25, %v16486_v16  ;;  %vm3674_vm13 = vcmp.eq.s32.totalorder %v16151_v33, %v16486_v16 }
  0x54   : > { %3738 = vmatprep.subr.bf16.mxu1 %v15991_v0  ;;  %vm12468_vm10 = vmpackc.low %vm3673_vm3, %vm3672_vm11  ;;  %vm3675_vm14 = vcmp.eq.s32.totalorder %v16154_v34, %v16486_v16  ;;  %vm3676_vm7 = vcmp.eq.s32.totalorder %v16162_v38, %v16486_v16  ;;  %vm3677_vm11 = vcmp.eq.s32.totalorder %v16165_v39, %v16486_v16  ;;  %vm3678_vm9 = vcmp.eq.s32.totalorder %v16177_v40, %v16486_v16 }
  0x55   : > { %vm12470_vm4 = vmpackc.low %vm3675_vm14, %vm3674_vm13  ;;  %vm3679_vm13 = vcmp.eq.s32.totalorder %v16180_v41, %v16486_v16 }
  0x56   : > { %vm11960_vm3 = vmpackc.low %vm913_vm6, %vm912_vm12  ;;  %vm917_vm12 = vcmp.eq.s32.totalorder %v16200_v44, %v16481_v14  ;;  %vm3680_vm6 = vcmp.eq.s32.totalorder %v16197_v43, %v16486_v16 }
  0x87   : > { %v734_v31 = vpop.permute.xlu0 %733 }
  0x8b   : > { %v739_v12 = vpop.permute.xlu0 %738 }
  0xec   : > { %v492_v18 = vpop.f32.mrb[0].mxu0 }
  0xed   : > { %v564_v19 = vpop.f32.mrb[0].mxu1  ;;  %v494_v21 = vpop.f32.mrb[1].mxu0 }
  0xee   : > { %v573_v20 = vmax.f32 %v492_v18, %v564_v19  ;;  %v566_v22 = vpop.f32.mrb[1].mxu1  ;;  %v496_v24 = vpop.f32.mrb[2].mxu0 }
  0xef   : > { %v574_v23 = vmax.f32 %v494_v21, %v566_v22  ;;  %v568_v26 = vpop.f32.mrb[2].mxu1  ;;  %v498_v28 = vpop.f32.mrb[3].mxu0 }
  0xf0   : > { %v575_v27 = vmax.f32 %v496_v24, %v568_v26  ;;  %v570_v29 = vpop.f32.mrb[3].mxu1 }
  0xf1   : > { %v576_v30 = vmax.f32 %v498_v28, %v570_v29  ;;  %v16651_v29 = vld [vmem:[%s20022_s1 + $0xf] ss:$0 sm:$0xff] }
  0xf4   : > { %v640_v32 = vpop.f32.mrb[4].mxu0 }
  0xf5   : > { %v716_v35 = vpop.f32.mrb[4].mxu1  ;;  %v649_v36 = vmax.f32 %v573_v20, %v640_v32  ;;  %v642_v37 = vpop.f32.mrb[5].mxu0 }
  0xf6   : > { %v718_v42 = vpop.f32.mrb[5].mxu1  ;;  %v650_v45 = vmax.f32 %v574_v23, %v642_v37  ;;  %v644_v46 = vpop.f32.mrb[6].mxu0 }
  0xf7   : > { %v720_v48 = vpop.f32.mrb[6].mxu1  ;;  %v725_v49 = vmax.f32 %v649_v36, %v716_v35  ;;  %v651_v52 = vmax.f32 %v575_v27, %v644_v46  ;;  %v646_v55 = vpop.f32.mrb[7].mxu0  ;;  %v16740_v36 = vld [vmem:[%s20022_s1 + $0x11] ss:$0 sm:$0xff] }
  0xf8   : > { %v722_v58 = vpop.f32.mrb[7].mxu1  ;;  %v726_v59 = vmax.f32 %v650_v45, %v718_v42  ;;  %v652_v60 = vmax.f32 %v576_v30, %v646_v55  ;;  %v15674_v42 = vld [vmem:[%s20025_s4 + $0x1c] sm:$0xff]  }
  0xf9   : > { %v741_v61 = vadd.f32 %v734_v31, %v725_v49  ;;  %v727_v62 = vmax.f32 %v651_v52, %v720_v48  ;;  %v16829_v48 = vld [vmem:[%s20022_s1 + $0x12] ss:$0 sm:$0xff] }
  0xfa   : > { %v742_v63 = vadd.f32 %v734_v31, %v726_v59  ;;  %v728_v13 = vmax.f32 %v652_v60, %v722_v58  ;;  %v16914_v58 = vld [vmem:[%s20022_s1 + $0x14] ss:$0 sm:$0xff] }
  0xfb   : > { %v743_v15 = vadd.f32 %v739_v12, %v727_v62  ;;  %v745_v18 = vmax.f32 %v741_v61, 0.0 }
  0xfc   : > { %v744_v17 = vadd.f32 %v739_v12, %v728_v13  ;;  %v746_v20 = vmax.f32 %v742_v63, 0.0 }
  0xfd   : > { %v747_v19 = vmax.f32 %v743_v15, 0.0 }
  0xfe   : > { %v748_v21 = vmax.f32 %v744_v17, 0.0 }
  0xff   : > { %v16496_v22 = vpack.c.bf16 %v747_v19, %v745_v18 }
 0x100   : > { %v16498_v23 = vpack.c.bf16 %v748_v21, %v746_v20  ;;  %v17003_v20 = vld [vmem:[%s20022_s1 + $0x15] ss:$0 sm:$0xff] }
 0x102   : > { %11953 = vmatprep.mubr.msk.bf16.mxu0 %vm845_vm5, %v16498_v23  ;;  %12450 = vmatprep.mubr.msk.bf16.mxu1 %vm845_vm5, %v16498_v23 }
 0x103   : > { %886 = vmatmul.mubr.bf16.vlgmr.msra.gmra.mrb[8].mxu0 %v16496_v22  ;;  %3548 = vmatmul.mubr.bf16.vlgmr.msra.gmra.mrb[8].mxu1 %v16496_v22 }
 0x104   : > { %11957 = vmatpush1.bf16.msk.msra.mxu0 %vm11956_vm8, %v15993_v47  ;;  %12469 = vmatpush1.bf16.msk.msra.mxu1 %vm12468_vm10, %v15993_v47  ;;  %vm12472_vm8 = vmpackc.low %vm3677_vm11, %vm3676_vm7  ;;  %vm914_vm10 = vcmp.eq.s32.totalorder %v16177_v40, %v16481_v14  ;;  %vm3681_vm7 = vcmp.eq.s32.totalorder %v16200_v44, %v16486_v16 }
 0x105   : > { %11980 = vmatprep.mubr.msk.bf16.mxu0 %vm845_vm5, %v16498_v23  ;;  %12492 = vmatprep.mubr.msk.bf16.mxu1 %vm845_vm5, %v16498_v23  ;;  %vm11962_vm14 = vmpackc.low %vm915_vm2, %vm914_vm10  ;;  %vm919_vm10 = vcmp.eq.s32.totalorder %v16258_v51, %v16481_v14  ;;  %vm3682_vm2 = vcmp.eq.s32.totalorder %v16255_v50, %v16486_v16 }
 0x106   : > { %976 = vmatprep.subr.bf16.mxu0 %v15991_v0  ;;  %3740 = vmatprep.subr.bf16.mxu1 %v15991_v0 }
 0x108   : > { %11959 = vmatpush1.bf16.msk.msra.mxu0 %vm11958_vm15, %v15993_v47  ;;  %12471 = vmatpush1.bf16.msk.msra.mxu1 %vm12470_vm4, %v15993_v47  ;;  %vm12474_vm15 = vmpackc.low %vm3679_vm13, %vm3678_vm9  ;;  %vm916_vm4 = vcmp.eq.s32.totalorder %v16197_v43, %v16481_v14  ;;  %vm3683_vm9 = vcmp.eq.s32.totalorder %v16258_v51, %v16486_v16 }
 0x109   : > { %978 = vmatprep.subr.bf16.mxu0 %v15991_v0  ;;  %3742 = vmatprep.subr.bf16.mxu1 %v15991_v0  ;;  %vm11964_vm11 = vmpackc.low %vm917_vm12, %vm916_vm4  ;;  %vm921_vm4 = vcmp.eq.s32.totalorder %v16275_v54, %v16481_v14  ;;  %vm3684_vm12 = vcmp.eq.s32.totalorder %v16272_v53, %v16486_v16 }
 0x10c   : > { %11961 = vmatpush1.bf16.msk.msra.mxu0 %vm11960_vm3, %v15993_v47  ;;  %12473 = vmatpush1.bf16.msk.msra.mxu1 %vm12472_vm8, %v15993_v47  ;;  %vm12476_vm3 = vmpackc.low %vm3681_vm7, %vm3680_vm6  ;;  %vm918_vm8 = vcmp.eq.s32.totalorder %v16255_v50, %v16481_v14  ;;  %vm3685_vm6 = vcmp.eq.s32.totalorder %v16275_v54, %v16486_v16 }
 0x10d   : > { %980 = vmatprep.subr.bf16.mxu0 %v15991_v0  ;;  %3744 = vmatprep.subr.bf16.mxu1 %v15991_v0  ;;  %vm11966_vm13 = vmpackc.low %vm919_vm10, %vm918_vm8  ;;  %vm923_vm8 = vcmp.eq.s32.totalorder %v16285_v57, %v16481_v14  ;;  %vm3686_vm10 = vcmp.eq.s32.totalorder %v16282_v56, %v16486_v16 }
 0x110   : > { %11963 = vmatpush1.bf16.msk.msra.mxu0 %vm11962_vm14, %v15993_v47  ;;  %12475 = vmatpush1.bf16.msk.msra.mxu1 %vm12474_vm15, %v15993_v47  ;;  %vm12478_vm14 = vmpackc.low %vm3683_vm9, %vm3682_vm2  ;;  %vm920_vm15 = vcmp.eq.s32.totalorder %v16272_v53, %v16481_v14  ;;  %vm3687_vm2 = vcmp.eq.s32.totalorder %v16285_v57, %v16486_v16 }
 0x111   : > { %982 = vmatprep.subr.bf16.mxu0 %v15991_v0  ;;  %3746 = vmatprep.subr.bf16.mxu1 %v15991_v0  ;;  %vm11968_vm7 = vmpackc.low %vm921_vm4, %vm920_vm15  ;;  %vm925_vm15 = vcmp.eq.s32.totalorder %v16397_v2, %v16481_v14  ;;  %vm3688_vm4 = vcmp.eq.s32.totalorder %v16394_v1, %v16486_v16 }
 0x114   : > { %11965 = vmatpush1.bf16.msk.msra.mxu0 %vm11964_vm11, %v15993_v47  ;;  %12477 = vmatpush1.bf16.msk.msra.mxu1 %vm12476_vm3, %v15993_v47  ;;  %vm12480_vm11 = vmpackc.low %vm3685_vm6, %vm3684_vm12  ;;  %vm922_vm3 = vcmp.eq.s32.totalorder %v16282_v56, %v16481_v14  ;;  %vm3689_vm12 = vcmp.eq.s32.totalorder %v16397_v2, %v16486_v16 }
 0x115   : > { %984 = vmatprep.subr.bf16.mxu0 %v15991_v0  ;;  %3748 = vmatprep.subr.bf16.mxu1 %v15991_v0  ;;  %vm11970_vm9 = vmpackc.low %vm923_vm8, %vm922_vm3  ;;  %vm927_vm3 = vcmp.eq.s32.totalorder %v16412_v4, %v16481_v14  ;;  %vm3690_vm8 = vcmp.eq.s32.totalorder %v16409_v3, %v16486_v16 }
 0x118   : > { %11967 = vmatpush1.bf16.msk.msra.mxu0 %vm11966_vm13, %v15993_v47  ;;  %12479 = vmatpush1.bf16.msk.msra.mxu1 %vm12478_vm14, %v15993_v47  ;;  %vm12482_vm13 = vmpackc.low %vm3687_vm2, %vm3686_vm10  ;;  %vm924_vm14 = vcmp.eq.s32.totalorder %v16394_v1, %v16481_v14  ;;  %vm3691_vm10 = vcmp.eq.s32.totalorder %v16412_v4, %v16486_v16 }
 0x119   : > { %986 = vmatprep.subr.bf16.mxu0 %v15991_v0  ;;  %3750 = vmatprep.subr.bf16.mxu1 %v15991_v0  ;;  %vm11972_vm6 = vmpackc.low %vm925_vm15, %vm924_vm14  ;;  %vm929_vm14 = vcmp.eq.s32.totalorder %v16430_v6, %v16481_v14  ;;  %vm3692_vm15 = vcmp.eq.s32.totalorder %v16427_v5, %v16486_v16 }
 0x11c   : > { %11969 = vmatpush1.bf16.msk.msra.mxu0 %vm11968_vm7, %v15993_v47  ;;  %12481 = vmatpush1.bf16.msk.msra.mxu1 %vm12480_vm11, %v15993_v47  ;;  %vm12484_vm7 = vmpackc.low %vm3689_vm12, %vm3688_vm4  ;;  %vm926_vm11 = vcmp.eq.s32.totalorder %v16409_v3, %v16481_v14  ;;  %vm3693_vm4 = vcmp.eq.s32.totalorder %v16430_v6, %v16486_v16  ;;  %vm932_vm12 = vcmp.eq.s32.totalorder %v16453_v9, %v16481_v14 }
 0x11d   : > { %988 = vmatprep.subr.bf16.mxu0 %v15991_v0  ;;  %3752 = vmatprep.subr.bf16.mxu1 %v15991_v0  ;;  %vm11974_vm2 = vmpackc.low %vm927_vm3, %vm926_vm11  ;;  %vm930_vm3 = vcmp.eq.s32.totalorder %v16445_v7, %v16481_v14  ;;  %v957_v24 = vsel %vm932_vm12, 1.0, %v15994_v10  ;;  %vm4120_vm12 = vcmp.eq.s32.totalorder %v16151_v33, %v16651_v29 }
 0x11e   : > { %vm12488_vm11 = vmpackc.low %vm3693_vm4, %vm3692_vm15  ;;  %v970_v27 = vpack.c.bf16 %v957_v24, %v957_v24  ;;  %vm4119_vm15 = vcmp.eq.s32.totalorder %v16132_v25, %v16651_v29 }
 0x120   : > { %11971 = vmatpush1.bf16.msk.msra.mxu0 %vm11970_vm9, %v15993_v47  ;;  %12483 = vmatpush1.bf16.msk.msra.mxu1 %vm12482_vm13, %v15993_v47  ;;  %vm12486_vm9 = vmpackc.low %vm3691_vm10, %vm3690_vm8  ;;  %vm928_vm13 = vcmp.eq.s32.totalorder %v16427_v5, %v16481_v14  ;;  %vm931_vm8 = vcmp.eq.s32.totalorder %v16448_v8, %v16481_v14  ;;  %vm3694_vm10 = vcmp.eq.s32.totalorder %v16445_v7, %v16486_v16  ;;  %v972_v30 = vsel %vm849_vm1, %v970_v27, 0 }
 0x121   : > { %990 = vmatprep.subr.bf16.mxu0 %v15991_v0  ;;  %3754 = vmatprep.subr.bf16.mxu1 %v15991_v0 }
 0x124   : > { %11973 = vmatpush1.bf16.msk.msra.mxu0 %vm11972_vm6, %v15993_v47  ;;  %12485 = vmatpush1.bf16.msk.msra.mxu1 %vm12484_vm7, %v15993_v47  ;;  %vm3696_vm6 = vcmp.eq.s32.totalorder %v16453_v9, %v16486_v16  ;;  %vm11976_vm7 = vmpackc.low %vm929_vm14, %vm928_vm13  ;;  %vm4118_vm14 = vcmp.eq.s32.totalorder %v16118_v11, %v16651_v29 }
 0x125   : > { %992 = vmatprep.subr.bf16.mxu0 %v15991_v0  ;;  %3756 = vmatprep.subr.bf16.mxu1 %v15991_v0  ;;  %v3721_v26 = vsel %vm3696_vm6, 1.0, %v15994_v10  ;;  %vm12552_vm4 = vmpackc.low %vm4119_vm15, %vm4118_vm14  ;;  %vm4121_vm6 = vcmp.eq.s32.totalorder %v16154_v34, %v16651_v29  ;;  %vm4127_vm14 = vcmp.eq.s32.totalorder %v16200_v44, %v16651_v29 }
 0x126   : > { %v3734_v28 = vpack.c.bf16 %v3721_v26, %v3721_v26 }
 0x128   : > { %11975 = vmatpush1.bf16.msk.msra.mxu0 %vm11974_vm2, %v15993_v47  ;;  %12487 = vmatpush1.bf16.msk.msra.mxu1 %vm12486_vm9, %v15993_v47  ;;  %vm3695_vm2 = vcmp.eq.s32.totalorder %v16448_v8, %v16486_v16  ;;  %vm11978_vm9 = vmpackc.low %vm931_vm8, %vm930_vm3  ;;  %v3736_v31 = vsel %vm849_vm1, %v3734_v28, 0  ;;  %vm4123_vm3 = vcmp.eq.s32.totalorder %v16165_v39, %v16651_v29 }
 0x129   : > { %994 = vmatprep.subr.bf16.mxu0 %v15991_v0  ;;  %3758 = vmatprep.subr.bf16.mxu1 %v15991_v0  ;;  %vm12490_vm13 = vmpackc.low %vm3695_vm2, %vm3694_vm10  ;;  %vm4124_vm10 = vcmp.eq.s32.totalorder %v16177_v40, %v16651_v29  ;;  %vm4125_vm2 = vcmp.eq.s32.totalorder %v16180_v41, %v16651_v29 }
 0x12c   : > { %11977 = vmatpush1.bf16.msk.msra.mxu0 %vm11976_vm7, %v15993_v47  ;;  %12489 = vmatpush1.bf16.msk.msra.mxu1 %vm12488_vm11, %v15993_v47  ;;  %vm12554_vm7 = vmpackc.low %vm4121_vm6, %vm4120_vm12  ;;  %vm4122_vm11 = vcmp.eq.s32.totalorder %v16162_v38, %v16651_v29  ;;  %vm4129_vm12 = vcmp.eq.s32.totalorder %v16258_v51, %v16651_v29 }
 0x12d   : > { %996 = vmatprep.subr.bf16.mxu0 %v15991_v0  ;;  %3760 = vmatprep.subr.bf16.mxu1 %v15991_v0  ;;  %vm12556_vm8 = vmpackc.low %vm4123_vm3, %vm4122_vm11  ;;  %vm4131_vm11 = vcmp.eq.s32.totalorder %v16275_v54, %v16651_v29 }
 0x130   : > { %11979 = vmatpush1.bf16.msk.msra.mxu0 %vm11978_vm9, %v15993_v47  ;;  %12491 = vmatpush1.bf16.msk.msra.mxu1 %vm12490_vm13, %v15993_v47  ;;  %vm12558_vm9 = vmpackc.low %vm4125_vm2, %vm4124_vm10  ;;  %vm4126_vm13 = vcmp.eq.s32.totalorder %v16197_v43, %v16651_v29  ;;  %vm4133_vm10 = vcmp.eq.s32.totalorder %v16285_v57, %v16651_v29 }
 0x131   : > { %998 = vmatprep.subr.bf16.mxu0 %v15991_v0  ;;  %3762 = vmatprep.subr.bf16.mxu1 %v15991_v0  ;;  %vm12560_vm15 = vmpackc.low %vm4127_vm14, %vm4126_vm13  ;;  %vm4135_vm13 = vcmp.eq.s32.totalorder %v16397_v2, %v16651_v29 }
 0x134   : > { %999 = vmatpush1.bf16.msra.mxu0 %v972_v30  ;;  %3763 = vmatpush1.bf16.msra.mxu1 %v3736_v31 }
 0x135   : > { %4184 = vmatprep.subr.bf16.mxu1 %v15991_v0 }
 0x137   : > { %1007 = vmatmul.mubr.bf16.vlgmr.msra.gmra.mrb[12].mxu0 %v16496_v22  ;;  %3771 = vmatmul.mubr.bf16.vlgmr.msra.gmra.mrb[12].mxu1 %v16496_v22 }
 0x138   : > { %12553 = vmatpush1.bf16.msk.msra.mxu1 %vm12552_vm4, %v15993_v47  ;;  %12576 = vmatprep.mubr.msk.bf16.mxu1 %vm845_vm5, %v16498_v23  ;;  %vm4128_vm4 = vcmp.eq.s32.totalorder %v16255_v50, %v16651_v29 }
 0x139   : > { %4186 = vmatprep.subr.bf16.mxu1 %v15991_v0  ;;  %vm12562_vm6 = vmpackc.low %vm4129_vm12, %vm4128_vm4  ;;  %vm4137_vm4 = vcmp.eq.s32.totalorder %v16412_v4, %v16651_v29 }
 0x13c   : > { %12555 = vmatpush1.bf16.msk.msra.mxu1 %vm12554_vm7, %v15993_v47  ;;  %vm4130_vm7 = vcmp.eq.s32.totalorder %v16272_v53, %v16651_v29 }
 0x13d   : > { %4188 = vmatprep.subr.bf16.mxu1 %v15991_v0  ;;  %vm12564_vm3 = vmpackc.low %vm4131_vm11, %vm4130_vm7  ;;  %vm4139_vm7 = vcmp.eq.s32.totalorder %v16430_v6, %v16651_v29  ;;  %vm4142_vm11 = vcmp.eq.s32.totalorder %v16453_v9, %v16651_v29 }
 0x13e   : > { %v4167_v32 = vsel %vm4142_vm11, 1.0, %v15994_v10 }
 0x13f   : > { %v4180_v35 = vpack.c.bf16 %v4167_v32, %v4167_v32 }
 0x140   : > { %12557 = vmatpush1.bf16.msk.msra.mxu1 %vm12556_vm8, %v15993_v47  ;;  %vm4132_vm8 = vcmp.eq.s32.totalorder %v16282_v56, %v16651_v29 }
 0x141   : > { %4190 = vmatprep.subr.bf16.mxu1 %v15991_v0  ;;  %vm12566_vm2 = vmpackc.low %vm4133_vm10, %vm4132_vm8  ;;  %vm4140_vm8 = vcmp.eq.s32.totalorder %v16445_v7, %v16651_v29  ;;  %vm4141_vm10 = vcmp.eq.s32.totalorder %v16448_v8, %v16651_v29  ;;  %v4182_v37 = vsel %vm849_vm1, %v4180_v35, 0 }
 0x144   : > { %12559 = vmatpush1.bf16.msk.msra.mxu1 %vm12558_vm9, %v15993_v47  ;;  %vm4134_vm9 = vcmp.eq.s32.totalorder %v16394_v1, %v16651_v29 }
 0x145   : > { %4192 = vmatprep.subr.bf16.mxu1 %v15991_v0  ;;  %vm12568_vm14 = vmpackc.low %vm4135_vm13, %vm4134_vm9  ;;  %vm4564_vm9 = vcmp.eq.s32.totalorder %v16118_v11, %v16740_v36  ;;  %vm4565_vm13 = vcmp.eq.s32.totalorder %v16132_v25, %v16740_v36 }
 0x148   : > { %12561 = vmatpush1.bf16.msk.msra.mxu1 %vm12560_vm15, %v15993_v47  ;;  %vm4136_vm15 = vcmp.eq.s32.totalorder %v16409_v3, %v16651_v29 }
 0x149   : > { %4194 = vmatprep.subr.bf16.mxu1 %v15991_v0  ;;  %vm12570_vm12 = vmpackc.low %vm4137_vm4, %vm4136_vm15  ;;  %vm4566_vm15 = vcmp.eq.s32.totalorder %v16151_v33, %v16740_v36  ;;  %vm4567_vm4 = vcmp.eq.s32.totalorder %v16154_v34, %v16740_v36 }
 0x14c   : > { %12563 = vmatpush1.bf16.msk.msra.mxu1 %vm12562_vm6, %v15993_v47  ;;  %vm4138_vm6 = vcmp.eq.s32.totalorder %v16427_v5, %v16651_v29 }
 0x14d   : > { %4196 = vmatprep.subr.bf16.mxu1 %v15991_v0 }
 0x150   : > { %12565 = vmatpush1.bf16.msk.msra.mxu1 %vm12564_vm3, %v15993_v47  ;;  %vm12572_vm3 = vmpackc.low %vm4139_vm7, %vm4138_vm6  ;;  %vm4568_vm6 = vcmp.eq.s32.totalorder %v16162_v38, %v16740_v36  ;;  %vm4569_vm7 = vcmp.eq.s32.totalorder %v16165_v39, %v16740_v36 }
 0x151   : > { %4198 = vmatprep.subr.bf16.mxu1 %v15991_v0  ;;  %vm12640_vm11 = vmpackc.low %vm4569_vm7, %vm4568_vm6  ;;  %vm4577_vm6 = vcmp.eq.s32.totalorder %v16275_v54, %v16740_v36 }
 0x154   : > { %12567 = vmatpush1.bf16.msk.msra.mxu1 %vm12566_vm2, %v15993_v47  ;;  %vm12574_vm2 = vmpackc.low %vm4141_vm10, %vm4140_vm8  ;;  %vm4571_vm8 = vcmp.eq.s32.totalorder %v16180_v41, %v16740_v36 }
 0x155   : > { %4200 = vmatprep.subr.bf16.mxu1 %v15991_v0 }
 0x158   : > { %12569 = vmatpush1.bf16.msk.msra.mxu1 %vm12568_vm14, %v15993_v47  ;;  %vm12636_vm14 = vmpackc.low %vm4565_vm13, %vm4564_vm9  ;;  %vm4573_vm9 = vcmp.eq.s32.totalorder %v16200_v44, %v16740_v36 }
 0x159   : > { %4202 = vmatprep.subr.bf16.mxu1 %v15991_v0 }
 0x15c   : > { %12571 = vmatpush1.bf16.msk.msra.mxu1 %vm12570_vm12, %v15993_v47  ;;  %vm12638_vm12 = vmpackc.low %vm4567_vm4, %vm4566_vm15  ;;  %vm4575_vm15 = vcmp.eq.s32.totalorder %v16258_v51, %v16740_v36 }
 0x15d   : > { %4204 = vmatprep.subr.bf16.mxu1 %v15991_v0 }
 0x160   : > { %12573 = vmatpush1.bf16.msk.msra.mxu1 %vm12572_vm3, %v15993_v47  ;;  %vm4570_vm3 = vcmp.eq.s32.totalorder %v16177_v40, %v16740_v36 }
 0x161   : > { %4206 = vmatprep.subr.bf16.mxu1 %v15991_v0  ;;  %vm12642_vm10 = vmpackc.low %vm4571_vm8, %vm4570_vm3  ;;  %vm4579_vm3 = vcmp.eq.s32.totalorder %v16285_v57, %v16740_v36 }
 0x164   : > { %12575 = vmatpush1.bf16.msk.msra.mxu1 %vm12574_vm2, %v15993_v47  ;;  %vm4572_vm2 = vcmp.eq.s32.totalorder %v16197_v43, %v16740_v36 }
 0x165   : > { %4208 = vmatprep.subr.bf16.mxu1 %v15991_v0  ;;  %vm12644_vm13 = vmpackc.low %vm4573_vm9, %vm4572_vm2  ;;  %vm4581_vm2 = vcmp.eq.s32.totalorder %v16397_v2, %v16740_v36 }
 0x168   : > { %4209 = vmatpush1.bf16.msra.mxu1 %v4182_v37  ;;  %v15675_v37 = vld [vmem:[%s20025_s4 + $0x24] sm:$0xff]  }
 0x169   : > { %4630 = vmatprep.subr.bf16.mxu1 %v15991_v0 }
 0x16b   : > { %4217 = vmatmul.mubr.bf16.vlgmr.msra.gmra.mrb[16].mxu1 %v16496_v22 }
 0x16c   : > { %12637 = vmatpush1.bf16.msk.msra.mxu1 %vm12636_vm14, %v15993_v47  ;;  %12660 = vmatprep.mubr.msk.bf16.mxu1 %vm845_vm5, %v16498_v23  ;;  %vm4574_vm14 = vcmp.eq.s32.totalorder %v16255_v50, %v16740_v36 }
 0x16d   : > { %4632 = vmatprep.subr.bf16.mxu1 %v15991_v0  ;;  %vm12646_vm4 = vmpackc.low %vm4575_vm15, %vm4574_vm14  ;;  %vm4583_vm14 = vcmp.eq.s32.totalorder %v16412_v4, %v16740_v36 }
 0x170   : > { %12639 = vmatpush1.bf16.msk.msra.mxu1 %vm12638_vm12, %v15993_v47  ;;  %vm4576_vm12 = vcmp.eq.s32.totalorder %v16272_v53, %v16740_v36 }
 0x171   : > { %4634 = vmatprep.subr.bf16.mxu1 %v15991_v0  ;;  %vm12648_vm7 = vmpackc.low %vm4577_vm6, %vm4576_vm12  ;;  %vm4585_vm12 = vcmp.eq.s32.totalorder %v16430_v6, %v16740_v36  ;;  %vm4588_vm6 = vcmp.eq.s32.totalorder %v16453_v9, %v16740_v36 }
 0x172   : > { %v4613_v45 = vsel %vm4588_vm6, 1.0, %v15994_v10  ;;  %vm4792_vm6 = vcmp.eq.s32.totalorder %v16165_v39, %v16829_v48 }
 0x173   : > { %v4626_v46 = vpack.c.bf16 %v4613_v45, %v4613_v45  ;;  %v15677_v45 = vld [vmem:[%s20025_s4 + $0x34] ss:$0 sps:$4 sm:$0x11]  }
 0x174   : > { %12641 = vmatpush1.bf16.msk.msra.mxu1 %vm12640_vm11, %v15993_v47  ;;  %vm4578_vm11 = vcmp.eq.s32.totalorder %v16282_v56, %v16740_v36 }
 0x175   : > { %4636 = vmatprep.subr.bf16.mxu1 %v15991_v0  ;;  %vm12650_vm8 = vmpackc.low %vm4579_vm3, %vm4578_vm11  ;;  %vm1042_vm11 = vcmask 130048   ;;  %vm4586_vm3 = vcmp.eq.s32.totalorder %v16445_v7, %v16740_v36  ;;  %v4628_v49 = vsel %vm849_vm1, %v4626_v46, 0  ;;  %v15678_v46 = vld [vmem:[%s20025_s4] sm:$0xff]  }
 0x176   : > { %14201 = vmatprep.mubr.msk.bf16.mxu0 %vm1042_vm11, %v15674_v42  ;;  %v15676_v42 = vld [vmem:[%s20025_s4 + $0x2c] sm:$0xff]  }
 0x178   : > { %12643 = vmatpush1.bf16.msk.msra.mxu1 %vm12642_vm10, %v15993_v47  ;;  %vm4580_vm10 = vcmp.eq.s32.totalorder %v16394_v1, %v16740_v36 }
 0x179   : > { %4638 = vmatprep.subr.bf16.mxu1 %v15991_v0  ;;  %vm12652_vm9 = vmpackc.low %vm4581_vm2, %vm4580_vm10  ;;  %vm4787_vm2 = vcmp.eq.s32.totalorder %v16118_v11, %v16829_v48 }
 0x17c   : > { %12645 = vmatpush1.bf16.msk.msra.mxu1 %vm12644_vm13, %v15993_v47  ;;  %vm4582_vm13 = vcmp.eq.s32.totalorder %v16409_v3, %v16740_v36 }
 0x17d   : > { %4640 = vmatprep.subr.bf16.mxu1 %v15991_v0  ;;  %vm12654_vm15 = vmpackc.low %vm4583_vm14, %vm4582_vm13  ;;  %vm4789_vm14 = vcmp.eq.s32.totalorder %v16151_v33, %v16829_v48 }
 0x180   : > { %12647 = vmatpush1.bf16.msk.msra.mxu1 %vm12646_vm4, %v15993_v47  ;;  %vm4584_vm4 = vcmp.eq.s32.totalorder %v16427_v5, %v16740_v36 }
 0x181   : > { %4642 = vmatprep.subr.bf16.mxu1 %v15991_v0 }
 0x184   : > { %12649 = vmatpush1.bf16.msk.msra.mxu1 %vm12648_vm7, %v15993_v47  ;;  %vm12656_vm7 = vmpackc.low %vm4585_vm12, %vm4584_vm4  ;;  %vm4791_vm12 = vcmp.eq.s32.totalorder %v16162_v38, %v16829_v48 }
 0x185   : > { %4644 = vmatprep.subr.bf16.mxu1 %v15991_v0 }
 0x188   : > { %12651 = vmatpush1.bf16.msk.msra.mxu1 %vm12650_vm8, %v15993_v47  ;;  %vm4587_vm8 = vcmp.eq.s32.totalorder %v16448_v8, %v16740_v36 }
 0x189   : > { %4646 = vmatprep.subr.bf16.mxu1 %v15991_v0  ;;  %vm12658_vm10 = vmpackc.low %vm4587_vm8, %vm4586_vm3  ;;  %vm4793_vm3 = vcmp.eq.s32.totalorder %v16177_v40, %v16829_v48  ;;  %vm4794_vm8 = vcmp.eq.s32.totalorder %v16180_v41, %v16829_v48 }
 0x18c   : > { %12653 = vmatpush1.bf16.msk.msra.mxu1 %vm12652_vm9, %v15993_v47  ;;  %vm4788_vm9 = vcmp.eq.s32.totalorder %v16132_v25, %v16829_v48 }
 0x18d   : > { %4648 = vmatprep.subr.bf16.mxu1 %v15991_v0  ;;  %vm12678_vm13 = vmpackc.low %vm4788_vm9, %vm4787_vm2  ;;  %vm4795_vm2 = vcmp.eq.s32.totalorder %v16197_v43, %v16829_v48  ;;  %vm4796_vm9 = vcmp.eq.s32.totalorder %v16200_v44, %v16829_v48 }
 0x190   : > { %12655 = vmatpush1.bf16.msk.msra.mxu1 %vm12654_vm15, %v15993_v47  ;;  %vm4790_vm15 = vcmp.eq.s32.totalorder %v16154_v34, %v16829_v48 }
 0x191   : > { %4650 = vmatprep.subr.bf16.mxu1 %v15991_v0  ;;  %vm12680_vm4 = vmpackc.low %vm4790_vm15, %vm4789_vm14  ;;  %vm4797_vm14 = vcmp.eq.s32.totalorder %v16255_v50, %v16829_v48  ;;  %vm4798_vm15 = vcmp.eq.s32.totalorder %v16258_v51, %v16829_v48 }
 0x194   : > { %12657 = vmatpush1.bf16.msk.msra.mxu1 %vm12656_vm7, %v15993_v47  ;;  %vm12682_vm7 = vmpackc.low %vm4792_vm6, %vm4791_vm12  ;;  %vm4799_vm12 = vcmp.eq.s32.totalorder %v16272_v53, %v16829_v48  ;;  %vm4800_vm6 = vcmp.eq.s32.totalorder %v16275_v54, %v16829_v48 }
 0x195   : > { %4652 = vmatprep.subr.bf16.mxu1 %v15991_v0 }
 0x198   : > { %12659 = vmatpush1.bf16.msk.msra.mxu1 %vm12658_vm10, %v15993_v47  ;;  %vm12684_vm10 = vmpackc.low %vm4794_vm8, %vm4793_vm3  ;;  %vm4801_vm3 = vcmp.eq.s32.totalorder %v16282_v56, %v16829_v48  ;;  %vm4802_vm8 = vcmp.eq.s32.totalorder %v16285_v57, %v16829_v48 }
 0x199   : > { %4654 = vmatprep.subr.bf16.mxu1 %v15991_v0 }
 0x19c   : > { %4655 = vmatpush1.bf16.msra.mxu1 %v4628_v49  ;;  %v15679_v49 = vld [vmem:[%s20025_s4 + $0x8] sm:$0xff]  }
 0x19d   : > { %4853 = vmatprep.subr.bf16.mxu1 %v15991_v0 }
 0x19f   : > { %4663 = vmatmul.mubr.bf16.vlgmr.msra.gmra.mrb[20].mxu1 %v16496_v22 }
 0x1a0   : > { %12679 = vmatpush1.bf16.msk.msra.mxu1 %vm12678_vm13, %v15993_v47  ;;  %12702 = vmatprep.mubr.msk.bf16.mxu1 %vm845_vm5, %v16498_v23  ;;  %vm12686_vm13 = vmpackc.low %vm4796_vm9, %vm4795_vm2  ;;  %vm4803_vm2 = vcmp.eq.s32.totalorder %v16394_v1, %v16829_v48  ;;  %vm4804_vm9 = vcmp.eq.s32.totalorder %v16397_v2, %v16829_v48 }
 0x1a1   : > { %4855 = vmatprep.subr.bf16.mxu1 %v15991_v0 }
 0x1a4   : > { %12681 = vmatpush1.bf16.msk.msra.mxu1 %vm12680_vm4, %v15993_v47  ;;  %vm12688_vm4 = vmpackc.low %vm4798_vm15, %vm4797_vm14  ;;  %vm4805_vm14 = vcmp.eq.s32.totalorder %v16409_v3, %v16829_v48  ;;  %vm4806_vm15 = vcmp.eq.s32.totalorder %v16412_v4, %v16829_v48 }
 0x1a5   : > { %4857 = vmatprep.subr.bf16.mxu1 %v15991_v0 }
 0x1a8   : > { %12683 = vmatpush1.bf16.msk.msra.mxu1 %vm12682_vm7, %v15993_v47  ;;  %vm12690_vm7 = vmpackc.low %vm4800_vm6, %vm4799_vm12  ;;  %vm4807_vm12 = vcmp.eq.s32.totalorder %v16427_v5, %v16829_v48  ;;  %vm4808_vm6 = vcmp.eq.s32.totalorder %v16430_v6, %v16829_v48 }
 0x1a9   : > { %4859 = vmatprep.subr.bf16.mxu1 %v15991_v0 }
 0x1ac   : > { %12685 = vmatpush1.bf16.msk.msra.mxu1 %vm12684_vm10, %v15993_v47  ;;  %vm12692_vm10 = vmpackc.low %vm4802_vm8, %vm4801_vm3  ;;  %vm4809_vm8 = vcmp.eq.s32.totalorder %v16445_v7, %v16829_v48 }
 0x1ad   : > { %4861 = vmatprep.subr.bf16.mxu1 %v15991_v0  ;;  %vm12698_vm3 = vmpackc.low %vm4808_vm6, %vm4807_vm12  ;;  %vm5237_vm6 = vcmp.eq.s32.totalorder %v16162_v38, %v16914_v58 }
 0x1b0   : > { %12687 = vmatpush1.bf16.msk.msra.mxu1 %vm12686_vm13, %v15993_v47  ;;  %vm12694_vm13 = vmpackc.low %vm4804_vm9, %vm4803_vm2  ;;  %vm5233_vm9 = vcmp.eq.s32.totalorder %v16118_v11, %v16914_v58 }
 0x1b1   : > { %4863 = vmatprep.subr.bf16.mxu1 %v15991_v0 }
 0x1b4   : > { %12689 = vmatpush1.bf16.msk.msra.mxu1 %vm12688_vm4, %v15993_v47  ;;  %vm12696_vm4 = vmpackc.low %vm4806_vm15, %vm4805_vm14  ;;  %vm5235_vm15 = vcmp.eq.s32.totalorder %v16151_v33, %v16914_v58 }
 0x1b5   : > { %4865 = vmatprep.subr.bf16.mxu1 %v15991_v0 }
 0x1b8   : > { %12691 = vmatpush1.bf16.msk.msra.mxu1 %vm12690_vm7, %v15993_v47  ;;  %vm4811_vm7 = vcmp.eq.s32.totalorder %v16453_v9, %v16829_v48 }
 0x1b9   : > { %4867 = vmatprep.subr.bf16.mxu1 %v15991_v0  ;;  %v4836_v52 = vsel %vm4811_vm7, 1.0, %v15994_v10  ;;  %vm5238_vm7 = vcmp.eq.s32.totalorder %v16165_v39, %v16914_v58 }
 0x1ba   : > { %v4849_v55 = vpack.c.bf16 %v4836_v52, %v4836_v52  ;;  %v15680_v52 = vld [vmem:[%s20025_s4 + $0x10] sm:$0xff]  }
 0x1bc   : > { %12693 = vmatpush1.bf16.msk.msra.mxu1 %vm12692_vm10, %v15993_v47  ;;  %vm4810_vm10 = vcmp.eq.s32.totalorder %v16448_v8, %v16829_v48  ;;  %v4851_v59 = vsel %vm849_vm1, %v4849_v55, 0  ;;  %v17072_v48 = vld [vmem:[%s20022_s1 + $0x2] ss:$0 sm:$0xff]  ;;  %v15681_v55 = vld [vmem:[%s20025_s4 + $0x18] ss:$0 sps:$4 sm:$0x11]  }
 0x1bd   : > { %4869 = vmatprep.subr.bf16.mxu1 %v15991_v0  ;;  %vm12700_vm2 = vmpackc.low %vm4810_vm10, %vm4809_vm8  ;;  %vm5239_vm8 = vcmp.eq.s32.totalorder %v16177_v40, %v16914_v58  ;;  %vm5240_vm10 = vcmp.eq.s32.totalorder %v16180_v41, %v16914_v58 }
 0x1c0   : > { %12695 = vmatpush1.bf16.msk.msra.mxu1 %vm12694_vm13, %v15993_v47  ;;  %vm5234_vm13 = vcmp.eq.s32.totalorder %v16132_v25, %v16914_v58 }
 0x1c1   : > { %4871 = vmatprep.subr.bf16.mxu1 %v15991_v0  ;;  %vm12762_vm14 = vmpackc.low %vm5234_vm13, %vm5233_vm9  ;;  %vm5241_vm9 = vcmp.eq.s32.totalorder %v16197_v43, %v16914_v58  ;;  %vm5242_vm13 = vcmp.eq.s32.totalorder %v16200_v44, %v16914_v58 }
 0x1c4   : > { %12697 = vmatpush1.bf16.msk.msra.mxu1 %vm12696_vm4, %v15993_v47  ;;  %vm5236_vm4 = vcmp.eq.s32.totalorder %v16154_v34, %v16914_v58 }
 0x1c5   : > { %4873 = vmatprep.subr.bf16.mxu1 %v15991_v0  ;;  %vm12764_vm12 = vmpackc.low %vm5236_vm4, %vm5235_vm15  ;;  %vm5243_vm15 = vcmp.eq.s32.totalorder %v16255_v50, %v16914_v58  ;;  %vm5244_vm4 = vcmp.eq.s32.totalorder %v16258_v51, %v16914_v58 }
 0x1c8   : > { %12699 = vmatpush1.bf16.msk.msra.mxu1 %vm12698_vm3, %v15993_v47  ;;  %vm12766_vm3 = vmpackc.low %vm5238_vm7, %vm5237_vm6  ;;  %vm5245_vm6 = vcmp.eq.s32.totalorder %v16272_v53, %v16914_v58  ;;  %vm5246_vm7 = vcmp.eq.s32.totalorder %v16275_v54, %v16914_v58 }
 0x1c9   : > { %4875 = vmatprep.subr.bf16.mxu1 %v15991_v0 }
 0x1cc   : > { %12701 = vmatpush1.bf16.msk.msra.mxu1 %vm12700_vm2, %v15993_v47  ;;  %vm12768_vm2 = vmpackc.low %vm5240_vm10, %vm5239_vm8  ;;  %vm5247_vm8 = vcmp.eq.s32.totalorder %v16282_v56, %v16914_v58  ;;  %vm5248_vm10 = vcmp.eq.s32.totalorder %v16285_v57, %v16914_v58 }
 0x1cd   : > { %4877 = vmatprep.subr.bf16.mxu1 %v15991_v0 }
 0x1d0   : > { %4878 = vmatpush1.bf16.msra.mxu1 %v4851_v59 }
 0x1d1   : > { %5299 = vmatprep.subr.bf16.mxu1 %v15991_v0 }
 0x1d3   : > { %4886 = vmatmul.mubr.bf16.vlgmr.msra.gmra.mrb[24].mxu1 %v16496_v22 }
 0x1d4   : > { %12763 = vmatpush1.bf16.msk.msra.mxu1 %vm12762_vm14, %v15993_v47  ;;  %12786 = vmatprep.mubr.msk.bf16.mxu1 %vm845_vm5, %v16498_v23  ;;  %vm12770_vm14 = vmpackc.low %vm5242_vm13, %vm5241_vm9  ;;  %vm5249_vm9 = vcmp.eq.s32.totalorder %v16394_v1, %v16914_v58  ;;  %vm5250_vm13 = vcmp.eq.s32.totalorder %v16397_v2, %v16914_v58 }
 0x1d5   : > { %5301 = vmatprep.subr.bf16.mxu1 %v15991_v0 }
 0x1d6   : > { %v887_v60 = vpop.f32.mrb[8].mxu0  ;;  %v3549_v61 = vpop.f32.mrb[8].mxu1 }
 0x1d7   : > { %v889_v62 = vpop.f32.mrb[9].mxu0  ;;  %v3551_v63 = vpop.f32.mrb[9].mxu1 }
 0x1d8   : > { %12765 = vmatpush1.bf16.msk.msra.mxu1 %vm12764_vm12, %v15993_v47  ;;  %v890_v12 = vpop.f32.mrb[10].mxu0  ;;  %v3552_v13 = vpop.f32.mrb[10].mxu1  ;;  %vm12772_vm12 = vmpackc.low %vm5244_vm4, %vm5243_vm15  ;;  %vm5251_vm15 = vcmp.eq.s32.totalorder %v16409_v3, %v16914_v58  ;;  %vm5252_vm4 = vcmp.eq.s32.totalorder %v16412_v4, %v16914_v58 }
 0x1d9   : > { %v16938_v14 = vpack.c.bf16 %v890_v12, %v887_v60  ;;  %v16940_v15 = vpack.c.bf16 %v3552_v13, %v3549_v61  ;;  %v892_v16 = vpop.f32.mrb[11].mxu0  ;;  %v3554_v17 = vpop.f32.mrb[11].mxu1  ;;  %5303 = vmatprep.subr.bf16.mxu1 %v15991_v0  ;;  %v17161_v60 = vld [vmem:[%s20022_s1 + $0x17] ss:$0 sm:$0xff] }
 0x1dc   : > { %12767 = vmatpush1.bf16.msk.msra.mxu1 %vm12766_vm3, %v15993_v47  ;;  %vm12774_vm3 = vmpackc.low %vm5246_vm7, %vm5245_vm6  ;;  %vm5253_vm6 = vcmp.eq.s32.totalorder %v16427_v5, %v16914_v58  ;;  %vm5254_vm7 = vcmp.eq.s32.totalorder %v16430_v6, %v16914_v58 }
 0x1dd   : > { %5305 = vmatprep.subr.bf16.mxu1 %v15991_v0 }
 0x1e0   : > { %12769 = vmatpush1.bf16.msk.msra.mxu1 %vm12768_vm2, %v15993_v47  ;;  %vm12776_vm2 = vmpackc.low %vm5248_vm10, %vm5247_vm8  ;;  %vm5255_vm10 = vcmp.eq.s32.totalorder %v16445_v7, %v16914_v58 }
 0x1e1   : > { %5307 = vmatprep.subr.bf16.mxu1 %v15991_v0  ;;  %vm12782_vm8 = vmpackc.low %vm5254_vm7, %vm5253_vm6  ;;  %vm5460_vm7 = vcmp.eq.s32.totalorder %v16162_v38, %v17003_v20 }
 0x1e4   : > { %12771 = vmatpush1.bf16.msk.msra.mxu1 %vm12770_vm14, %v15993_v47  ;;  %vm12778_vm14 = vmpackc.low %vm5250_vm13, %vm5249_vm9  ;;  %vm5456_vm13 = vcmp.eq.s32.totalorder %v16118_v11, %v17003_v20 }
 0x1e5   : > { %5309 = vmatprep.subr.bf16.mxu1 %v15991_v0 }
 0x1e8   : > { %12773 = vmatpush1.bf16.msk.msra.mxu1 %vm12772_vm12, %v15993_v47  ;;  %vm12780_vm12 = vmpackc.low %vm5252_vm4, %vm5251_vm15  ;;  %vm5458_vm4 = vcmp.eq.s32.totalorder %v16151_v33, %v17003_v20 }
 0x1e9   : > { %5311 = vmatprep.subr.bf16.mxu1 %v15991_v0 }
 0x1ec   : > { %12775 = vmatpush1.bf16.msk.msra.mxu1 %vm12774_vm3, %v15993_v47  ;;  %vm5257_vm3 = vcmp.eq.s32.totalorder %v16453_v9, %v16914_v58 }
 0x1ed   : > { %5313 = vmatprep.subr.bf16.mxu1 %v15991_v0  ;;  %v5282_v18 = vsel %vm5257_vm3, 1.0, %v15994_v10  ;;  %vm5461_vm3 = vcmp.eq.s32.totalorder %v16165_v39, %v17003_v20 }
 0x1ee   : > { %v5295_v19 = vpack.c.bf16 %v5282_v18, %v5282_v18 }
 0x1f0   : > { %12777 = vmatpush1.bf16.msk.msra.mxu1 %vm12776_vm2, %v15993_v47  ;;  %vm5256_vm2 = vcmp.eq.s32.totalorder %v16448_v8, %v16914_v58  ;;  %v5297_v21 = vsel %vm849_vm1, %v5295_v19, 0 }
 0x1f1   : > { %5315 = vmatprep.subr.bf16.mxu1 %v15991_v0  ;;  %vm12784_vm9 = vmpackc.low %vm5256_vm2, %vm5255_vm10  ;;  %vm5462_vm10 = vcmp.eq.s32.totalorder %v16177_v40, %v17003_v20  ;;  %vm5463_vm2 = vcmp.eq.s32.totalorder %v16180_v41, %v17003_v20 }
 0x1f4   : > { %12779 = vmatpush1.bf16.msk.msra.mxu1 %vm12778_vm14, %v15993_v47  ;;  %vm5457_vm14 = vcmp.eq.s32.totalorder %v16132_v25, %v17003_v20 }
 0x1f5   : > { %5317 = vmatprep.subr.bf16.mxu1 %v15991_v0  ;;  %vm12804_vm15 = vmpackc.low %vm5457_vm14, %vm5456_vm13  ;;  %vm5464_vm13 = vcmp.eq.s32.totalorder %v16197_v43, %v17003_v20  ;;  %vm5465_vm14 = vcmp.eq.s32.totalorder %v16200_v44, %v17003_v20 }
 0x1f8   : > { %12781 = vmatpush1.bf16.msk.msra.mxu1 %vm12780_vm12, %v15993_v47  ;;  %vm5459_vm12 = vcmp.eq.s32.totalorder %v16154_v34, %v17003_v20 }
 0x1f9   : > { %5319 = vmatprep.subr.bf16.mxu1 %v15991_v0  ;;  %vm12806_vm6 = vmpackc.low %vm5459_vm12, %vm5458_vm4  ;;  %vm5466_vm4 = vcmp.eq.s32.totalorder %v16255_v50, %v17003_v20  ;;  %vm5467_vm12 = vcmp.eq.s32.totalorder %v16258_v51, %v17003_v20 }
 0x1fc   : > { %12783 = vmatpush1.bf16.msk.msra.mxu1 %vm12782_vm8, %v15993_v47  ;;  %vm12808_vm8 = vmpackc.low %vm5461_vm3, %vm5460_vm7  ;;  %vm5468_vm7 = vcmp.eq.s32.totalorder %v16272_v53, %v17003_v20  ;;  %vm5469_vm3 = vcmp.eq.s32.totalorder %v16275_v54, %v17003_v20 }
 0x1fd   : > { %5321 = vmatprep.subr.bf16.mxu1 %v15991_v0 }
 0x200   : > { %12785 = vmatpush1.bf16.msk.msra.mxu1 %vm12784_vm9, %v15993_v47  ;;  %vm12810_vm9 = vmpackc.low %vm5463_vm2, %vm5462_vm10  ;;  %vm1219_vm10 = vcmp.eq.s32.totalorder %v16118_v11, %v17072_v48  ;;  %vm1220_vm2 = vcmp.eq.s32.totalorder %v16132_v25, %v17072_v48 }
 0x201   : > { %5323 = vmatprep.subr.bf16.mxu1 %v15991_v0 }
 0x204   : > { %5324 = vmatpush1.bf16.msra.mxu1 %v5297_v21 }
 0x205   : > { %5522 = vmatprep.subr.bf16.mxu1 %v15991_v0 }
 0x207   : > { %5332 = vmatmul.mubr.bf16.vlgmr.msra.gmra.mrb[28].mxu1 %v16496_v22 }
 0x208   : > { %12805 = vmatpush1.bf16.msk.msra.mxu1 %vm12804_vm15, %v15993_v47  ;;  %12828 = vmatprep.mubr.msk.bf16.mxu1 %vm845_vm5, %v16498_v23  ;;  %vm12812_vm15 = vmpackc.low %vm5465_vm14, %vm5464_vm13  ;;  %vm5471_vm13 = vcmp.eq.s32.totalorder %v16285_v57, %v17003_v20 }
 0x209   : > { %5524 = vmatprep.subr.bf16.mxu1 %v15991_v0  ;;  %vm12006_vm14 = vmpackc.low %vm1220_vm2, %vm1219_vm10  ;;  %vm1223_vm10 = vcmp.eq.s32.totalorder %v16162_v38, %v17072_v48  ;;  %vm1224_vm2 = vcmp.eq.s32.totalorder %v16165_v39, %v17072_v48 }
 0x20a   : > { %v1008_v24 = vpop.f32.mrb[12].mxu0  ;;  %v3772_v26 = vpop.f32.mrb[12].mxu1 }
 0x20b   : > { %v1010_v27 = vpop.f32.mrb[13].mxu0  ;;  %v3774_v28 = vpop.f32.mrb[13].mxu1 }
 0x20c   : > { %v1011_v29 = vpop.f32.mrb[14].mxu0  ;;  %v3775_v30 = vpop.f32.mrb[14].mxu1  ;;  %12807 = vmatpush1.bf16.msk.msra.mxu1 %vm12806_vm6, %v15993_v47  ;;  %vm12814_vm6 = vmpackc.low %vm5467_vm12, %vm5466_vm4  ;;  %vm1221_vm4 = vcmp.eq.s32.totalorder %v16151_v33, %v17072_v48  ;;  %vm1222_vm12 = vcmp.eq.s32.totalorder %v16154_v34, %v17072_v48 }
 0x20d   : > { %v1015_v31 = vpack.c.bf16 %v1011_v29, %v1008_v24  ;;  %v17027_v32 = vpack.c.bf16 %v3775_v30, %v3772_v26  ;;  %v1013_v35 = vpop.f32.mrb[15].mxu0  ;;  %v3777_v36 = vpop.f32.mrb[15].mxu1  ;;  %5526 = vmatprep.subr.bf16.mxu1 %v15991_v0 }
 0x20f   : > { %14199 = vmatprep.subr.bf16.mxu0 %v1015_v31 }
 0x210   : > { %14200 = vmatpush3.bf16.msra.mxu0 %v1015_v31  ;;  %12809 = vmatpush1.bf16.msk.msra.mxu1 %vm12808_vm8, %v15993_v47  ;;  %vm12816_vm8 = vmpackc.low %vm5469_vm3, %vm5468_vm7  ;;  %vm5473_vm7 = vcmp.eq.s32.totalorder %v16397_v2, %v17003_v20 }
 0x211   : > { %14209 = vmatprep.subr.bf16.mxu0 %v16938_v14  ;;  %5528 = vmatprep.subr.bf16.mxu1 %v15991_v0  ;;  %vm12008_vm3 = vmpackc.low %vm1222_vm12, %vm1221_vm4  ;;  %vm1225_vm4 = vcmp.eq.s32.totalorder %v16177_v40, %v17072_v48  ;;  %vm1226_vm12 = vcmp.eq.s32.totalorder %v16180_v41, %v17072_v48 }
 0x213   : > { %14202 = vmatmul.mubr.msk.bf16.vlgmr.msra.gmra.mrb[16].mxu0 %vm1042_vm11, %v15675_v37 }
 0x214   : > { %14210 = vmatpush3.bf16.msra.mxu0 %v16938_v14  ;;  %12811 = vmatpush1.bf16.msk.msra.mxu1 %vm12810_vm9, %v15993_v47  ;;  %vm5470_vm9 = vcmp.eq.s32.totalorder %v16282_v56, %v17003_v20 }
 0x215   : > { %5530 = vmatprep.subr.bf16.mxu1 %v15991_v0  ;;  %14205 = vmatprep.mubr.msk.bf16.mxu0 %vm1042_vm11, %v15676_v42  ;;  %v15682_v42 = vld [vmem:[%s20025_s4 + $0x38] sm:$0xff]  }
 0x216   : > { %1285 = vmatprep.subr.bf16.mxu0 %v15991_v0 }
 0x218   : > { %12813 = vmatpush1.bf16.msk.msra.mxu1 %vm12812_vm15, %v15993_v47  ;;  %vm12818_vm15 = vmpackc.low %vm5471_vm13, %vm5470_vm9  ;;  %vm5474_vm9 = vcmp.eq.s32.totalorder %v16409_v3, %v17003_v20  ;;  %vm5475_vm13 = vcmp.eq.s32.totalorder %v16412_v4, %v17003_v20 }
 0x219   : > { %5532 = vmatprep.subr.bf16.mxu1 %v15991_v0 }
 0x21b   : > { %14206 = vmatmul.mubr.msk.bf16.gmra.mrb[20].mxu0 %vm1042_vm11, %v15677_v45 }
 0x21c   : > { %12815 = vmatpush1.bf16.msk.msra.mxu1 %vm12814_vm6, %v15993_v47  ;;  %14211 = vmatprep.mubr.msk.bf16.mxu0 %vm1042_vm11, %v15678_v46  ;;  %vm5472_vm6 = vcmp.eq.s32.totalorder %v16394_v1, %v17003_v20 }
 0x21d   : > { %5534 = vmatprep.subr.bf16.mxu1 %v15991_v0 }
 0x220   : > { %12817 = vmatpush1.bf16.msk.msra.mxu1 %vm12816_vm8, %v15993_v47  ;;  %vm12820_vm8 = vmpackc.low %vm5473_vm7, %vm5472_vm6  ;;  %vm5476_vm6 = vcmp.eq.s32.totalorder %v16427_v5, %v17003_v20  ;;  %vm5477_vm7 = vcmp.eq.s32.totalorder %v16430_v6, %v17003_v20 }
 0x221   : > { %5536 = vmatprep.subr.bf16.mxu1 %v15991_v0 }
 0x223   : > { %14212 = vmatmul.mubr.msk.bf16.vlgmr.msra.gmra.mrb[16].mxu0 %vm1042_vm11, %v15679_v49 }
 0x224   : > { %12007 = vmatpush1.bf16.msk.msra.mxu0 %vm12006_vm14, %v15993_v47  ;;  %12819 = vmatpush1.bf16.msk.msra.mxu1 %vm12818_vm15, %v15993_v47  ;;  %vm12010_vm14 = vmpackc.low %vm1224_vm2, %vm1223_vm10  ;;  %vm1227_vm2 = vcmp.eq.s32.totalorder %v16197_v43, %v17072_v48 }
 0x225   : > { %1287 = vmatprep.subr.bf16.mxu0 %v15991_v0  ;;  %5538 = vmatprep.subr.bf16.mxu1 %v15991_v0  ;;  %vm12822_vm15 = vmpackc.low %vm5475_vm13, %vm5474_vm9  ;;  %vm1228_vm9 = vcmp.eq.s32.totalorder %v16200_v44, %v17072_v48  ;;  %vm5478_vm13 = vcmp.eq.s32.totalorder %v16445_v7, %v17003_v20 }
 0x226   : > { %14215 = vmatprep.mubr.msk.bf16.mxu0 %vm1042_vm11, %v15680_v52  ;;  %vm12824_vm10 = vmpackc.low %vm5477_vm7, %vm5476_vm6  ;;  %vm1230_vm6 = vcmp.eq.s32.totalorder %v16258_v51, %v17072_v48 }
 0x228   : > { %12009 = vmatpush1.bf16.msk.msra.mxu0 %vm12008_vm3, %v15993_v47  ;;  %12821 = vmatpush1.bf16.msk.msra.mxu1 %vm12820_vm8, %v15993_v47  ;;  %vm5480_vm3 = vcmp.eq.s32.totalorder %v16453_v9, %v17003_v20  ;;  %vm12012_vm8 = vmpackc.low %vm1226_vm12, %vm1225_vm4  ;;  %vm1229_vm12 = vcmp.eq.s32.totalorder %v16255_v50, %v17072_v48 }
 0x229   : > { %1289 = vmatprep.subr.bf16.mxu0 %v15991_v0  ;;  %5540 = vmatprep.subr.bf16.mxu1 %v15991_v0  ;;  %v5505_v58 = vsel %vm5480_vm3, 1.0, %v15994_v10  ;;  %vm12016_vm7 = vmpackc.low %vm1230_vm6, %vm1229_vm12  ;;  %vm1231_vm3 = vcmp.eq.s32.totalorder %v16272_v53, %v17072_v48  ;;  %vm5905_vm12 = vcmp.eq.s32.totalorder %v16154_v34, %v17161_v60 }
 0x22a   : > { %v5518_v59 = vpack.c.bf16 %v5505_v58, %v5505_v58 }
 0x22b   : > { %14216 = vmatmul.mubr.msk.bf16.gmra.mrb[20].mxu0 %vm1042_vm11, %v15681_v55 }
 0x22c   : > { %12011 = vmatpush1.bf16.msk.msra.mxu0 %vm12010_vm14, %v15993_v47  ;;  %12030 = vmatprep.mubr.msk.bf16.mxu0 %vm845_vm5, %v16498_v23  ;;  %vm5479_vm14 = vcmp.eq.s32.totalorder %v16448_v8, %v17003_v20  ;;  %v5520_v61 = vsel %vm849_vm1, %v5518_v59, 0 }
 0x22d   : > { %12823 = vmatpush1.bf16.msk.msra.mxu1 %vm12822_vm15, %v15993_v47  ;;  %1291 = vmatprep.subr.bf16.mxu0 %v15991_v0  ;;  %vm12014_vm15 = vmpackc.low %vm1228_vm9, %vm1227_vm2  ;;  %vm5903_vm2 = vcmp.eq.s32.totalorder %v16132_v25, %v17161_v60 }
 0x22e   : > { %5542 = vmatprep.subr.bf16.mxu1 %v15991_v0  ;;  %vm12826_vm4 = vmpackc.low %vm5479_vm14, %vm5478_vm13  ;;  %vm1233_vm14 = vcmp.eq.s32.totalorder %v16282_v56, %v17072_v48 }
 0x230   : > { %12013 = vmatpush1.bf16.msk.msra.mxu0 %vm12012_vm8, %v15993_v47  ;;  %vm1232_vm8 = vcmp.eq.s32.totalorder %v16275_v54, %v17072_v48 }
 0x231   : > { %12825 = vmatpush1.bf16.msk.msra.mxu1 %vm12824_vm10, %v15993_v47  ;;  %1293 = vmatprep.subr.bf16.mxu0 %v15991_v0  ;;  %vm5902_vm10 = vcmp.eq.s32.totalorder %v16118_v11, %v17161_v60  ;;  %vm12018_vm9 = vmpackc.low %vm1232_vm8, %vm1231_vm3  ;;  %vm1235_vm3 = vcmp.eq.s32.totalorder %v16394_v1, %v17072_v48  ;;  %vm1236_vm8 = vcmp.eq.s32.totalorder %v16397_v2, %v17072_v48 }
 0x232   : > { %5544 = vmatprep.subr.bf16.mxu1 %v15991_v0  ;;  %vm12888_vm13 = vmpackc.low %vm5903_vm2, %vm5902_vm10  ;;  %vm5906_vm10 = vcmp.eq.s32.totalorder %v16162_v38, %v17161_v60  ;;  %vm5907_vm2 = vcmp.eq.s32.totalorder %v16165_v39, %v17161_v60 }
 0x234   : > { %12015 = vmatpush1.bf16.msk.msra.mxu0 %vm12014_vm15, %v15993_v47  ;;  %vm1234_vm15 = vcmp.eq.s32.totalorder %v16285_v57, %v17072_v48 }
 0x235   : > { %12827 = vmatpush1.bf16.msk.msra.mxu1 %vm12826_vm4, %v15993_v47  ;;  %1295 = vmatprep.subr.bf16.mxu0 %v15991_v0  ;;  %vm5904_vm4 = vcmp.eq.s32.totalorder %v16151_v33, %v17161_v60  ;;  %vm12020_vm6 = vmpackc.low %vm1234_vm15, %vm1233_vm14  ;;  %vm1237_vm14 = vcmp.eq.s32.totalorder %v16409_v3, %v17072_v48  ;;  %vm1238_vm15 = vcmp.eq.s32.totalorder %v16412_v4, %v17072_v48 }
 0x236   : > { %5546 = vmatprep.subr.bf16.mxu1 %v15991_v0 }
 0x238   : > { %12017 = vmatpush1.bf16.msk.msra.mxu0 %vm12016_vm7, %v15993_v47  ;;  %vm12890_vm7 = vmpackc.low %vm5905_vm12, %vm5904_vm4  ;;  %vm5908_vm4 = vcmp.eq.s32.totalorder %v16177_v40, %v17161_v60  ;;  %vm5909_vm12 = vcmp.eq.s32.totalorder %v16180_v41, %v17161_v60 }
 0x239   : > { %5547 = vmatpush1.bf16.msra.mxu1 %v5520_v61  ;;  %1297 = vmatprep.subr.bf16.mxu0 %v15991_v0 }
 0x23a   : > { %5968 = vmatprep.subr.bf16.mxu1 %v15991_v0 }
 0x23c   : > { %12019 = vmatpush1.bf16.msk.msra.mxu0 %vm12018_vm9, %v15993_v47  ;;  %5555 = vmatmul.mubr.bf16.vlgmr.msra.gmra.mrb[32].mxu1 %v16496_v22  ;;  %vm12022_vm9 = vmpackc.low %vm1236_vm8, %vm1235_vm3  ;;  %vm1239_vm3 = vcmp.eq.s32.totalorder %v16427_v5, %v17072_v48  ;;  %vm1240_vm8 = vcmp.eq.s32.totalorder %v16430_v6, %v17072_v48 }
 0x23d   : > { %12889 = vmatpush1.bf16.msk.msra.mxu1 %vm12888_vm13, %v15993_v47  ;;  %12912 = vmatprep.mubr.msk.bf16.mxu1 %vm845_vm5, %v16498_v23  ;;  %vm12892_vm13 = vmpackc.low %vm5907_vm2, %vm5906_vm10  ;;  %vm5910_vm10 = vcmp.eq.s32.totalorder %v16197_v43, %v17161_v60  ;;  %vm5911_vm2 = vcmp.eq.s32.totalorder %v16200_v44, %v17161_v60 }
 0x23e   : > { %1299 = vmatprep.subr.bf16.mxu0 %v15991_v0  ;;  %v4218_v62 = vpop.f32.mrb[16].mxu1  ;;  %5970 = vmatprep.subr.bf16.mxu1 %v15991_v0 }
 0x23f   : > { %v4220_v63 = vpop.f32.mrb[17].mxu1 }
 0x240   : > { %12021 = vmatpush1.bf16.msk.msra.mxu0 %vm12020_vm6, %v15993_v47  ;;  %v4221_v12 = vpop.f32.mrb[18].mxu1  ;;  %vm12024_vm6 = vmpackc.low %vm1238_vm15, %vm1237_vm14  ;;  %vm1241_vm15 = vcmp.eq.s32.totalorder %v16445_v7, %v17072_v48 }
 0x241   : > { %v17202_v13 = vpack.c.bf16 %v4221_v12, %v4218_v62  ;;  %12891 = vmatpush1.bf16.msk.msra.mxu1 %vm12890_vm7, %v15993_v47  ;;  %v4223_v14 = vpop.f32.mrb[19].mxu1  ;;  %1301 = vmatprep.subr.bf16.mxu0 %v15991_v0  ;;  %vm12894_vm7 = vmpackc.low %vm5909_vm12, %vm5908_vm4  ;;  %vm1242_vm4 = vcmp.eq.s32.totalorder %v16448_v8, %v17072_v48  ;;  %vm5912_vm12 = vcmp.eq.s32.totalorder %v16255_v50, %v17161_v60  ;;  %v17308_v12 = vld [vmem:[%s20022_s1 + $0x3] ss:$0 sm:$0xff] }
 0x242   : > { %5972 = vmatprep.subr.bf16.mxu1 %v15991_v0  ;;  %vm12896_vm14 = vmpackc.low %vm5911_vm2, %vm5910_vm10  ;;  %vm5915_vm10 = vcmp.eq.s32.totalorder %v16275_v54, %v17161_v60 }
 0x244   : > { %12023 = vmatpush1.bf16.msk.msra.mxu0 %vm12022_vm9, %v15993_v47  ;;  %vm1243_vm9 = vcmp.eq.s32.totalorder %v16453_v9, %v17072_v48 }
 0x245   : > { %12893 = vmatpush1.bf16.msk.msra.mxu1 %vm12892_vm13, %v15993_v47  ;;  %1303 = vmatprep.subr.bf16.mxu0 %v15991_v0  ;;  %vm12026_vm13 = vmpackc.low %vm1240_vm8, %vm1239_vm3  ;;  %v1268_v16 = vsel %vm1243_vm9, 1.0, %v15994_v10  ;;  %vm5914_vm8 = vcmp.eq.s32.totalorder %v16272_v53, %v17161_v60  ;;  %vm5916_vm9 = vcmp.eq.s32.totalorder %v16282_v56, %v17161_v60 }
 0x246   : > { %5974 = vmatprep.subr.bf16.mxu1 %v15991_v0  ;;  %v1281_v17 = vpack.c.bf16 %v1268_v16, %v1268_v16  ;;  %vm12900_vm2 = vmpackc.low %vm5915_vm10, %vm5914_vm8  ;;  %vm5922_vm8 = vcmp.eq.s32.totalorder %v16427_v5, %v17161_v60  ;;  %vm5923_vm10 = vcmp.eq.s32.totalorder %v16430_v6, %v17161_v60 }
 0x248   : > { %12025 = vmatpush1.bf16.msk.msra.mxu0 %vm12024_vm6, %v15993_v47  ;;  %vm5913_vm6 = vcmp.eq.s32.totalorder %v16258_v51, %v17161_v60  ;;  %v1283_v18 = vsel %vm849_vm1, %v1281_v17, 0 }
 0x249   : > { %12895 = vmatpush1.bf16.msk.msra.mxu1 %vm12894_vm7, %v15993_v47  ;;  %1305 = vmatprep.subr.bf16.mxu0 %v15991_v0  ;;  %vm12028_vm7 = vmpackc.low %vm1242_vm4, %vm1241_vm15  ;;  %vm5918_vm15 = vcmp.eq.s32.totalorder %v16394_v1, %v17161_v60  ;;  %vm5919_vm4 = vcmp.eq.s32.totalorder %v16397_v2, %v17161_v60 }
 0x24a   : > { %5976 = vmatprep.subr.bf16.mxu1 %v15991_v0  ;;  %vm12898_vm3 = vmpackc.low %vm5913_vm6, %vm5912_vm12  ;;  %vm5920_vm6 = vcmp.eq.s32.totalorder %v16409_v3, %v17161_v60 }
 0x24b   : > { %vm12904_vm12 = vmpackc.low %vm5919_vm4, %vm5918_vm15  ;;  %vm1442_vm4 = vcmp.eq.s32.totalorder %v16118_v11, %v17308_v12 }
 0x24c   : > { %12027 = vmatpush1.bf16.msk.msra.mxu0 %vm12026_vm13, %v15993_v47  ;;  %vm5917_vm13 = vcmp.eq.s32.totalorder %v16285_v57, %v17161_v60 }
 0x24d   : > { %12897 = vmatpush1.bf16.msk.msra.mxu1 %vm12896_vm14, %v15993_v47  ;;  %1307 = vmatprep.subr.bf16.mxu0 %v15991_v0  ;;  %vm12902_vm14 = vmpackc.low %vm5917_vm13, %vm5916_vm9  ;;  %vm5924_vm13 = vcmp.eq.s32.totalorder %v16445_v7, %v17161_v60 }
 0x24e   : > { %5978 = vmatprep.subr.bf16.mxu1 %v15991_v0  ;;  %vm12908_vm9 = vmpackc.low %vm5923_vm10, %vm5922_vm8  ;;  %vm1446_vm10 = vcmp.eq.s32.totalorder %v16162_v38, %v17308_v12 }
 0x250   : > { %12029 = vmatpush1.bf16.msk.msra.mxu0 %vm12028_vm7, %v15993_v47  ;;  %vm5921_vm7 = vcmp.eq.s32.totalorder %v16412_v4, %v17161_v60 }
 0x251   : > { %12899 = vmatpush1.bf16.msk.msra.mxu1 %vm12898_vm3, %v15993_v47  ;;  %1309 = vmatprep.subr.bf16.mxu0 %v15991_v0  ;;  %vm12906_vm3 = vmpackc.low %vm5921_vm7, %vm5920_vm6  ;;  %vm1444_vm7 = vcmp.eq.s32.totalorder %v16151_v33, %v17308_v12 }
 0x252   : > { %5980 = vmatprep.subr.bf16.mxu1 %v15991_v0 }
 0x254   : > { %1310 = vmatpush1.bf16.msra.mxu0 %v1283_v18  ;;  %v15683_v18 = vld [vmem:[%s20025_s4 + $0x40] sm:$0xff]  }
 0x255   : > { %12901 = vmatpush1.bf16.msk.msra.mxu1 %vm12900_vm2, %v15993_v47  ;;  %vm5926_vm2 = vcmp.eq.s32.totalorder %v16453_v9, %v17161_v60 }
 0x256   : > { %5982 = vmatprep.subr.bf16.mxu1 %v15991_v0  ;;  %v5951_v19 = vsel %vm5926_vm2, 1.0, %v15994_v10  ;;  %vm1447_vm2 = vcmp.eq.s32.totalorder %v16165_v39, %v17308_v12 }
 0x257   : > { %1318 = vmatmul.mubr.bf16.vlgmr.msra.gmra.mrb[24].mxu0 %v16496_v22  ;;  %v5964_v20 = vpack.c.bf16 %v5951_v19, %v5951_v19  ;;  %v15684_v19 = vld [vmem:[%s20025_s4 + $0x48] sm:$0xff]  }
 0x258   : > { %14221 = vmatprep.mubr.msk.bf16.mxu0 %vm1042_vm11, %v15682_v42 }
 0x259   : > { %12903 = vmatpush1.bf16.msk.msra.mxu1 %vm12902_vm14, %v15993_v47  ;;  %vm5925_vm14 = vcmp.eq.s32.totalorder %v16448_v8, %v17161_v60  ;;  %v5966_v21 = vsel %vm849_vm1, %v5964_v20, 0  ;;  %v15685_v20 = vld [vmem:[%s20025_s4 + $0x50] ss:$0 sps:$4 sm:$0x11]  }
 0x25a   : > { %5984 = vmatprep.subr.bf16.mxu1 %v15991_v0  ;;  %vm12910_vm15 = vmpackc.low %vm5925_vm14, %vm5924_vm13  ;;  %vm1448_vm13 = vcmp.eq.s32.totalorder %v16177_v40, %v17308_v12  ;;  %vm1449_vm14 = vcmp.eq.s32.totalorder %v16180_v41, %v17308_v12 }
 0x25d   : > { %12905 = vmatpush1.bf16.msk.msra.mxu1 %vm12904_vm12, %v15993_v47  ;;  %vm1443_vm12 = vcmp.eq.s32.totalorder %v16132_v25, %v17308_v12 }
 0x25e   : > { %5986 = vmatprep.subr.bf16.mxu1 %v15991_v0  ;;  %vm12048_vm6 = vmpackc.low %vm1443_vm12, %vm1442_vm4  ;;  %vm1450_vm4 = vcmp.eq.s32.totalorder %v16197_v43, %v17308_v12  ;;  %vm1451_vm12 = vcmp.eq.s32.totalorder %v16200_v44, %v17308_v12 }
 0x261   : > { %12907 = vmatpush1.bf16.msk.msra.mxu1 %vm12906_vm3, %v15993_v47  ;;  %vm1445_vm3 = vcmp.eq.s32.totalorder %v16154_v34, %v17308_v12 }
 0x262   : > { %5988 = vmatprep.subr.bf16.mxu1 %v15991_v0  ;;  %vm12050_vm8 = vmpackc.low %vm1445_vm3, %vm1444_vm7  ;;  %vm1452_vm7 = vcmp.eq.s32.totalorder %v16255_v50, %v17308_v12  ;;  %vm1453_vm3 = vcmp.eq.s32.totalorder %v16258_v51, %v17308_v12 }
 0x265   : > { %12909 = vmatpush1.bf16.msk.msra.mxu1 %vm12908_vm9, %v15993_v47  ;;  %vm12052_vm9 = vmpackc.low %vm1447_vm2, %vm1446_vm10  ;;  %vm1454_vm10 = vcmp.eq.s32.totalorder %v16272_v53, %v17308_v12  ;;  %vm1455_vm2 = vcmp.eq.s32.totalorder %v16275_v54, %v17308_v12 }
 0x266   : > { %5990 = vmatprep.subr.bf16.mxu1 %v15991_v0 }
 0x269   : > { %12911 = vmatpush1.bf16.msk.msra.mxu1 %vm12910_vm15, %v15993_v47  ;;  %vm12054_vm15 = vmpackc.low %vm1449_vm14, %vm1448_vm13  ;;  %vm1456_vm13 = vcmp.eq.s32.totalorder %v16282_v56, %v17308_v12  ;;  %vm1457_vm14 = vcmp.eq.s32.totalorder %v16285_v57, %v17308_v12 }
 0x26a   : > { %5992 = vmatprep.subr.bf16.mxu1 %v15991_v0 }
 0x26d   : > { %5993 = vmatpush1.bf16.msra.mxu1 %v5966_v21 }
 0x270   : > { %6001 = vmatmul.mubr.bf16.vlgmr.msra.gmra.mrb[36].mxu1 %v16496_v22 }
 0x272   : > { %v4664_v24 = vpop.f32.mrb[20].mxu1 }
 0x273   : > { %v4666_v26 = vpop.f32.mrb[21].mxu1 }
 0x274   : > { %v4667_v27 = vpop.f32.mrb[22].mxu1 }
 0x275   : > { %v17293_v28 = vpack.c.bf16 %v4667_v27, %v4664_v24  ;;  %v4669_v29 = vpop.f32.mrb[23].mxu1 }
 0x2a6   : > { %v4887_v30 = vpop.f32.mrb[24].mxu1 }
 0x2a7   : > { %v4889_v31 = vpop.f32.mrb[25].mxu1 }
 0x2a8   : > { %v4890_v35 = vpop.f32.mrb[26].mxu1 }
 0x2a9   : > { %v17295_v36 = vpack.c.bf16 %v4890_v35, %v4887_v30  ;;  %v4892_v37 = vpop.f32.mrb[27].mxu1 }
 0x2aa   : > { %v15686_v37 = vld [vmem:[%s20025_s4 + $0x54] sm:$0xff]  }
 0x2da   : > { %v5333_v45 = vpop.f32.mrb[28].mxu1 }
 0x2db   : > { %v5335_v46 = vpop.f32.mrb[29].mxu1 }
 0x2dc   : > { %v5336_v48 = vpop.f32.mrb[30].mxu1  ;;  %v17411_v46 = vld [vmem:[%s20022_s1 + $0x4] ss:$0 sm:$0xff] }
 0x2dd   : > { %v17301_v49 = vpack.c.bf16 %v5336_v48, %v5333_v45  ;;  %v5338_v52 = vpop.f32.mrb[31].mxu1 }
 0x30f   : > { %v5556_v55 = vpop.f32.mrb[32].mxu1 }
 0x310   : > { %v5558_v58 = vpop.f32.mrb[33].mxu1 }
 0x311   : > { %v5559_v59 = vpop.f32.mrb[34].mxu1  ;;  %v15687_v58 = vld [vmem:[%s20025_s4 + $0x5c] sm:$0xff]  }
 0x312   : > { %v17303_v60 = vpack.c.bf16 %v5559_v59, %v5556_v55  ;;  %v5561_v61 = vpop.f32.mrb[35].mxu1  ;;  %v15688_v59 = vld [vmem:[%s20025_s4 + $0x64] sm:$0xff]  }
 0x313   : > { %v15689_v61 = vld [vmem:[%s20025_s4 + $0x6c] ss:$0 sps:$4 sm:$0x11]  }
 0x32a   : > { %v1319_v62 = vpop.f32.mrb[24].mxu0 }
 0x32b   : > { %v1321_v63 = vpop.f32.mrb[25].mxu0 }
 0x32c   : > { %v1322_v14 = vpop.f32.mrb[26].mxu0 }
 0x32d   : > { %v1326_v16 = vpack.c.bf16 %v1322_v14, %v1319_v62  ;;  %v1324_v17 = vpop.f32.mrb[27].mxu0  ;;  %v15690_v14 = vld [vmem:[%s20025_s4 + $0x70] sm:$0xff]  }
 0x32f   : > { %14219 = vmatprep.subr.bf16.mxu0 %v1326_v16 }
 0x330   : > { %14220 = vmatpush3.bf16.msra.mxu0 %v1326_v16 }
 0x331   : > { %1508 = vmatprep.subr.bf16.mxu0 %v15991_v0 }
 0x333   : > { %14222 = vmatmul.mubr.msk.bf16.vlgmr.msra.gmra.mrb[16].mxu0 %vm1042_vm11, %v15683_v18  ;;  %v17512_v18 = vld [vmem:[%s20022_s1 + $0x5] ss:$0 sm:$0xff] }
 0x334   : > { %12049 = vmatpush1.bf16.msk.msra.mxu0 %vm12048_vm6, %v15993_v47  ;;  %14225 = vmatprep.mubr.msk.bf16.mxu0 %vm1042_vm11, %v15684_v19  ;;  %vm12056_vm6 = vmpackc.low %vm1451_vm12, %vm1450_vm4  ;;  %vm1458_vm4 = vcmp.eq.s32.totalorder %v16394_v1, %v17308_v12  ;;  %vm1459_vm12 = vcmp.eq.s32.totalorder %v16397_v2, %v17308_v12 }
 0x335   : > { %1510 = vmatprep.subr.bf16.mxu0 %v15991_v0 }
 0x338   : > { %12051 = vmatpush1.bf16.msk.msra.mxu0 %vm12050_vm8, %v15993_v47  ;;  %vm12058_vm8 = vmpackc.low %vm1453_vm3, %vm1452_vm7  ;;  %vm1460_vm7 = vcmp.eq.s32.totalorder %v16409_v3, %v17308_v12  ;;  %vm1461_vm3 = vcmp.eq.s32.totalorder %v16412_v4, %v17308_v12 }
 0x339   : > { %1512 = vmatprep.subr.bf16.mxu0 %v15991_v0 }
 0x33b   : > { %14226 = vmatmul.mubr.msk.bf16.gmra.mrb[20].mxu0 %vm1042_vm11, %v15685_v20 }
 0x33c   : > { %12053 = vmatpush1.bf16.msk.msra.mxu0 %vm12052_vm9, %v15993_v47  ;;  %12072 = vmatprep.mubr.msk.bf16.mxu0 %vm845_vm5, %v16498_v23  ;;  %vm12060_vm9 = vmpackc.low %vm1455_vm2, %vm1454_vm10  ;;  %vm1462_vm10 = vcmp.eq.s32.totalorder %v16427_v5, %v17308_v12  ;;  %vm1463_vm2 = vcmp.eq.s32.totalorder %v16430_v6, %v17308_v12 }
 0x33d   : > { %1514 = vmatprep.subr.bf16.mxu0 %v15991_v0 }
 0x340   : > { %12055 = vmatpush1.bf16.msk.msra.mxu0 %vm12054_vm15, %v15993_v47  ;;  %vm12062_vm15 = vmpackc.low %vm1457_vm14, %vm1456_vm13  ;;  %vm1464_vm14 = vcmp.eq.s32.totalorder %v16445_v7, %v17308_v12 }
 0x341   : > { %1516 = vmatprep.subr.bf16.mxu0 %v15991_v0  ;;  %vm12068_vm13 = vmpackc.low %vm1463_vm2, %vm1462_vm10  ;;  %vm1669_vm2 = vcmp.eq.s32.totalorder %v16162_v38, %v17411_v46 }
 0x343   : > { %v6002_v21 = vpop.f32.mrb[36].mxu1 }
 0x344   : > { %12057 = vmatpush1.bf16.msk.msra.mxu0 %vm12056_vm6, %v15993_v47  ;;  %v6004_v24 = vpop.f32.mrb[37].mxu1  ;;  %vm12064_vm6 = vmpackc.low %vm1459_vm12, %vm1458_vm4  ;;  %vm1665_vm12 = vcmp.eq.s32.totalorder %v16118_v11, %v17411_v46 }
 0x345   : > { %v6005_v26 = vpop.f32.mrb[38].mxu1  ;;  %1518 = vmatprep.subr.bf16.mxu0 %v15991_v0  ;;  %v15691_v24 = vld [vmem:[%s20025_s4 + $0x78] sm:$0xff]  }
 0x346   : > { %v17359_v27 = vpack.c.bf16 %v6005_v26, %v6002_v21  ;;  %v6007_v29 = vpop.f32.mrb[39].mxu1  ;;  %v15692_v26 = vld [vmem:[%s20025_s4 + $0x80] sm:$0xff]  }
 0x347   : > { %v15693_v29 = vld [vmem:[%s20025_s4 + $0x88] ss:$0 sps:$4 sm:$0x11]  }
 0x348   : > { %12059 = vmatpush1.bf16.msk.msra.mxu0 %vm12058_vm8, %v15993_v47  ;;  %vm12066_vm8 = vmpackc.low %vm1461_vm3, %vm1460_vm7  ;;  %vm1667_vm3 = vcmp.eq.s32.totalorder %v16151_v33, %v17411_v46 }
 0x349   : > { %1520 = vmatprep.subr.bf16.mxu0 %v15991_v0 }
 0x34c   : > { %12061 = vmatpush1.bf16.msk.msra.mxu0 %vm12060_vm9, %v15993_v47  ;;  %vm1466_vm9 = vcmp.eq.s32.totalorder %v16453_v9, %v17308_v12 }
 0x34d   : > { %1522 = vmatprep.subr.bf16.mxu0 %v15991_v0  ;;  %v1491_v30 = vsel %vm1466_vm9, 1.0, %v15994_v10  ;;  %vm1670_vm9 = vcmp.eq.s32.totalorder %v16165_v39, %v17411_v46 }
 0x34e   : > { %v1504_v31 = vpack.c.bf16 %v1491_v30, %v1491_v30 }
 0x350   : > { %12063 = vmatpush1.bf16.msk.msra.mxu0 %vm12062_vm15, %v15993_v47  ;;  %vm1465_vm15 = vcmp.eq.s32.totalorder %v16448_v8, %v17308_v12  ;;  %v1506_v35 = vsel %vm849_vm1, %v1504_v31, 0 }
 0x351   : > { %1524 = vmatprep.subr.bf16.mxu0 %v15991_v0  ;;  %vm12070_vm4 = vmpackc.low %vm1465_vm15, %vm1464_vm14  ;;  %vm1671_vm14 = vcmp.eq.s32.totalorder %v16177_v40, %v17411_v46  ;;  %vm1672_vm15 = vcmp.eq.s32.totalorder %v16180_v41, %v17411_v46 }
 0x354   : > { %12065 = vmatpush1.bf16.msk.msra.mxu0 %vm12064_vm6, %v15993_v47  ;;  %vm1666_vm6 = vcmp.eq.s32.totalorder %v16132_v25, %v17411_v46 }
 0x355   : > { %1526 = vmatprep.subr.bf16.mxu0 %v15991_v0  ;;  %vm12090_vm7 = vmpackc.low %vm1666_vm6, %vm1665_vm12  ;;  %vm1673_vm12 = vcmp.eq.s32.totalorder %v16197_v43, %v17411_v46  ;;  %vm1674_vm6 = vcmp.eq.s32.totalorder %v16200_v44, %v17411_v46 }
 0x358   : > { %12067 = vmatpush1.bf16.msk.msra.mxu0 %vm12066_vm8, %v15993_v47  ;;  %vm1668_vm8 = vcmp.eq.s32.totalorder %v16154_v34, %v17411_v46 }
 0x359   : > { %1528 = vmatprep.subr.bf16.mxu0 %v15991_v0  ;;  %vm12092_vm10 = vmpackc.low %vm1668_vm8, %vm1667_vm3  ;;  %vm1675_vm3 = vcmp.eq.s32.totalorder %v16255_v50, %v17411_v46  ;;  %vm1676_vm8 = vcmp.eq.s32.totalorder %v16258_v51, %v17411_v46 }
 0x35c   : > { %12069 = vmatpush1.bf16.msk.msra.mxu0 %vm12068_vm13, %v15993_v47  ;;  %vm12094_vm13 = vmpackc.low %vm1670_vm9, %vm1669_vm2  ;;  %vm1677_vm2 = vcmp.eq.s32.totalorder %v16272_v53, %v17411_v46  ;;  %vm1678_vm9 = vcmp.eq.s32.totalorder %v16275_v54, %v17411_v46 }
 0x35d   : > { %1530 = vmatprep.subr.bf16.mxu0 %v15991_v0 }
 0x360   : > { %12071 = vmatpush1.bf16.msk.msra.mxu0 %vm12070_vm4, %v15993_v47  ;;  %vm12096_vm4 = vmpackc.low %vm1672_vm15, %vm1671_vm14  ;;  %vm1679_vm14 = vcmp.eq.s32.totalorder %v16282_v56, %v17411_v46  ;;  %vm1680_vm15 = vcmp.eq.s32.totalorder %v16285_v57, %v17411_v46 }
 0x361   : > { %1532 = vmatprep.subr.bf16.mxu0 %v15991_v0 }
 0x364   : > { %1533 = vmatpush1.bf16.msra.mxu0 %v1506_v35 }
 0x367   : > { %1541 = vmatmul.mubr.bf16.vlgmr.msra.gmra.mrb[28].mxu0 %v16496_v22 }
 0x368   : > { %14231 = vmatprep.mubr.msk.bf16.mxu0 %vm1042_vm11, %v15686_v37  ;;  %v15694_v37 = vld [vmem:[%s20025_s4 + $0x8c] sm:$0xff]  }
 0x43a   : > { %v1542_v42 = vpop.f32.mrb[28].mxu0 }
 0x43b   : > { %v1544_v45 = vpop.f32.mrb[29].mxu0 }
 0x43c   : > { %v1545_v48 = vpop.f32.mrb[30].mxu0 }
 0x43d   : > { %v1549_v52 = vpack.c.bf16 %v1545_v48, %v1542_v42  ;;  %v1547_v55 = vpop.f32.mrb[31].mxu0 }
 0x43f   : > { %14229 = vmatprep.subr.bf16.mxu0 %v1549_v52 }
 0x440   : > { %14230 = vmatpush3.bf16.msra.mxu0 %v1549_v52 }
 0x441   : > { %1731 = vmatprep.subr.bf16.mxu0 %v15991_v0 }
 0x443   : > { %14232 = vmatmul.mubr.msk.bf16.vlgmr.msra.gmra.mrb[16].mxu0 %vm1042_vm11, %v15687_v58  ;;  %v15695_v58 = vld [vmem:[%s20025_s4 + $0x94] sm:$0xff]  }
 0x444   : > { %12091 = vmatpush1.bf16.msk.msra.mxu0 %vm12090_vm7, %v15993_v47  ;;  %14235 = vmatprep.mubr.msk.bf16.mxu0 %vm1042_vm11, %v15688_v59  ;;  %vm12098_vm7 = vmpackc.low %vm1674_vm6, %vm1673_vm12  ;;  %vm1681_vm12 = vcmp.eq.s32.totalorder %v16394_v1, %v17411_v46  ;;  %vm1682_vm6 = vcmp.eq.s32.totalorder %v16397_v2, %v17411_v46  ;;  %v15696_v59 = vld [vmem:[%s20025_s4 + $0x9c] sm:$0xff]  }
 0x445   : > { %1733 = vmatprep.subr.bf16.mxu0 %v15991_v0 }
 0x448   : > { %12093 = vmatpush1.bf16.msk.msra.mxu0 %vm12092_vm10, %v15993_v47  ;;  %vm12100_vm10 = vmpackc.low %vm1676_vm8, %vm1675_vm3  ;;  %vm1683_vm3 = vcmp.eq.s32.totalorder %v16409_v3, %v17411_v46  ;;  %vm1684_vm8 = vcmp.eq.s32.totalorder %v16412_v4, %v17411_v46 }
 0x449   : > { %1735 = vmatprep.subr.bf16.mxu0 %v15991_v0 }
 0x44b   : > { %14236 = vmatmul.mubr.msk.bf16.gmra.mrb[20].mxu0 %vm1042_vm11, %v15689_v61  ;;  %v15697_v61 = vld [vmem:[%s20025_s4 + $0xa4] ss:$0 sps:$4 sm:$0x11]  }
 0x44c   : > { %12095 = vmatpush1.bf16.msk.msra.mxu0 %vm12094_vm13, %v15993_v47  ;;  %12114 = vmatprep.mubr.msk.bf16.mxu0 %vm845_vm5, %v16498_v23  ;;  %vm12102_vm13 = vmpackc.low %vm1678_vm9, %vm1677_vm2  ;;  %vm1685_vm2 = vcmp.eq.s32.totalorder %v16427_v5, %v17411_v46  ;;  %vm1686_vm9 = vcmp.eq.s32.totalorder %v16430_v6, %v17411_v46 }
 0x44d   : > { %1737 = vmatprep.subr.bf16.mxu0 %v15991_v0 }
 0x450   : > { %12097 = vmatpush1.bf16.msk.msra.mxu0 %vm12096_vm4, %v15993_v47  ;;  %vm12104_vm4 = vmpackc.low %vm1680_vm15, %vm1679_vm14  ;;  %vm1687_vm15 = vcmp.eq.s32.totalorder %v16445_v7, %v17411_v46 }
 0x451   : > { %1739 = vmatprep.subr.bf16.mxu0 %v15991_v0  ;;  %vm12110_vm14 = vmpackc.low %vm1686_vm9, %vm1685_vm2  ;;  %vm1892_vm9 = vcmp.eq.s32.totalorder %v16162_v38, %v17512_v18 }
 0x454   : > { %12099 = vmatpush1.bf16.msk.msra.mxu0 %vm12098_vm7, %v15993_v47  ;;  %vm12106_vm7 = vmpackc.low %vm1682_vm6, %vm1681_vm12  ;;  %vm1888_vm6 = vcmp.eq.s32.totalorder %v16118_v11, %v17512_v18 }
 0x455   : > { %1741 = vmatprep.subr.bf16.mxu0 %v15991_v0 }
 0x458   : > { %12101 = vmatpush1.bf16.msk.msra.mxu0 %vm12100_vm10, %v15993_v47  ;;  %vm12108_vm10 = vmpackc.low %vm1684_vm8, %vm1683_vm3  ;;  %vm1890_vm8 = vcmp.eq.s32.totalorder %v16151_v33, %v17512_v18 }
 0x459   : > { %1743 = vmatprep.subr.bf16.mxu0 %v15991_v0 }
 0x45c   : > { %12103 = vmatpush1.bf16.msk.msra.mxu0 %vm12102_vm13, %v15993_v47  ;;  %vm1689_vm13 = vcmp.eq.s32.totalorder %v16453_v9, %v17411_v46 }
 0x45d   : > { %1745 = vmatprep.subr.bf16.mxu0 %v15991_v0  ;;  %v1714_v62 = vsel %vm1689_vm13, 1.0, %v15994_v10  ;;  %vm1893_vm13 = vcmp.eq.s32.totalorder %v16165_v39, %v17512_v18 }
 0x45e   : > { %v1727_v63 = vpack.c.bf16 %v1714_v62, %v1714_v62 }
 0x460   : > { %12105 = vmatpush1.bf16.msk.msra.mxu0 %vm12104_vm4, %v15993_v47  ;;  %vm1688_vm4 = vcmp.eq.s32.totalorder %v16448_v8, %v17411_v46  ;;  %v1729_v12 = vsel %vm849_vm1, %v1727_v63, 0  ;;  %v17613_v46 = vld [vmem:[%s20022_s1 + $0x6] ss:$0 sm:$0xff] }
 0x461   : > { %1747 = vmatprep.subr.bf16.mxu0 %v15991_v0  ;;  %vm12112_vm12 = vmpackc.low %vm1688_vm4, %vm1687_vm15  ;;  %vm1894_vm15 = vcmp.eq.s32.totalorder %v16177_v40, %v17512_v18  ;;  %vm1895_vm4 = vcmp.eq.s32.totalorder %v16180_v41, %v17512_v18 }
 0x464   : > { %12107 = vmatpush1.bf16.msk.msra.mxu0 %vm12106_vm7, %v15993_v47  ;;  %vm1889_vm7 = vcmp.eq.s32.totalorder %v16132_v25, %v17512_v18 }
 0x465   : > { %1749 = vmatprep.subr.bf16.mxu0 %v15991_v0  ;;  %vm12132_vm3 = vmpackc.low %vm1889_vm7, %vm1888_vm6  ;;  %vm1896_vm6 = vcmp.eq.s32.totalorder %v16197_v43, %v17512_v18  ;;  %vm1897_vm7 = vcmp.eq.s32.totalorder %v16200_v44, %v17512_v18 }
 0x468   : > { %12109 = vmatpush1.bf16.msk.msra.mxu0 %vm12108_vm10, %v15993_v47  ;;  %vm1891_vm10 = vcmp.eq.s32.totalorder %v16154_v34, %v17512_v18 }
 0x469   : > { %1751 = vmatprep.subr.bf16.mxu0 %v15991_v0  ;;  %vm12134_vm2 = vmpackc.low %vm1891_vm10, %vm1890_vm8  ;;  %vm1898_vm8 = vcmp.eq.s32.totalorder %v16255_v50, %v17512_v18  ;;  %vm1899_vm10 = vcmp.eq.s32.totalorder %v16258_v51, %v17512_v18 }
 0x46c   : > { %12111 = vmatpush1.bf16.msk.msra.mxu0 %vm12110_vm14, %v15993_v47  ;;  %vm12136_vm14 = vmpackc.low %vm1893_vm13, %vm1892_vm9  ;;  %vm1900_vm9 = vcmp.eq.s32.totalorder %v16272_v53, %v17512_v18  ;;  %vm1901_vm13 = vcmp.eq.s32.totalorder %v16275_v54, %v17512_v18 }
 0x46d   : > { %1753 = vmatprep.subr.bf16.mxu0 %v15991_v0 }
 0x470   : > { %12113 = vmatpush1.bf16.msk.msra.mxu0 %vm12112_vm12, %v15993_v47  ;;  %vm12138_vm12 = vmpackc.low %vm1895_vm4, %vm1894_vm15  ;;  %vm1902_vm15 = vcmp.eq.s32.totalorder %v16282_v56, %v17512_v18  ;;  %vm1903_vm4 = vcmp.eq.s32.totalorder %v16285_v57, %v17512_v18 }
 0x471   : > { %1755 = vmatprep.subr.bf16.mxu0 %v15991_v0 }
 0x474   : > { %1756 = vmatpush1.bf16.msra.mxu0 %v1729_v12 }
 0x477   : > { %1764 = vmatmul.mubr.bf16.vlgmr.msra.gmra.mrb[32].mxu0 %v16496_v22 }
 0x478   : > { %14241 = vmatprep.mubr.msk.bf16.mxu0 %vm1042_vm11, %v15690_v14  ;;  %v15698_v14 = vld [vmem:[%s20025_s4 + $0xa8] sm:$0xff]  }
 0x54a   : > { %v1765_v16 = vpop.f32.mrb[32].mxu0 }
 0x54b   : > { %v1767_v17 = vpop.f32.mrb[33].mxu0 }
 0x54c   : > { %v1768_v19 = vpop.f32.mrb[34].mxu0 }
 0x54d   : > { %v1772_v20 = vpack.c.bf16 %v1768_v19, %v1765_v16  ;;  %v1770_v21 = vpop.f32.mrb[35].mxu0 }
 0x54f   : > { %14239 = vmatprep.subr.bf16.mxu0 %v1772_v20 }
 0x550   : > { %14240 = vmatpush3.bf16.msra.mxu0 %v1772_v20 }
 0x551   : > { %1954 = vmatprep.subr.bf16.mxu0 %v15991_v0 }
 0x553   : > { %14242 = vmatmul.mubr.msk.bf16.vlgmr.msra.gmra.mrb[16].mxu0 %vm1042_vm11, %v15691_v24  ;;  %v15699_v24 = vld [vmem:[%s20025_s4 + $0xb0] sm:$0xff]  }
 0x554   : > { %12133 = vmatpush1.bf16.msk.msra.mxu0 %vm12132_vm3, %v15993_v47  ;;  %14245 = vmatprep.mubr.msk.bf16.mxu0 %vm1042_vm11, %v15692_v26  ;;  %vm12140_vm3 = vmpackc.low %vm1897_vm7, %vm1896_vm6  ;;  %vm1904_vm6 = vcmp.eq.s32.totalorder %v16394_v1, %v17512_v18  ;;  %vm1905_vm7 = vcmp.eq.s32.totalorder %v16397_v2, %v17512_v18  ;;  %v15700_v26 = vld [vmem:[%s20025_s4 + $0xb8] sm:$0xff]  }
 0x555   : > { %1956 = vmatprep.subr.bf16.mxu0 %v15991_v0 }
 0x558   : > { %12135 = vmatpush1.bf16.msk.msra.mxu0 %vm12134_vm2, %v15993_v47  ;;  %vm12142_vm2 = vmpackc.low %vm1899_vm10, %vm1898_vm8  ;;  %vm1906_vm8 = vcmp.eq.s32.totalorder %v16409_v3, %v17512_v18  ;;  %vm1907_vm10 = vcmp.eq.s32.totalorder %v16412_v4, %v17512_v18 }
 0x559   : > { %1958 = vmatprep.subr.bf16.mxu0 %v15991_v0 }
 0x55b   : > { %14246 = vmatmul.mubr.msk.bf16.gmra.mrb[20].mxu0 %vm1042_vm11, %v15693_v29  ;;  %v15701_v29 = vld [vmem:[%s20025_s4 + $0xc0] ss:$0 sps:$4 sm:$0x11]  }
 0x55c   : > { %12137 = vmatpush1.bf16.msk.msra.mxu0 %vm12136_vm14, %v15993_v47  ;;  %12156 = vmatprep.mubr.msk.bf16.mxu0 %vm845_vm5, %v16498_v23  ;;  %vm12144_vm14 = vmpackc.low %vm1901_vm13, %vm1900_vm9  ;;  %vm1908_vm9 = vcmp.eq.s32.totalorder %v16427_v5, %v17512_v18  ;;  %vm1909_vm13 = vcmp.eq.s32.totalorder %v16430_v6, %v17512_v18 }
 0x55d   : > { %1960 = vmatprep.subr.bf16.mxu0 %v15991_v0 }
 0x560   : > { %12139 = vmatpush1.bf16.msk.msra.mxu0 %vm12138_vm12, %v15993_v47  ;;  %vm12146_vm12 = vmpackc.low %vm1903_vm4, %vm1902_vm15  ;;  %vm1910_vm4 = vcmp.eq.s32.totalorder %v16445_v7, %v17512_v18 }
 0x561   : > { %1962 = vmatprep.subr.bf16.mxu0 %v15991_v0  ;;  %vm12152_vm15 = vmpackc.low %vm1909_vm13, %vm1908_vm9  ;;  %vm2115_vm13 = vcmp.eq.s32.totalorder %v16162_v38, %v17613_v46 }
 0x564   : > { %12141 = vmatpush1.bf16.msk.msra.mxu0 %vm12140_vm3, %v15993_v47  ;;  %vm12148_vm3 = vmpackc.low %vm1905_vm7, %vm1904_vm6  ;;  %vm2111_vm7 = vcmp.eq.s32.totalorder %v16118_v11, %v17613_v46 }
 0x565   : > { %1964 = vmatprep.subr.bf16.mxu0 %v15991_v0 }
 0x568   : > { %12143 = vmatpush1.bf16.msk.msra.mxu0 %vm12142_vm2, %v15993_v47  ;;  %vm12150_vm2 = vmpackc.low %vm1907_vm10, %vm1906_vm8  ;;  %vm2113_vm10 = vcmp.eq.s32.totalorder %v16151_v33, %v17613_v46 }
 0x569   : > { %1966 = vmatprep.subr.bf16.mxu0 %v15991_v0 }
 0x56c   : > { %12145 = vmatpush1.bf16.msk.msra.mxu0 %vm12144_vm14, %v15993_v47  ;;  %vm1912_vm14 = vcmp.eq.s32.totalorder %v16453_v9, %v17512_v18 }
 0x56d   : > { %1968 = vmatprep.subr.bf16.mxu0 %v15991_v0  ;;  %v1937_v30 = vsel %vm1912_vm14, 1.0, %v15994_v10  ;;  %vm2116_vm14 = vcmp.eq.s32.totalorder %v16165_v39, %v17613_v46 }
 0x56e   : > { %v1950_v31 = vpack.c.bf16 %v1937_v30, %v1937_v30 }
 0x570   : > { %12147 = vmatpush1.bf16.msk.msra.mxu0 %vm12146_vm12, %v15993_v47  ;;  %vm1911_vm12 = vcmp.eq.s32.totalorder %v16448_v8, %v17512_v18  ;;  %v1952_v35 = vsel %vm849_vm1, %v1950_v31, 0  ;;  %v17714_v18 = vld [vmem:[%s20022_s1 + $0x7] ss:$0 sm:$0xff] }
 0x571   : > { %1970 = vmatprep.subr.bf16.mxu0 %v15991_v0  ;;  %vm12154_vm6 = vmpackc.low %vm1911_vm12, %vm1910_vm4  ;;  %vm2117_vm4 = vcmp.eq.s32.totalorder %v16177_v40, %v17613_v46  ;;  %vm2118_vm12 = vcmp.eq.s32.totalorder %v16180_v41, %v17613_v46 }
 0x574   : > { %12149 = vmatpush1.bf16.msk.msra.mxu0 %vm12148_vm3, %v15993_v47  ;;  %vm2112_vm3 = vcmp.eq.s32.totalorder %v16132_v25, %v17613_v46 }
 0x575   : > { %1972 = vmatprep.subr.bf16.mxu0 %v15991_v0  ;;  %vm12174_vm8 = vmpackc.low %vm2112_vm3, %vm2111_vm7  ;;  %vm2119_vm7 = vcmp.eq.s32.totalorder %v16197_v43, %v17613_v46  ;;  %vm2120_vm3 = vcmp.eq.s32.totalorder %v16200_v44, %v17613_v46 }
 0x578   : > { %12151 = vmatpush1.bf16.msk.msra.mxu0 %vm12150_vm2, %v15993_v47  ;;  %vm2114_vm2 = vcmp.eq.s32.totalorder %v16154_v34, %v17613_v46 }
 0x579   : > { %1974 = vmatprep.subr.bf16.mxu0 %v15991_v0  ;;  %vm12176_vm9 = vmpackc.low %vm2114_vm2, %vm2113_vm10  ;;  %vm2121_vm10 = vcmp.eq.s32.totalorder %v16255_v50, %v17613_v46  ;;  %vm2122_vm2 = vcmp.eq.s32.totalorder %v16258_v51, %v17613_v46 }
 0x57c   : > { %12153 = vmatpush1.bf16.msk.msra.mxu0 %vm12152_vm15, %v15993_v47  ;;  %vm12178_vm15 = vmpackc.low %vm2116_vm14, %vm2115_vm13  ;;  %vm2123_vm13 = vcmp.eq.s32.totalorder %v16272_v53, %v17613_v46  ;;  %vm2124_vm14 = vcmp.eq.s32.totalorder %v16275_v54, %v17613_v46 }
 0x57d   : > { %1976 = vmatprep.subr.bf16.mxu0 %v15991_v0 }
 0x580   : > { %12155 = vmatpush1.bf16.msk.msra.mxu0 %vm12154_vm6, %v15993_v47  ;;  %vm12180_vm6 = vmpackc.low %vm2118_vm12, %vm2117_vm4  ;;  %vm2125_vm4 = vcmp.eq.s32.totalorder %v16282_v56, %v17613_v46  ;;  %vm2126_vm12 = vcmp.eq.s32.totalorder %v16285_v57, %v17613_v46 }
 0x581   : > { %1978 = vmatprep.subr.bf16.mxu0 %v15991_v0 }
 0x584   : > { %1979 = vmatpush1.bf16.msra.mxu0 %v1952_v35 }
 0x587   : > { %1987 = vmatmul.mubr.bf16.vlgmr.msra.gmra.mrb[36].mxu0 %v16496_v22 }
 0x588   : > { %14251 = vmatprep.mubr.msk.bf16.mxu0 %vm1042_vm11, %v15694_v37  ;;  %v15702_v37 = vld [vmem:[%s20025_s4 + $0xc4] sm:$0xff]  }
 0x65a   : > { %v1988_v42 = vpop.f32.mrb[36].mxu0 }
 0x65b   : > { %v1990_v45 = vpop.f32.mrb[37].mxu0 }
 0x65c   : > { %v1991_v48 = vpop.f32.mrb[38].mxu0 }
 0x65d   : > { %v1995_v52 = vpack.c.bf16 %v1991_v48, %v1988_v42  ;;  %v1993_v55 = vpop.f32.mrb[39].mxu0 }
 0x65f   : > { %14249 = vmatprep.subr.bf16.mxu0 %v1995_v52 }
 0x660   : > { %14250 = vmatpush3.bf16.msra.mxu0 %v1995_v52 }
 0x661   : > { %2177 = vmatprep.subr.bf16.mxu0 %v15991_v0 }
 0x663   : > { %14252 = vmatmul.mubr.msk.bf16.vlgmr.msra.gmra.mrb[16].mxu0 %vm1042_vm11, %v15695_v58  ;;  %v15703_v58 = vld [vmem:[%s20025_s4 + $0xcc] sm:$0xff]  }
 0x664   : > { %12175 = vmatpush1.bf16.msk.msra.mxu0 %vm12174_vm8, %v15993_v47  ;;  %14255 = vmatprep.mubr.msk.bf16.mxu0 %vm1042_vm11, %v15696_v59  ;;  %vm12182_vm8 = vmpackc.low %vm2120_vm3, %vm2119_vm7  ;;  %vm2127_vm7 = vcmp.eq.s32.totalorder %v16394_v1, %v17613_v46  ;;  %vm2128_vm3 = vcmp.eq.s32.totalorder %v16397_v2, %v17613_v46  ;;  %v15704_v59 = vld [vmem:[%s20025_s4 + $0xd4] sm:$0xff]  }
 0x665   : > { %2179 = vmatprep.subr.bf16.mxu0 %v15991_v0 }
 0x668   : > { %12177 = vmatpush1.bf16.msk.msra.mxu0 %vm12176_vm9, %v15993_v47  ;;  %vm12184_vm9 = vmpackc.low %vm2122_vm2, %vm2121_vm10  ;;  %vm2129_vm10 = vcmp.eq.s32.totalorder %v16409_v3, %v17613_v46  ;;  %vm2130_vm2 = vcmp.eq.s32.totalorder %v16412_v4, %v17613_v46 }
 0x669   : > { %2181 = vmatprep.subr.bf16.mxu0 %v15991_v0 }
 0x66b   : > { %14256 = vmatmul.mubr.msk.bf16.gmra.mrb[20].mxu0 %vm1042_vm11, %v15697_v61  ;;  %v15705_v61 = vld [vmem:[%s20025_s4 + $0xdc] ss:$0 sps:$4 sm:$0x11]  }
 0x66c   : > { %12179 = vmatpush1.bf16.msk.msra.mxu0 %vm12178_vm15, %v15993_v47  ;;  %12198 = vmatprep.mubr.msk.bf16.mxu0 %vm845_vm5, %v16498_v23  ;;  %vm12186_vm15 = vmpackc.low %vm2124_vm14, %vm2123_vm13  ;;  %vm2131_vm13 = vcmp.eq.s32.totalorder %v16427_v5, %v17613_v46  ;;  %vm2132_vm14 = vcmp.eq.s32.totalorder %v16430_v6, %v17613_v46 }
 0x66d   : > { %2183 = vmatprep.subr.bf16.mxu0 %v15991_v0 }
 0x670   : > { %12181 = vmatpush1.bf16.msk.msra.mxu0 %vm12180_vm6, %v15993_v47  ;;  %vm12188_vm6 = vmpackc.low %vm2126_vm12, %vm2125_vm4  ;;  %vm2133_vm12 = vcmp.eq.s32.totalorder %v16445_v7, %v17613_v46 }
 0x671   : > { %2185 = vmatprep.subr.bf16.mxu0 %v15991_v0  ;;  %vm12194_vm4 = vmpackc.low %vm2132_vm14, %vm2131_vm13  ;;  %vm2338_vm14 = vcmp.eq.s32.totalorder %v16162_v38, %v17714_v18 }
 0x674   : > { %12183 = vmatpush1.bf16.msk.msra.mxu0 %vm12182_vm8, %v15993_v47  ;;  %vm12190_vm8 = vmpackc.low %vm2128_vm3, %vm2127_vm7  ;;  %vm2334_vm3 = vcmp.eq.s32.totalorder %v16118_v11, %v17714_v18 }
 0x675   : > { %2187 = vmatprep.subr.bf16.mxu0 %v15991_v0 }
 0x678   : > { %12185 = vmatpush1.bf16.msk.msra.mxu0 %vm12184_vm9, %v15993_v47  ;;  %vm12192_vm9 = vmpackc.low %vm2130_vm2, %vm2129_vm10  ;;  %vm2336_vm2 = vcmp.eq.s32.totalorder %v16151_v33, %v17714_v18 }
 0x679   : > { %2189 = vmatprep.subr.bf16.mxu0 %v15991_v0 }
 0x67c   : > { %12187 = vmatpush1.bf16.msk.msra.mxu0 %vm12186_vm15, %v15993_v47  ;;  %vm2135_vm15 = vcmp.eq.s32.totalorder %v16453_v9, %v17613_v46 }
 0x67d   : > { %2191 = vmatprep.subr.bf16.mxu0 %v15991_v0  ;;  %v2160_v62 = vsel %vm2135_vm15, 1.0, %v15994_v10  ;;  %vm2339_vm15 = vcmp.eq.s32.totalorder %v16165_v39, %v17714_v18 }
 0x67e   : > { %v2173_v63 = vpack.c.bf16 %v2160_v62, %v2160_v62 }
 0x680   : > { %12189 = vmatpush1.bf16.msk.msra.mxu0 %vm12188_vm6, %v15993_v47  ;;  %vm2134_vm6 = vcmp.eq.s32.totalorder %v16448_v8, %v17613_v46  ;;  %v2175_v12 = vsel %vm849_vm1, %v2173_v63, 0  ;;  %v17815_v46 = vld [vmem:[%s20022_s1 + $0x8] ss:$0 sm:$0xff] }
 0x681   : > { %2193 = vmatprep.subr.bf16.mxu0 %v15991_v0  ;;  %vm12196_vm7 = vmpackc.low %vm2134_vm6, %vm2133_vm12  ;;  %vm2340_vm12 = vcmp.eq.s32.totalorder %v16177_v40, %v17714_v18  ;;  %vm2341_vm6 = vcmp.eq.s32.totalorder %v16180_v41, %v17714_v18 }
 0x684   : > { %12191 = vmatpush1.bf16.msk.msra.mxu0 %vm12190_vm8, %v15993_v47  ;;  %vm2335_vm8 = vcmp.eq.s32.totalorder %v16132_v25, %v17714_v18 }
 0x685   : > { %2195 = vmatprep.subr.bf16.mxu0 %v15991_v0  ;;  %vm12216_vm10 = vmpackc.low %vm2335_vm8, %vm2334_vm3  ;;  %vm2342_vm3 = vcmp.eq.s32.totalorder %v16197_v43, %v17714_v18  ;;  %vm2343_vm8 = vcmp.eq.s32.totalorder %v16200_v44, %v17714_v18 }
 0x688   : > { %12193 = vmatpush1.bf16.msk.msra.mxu0 %vm12192_vm9, %v15993_v47  ;;  %vm2337_vm9 = vcmp.eq.s32.totalorder %v16154_v34, %v17714_v18 }
 0x689   : > { %2197 = vmatprep.subr.bf16.mxu0 %v15991_v0  ;;  %vm12218_vm13 = vmpackc.low %vm2337_vm9, %vm2336_vm2  ;;  %vm2344_vm2 = vcmp.eq.s32.totalorder %v16255_v50, %v17714_v18  ;;  %vm2345_vm9 = vcmp.eq.s32.totalorder %v16258_v51, %v17714_v18 }
 0x68c   : > { %12195 = vmatpush1.bf16.msk.msra.mxu0 %vm12194_vm4, %v15993_v47  ;;  %vm12220_vm4 = vmpackc.low %vm2339_vm15, %vm2338_vm14  ;;  %vm2346_vm14 = vcmp.eq.s32.totalorder %v16272_v53, %v17714_v18  ;;  %vm2347_vm15 = vcmp.eq.s32.totalorder %v16275_v54, %v17714_v18 }
 0x68d   : > { %2199 = vmatprep.subr.bf16.mxu0 %v15991_v0 }
 0x690   : > { %12197 = vmatpush1.bf16.msk.msra.mxu0 %vm12196_vm7, %v15993_v47  ;;  %vm12222_vm7 = vmpackc.low %vm2341_vm6, %vm2340_vm12  ;;  %vm2348_vm12 = vcmp.eq.s32.totalorder %v16282_v56, %v17714_v18  ;;  %vm2349_vm6 = vcmp.eq.s32.totalorder %v16285_v57, %v17714_v18 }
 0x691   : > { %2201 = vmatprep.subr.bf16.mxu0 %v15991_v0 }
 0x694   : > { %2202 = vmatpush1.bf16.msra.mxu0 %v2175_v12 }
 0x697   : > { %2210 = vmatmul.mubr.bf16.vlgmr.msra.gmra.mrb[40].mxu0 %v16496_v22 }
 0x698   : > { %14261 = vmatprep.mubr.msk.bf16.mxu0 %vm1042_vm11, %v15698_v14  ;;  %v15706_v14 = vld [vmem:[%s20025_s4 + $0xe0] sm:$0xff]  }
 0x76a   : > { %v2211_v16 = vpop.f32.mrb[40].mxu0 }
 0x76b   : > { %v2213_v17 = vpop.f32.mrb[41].mxu0 }
 0x76c   : > { %v2214_v19 = vpop.f32.mrb[42].mxu0 }
 0x76d   : > { %v2218_v20 = vpack.c.bf16 %v2214_v19, %v2211_v16  ;;  %v2216_v21 = vpop.f32.mrb[43].mxu0 }
 0x76f   : > { %14259 = vmatprep.subr.bf16.mxu0 %v2218_v20 }
 0x770   : > { %14260 = vmatpush3.bf16.msra.mxu0 %v2218_v20 }
 0x771   : > { %2400 = vmatprep.subr.bf16.mxu0 %v15991_v0 }
 0x773   : > { %14262 = vmatmul.mubr.msk.bf16.vlgmr.msra.gmra.mrb[16].mxu0 %vm1042_vm11, %v15699_v24  ;;  %v15707_v24 = vld [vmem:[%s20025_s4 + $0xe8] sm:$0xff]  }
 0x774   : > { %12217 = vmatpush1.bf16.msk.msra.mxu0 %vm12216_vm10, %v15993_v47  ;;  %14265 = vmatprep.mubr.msk.bf16.mxu0 %vm1042_vm11, %v15700_v26  ;;  %vm12224_vm10 = vmpackc.low %vm2343_vm8, %vm2342_vm3  ;;  %vm2350_vm3 = vcmp.eq.s32.totalorder %v16394_v1, %v17714_v18  ;;  %vm2351_vm8 = vcmp.eq.s32.totalorder %v16397_v2, %v17714_v18  ;;  %v15708_v26 = vld [vmem:[%s20025_s4 + $0xf0] sm:$0xff]  }
 0x775   : > { %2402 = vmatprep.subr.bf16.mxu0 %v15991_v0 }
 0x778   : > { %12219 = vmatpush1.bf16.msk.msra.mxu0 %vm12218_vm13, %v15993_v47  ;;  %vm12226_vm13 = vmpackc.low %vm2345_vm9, %vm2344_vm2  ;;  %vm2352_vm2 = vcmp.eq.s32.totalorder %v16409_v3, %v17714_v18  ;;  %vm2353_vm9 = vcmp.eq.s32.totalorder %v16412_v4, %v17714_v18 }
 0x779   : > { %2404 = vmatprep.subr.bf16.mxu0 %v15991_v0 }
 0x77b   : > { %14266 = vmatmul.mubr.msk.bf16.gmra.mrb[20].mxu0 %vm1042_vm11, %v15701_v29  ;;  %v15709_v29 = vld [vmem:[%s20025_s4 + $0xf8] ss:$0 sps:$4 sm:$0x11]  }
 0x77c   : > { %12221 = vmatpush1.bf16.msk.msra.mxu0 %vm12220_vm4, %v15993_v47  ;;  %12240 = vmatprep.mubr.msk.bf16.mxu0 %vm845_vm5, %v16498_v23  ;;  %vm12228_vm4 = vmpackc.low %vm2347_vm15, %vm2346_vm14  ;;  %vm2354_vm14 = vcmp.eq.s32.totalorder %v16427_v5, %v17714_v18  ;;  %vm2355_vm15 = vcmp.eq.s32.totalorder %v16430_v6, %v17714_v18 }
 0x77d   : > { %2406 = vmatprep.subr.bf16.mxu0 %v15991_v0 }
 0x780   : > { %12223 = vmatpush1.bf16.msk.msra.mxu0 %vm12222_vm7, %v15993_v47  ;;  %vm12230_vm7 = vmpackc.low %vm2349_vm6, %vm2348_vm12  ;;  %vm2356_vm6 = vcmp.eq.s32.totalorder %v16445_v7, %v17714_v18 }
 0x781   : > { %2408 = vmatprep.subr.bf16.mxu0 %v15991_v0  ;;  %vm12236_vm12 = vmpackc.low %vm2355_vm15, %vm2354_vm14  ;;  %vm2561_vm15 = vcmp.eq.s32.totalorder %v16162_v38, %v17815_v46 }
 0x784   : > { %12225 = vmatpush1.bf16.msk.msra.mxu0 %vm12224_vm10, %v15993_v47  ;;  %vm12232_vm10 = vmpackc.low %vm2351_vm8, %vm2350_vm3  ;;  %vm2557_vm8 = vcmp.eq.s32.totalorder %v16118_v11, %v17815_v46 }
 0x785   : > { %2410 = vmatprep.subr.bf16.mxu0 %v15991_v0 }
 0x788   : > { %12227 = vmatpush1.bf16.msk.msra.mxu0 %vm12226_vm13, %v15993_v47  ;;  %vm12234_vm13 = vmpackc.low %vm2353_vm9, %vm2352_vm2  ;;  %vm2559_vm9 = vcmp.eq.s32.totalorder %v16151_v33, %v17815_v46 }
 0x789   : > { %2412 = vmatprep.subr.bf16.mxu0 %v15991_v0 }
 0x78c   : > { %12229 = vmatpush1.bf16.msk.msra.mxu0 %vm12228_vm4, %v15993_v47  ;;  %vm2358_vm4 = vcmp.eq.s32.totalorder %v16453_v9, %v17714_v18 }
 0x78d   : > { %2414 = vmatprep.subr.bf16.mxu0 %v15991_v0  ;;  %v2383_v30 = vsel %vm2358_vm4, 1.0, %v15994_v10  ;;  %vm2562_vm4 = vcmp.eq.s32.totalorder %v16165_v39, %v17815_v46 }
 0x78e   : > { %v2396_v31 = vpack.c.bf16 %v2383_v30, %v2383_v30 }
 0x790   : > { %12231 = vmatpush1.bf16.msk.msra.mxu0 %vm12230_vm7, %v15993_v47  ;;  %vm2357_vm7 = vcmp.eq.s32.totalorder %v16448_v8, %v17714_v18  ;;  %v2398_v35 = vsel %vm849_vm1, %v2396_v31, 0  ;;  %v17916_v18 = vld [vmem:[%s20022_s1 + $0x9] ss:$0 sm:$0xff] }
 0x791   : > { %2416 = vmatprep.subr.bf16.mxu0 %v15991_v0  ;;  %vm12238_vm3 = vmpackc.low %vm2357_vm7, %vm2356_vm6  ;;  %vm2563_vm6 = vcmp.eq.s32.totalorder %v16177_v40, %v17815_v46  ;;  %vm2564_vm7 = vcmp.eq.s32.totalorder %v16180_v41, %v17815_v46 }
 0x794   : > { %12233 = vmatpush1.bf16.msk.msra.mxu0 %vm12232_vm10, %v15993_v47  ;;  %vm2558_vm10 = vcmp.eq.s32.totalorder %v16132_v25, %v17815_v46 }
 0x795   : > { %2418 = vmatprep.subr.bf16.mxu0 %v15991_v0  ;;  %vm12258_vm2 = vmpackc.low %vm2558_vm10, %vm2557_vm8  ;;  %vm2565_vm8 = vcmp.eq.s32.totalorder %v16197_v43, %v17815_v46  ;;  %vm2566_vm10 = vcmp.eq.s32.totalorder %v16200_v44, %v17815_v46 }
 0x798   : > { %12235 = vmatpush1.bf16.msk.msra.mxu0 %vm12234_vm13, %v15993_v47  ;;  %vm2560_vm13 = vcmp.eq.s32.totalorder %v16154_v34, %v17815_v46 }
 0x799   : > { %2420 = vmatprep.subr.bf16.mxu0 %v15991_v0  ;;  %vm12260_vm14 = vmpackc.low %vm2560_vm13, %vm2559_vm9  ;;  %vm2567_vm9 = vcmp.eq.s32.totalorder %v16255_v50, %v17815_v46  ;;  %vm2568_vm13 = vcmp.eq.s32.totalorder %v16258_v51, %v17815_v46 }
 0x79c   : > { %12237 = vmatpush1.bf16.msk.msra.mxu0 %vm12236_vm12, %v15993_v47  ;;  %vm12262_vm12 = vmpackc.low %vm2562_vm4, %vm2561_vm15  ;;  %vm2569_vm15 = vcmp.eq.s32.totalorder %v16272_v53, %v17815_v46  ;;  %vm2570_vm4 = vcmp.eq.s32.totalorder %v16275_v54, %v17815_v46 }
 0x79d   : > { %2422 = vmatprep.subr.bf16.mxu0 %v15991_v0 }
 0x7a0   : > { %12239 = vmatpush1.bf16.msk.msra.mxu0 %vm12238_vm3, %v15993_v47  ;;  %vm12264_vm3 = vmpackc.low %vm2564_vm7, %vm2563_vm6  ;;  %vm2571_vm6 = vcmp.eq.s32.totalorder %v16282_v56, %v17815_v46  ;;  %vm2572_vm7 = vcmp.eq.s32.totalorder %v16285_v57, %v17815_v46 }
 0x7a1   : > { %2424 = vmatprep.subr.bf16.mxu0 %v15991_v0 }
 0x7a4   : > { %2425 = vmatpush1.bf16.msra.mxu0 %v2398_v35 }
 0x7a7   : > { %2433 = vmatmul.mubr.bf16.vlgmr.msra.gmra.mrb[44].mxu0 %v16496_v22 }
 0x7a8   : > { %14271 = vmatprep.mubr.msk.bf16.mxu0 %vm1042_vm11, %v15702_v37  ;;  %v15710_v37 = vld [vmem:[%s20025_s4 + $0xfc] sm:$0xff]  }
 0x87a   : > { %v2434_v42 = vpop.f32.mrb[44].mxu0 }
 0x87b   : > { %v2436_v45 = vpop.f32.mrb[45].mxu0 }
 0x87c   : > { %v2437_v48 = vpop.f32.mrb[46].mxu0 }
 0x87d   : > { %v2441_v52 = vpack.c.bf16 %v2437_v48, %v2434_v42  ;;  %v2439_v55 = vpop.f32.mrb[47].mxu0 }
 0x87f   : > { %14269 = vmatprep.subr.bf16.mxu0 %v2441_v52 }
 0x880   : > { %14270 = vmatpush3.bf16.msra.mxu0 %v2441_v52 }
 0x881   : > { %2623 = vmatprep.subr.bf16.mxu0 %v15991_v0 }
 0x883   : > { %14272 = vmatmul.mubr.msk.bf16.vlgmr.msra.gmra.mrb[16].mxu0 %vm1042_vm11, %v15703_v58  ;;  %v15711_v58 = vld [vmem:[%s20025_s4 + $0x104] sm:$0xff]  }
 0x884   : > { %12259 = vmatpush1.bf16.msk.msra.mxu0 %vm12258_vm2, %v15993_v47  ;;  %14275 = vmatprep.mubr.msk.bf16.mxu0 %vm1042_vm11, %v15704_v59  ;;  %vm12266_vm2 = vmpackc.low %vm2566_vm10, %vm2565_vm8  ;;  %vm2573_vm8 = vcmp.eq.s32.totalorder %v16394_v1, %v17815_v46  ;;  %vm2574_vm10 = vcmp.eq.s32.totalorder %v16397_v2, %v17815_v46  ;;  %v15712_v59 = vld [vmem:[%s20025_s4 + $0x10c] sm:$0xff]  }
 0x885   : > { %2625 = vmatprep.subr.bf16.mxu0 %v15991_v0 }
 0x888   : > { %12261 = vmatpush1.bf16.msk.msra.mxu0 %vm12260_vm14, %v15993_v47  ;;  %vm12268_vm14 = vmpackc.low %vm2568_vm13, %vm2567_vm9  ;;  %vm2575_vm9 = vcmp.eq.s32.totalorder %v16409_v3, %v17815_v46  ;;  %vm2576_vm13 = vcmp.eq.s32.totalorder %v16412_v4, %v17815_v46 }
 0x889   : > { %2627 = vmatprep.subr.bf16.mxu0 %v15991_v0 }
 0x88b   : > { %14276 = vmatmul.mubr.msk.bf16.gmra.mrb[20].mxu0 %vm1042_vm11, %v15705_v61  ;;  %v15713_v61 = vld [vmem:[%s20025_s4 + $0x114] ss:$0 sps:$4 sm:$0x11]  }
 0x88c   : > { %12263 = vmatpush1.bf16.msk.msra.mxu0 %vm12262_vm12, %v15993_v47  ;;  %12282 = vmatprep.mubr.msk.bf16.mxu0 %vm845_vm5, %v16498_v23  ;;  %vm12270_vm12 = vmpackc.low %vm2570_vm4, %vm2569_vm15  ;;  %vm2577_vm15 = vcmp.eq.s32.totalorder %v16427_v5, %v17815_v46  ;;  %vm2578_vm4 = vcmp.eq.s32.totalorder %v16430_v6, %v17815_v46 }
 0x88d   : > { %2629 = vmatprep.subr.bf16.mxu0 %v15991_v0 }
 0x890   : > { %12265 = vmatpush1.bf16.msk.msra.mxu0 %vm12264_vm3, %v15993_v47  ;;  %vm12272_vm3 = vmpackc.low %vm2572_vm7, %vm2571_vm6  ;;  %vm2579_vm7 = vcmp.eq.s32.totalorder %v16445_v7, %v17815_v46 }
 0x891   : > { %2631 = vmatprep.subr.bf16.mxu0 %v15991_v0  ;;  %vm12278_vm6 = vmpackc.low %vm2578_vm4, %vm2577_vm15  ;;  %vm2784_vm4 = vcmp.eq.s32.totalorder %v16162_v38, %v17916_v18 }
 0x894   : > { %12267 = vmatpush1.bf16.msk.msra.mxu0 %vm12266_vm2, %v15993_v47  ;;  %vm12274_vm2 = vmpackc.low %vm2574_vm10, %vm2573_vm8  ;;  %vm2780_vm10 = vcmp.eq.s32.totalorder %v16118_v11, %v17916_v18 }
 0x895   : > { %2633 = vmatprep.subr.bf16.mxu0 %v15991_v0 }
 0x898   : > { %12269 = vmatpush1.bf16.msk.msra.mxu0 %vm12268_vm14, %v15993_v47  ;;  %vm12276_vm14 = vmpackc.low %vm2576_vm13, %vm2575_vm9  ;;  %vm2782_vm13 = vcmp.eq.s32.totalorder %v16151_v33, %v17916_v18 }
 0x899   : > { %2635 = vmatprep.subr.bf16.mxu0 %v15991_v0 }
 0x89c   : > { %12271 = vmatpush1.bf16.msk.msra.mxu0 %vm12270_vm12, %v15993_v47  ;;  %vm2581_vm12 = vcmp.eq.s32.totalorder %v16453_v9, %v17815_v46 }
 0x89d   : > { %2637 = vmatprep.subr.bf16.mxu0 %v15991_v0  ;;  %v2606_v62 = vsel %vm2581_vm12, 1.0, %v15994_v10  ;;  %vm2785_vm12 = vcmp.eq.s32.totalorder %v16165_v39, %v17916_v18 }
 0x89e   : > { %v2619_v63 = vpack.c.bf16 %v2606_v62, %v2606_v62 }
 0x8a0   : > { %12273 = vmatpush1.bf16.msk.msra.mxu0 %vm12272_vm3, %v15993_v47  ;;  %vm2580_vm3 = vcmp.eq.s32.totalorder %v16448_v8, %v17815_v46  ;;  %v2621_v12 = vsel %vm849_vm1, %v2619_v63, 0  ;;  %v18017_v46 = vld [vmem:[%s20022_s1 + $0xa] ss:$0 sm:$0xff] }
 0x8a1   : > { %2639 = vmatprep.subr.bf16.mxu0 %v15991_v0  ;;  %vm12280_vm8 = vmpackc.low %vm2580_vm3, %vm2579_vm7  ;;  %vm2786_vm7 = vcmp.eq.s32.totalorder %v16177_v40, %v17916_v18  ;;  %vm2787_vm3 = vcmp.eq.s32.totalorder %v16180_v41, %v17916_v18 }
 0x8a4   : > { %12275 = vmatpush1.bf16.msk.msra.mxu0 %vm12274_vm2, %v15993_v47  ;;  %vm2781_vm2 = vcmp.eq.s32.totalorder %v16132_v25, %v17916_v18 }
 0x8a5   : > { %2641 = vmatprep.subr.bf16.mxu0 %v15991_v0  ;;  %vm12300_vm9 = vmpackc.low %vm2781_vm2, %vm2780_vm10  ;;  %vm2788_vm10 = vcmp.eq.s32.totalorder %v16197_v43, %v17916_v18  ;;  %vm2789_vm2 = vcmp.eq.s32.totalorder %v16200_v44, %v17916_v18 }
 0x8a8   : > { %12277 = vmatpush1.bf16.msk.msra.mxu0 %vm12276_vm14, %v15993_v47  ;;  %vm2783_vm14 = vcmp.eq.s32.totalorder %v16154_v34, %v17916_v18 }
 0x8a9   : > { %2643 = vmatprep.subr.bf16.mxu0 %v15991_v0  ;;  %vm12302_vm15 = vmpackc.low %vm2783_vm14, %vm2782_vm13  ;;  %vm2790_vm13 = vcmp.eq.s32.totalorder %v16255_v50, %v17916_v18  ;;  %vm2791_vm14 = vcmp.eq.s32.totalorder %v16258_v51, %v17916_v18 }
 0x8ac   : > { %12279 = vmatpush1.bf16.msk.msra.mxu0 %vm12278_vm6, %v15993_v47  ;;  %vm12304_vm6 = vmpackc.low %vm2785_vm12, %vm2784_vm4  ;;  %vm2792_vm4 = vcmp.eq.s32.totalorder %v16272_v53, %v17916_v18  ;;  %vm2793_vm12 = vcmp.eq.s32.totalorder %v16275_v54, %v17916_v18 }
 0x8ad   : > { %2645 = vmatprep.subr.bf16.mxu0 %v15991_v0 }
 0x8b0   : > { %12281 = vmatpush1.bf16.msk.msra.mxu0 %vm12280_vm8, %v15993_v47  ;;  %vm12306_vm8 = vmpackc.low %vm2787_vm3, %vm2786_vm7  ;;  %vm2794_vm7 = vcmp.eq.s32.totalorder %v16282_v56, %v17916_v18  ;;  %vm2795_vm3 = vcmp.eq.s32.totalorder %v16285_v57, %v17916_v18 }
 0x8b1   : > { %2647 = vmatprep.subr.bf16.mxu0 %v15991_v0 }
 0x8b4   : > { %2648 = vmatpush1.bf16.msra.mxu0 %v2621_v12 }
 0x8b7   : > { %2656 = vmatmul.mubr.bf16.vlgmr.msra.gmra.mrb[48].mxu0 %v16496_v22 }
 0x8b8   : > { %14281 = vmatprep.mubr.msk.bf16.mxu0 %vm1042_vm11, %v15706_v14  ;;  %v15714_v14 = vld [vmem:[%s20025_s4 + $0x118] sm:$0xff]  }
 0x98a   : > { %v2657_v16 = vpop.f32.mrb[48].mxu0 }
 0x98b   : > { %v2659_v17 = vpop.f32.mrb[49].mxu0 }
 0x98c   : > { %v2660_v19 = vpop.f32.mrb[50].mxu0 }
 0x98d   : > { %v2664_v20 = vpack.c.bf16 %v2660_v19, %v2657_v16  ;;  %v2662_v21 = vpop.f32.mrb[51].mxu0 }
 0x98f   : > { %14279 = vmatprep.subr.bf16.mxu0 %v2664_v20 }
 0x990   : > { %14280 = vmatpush3.bf16.msra.mxu0 %v2664_v20 }
 0x991   : > { %2846 = vmatprep.subr.bf16.mxu0 %v15991_v0 }
 0x993   : > { %14282 = vmatmul.mubr.msk.bf16.vlgmr.msra.gmra.mrb[16].mxu0 %vm1042_vm11, %v15707_v24  ;;  %v15715_v24 = vld [vmem:[%s20025_s4 + $0x120] sm:$0xff]  }
 0x994   : > { %12301 = vmatpush1.bf16.msk.msra.mxu0 %vm12300_vm9, %v15993_v47  ;;  %14285 = vmatprep.mubr.msk.bf16.mxu0 %vm1042_vm11, %v15708_v26  ;;  %vm12308_vm9 = vmpackc.low %vm2789_vm2, %vm2788_vm10  ;;  %vm2796_vm10 = vcmp.eq.s32.totalorder %v16394_v1, %v17916_v18  ;;  %vm2797_vm2 = vcmp.eq.s32.totalorder %v16397_v2, %v17916_v18  ;;  %v15716_v26 = vld [vmem:[%s20025_s4 + $0x128] sm:$0xff]  }
 0x995   : > { %2848 = vmatprep.subr.bf16.mxu0 %v15991_v0 }
 0x998   : > { %12303 = vmatpush1.bf16.msk.msra.mxu0 %vm12302_vm15, %v15993_v47  ;;  %vm12310_vm15 = vmpackc.low %vm2791_vm14, %vm2790_vm13  ;;  %vm2798_vm13 = vcmp.eq.s32.totalorder %v16409_v3, %v17916_v18  ;;  %vm2799_vm14 = vcmp.eq.s32.totalorder %v16412_v4, %v17916_v18 }
 0x999   : > { %2850 = vmatprep.subr.bf16.mxu0 %v15991_v0 }
 0x99b   : > { %14286 = vmatmul.mubr.msk.bf16.gmra.mrb[20].mxu0 %vm1042_vm11, %v15709_v29  ;;  %v15717_v29 = vld [vmem:[%s20025_s4 + $0x130] ss:$0 sps:$4 sm:$0x11]  }
 0x99c   : > { %12305 = vmatpush1.bf16.msk.msra.mxu0 %vm12304_vm6, %v15993_v47  ;;  %12324 = vmatprep.mubr.msk.bf16.mxu0 %vm845_vm5, %v16498_v23  ;;  %vm12312_vm6 = vmpackc.low %vm2793_vm12, %vm2792_vm4  ;;  %vm2800_vm4 = vcmp.eq.s32.totalorder %v16427_v5, %v17916_v18  ;;  %vm2801_vm12 = vcmp.eq.s32.totalorder %v16430_v6, %v17916_v18 }
 0x99d   : > { %2852 = vmatprep.subr.bf16.mxu0 %v15991_v0 }
 0x9a0   : > { %12307 = vmatpush1.bf16.msk.msra.mxu0 %vm12306_vm8, %v15993_v47  ;;  %vm12314_vm8 = vmpackc.low %vm2795_vm3, %vm2794_vm7  ;;  %vm2802_vm3 = vcmp.eq.s32.totalorder %v16445_v7, %v17916_v18 }
 0x9a1   : > { %2854 = vmatprep.subr.bf16.mxu0 %v15991_v0  ;;  %vm12320_vm7 = vmpackc.low %vm2801_vm12, %vm2800_vm4  ;;  %vm3007_vm12 = vcmp.eq.s32.totalorder %v16162_v38, %v18017_v46 }
 0x9a4   : > { %12309 = vmatpush1.bf16.msk.msra.mxu0 %vm12308_vm9, %v15993_v47  ;;  %vm12316_vm9 = vmpackc.low %vm2797_vm2, %vm2796_vm10  ;;  %vm3003_vm2 = vcmp.eq.s32.totalorder %v16118_v11, %v18017_v46 }
 0x9a5   : > { %2856 = vmatprep.subr.bf16.mxu0 %v15991_v0 }
 0x9a8   : > { %12311 = vmatpush1.bf16.msk.msra.mxu0 %vm12310_vm15, %v15993_v47  ;;  %vm12318_vm15 = vmpackc.low %vm2799_vm14, %vm2798_vm13  ;;  %vm3005_vm14 = vcmp.eq.s32.totalorder %v16151_v33, %v18017_v46 }
 0x9a9   : > { %2858 = vmatprep.subr.bf16.mxu0 %v15991_v0 }
 0x9ac   : > { %12313 = vmatpush1.bf16.msk.msra.mxu0 %vm12312_vm6, %v15993_v47  ;;  %vm2804_vm6 = vcmp.eq.s32.totalorder %v16453_v9, %v17916_v18 }
 0x9ad   : > { %2860 = vmatprep.subr.bf16.mxu0 %v15991_v0  ;;  %v2829_v30 = vsel %vm2804_vm6, 1.0, %v15994_v10  ;;  %vm3008_vm6 = vcmp.eq.s32.totalorder %v16165_v39, %v18017_v46 }
 0x9ae   : > { %v2842_v31 = vpack.c.bf16 %v2829_v30, %v2829_v30 }
 0x9b0   : > { %12315 = vmatpush1.bf16.msk.msra.mxu0 %vm12314_vm8, %v15993_v47  ;;  %vm2803_vm8 = vcmp.eq.s32.totalorder %v16448_v8, %v17916_v18  ;;  %v2844_v35 = vsel %vm849_vm1, %v2842_v31, 0  ;;  %v18118_v18 = vld [vmem:[%s20022_s1 + $0xb] ss:$0 sm:$0xff] }
 0x9b1   : > { %2862 = vmatprep.subr.bf16.mxu0 %v15991_v0  ;;  %vm12322_vm10 = vmpackc.low %vm2803_vm8, %vm2802_vm3  ;;  %vm3009_vm3 = vcmp.eq.s32.totalorder %v16177_v40, %v18017_v46  ;;  %vm3010_vm8 = vcmp.eq.s32.totalorder %v16180_v41, %v18017_v46 }
 0x9b4   : > { %12317 = vmatpush1.bf16.msk.msra.mxu0 %vm12316_vm9, %v15993_v47  ;;  %vm3004_vm9 = vcmp.eq.s32.totalorder %v16132_v25, %v18017_v46 }
 0x9b5   : > { %2864 = vmatprep.subr.bf16.mxu0 %v15991_v0  ;;  %vm12342_vm13 = vmpackc.low %vm3004_vm9, %vm3003_vm2  ;;  %vm3011_vm2 = vcmp.eq.s32.totalorder %v16197_v43, %v18017_v46  ;;  %vm3012_vm9 = vcmp.eq.s32.totalorder %v16200_v44, %v18017_v46 }
 0x9b8   : > { %12319 = vmatpush1.bf16.msk.msra.mxu0 %vm12318_vm15, %v15993_v47  ;;  %vm3006_vm15 = vcmp.eq.s32.totalorder %v16154_v34, %v18017_v46 }
 0x9b9   : > { %2866 = vmatprep.subr.bf16.mxu0 %v15991_v0  ;;  %vm12344_vm4 = vmpackc.low %vm3006_vm15, %vm3005_vm14  ;;  %vm3013_vm14 = vcmp.eq.s32.totalorder %v16255_v50, %v18017_v46  ;;  %vm3014_vm15 = vcmp.eq.s32.totalorder %v16258_v51, %v18017_v46 }
 0x9bc   : > { %12321 = vmatpush1.bf16.msk.msra.mxu0 %vm12320_vm7, %v15993_v47  ;;  %vm12346_vm7 = vmpackc.low %vm3008_vm6, %vm3007_vm12  ;;  %vm3015_vm12 = vcmp.eq.s32.totalorder %v16272_v53, %v18017_v46  ;;  %vm3016_vm6 = vcmp.eq.s32.totalorder %v16275_v54, %v18017_v46 }
 0x9bd   : > { %2868 = vmatprep.subr.bf16.mxu0 %v15991_v0 }
 0x9c0   : > { %12323 = vmatpush1.bf16.msk.msra.mxu0 %vm12322_vm10, %v15993_v47  ;;  %vm12348_vm10 = vmpackc.low %vm3010_vm8, %vm3009_vm3  ;;  %vm3017_vm3 = vcmp.eq.s32.totalorder %v16282_v56, %v18017_v46  ;;  %vm3018_vm8 = vcmp.eq.s32.totalorder %v16285_v57, %v18017_v46 }
 0x9c1   : > { %2870 = vmatprep.subr.bf16.mxu0 %v15991_v0 }
 0x9c4   : > { %2871 = vmatpush1.bf16.msra.mxu0 %v2844_v35 }
 0x9c7   : > { %2879 = vmatmul.mubr.bf16.vlgmr.msra.gmra.mrb[52].mxu0 %v16496_v22 }
 0x9c8   : > { %14291 = vmatprep.mubr.msk.bf16.mxu0 %vm1042_vm11, %v15710_v37  ;;  %v15718_v37 = vld [vmem:[%s20025_s4 + $0x134] sm:$0xff]  }
 0xa9a   : > { %v2880_v42 = vpop.f32.mrb[52].mxu0 }
 0xa9b   : > { %v2882_v45 = vpop.f32.mrb[53].mxu0 }
 0xa9c   : > { %v2883_v48 = vpop.f32.mrb[54].mxu0 }
 0xa9d   : > { %v2887_v52 = vpack.c.bf16 %v2883_v48, %v2880_v42  ;;  %v2885_v55 = vpop.f32.mrb[55].mxu0 }
 0xa9e   : > { %v15719_v55 = vld [vmem:[%s20025_s4 + $0x13c] sm:$0xff]  }
 0xa9f   : > { %14289 = vmatprep.subr.bf16.mxu0 %v2887_v52 }
 0xaa0   : > { %14290 = vmatpush3.bf16.msra.mxu0 %v2887_v52 }
 0xaa1   : > { %3069 = vmatprep.subr.bf16.mxu0 %v15991_v0 }
 0xaa3   : > { %14292 = vmatmul.mubr.msk.bf16.vlgmr.msra.gmra.mrb[16].mxu0 %vm1042_vm11, %v15711_v58  ;;  %v15720_v58 = vld [vmem:[%s20025_s4 + $0x144] sm:$0xff]  }
 0xaa4   : > { %12343 = vmatpush1.bf16.msk.msra.mxu0 %vm12342_vm13, %v15993_v47  ;;  %14295 = vmatprep.mubr.msk.bf16.mxu0 %vm1042_vm11, %v15712_v59  ;;  %vm12350_vm13 = vmpackc.low %vm3012_vm9, %vm3011_vm2  ;;  %vm3019_vm2 = vcmp.eq.s32.totalorder %v16394_v1, %v18017_v46  ;;  %vm3020_vm9 = vcmp.eq.s32.totalorder %v16397_v2, %v18017_v46  ;;  %v15721_v59 = vld [vmem:[%s20025_s4 + $0x14c] ss:$0 sps:$4 sm:$0x11]  }
 0xaa5   : > { %3071 = vmatprep.subr.bf16.mxu0 %v15991_v0 }
 0xaa8   : > { %12345 = vmatpush1.bf16.msk.msra.mxu0 %vm12344_vm4, %v15993_v47  ;;  %vm12352_vm4 = vmpackc.low %vm3014_vm15, %vm3013_vm14  ;;  %vm3021_vm14 = vcmp.eq.s32.totalorder %v16409_v3, %v18017_v46  ;;  %vm3022_vm15 = vcmp.eq.s32.totalorder %v16412_v4, %v18017_v46 }
 0xaa9   : > { %3073 = vmatprep.subr.bf16.mxu0 %v15991_v0 }
 0xaab   : > { %14296 = vmatmul.mubr.msk.bf16.gmra.mrb[20].mxu0 %vm1042_vm11, %v15713_v61  ;;  %v15722_v61 = vld [vmem:[%s20025_s4 + $0x150] sm:$0xff]  }
 0xaac   : > { %12347 = vmatpush1.bf16.msk.msra.mxu0 %vm12346_vm7, %v15993_v47  ;;  %12366 = vmatprep.mubr.msk.bf16.mxu0 %vm845_vm5, %v16498_v23  ;;  %vm12354_vm7 = vmpackc.low %vm3016_vm6, %vm3015_vm12  ;;  %vm3023_vm12 = vcmp.eq.s32.totalorder %v16427_v5, %v18017_v46  ;;  %vm3024_vm6 = vcmp.eq.s32.totalorder %v16430_v6, %v18017_v46 }
 0xaad   : > { %3075 = vmatprep.subr.bf16.mxu0 %v15991_v0 }
 0xab0   : > { %12349 = vmatpush1.bf16.msk.msra.mxu0 %vm12348_vm10, %v15993_v47  ;;  %vm12356_vm10 = vmpackc.low %vm3018_vm8, %vm3017_vm3  ;;  %vm3025_vm8 = vcmp.eq.s32.totalorder %v16445_v7, %v18017_v46 }
 0xab1   : > { %3077 = vmatprep.subr.bf16.mxu0 %v15991_v0  ;;  %vm12362_vm3 = vmpackc.low %vm3024_vm6, %vm3023_vm12  ;;  %vm3230_vm6 = vcmp.eq.s32.totalorder %v16162_v38, %v18118_v18 }
 0xab4   : > { %12351 = vmatpush1.bf16.msk.msra.mxu0 %vm12350_vm13, %v15993_v47  ;;  %vm12358_vm13 = vmpackc.low %vm3020_vm9, %vm3019_vm2  ;;  %vm3226_vm9 = vcmp.eq.s32.totalorder %v16118_v11, %v18118_v18 }
 0xab5   : > { %3079 = vmatprep.subr.bf16.mxu0 %v15991_v0 }
 0xab8   : > { %12353 = vmatpush1.bf16.msk.msra.mxu0 %vm12352_vm4, %v15993_v47  ;;  %vm12360_vm4 = vmpackc.low %vm3022_vm15, %vm3021_vm14  ;;  %vm3228_vm15 = vcmp.eq.s32.totalorder %v16151_v33, %v18118_v18 }
 0xab9   : > { %3081 = vmatprep.subr.bf16.mxu0 %v15991_v0 }
 0xabc   : > { %12355 = vmatpush1.bf16.msk.msra.mxu0 %vm12354_vm7, %v15993_v47  ;;  %vm3027_vm7 = vcmp.eq.s32.totalorder %v16453_v9, %v18017_v46 }
 0xabd   : > { %3083 = vmatprep.subr.bf16.mxu0 %v15991_v0  ;;  %v3052_v62 = vsel %vm3027_vm7, 1.0, %v15994_v10  ;;  %vm3231_vm7 = vcmp.eq.s32.totalorder %v16165_v39, %v18118_v18 }
 0xabe   : > { %v3065_v63 = vpack.c.bf16 %v3052_v62, %v3052_v62  ;;  %v15724_v62 = vld [vmem:[%s20025_s4 + $0x160] sm:$0xff]  }
 0xac0   : > { %12357 = vmatpush1.bf16.msk.msra.mxu0 %vm12356_vm10, %v15993_v47  ;;  %vm3026_vm10 = vcmp.eq.s32.totalorder %v16448_v8, %v18017_v46  ;;  %v3067_v12 = vsel %vm849_vm1, %v3065_v63, 0  ;;  %v15725_v63 = vld [vmem:[%s20025_s4 + $0x168] ss:$0 sps:$4 sm:$0x11]  }
 0xac1   : > { %3085 = vmatprep.subr.bf16.mxu0 %v15991_v0  ;;  %vm12364_vm2 = vmpackc.low %vm3026_vm10, %vm3025_vm8  ;;  %vm3232_vm8 = vcmp.eq.s32.totalorder %v16177_v40, %v18118_v18  ;;  %vm3233_vm10 = vcmp.eq.s32.totalorder %v16180_v41, %v18118_v18 }
 0xac4   : > { %12359 = vmatpush1.bf16.msk.msra.mxu0 %vm12358_vm13, %v15993_v47  ;;  %vm3227_vm13 = vcmp.eq.s32.totalorder %v16132_v25, %v18118_v18 }
 0xac5   : > { %3087 = vmatprep.subr.bf16.mxu0 %v15991_v0  ;;  %vm12384_vm14 = vmpackc.low %vm3227_vm13, %vm3226_vm9  ;;  %vm3234_vm9 = vcmp.eq.s32.totalorder %v16197_v43, %v18118_v18  ;;  %vm3235_vm13 = vcmp.eq.s32.totalorder %v16200_v44, %v18118_v18 }
 0xac8   : > { %12361 = vmatpush1.bf16.msk.msra.mxu0 %vm12360_vm4, %v15993_v47  ;;  %vm3229_vm4 = vcmp.eq.s32.totalorder %v16154_v34, %v18118_v18 }
 0xac9   : > { %3089 = vmatprep.subr.bf16.mxu0 %v15991_v0  ;;  %vm12386_vm12 = vmpackc.low %vm3229_vm4, %vm3228_vm15  ;;  %vm3236_vm15 = vcmp.eq.s32.totalorder %v16255_v50, %v18118_v18  ;;  %vm3237_vm4 = vcmp.eq.s32.totalorder %v16258_v51, %v18118_v18 }
 0xacc   : > { %12363 = vmatpush1.bf16.msk.msra.mxu0 %vm12362_vm3, %v15993_v47  ;;  %vm12388_vm3 = vmpackc.low %vm3231_vm7, %vm3230_vm6  ;;  %vm3238_vm6 = vcmp.eq.s32.totalorder %v16272_v53, %v18118_v18  ;;  %vm3239_vm7 = vcmp.eq.s32.totalorder %v16275_v54, %v18118_v18 }
 0xacd   : > { %3091 = vmatprep.subr.bf16.mxu0 %v15991_v0 }
 0xad0   : > { %12365 = vmatpush1.bf16.msk.msra.mxu0 %vm12364_vm2, %v15993_v47  ;;  %vm12390_vm2 = vmpackc.low %vm3233_vm10, %vm3232_vm8  ;;  %vm3240_vm8 = vcmp.eq.s32.totalorder %v16282_v56, %v18118_v18  ;;  %vm3241_vm10 = vcmp.eq.s32.totalorder %v16285_v57, %v18118_v18 }
 0xad1   : > { %3093 = vmatprep.subr.bf16.mxu0 %v15991_v0 }
 0xad4   : > { %3094 = vmatpush1.bf16.msra.mxu0 %v3067_v12  ;;  %v15726_v12 = vld [vmem:[%s20025_s4 + $0x16c] sm:$0xff]  }
 0xad7   : > { %3102 = vmatmul.mubr.bf16.vlgmr.msra.gmra.mrb[56].mxu0 %v16496_v22 }
 0xad8   : > { %14301 = vmatprep.mubr.msk.bf16.mxu0 %vm1042_vm11, %v15714_v14  ;;  %v18255_v14 = vld [vmem:[%s20022_s1 + $0xe] ss:$0 sm:$0xff] }
 0xbaa   : > { %v3103_v16 = vpop.f32.mrb[56].mxu0 }
 0xbab   : > { %v3105_v17 = vpop.f32.mrb[57].mxu0 }
 0xbac   : > { %v3106_v19 = vpop.f32.mrb[58].mxu0  ;;  %v15729_v17 = vld [vmem:[%s20025_s4 + $0x184] ss:$0 sps:$4 sm:$0x11]  }
 0xbad   : > { %v3110_v20 = vpack.c.bf16 %v3106_v19, %v3103_v16  ;;  %v3108_v21 = vpop.f32.mrb[59].mxu0  ;;  %v15728_v16 = vld [vmem:[%s20025_s4 + $0x17c] sm:$0xff]  }
 0xbae   : > { %v15730_v21 = vld [vmem:[%s20025_s4 + $0x188] sm:$0xff]  }
 0xbaf   : > { %14299 = vmatprep.subr.bf16.mxu0 %v3110_v20 }
 0xbb0   : > { %14300 = vmatpush3.bf16.msra.mxu0 %v3110_v20 }
 0xbb1   : > { %3292 = vmatprep.subr.bf16.mxu0 %v15991_v0 }
 0xbb3   : > { %14302 = vmatmul.mubr.msk.bf16.vlgmr.msra.gmra.mrb[16].mxu0 %vm1042_vm11, %v15715_v24 }
 0xbb4   : > { %12385 = vmatpush1.bf16.msk.msra.mxu0 %vm12384_vm14, %v15993_v47  ;;  %14305 = vmatprep.mubr.msk.bf16.mxu0 %vm1042_vm11, %v15716_v26  ;;  %vm12392_vm14 = vmpackc.low %vm3235_vm13, %vm3234_vm9  ;;  %vm3242_vm9 = vcmp.eq.s32.totalorder %v16394_v1, %v18118_v18  ;;  %vm3243_vm13 = vcmp.eq.s32.totalorder %v16397_v2, %v18118_v18 }
 0xbb5   : > { %3294 = vmatprep.subr.bf16.mxu0 %v15991_v0 }
 0xbb8   : > { %12387 = vmatpush1.bf16.msk.msra.mxu0 %vm12386_vm12, %v15993_v47  ;;  %vm12394_vm12 = vmpackc.low %vm3237_vm4, %vm3236_vm15  ;;  %vm3244_vm15 = vcmp.eq.s32.totalorder %v16409_v3, %v18118_v18  ;;  %vm3245_vm4 = vcmp.eq.s32.totalorder %v16412_v4, %v18118_v18 }
 0xbb9   : > { %3296 = vmatprep.subr.bf16.mxu0 %v15991_v0 }
 0xbbb   : > { %14306 = vmatmul.mubr.msk.bf16.gmra.mrb[20].mxu0 %vm1042_vm11, %v15717_v29 }
 0xbbc   : > { %12389 = vmatpush1.bf16.msk.msra.mxu0 %vm12388_vm3, %v15993_v47  ;;  %12408 = vmatprep.mubr.msk.bf16.mxu0 %vm845_vm5, %v16498_v23  ;;  %vm12396_vm3 = vmpackc.low %vm3239_vm7, %vm3238_vm6  ;;  %vm3246_vm6 = vcmp.eq.s32.totalorder %v16427_v5, %v18118_v18  ;;  %vm3247_vm7 = vcmp.eq.s32.totalorder %v16430_v6, %v18118_v18 }
 0xbbd   : > { %3298 = vmatprep.subr.bf16.mxu0 %v15991_v0 }
 0xbc0   : > { %12391 = vmatpush1.bf16.msk.msra.mxu0 %vm12390_vm2, %v15993_v47  ;;  %vm12398_vm2 = vmpackc.low %vm3241_vm10, %vm3240_vm8  ;;  %vm3248_vm10 = vcmp.eq.s32.totalorder %v16445_v7, %v18118_v18 }
 0xbc1   : > { %3300 = vmatprep.subr.bf16.mxu0 %v15991_v0  ;;  %vm12404_vm8 = vmpackc.low %vm3247_vm7, %vm3246_vm6  ;;  %vm3899_vm7 = vcmp.eq.s32.totalorder %v16162_v38, %v18255_v14 }
 0xbc4   : > { %12393 = vmatpush1.bf16.msk.msra.mxu0 %vm12392_vm14, %v15993_v47  ;;  %vm12400_vm14 = vmpackc.low %vm3243_vm13, %vm3242_vm9  ;;  %vm3895_vm13 = vcmp.eq.s32.totalorder %v16118_v11, %v18255_v14 }
 0xbc5   : > { %3302 = vmatprep.subr.bf16.mxu0 %v15991_v0 }
 0xbc8   : > { %12395 = vmatpush1.bf16.msk.msra.mxu0 %vm12394_vm12, %v15993_v47  ;;  %vm12402_vm12 = vmpackc.low %vm3245_vm4, %vm3244_vm15  ;;  %vm3897_vm4 = vcmp.eq.s32.totalorder %v16151_v33, %v18255_v14 }
 0xbc9   : > { %3304 = vmatprep.subr.bf16.mxu0 %v15991_v0 }
 0xbcc   : > { %12397 = vmatpush1.bf16.msk.msra.mxu0 %vm12396_vm3, %v15993_v47  ;;  %vm3250_vm3 = vcmp.eq.s32.totalorder %v16453_v9, %v18118_v18 }
 0xbcd   : > { %3306 = vmatprep.subr.bf16.mxu0 %v15991_v0  ;;  %v3275_v30 = vsel %vm3250_vm3, 1.0, %v15994_v10  ;;  %vm3900_vm3 = vcmp.eq.s32.totalorder %v16165_v39, %v18255_v14 }
 0xbce   : > { %v3288_v31 = vpack.c.bf16 %v3275_v30, %v3275_v30 }
 0xbd0   : > { %12399 = vmatpush1.bf16.msk.msra.mxu0 %vm12398_vm2, %v15993_v47  ;;  %vm3249_vm2 = vcmp.eq.s32.totalorder %v16448_v8, %v18118_v18  ;;  %v3290_v35 = vsel %vm849_vm1, %v3288_v31, 0 }
 0xbd1   : > { %3308 = vmatprep.subr.bf16.mxu0 %v15991_v0  ;;  %vm12406_vm9 = vmpackc.low %vm3249_vm2, %vm3248_vm10  ;;  %vm3901_vm10 = vcmp.eq.s32.totalorder %v16177_v40, %v18255_v14  ;;  %vm3902_vm2 = vcmp.eq.s32.totalorder %v16180_v41, %v18255_v14 }
 0xbd4   : > { %12401 = vmatpush1.bf16.msk.msra.mxu0 %vm12400_vm14, %v15993_v47  ;;  %vm3896_vm14 = vcmp.eq.s32.totalorder %v16132_v25, %v18255_v14 }
 0xbd5   : > { %3310 = vmatprep.subr.bf16.mxu0 %v15991_v0  ;;  %vm12510_vm15 = vmpackc.low %vm3896_vm14, %vm3895_vm13  ;;  %vm3903_vm13 = vcmp.eq.s32.totalorder %v16197_v43, %v18255_v14  ;;  %vm3904_vm14 = vcmp.eq.s32.totalorder %v16200_v44, %v18255_v14 }
 0xbd8   : > { %12403 = vmatpush1.bf16.msk.msra.mxu0 %vm12402_vm12, %v15993_v47  ;;  %vm3898_vm12 = vcmp.eq.s32.totalorder %v16154_v34, %v18255_v14 }
 0xbd9   : > { %3312 = vmatprep.subr.bf16.mxu0 %v15991_v0  ;;  %vm12512_vm6 = vmpackc.low %vm3898_vm12, %vm3897_vm4  ;;  %vm3905_vm4 = vcmp.eq.s32.totalorder %v16255_v50, %v18255_v14  ;;  %vm3906_vm12 = vcmp.eq.s32.totalorder %v16258_v51, %v18255_v14 }
 0xbdc   : > { %12405 = vmatpush1.bf16.msk.msra.mxu0 %vm12404_vm8, %v15993_v47  ;;  %vm12514_vm8 = vmpackc.low %vm3900_vm3, %vm3899_vm7  ;;  %vm3907_vm7 = vcmp.eq.s32.totalorder %v16272_v53, %v18255_v14  ;;  %vm3908_vm3 = vcmp.eq.s32.totalorder %v16275_v54, %v18255_v14 }
 0xbdd   : > { %3314 = vmatprep.subr.bf16.mxu0 %v15991_v0 }
 0xbe0   : > { %12407 = vmatpush1.bf16.msk.msra.mxu0 %vm12406_vm9, %v15993_v47  ;;  %vm12516_vm9 = vmpackc.low %vm3902_vm2, %vm3901_vm10  ;;  %vm3909_vm10 = vcmp.eq.s32.totalorder %v16282_v56, %v18255_v14  ;;  %vm3910_vm2 = vcmp.eq.s32.totalorder %v16285_v57, %v18255_v14 }
 0xbe1   : > { %3316 = vmatprep.subr.bf16.mxu0 %v15991_v0 }
 0xbe4   : > { %3317 = vmatpush1.bf16.msra.mxu0 %v3290_v35  ;;  %v15731_v35 = vld [vmem:[%s20025_s4 + $0x190] sm:$0xff]  }
 0xbe7   : > { %3325 = vmatmul.mubr.bf16.vlgmr.msra.gmra.mrb[60].mxu0 %v16496_v22 }
 0xbe8   : > { %14311 = vmatprep.mubr.msk.bf16.mxu0 %vm1042_vm11, %v15718_v37  ;;  %v15732_v37 = vld [vmem:[%s20025_s4 + $0x198] sm:$0xff]  }
 0xcba   : > { %v3326_v42 = vpop.f32.mrb[60].mxu0 }
 0xcbb   : > { %v3328_v45 = vpop.f32.mrb[61].mxu0 }
 0xcbc   : > { %v3329_v46 = vpop.f32.mrb[62].mxu0  ;;  %v15734_v45 = vld [vmem:[%s20025_s4 + $0x1a4] sm:$0xff]  }
 0xcbd   : > { %v3333_v48 = vpack.c.bf16 %v3329_v46, %v3326_v42  ;;  %v3331_v52 = vpop.f32.mrb[63].mxu0  ;;  %v15733_v42 = vld [vmem:[%s20025_s4 + $0x1a0] ss:$0 sps:$4 sm:$0x11]   ;;  %v18374_v46 = vld [vmem:[%s20022_s1 + $0x10] ss:$0 sm:$0xff] }
 0xcbe   : > { %v15737_v52 = vld [vmem:[%s20025_s4 + $0x1bc] ss:$0 sps:$4 sm:$0x11]  }
 0xcbf   : > { %14309 = vmatprep.subr.bf16.mxu0 %v3333_v48 }
 0xcc0   : > { %14310 = vmatpush3.bf16.msra.mxu0 %v3333_v48  ;;  %v15736_v48 = vld [vmem:[%s20025_s4 + $0x1b4] sm:$0xff]  }
 0xcc1   : > { %14319 = vmatprep.subr.bf16.mxu0 %v16940_v15 }
 0xcc3   : > { %14312 = vmatmul.mubr.msk.bf16.vlgmr.msra.gmra.mrb[16].mxu0 %vm1042_vm11, %v15719_v55 }
 0xcc4   : > { %14320 = vmatpush3.bf16.msra.mxu0 %v16940_v15  ;;  %14315 = vmatprep.mubr.msk.bf16.mxu0 %vm1042_vm11, %v15720_v58  ;;  %v15723_v15 = vld [vmem:[%s20025_s4 + $0x158] sm:$0xff]  }
 0xcc5   : > { %14329 = vmatprep.subr.bf16.mxu0 %v17027_v32 }
 0xccb   : > { %14316 = vmatmul.mubr.msk.bf16.gmra.mrb[20].mxu0 %vm1042_vm11, %v15721_v59 }
 0xccc   : > { %14321 = vmatprep.mubr.msk.bf16.mxu0 %vm1042_vm11, %v15722_v61  ;;  %v15738_v61 = vld [vmem:[%s20025_s4 + $0x1c0] sm:$0xff]  }
 0xcd3   : > { %14322 = vmatmul.mubr.msk.bf16.vlgmr.msra.gmra.mrb[16].mxu0 %vm1042_vm11, %v15723_v15 }
 0xcd4   : > { %14330 = vmatpush3.bf16.msra.mxu0 %v17027_v32  ;;  %14325 = vmatprep.mubr.msk.bf16.mxu0 %vm1042_vm11, %v15724_v62  ;;  %v15727_v32 = vld [vmem:[%s20025_s4 + $0x174] sm:$0xff]  }
 0xcd5   : > { %3961 = vmatprep.subr.bf16.mxu0 %v15991_v0 }
 0xcdb   : > { %14326 = vmatmul.mubr.msk.bf16.gmra.mrb[20].mxu0 %vm1042_vm11, %v15725_v63 }
 0xcdc   : > { %14331 = vmatprep.mubr.msk.bf16.mxu0 %vm1042_vm11, %v15726_v12 }
 0xce3   : > { %14332 = vmatmul.mubr.msk.bf16.vlgmr.msra.gmra.mrb[16].mxu0 %vm1042_vm11, %v15727_v32  ;;  %v15739_v32 = vld [vmem:[%s20025_s4 + $0x1c8] sm:$0xff]  }
 0xce4   : > { %12511 = vmatpush1.bf16.msk.msra.mxu0 %vm12510_vm15, %v15993_v47  ;;  %14335 = vmatprep.mubr.msk.bf16.mxu0 %vm1042_vm11, %v15728_v16  ;;  %vm12518_vm15 = vmpackc.low %vm3904_vm14, %vm3903_vm13  ;;  %vm3911_vm13 = vcmp.eq.s32.totalorder %v16394_v1, %v18255_v14  ;;  %vm3912_vm14 = vcmp.eq.s32.totalorder %v16397_v2, %v18255_v14  ;;  %v15740_v16 = vld [vmem:[%s20025_s4 + $0x1d0] sm:$0xff]  }
 0xce5   : > { %3963 = vmatprep.subr.bf16.mxu0 %v15991_v0 }
 0xce8   : > { %12513 = vmatpush1.bf16.msk.msra.mxu0 %vm12512_vm6, %v15993_v47  ;;  %vm12520_vm6 = vmpackc.low %vm3906_vm12, %vm3905_vm4  ;;  %vm3913_vm4 = vcmp.eq.s32.totalorder %v16409_v3, %v18255_v14  ;;  %vm3914_vm12 = vcmp.eq.s32.totalorder %v16412_v4, %v18255_v14 }
 0xce9   : > { %3965 = vmatprep.subr.bf16.mxu0 %v15991_v0 }
 0xceb   : > { %14336 = vmatmul.mubr.msk.bf16.gmra.mrb[20].mxu0 %vm1042_vm11, %v15729_v17  ;;  %v15741_v17 = vld [vmem:[%s20025_s4 + $0x1d8] ss:$0 sps:$4 sm:$0x11]  }
 0xcec   : > { %12515 = vmatpush1.bf16.msk.msra.mxu0 %vm12514_vm8, %v15993_v47  ;;  %12534 = vmatprep.mubr.msk.bf16.mxu0 %vm845_vm5, %v16498_v23  ;;  %vm12522_vm8 = vmpackc.low %vm3908_vm3, %vm3907_vm7  ;;  %vm3915_vm7 = vcmp.eq.s32.totalorder %v16427_v5, %v18255_v14  ;;  %vm3916_vm3 = vcmp.eq.s32.totalorder %v16430_v6, %v18255_v14 }
 0xced   : > { %3967 = vmatprep.subr.bf16.mxu0 %v15991_v0 }
 0xcf0   : > { %12517 = vmatpush1.bf16.msk.msra.mxu0 %vm12516_vm9, %v15993_v47  ;;  %vm12524_vm9 = vmpackc.low %vm3910_vm2, %vm3909_vm10  ;;  %vm3917_vm2 = vcmp.eq.s32.totalorder %v16445_v7, %v18255_v14 }
 0xcf1   : > { %3969 = vmatprep.subr.bf16.mxu0 %v15991_v0  ;;  %vm12530_vm10 = vmpackc.low %vm3916_vm3, %vm3915_vm7  ;;  %vm4345_vm3 = vcmp.eq.s32.totalorder %v16162_v38, %v18374_v46 }
 0xcf4   : > { %12519 = vmatpush1.bf16.msk.msra.mxu0 %vm12518_vm15, %v15993_v47  ;;  %vm12526_vm15 = vmpackc.low %vm3912_vm14, %vm3911_vm13  ;;  %vm4341_vm14 = vcmp.eq.s32.totalorder %v16118_v11, %v18374_v46 }
 0xcf5   : > { %3971 = vmatprep.subr.bf16.mxu0 %v15991_v0 }
 0xcf8   : > { %12521 = vmatpush1.bf16.msk.msra.mxu0 %vm12520_vm6, %v15993_v47  ;;  %vm12528_vm6 = vmpackc.low %vm3914_vm12, %vm3913_vm4  ;;  %vm4343_vm12 = vcmp.eq.s32.totalorder %v16151_v33, %v18374_v46 }
 0xcf9   : > { %3973 = vmatprep.subr.bf16.mxu0 %v15991_v0 }
 0xcfc   : > { %12523 = vmatpush1.bf16.msk.msra.mxu0 %vm12522_vm8, %v15993_v47  ;;  %vm3919_vm8 = vcmp.eq.s32.totalorder %v16453_v9, %v18255_v14 }
 0xcfd   : > { %3975 = vmatprep.subr.bf16.mxu0 %v15991_v0  ;;  %v3944_v18 = vsel %vm3919_vm8, 1.0, %v15994_v10  ;;  %vm4346_vm8 = vcmp.eq.s32.totalorder %v16165_v39, %v18374_v46 }
 0xcfe   : > { %v3957_v19 = vpack.c.bf16 %v3944_v18, %v3944_v18  ;;  %v15742_v18 = vld [vmem:[%s20025_s4 + $0x1dc] sm:$0xff]  }
 0xd00   : > { %12525 = vmatpush1.bf16.msk.msra.mxu0 %vm12524_vm9, %v15993_v47  ;;  %vm3918_vm9 = vcmp.eq.s32.totalorder %v16448_v8, %v18255_v14  ;;  %v3959_v20 = vsel %vm849_vm1, %v3957_v19, 0  ;;  %v15744_v19 = vld [vmem:[%s20025_s4 + $0x1ec] sm:$0xff]  }
 0xd01   : > { %3977 = vmatprep.subr.bf16.mxu0 %v15991_v0  ;;  %vm12532_vm13 = vmpackc.low %vm3918_vm9, %vm3917_vm2  ;;  %vm4347_vm2 = vcmp.eq.s32.totalorder %v16177_v40, %v18374_v46  ;;  %vm4348_vm9 = vcmp.eq.s32.totalorder %v16180_v41, %v18374_v46 }
 0xd04   : > { %12527 = vmatpush1.bf16.msk.msra.mxu0 %vm12526_vm15, %v15993_v47  ;;  %vm4342_vm15 = vcmp.eq.s32.totalorder %v16132_v25, %v18374_v46 }
 0xd05   : > { %3979 = vmatprep.subr.bf16.mxu0 %v15991_v0  ;;  %vm12594_vm4 = vmpackc.low %vm4342_vm15, %vm4341_vm14  ;;  %vm4349_vm14 = vcmp.eq.s32.totalorder %v16197_v43, %v18374_v46  ;;  %vm4350_vm15 = vcmp.eq.s32.totalorder %v16200_v44, %v18374_v46 }
 0xd08   : > { %12529 = vmatpush1.bf16.msk.msra.mxu0 %vm12528_vm6, %v15993_v47  ;;  %vm4344_vm6 = vcmp.eq.s32.totalorder %v16154_v34, %v18374_v46 }
 0xd09   : > { %3981 = vmatprep.subr.bf16.mxu0 %v15991_v0  ;;  %vm12596_vm7 = vmpackc.low %vm4344_vm6, %vm4343_vm12  ;;  %vm4351_vm12 = vcmp.eq.s32.totalorder %v16255_v50, %v18374_v46  ;;  %vm4352_vm6 = vcmp.eq.s32.totalorder %v16258_v51, %v18374_v46 }
 0xd0c   : > { %12531 = vmatpush1.bf16.msk.msra.mxu0 %vm12530_vm10, %v15993_v47  ;;  %vm12598_vm10 = vmpackc.low %vm4346_vm8, %vm4345_vm3  ;;  %vm4353_vm3 = vcmp.eq.s32.totalorder %v16272_v53, %v18374_v46  ;;  %vm4354_vm8 = vcmp.eq.s32.totalorder %v16275_v54, %v18374_v46 }
 0xd0d   : > { %3983 = vmatprep.subr.bf16.mxu0 %v15991_v0 }
 0xd10   : > { %12533 = vmatpush1.bf16.msk.msra.mxu0 %vm12532_vm13, %v15993_v47  ;;  %vm12600_vm13 = vmpackc.low %vm4348_vm9, %vm4347_vm2  ;;  %vm4355_vm2 = vcmp.eq.s32.totalorder %v16282_v56, %v18374_v46  ;;  %vm4356_vm9 = vcmp.eq.s32.totalorder %v16285_v57, %v18374_v46 }
 0xd11   : > { %3985 = vmatprep.subr.bf16.mxu0 %v15991_v0 }
 0xd14   : > { %3986 = vmatpush1.bf16.msra.mxu0 %v3959_v20  ;;  %v15745_v20 = vld [vmem:[%s20025_s4 + $0x1f4] ss:$0 sps:$4 sm:$0x11]  }
 0xd17   : > { %3994 = vmatmul.mubr.bf16.vlgmr.msra.gmra.mrb[64].mxu0 %v16496_v22 }
 0xd18   : > { %14341 = vmatprep.mubr.msk.bf16.mxu0 %vm1042_vm11, %v15730_v21  ;;  %v15746_v21 = vld [vmem:[%s20025_s4 + $0x1f8] sm:$0xff]  }
 0xdea   : > { %v3995_v24 = vpop.f32.mrb[64].mxu0 }
 0xdeb   : > { %v3997_v26 = vpop.f32.mrb[65].mxu0 }
 0xdec   : > { %v3998_v29 = vpop.f32.mrb[66].mxu0  ;;  %v15748_v26 = vld [vmem:[%s20025_s4 + $0x208] sm:$0xff]  }
 0xded   : > { %v4002_v30 = vpack.c.bf16 %v3998_v29, %v3995_v24  ;;  %v4000_v31 = vpop.f32.mrb[67].mxu0  ;;  %v18511_v24 = vld [vmem:[%s20022_s1 + $0x13] ss:$0 sm:$0xff]  ;;  %v15749_v29 = vld [vmem:[%s20025_s4 + $0x210] ss:$0 sps:$4 sm:$0x11]  }
 0xdef   : > { %14339 = vmatprep.subr.bf16.mxu0 %v4002_v30 }
 0xdf0   : > { %14340 = vmatpush3.bf16.msra.mxu0 %v4002_v30 }
 0xdf1   : > { %14349 = vmatprep.subr.bf16.mxu0 %v17202_v13 }
 0xdf3   : > { %14342 = vmatmul.mubr.msk.bf16.vlgmr.msra.gmra.mrb[16].mxu0 %vm1042_vm11, %v15731_v35 }
 0xdf4   : > { %14350 = vmatpush3.bf16.msra.mxu0 %v17202_v13  ;;  %14345 = vmatprep.mubr.msk.bf16.mxu0 %vm1042_vm11, %v15732_v37  ;;  %v15735_v13 = vld [vmem:[%s20025_s4 + $0x1ac] sm:$0xff]   ;;  %v15750_v37 = vld [vmem:[%s20025_s4 + $0x214] sm:$0xff]  }
 0xdf5   : > { %4407 = vmatprep.subr.bf16.mxu0 %v15991_v0 }
 0xdfb   : > { %14346 = vmatmul.mubr.msk.bf16.gmra.mrb[20].mxu0 %vm1042_vm11, %v15733_v42 }
 0xdfc   : > { %14351 = vmatprep.mubr.msk.bf16.mxu0 %vm1042_vm11, %v15734_v45 }
 0xe03   : > { %14352 = vmatmul.mubr.msk.bf16.vlgmr.msra.gmra.mrb[16].mxu0 %vm1042_vm11, %v15735_v13 }
 0xe04   : > { %12595 = vmatpush1.bf16.msk.msra.mxu0 %vm12594_vm4, %v15993_v47  ;;  %14355 = vmatprep.mubr.msk.bf16.mxu0 %vm1042_vm11, %v15736_v48  ;;  %vm12602_vm4 = vmpackc.low %vm4350_vm15, %vm4349_vm14  ;;  %vm4357_vm14 = vcmp.eq.s32.totalorder %v16394_v1, %v18374_v46  ;;  %vm4358_vm15 = vcmp.eq.s32.totalorder %v16397_v2, %v18374_v46 }
 0xe05   : > { %4409 = vmatprep.subr.bf16.mxu0 %v15991_v0 }
 0xe08   : > { %12597 = vmatpush1.bf16.msk.msra.mxu0 %vm12596_vm7, %v15993_v47  ;;  %vm12604_vm7 = vmpackc.low %vm4352_vm6, %vm4351_vm12  ;;  %vm4359_vm12 = vcmp.eq.s32.totalorder %v16409_v3, %v18374_v46  ;;  %vm4360_vm6 = vcmp.eq.s32.totalorder %v16412_v4, %v18374_v46 }
 0xe09   : > { %4411 = vmatprep.subr.bf16.mxu0 %v15991_v0 }
 0xe0b   : > { %14356 = vmatmul.mubr.msk.bf16.gmra.mrb[20].mxu0 %vm1042_vm11, %v15737_v52  ;;  %v15751_v52 = vld [vmem:[%s20025_s4 + $0x21c] sm:$0xff]  }
 0xe0c   : > { %12599 = vmatpush1.bf16.msk.msra.mxu0 %vm12598_vm10, %v15993_v47  ;;  %12618 = vmatprep.mubr.msk.bf16.mxu0 %vm845_vm5, %v16498_v23  ;;  %vm12606_vm10 = vmpackc.low %vm4354_vm8, %vm4353_vm3  ;;  %vm4361_vm3 = vcmp.eq.s32.totalorder %v16427_v5, %v18374_v46  ;;  %vm4362_vm8 = vcmp.eq.s32.totalorder %v16430_v6, %v18374_v46 }
 0xe0d   : > { %4413 = vmatprep.subr.bf16.mxu0 %v15991_v0 }
 0xe10   : > { %12601 = vmatpush1.bf16.msk.msra.mxu0 %vm12600_vm13, %v15993_v47  ;;  %vm12608_vm13 = vmpackc.low %vm4356_vm9, %vm4355_vm2  ;;  %vm4363_vm9 = vcmp.eq.s32.totalorder %v16445_v7, %v18374_v46 }
 0xe11   : > { %4415 = vmatprep.subr.bf16.mxu0 %v15991_v0  ;;  %vm12614_vm2 = vmpackc.low %vm4362_vm8, %vm4361_vm3  ;;  %vm5014_vm8 = vcmp.eq.s32.totalorder %v16162_v38, %v18511_v24 }
 0xe14   : > { %12603 = vmatpush1.bf16.msk.msra.mxu0 %vm12602_vm4, %v15993_v47  ;;  %vm12610_vm4 = vmpackc.low %vm4358_vm15, %vm4357_vm14  ;;  %vm5010_vm15 = vcmp.eq.s32.totalorder %v16118_v11, %v18511_v24 }
 0xe15   : > { %4417 = vmatprep.subr.bf16.mxu0 %v15991_v0 }
 0xe18   : > { %12605 = vmatpush1.bf16.msk.msra.mxu0 %vm12604_vm7, %v15993_v47  ;;  %vm12612_vm7 = vmpackc.low %vm4360_vm6, %vm4359_vm12  ;;  %vm5012_vm6 = vcmp.eq.s32.totalorder %v16151_v33, %v18511_v24 }
 0xe19   : > { %4419 = vmatprep.subr.bf16.mxu0 %v15991_v0 }
 0xe1c   : > { %12607 = vmatpush1.bf16.msk.msra.mxu0 %vm12606_vm10, %v15993_v47  ;;  %vm4365_vm10 = vcmp.eq.s32.totalorder %v16453_v9, %v18374_v46 }
 0xe1d   : > { %4421 = vmatprep.subr.bf16.mxu0 %v15991_v0  ;;  %v4390_v55 = vsel %vm4365_vm10, 1.0, %v15994_v10  ;;  %vm5015_vm10 = vcmp.eq.s32.totalorder %v16165_v39, %v18511_v24 }
 0xe1e   : > { %v4403_v58 = vpack.c.bf16 %v4390_v55, %v4390_v55  ;;  %v15752_v55 = vld [vmem:[%s20025_s4 + $0x224] sm:$0xff]  }
 0xe20   : > { %12609 = vmatpush1.bf16.msk.msra.mxu0 %vm12608_vm13, %v15993_v47  ;;  %vm4364_vm13 = vcmp.eq.s32.totalorder %v16448_v8, %v18374_v46  ;;  %v4405_v59 = vsel %vm849_vm1, %v4403_v58, 0  ;;  %v15753_v58 = vld [vmem:[%s20025_s4 + $0x22c] ss:$0 sps:$4 sm:$0x11]  }
 0xe21   : > { %4423 = vmatprep.subr.bf16.mxu0 %v15991_v0  ;;  %vm12616_vm14 = vmpackc.low %vm4364_vm13, %vm4363_vm9  ;;  %vm5016_vm9 = vcmp.eq.s32.totalorder %v16177_v40, %v18511_v24  ;;  %vm5017_vm13 = vcmp.eq.s32.totalorder %v16180_v41, %v18511_v24 }
 0xe24   : > { %12611 = vmatpush1.bf16.msk.msra.mxu0 %vm12610_vm4, %v15993_v47  ;;  %vm5011_vm4 = vcmp.eq.s32.totalorder %v16132_v25, %v18511_v24 }
 0xe25   : > { %4425 = vmatprep.subr.bf16.mxu0 %v15991_v0  ;;  %vm12720_vm12 = vmpackc.low %vm5011_vm4, %vm5010_vm15  ;;  %vm5018_vm15 = vcmp.eq.s32.totalorder %v16197_v43, %v18511_v24  ;;  %vm5019_vm4 = vcmp.eq.s32.totalorder %v16200_v44, %v18511_v24 }
 0xe28   : > { %12613 = vmatpush1.bf16.msk.msra.mxu0 %vm12612_vm7, %v15993_v47  ;;  %vm5013_vm7 = vcmp.eq.s32.totalorder %v16154_v34, %v18511_v24 }
 0xe29   : > { %4427 = vmatprep.subr.bf16.mxu0 %v15991_v0  ;;  %vm12722_vm3 = vmpackc.low %vm5013_vm7, %vm5012_vm6  ;;  %vm5020_vm6 = vcmp.eq.s32.totalorder %v16255_v50, %v18511_v24  ;;  %vm5021_vm7 = vcmp.eq.s32.totalorder %v16258_v51, %v18511_v24 }
 0xe2c   : > { %12615 = vmatpush1.bf16.msk.msra.mxu0 %vm12614_vm2, %v15993_v47  ;;  %vm12724_vm2 = vmpackc.low %vm5015_vm10, %vm5014_vm8  ;;  %vm5022_vm8 = vcmp.eq.s32.totalorder %v16272_v53, %v18511_v24  ;;  %vm5023_vm10 = vcmp.eq.s32.totalorder %v16275_v54, %v18511_v24 }
 0xe2d   : > { %4429 = vmatprep.subr.bf16.mxu0 %v15991_v0 }
 0xe30   : > { %12617 = vmatpush1.bf16.msk.msra.mxu0 %vm12616_vm14, %v15993_v47  ;;  %vm12726_vm14 = vmpackc.low %vm5017_vm13, %vm5016_vm9  ;;  %vm5024_vm9 = vcmp.eq.s32.totalorder %v16282_v56, %v18511_v24  ;;  %vm5025_vm13 = vcmp.eq.s32.totalorder %v16285_v57, %v18511_v24 }
 0xe31   : > { %4431 = vmatprep.subr.bf16.mxu0 %v15991_v0 }
 0xe34   : > { %4432 = vmatpush1.bf16.msra.mxu0 %v4405_v59  ;;  %v15754_v59 = vld [vmem:[%s20025_s4 + $0x230] sm:$0xff]  }
 0xe37   : > { %4440 = vmatmul.mubr.bf16.vlgmr.msra.gmra.mrb[68].mxu0 %v16496_v22 }
 0xe38   : > { %14361 = vmatprep.mubr.msk.bf16.mxu0 %vm1042_vm11, %v15738_v61  ;;  %v15756_v61 = vld [vmem:[%s20025_s4 + $0x240] sm:$0xff]  }
 0xf0a   : > { %v4441_v15 = vpop.f32.mrb[68].mxu0 }
 0xf0b   : > { %v4443_v62 = vpop.f32.mrb[69].mxu0 }
 0xf0c   : > { %v4444_v63 = vpop.f32.mrb[70].mxu0  ;;  %v15758_v62 = vld [vmem:[%s20025_s4 + $0x24c] sm:$0xff]  }
 0xf0d   : > { %v4448_v12 = vpack.c.bf16 %v4444_v63, %v4441_v15  ;;  %v4446_v14 = vpop.f32.mrb[71].mxu0  ;;  %v15757_v15 = vld [vmem:[%s20025_s4 + $0x248] ss:$0 sps:$4 sm:$0x11]   ;;  %v18648_v63 = vld [vmem:[%s20022_s1 + $0x16] ss:$0 sm:$0xff] }
 0xf0e   : > { %v15761_v14 = vld [vmem:[%s20025_s4 + $0x264] ss:$0 sps:$4 sm:$0x11]  }
 0xf0f   : > { %14359 = vmatprep.subr.bf16.mxu0 %v4448_v12 }
 0xf10   : > { %14360 = vmatpush3.bf16.msra.mxu0 %v4448_v12  ;;  %v15760_v12 = vld [vmem:[%s20025_s4 + $0x25c] sm:$0xff]  }
 0xf11   : > { %14369 = vmatprep.subr.bf16.mxu0 %v17293_v28 }
 0xf13   : > { %14362 = vmatmul.mubr.msk.bf16.vlgmr.msra.gmra.mrb[16].mxu0 %vm1042_vm11, %v15739_v32 }
 0xf14   : > { %14370 = vmatpush3.bf16.msra.mxu0 %v17293_v28  ;;  %14365 = vmatprep.mubr.msk.bf16.mxu0 %vm1042_vm11, %v15740_v16  ;;  %v15743_v28 = vld [vmem:[%s20025_s4 + $0x1e4] sm:$0xff]  }
 0xf15   : > { %14379 = vmatprep.subr.bf16.mxu0 %v17295_v36 }
 0xf1b   : > { %14366 = vmatmul.mubr.msk.bf16.gmra.mrb[20].mxu0 %vm1042_vm11, %v15741_v17 }
 0xf1c   : > { %14371 = vmatprep.mubr.msk.bf16.mxu0 %vm1042_vm11, %v15742_v18  ;;  %v15762_v18 = vld [vmem:[%s20025_s4 + $0x268] sm:$0xff]  }
 0xf23   : > { %14372 = vmatmul.mubr.msk.bf16.vlgmr.msra.gmra.mrb[16].mxu0 %vm1042_vm11, %v15743_v28 }
 0xf24   : > { %14380 = vmatpush3.bf16.msra.mxu0 %v17295_v36  ;;  %14375 = vmatprep.mubr.msk.bf16.mxu0 %vm1042_vm11, %v15744_v19  ;;  %v15747_v36 = vld [vmem:[%s20025_s4 + $0x200] sm:$0xff]  }
 0xf25   : > { %5076 = vmatprep.subr.bf16.mxu0 %v15991_v0 }
 0xf2b   : > { %14376 = vmatmul.mubr.msk.bf16.gmra.mrb[20].mxu0 %vm1042_vm11, %v15745_v20 }
 0xf2c   : > { %14381 = vmatprep.mubr.msk.bf16.mxu0 %vm1042_vm11, %v15746_v21 }
 0xf33   : > { %14382 = vmatmul.mubr.msk.bf16.vlgmr.msra.gmra.mrb[16].mxu0 %vm1042_vm11, %v15747_v36  ;;  %v15763_v36 = vld [vmem:[%s20025_s4 + $0x270] sm:$0xff]  }
 0xf34   : > { %12721 = vmatpush1.bf16.msk.msra.mxu0 %vm12720_vm12, %v15993_v47  ;;  %14385 = vmatprep.mubr.msk.bf16.mxu0 %vm1042_vm11, %v15748_v26  ;;  %vm12728_vm12 = vmpackc.low %vm5019_vm4, %vm5018_vm15  ;;  %vm5026_vm15 = vcmp.eq.s32.totalorder %v16394_v1, %v18511_v24  ;;  %vm5027_vm4 = vcmp.eq.s32.totalorder %v16397_v2, %v18511_v24  ;;  %v15764_v26 = vld [vmem:[%s20025_s4 + $0x278] sm:$0xff]  }
 0xf35   : > { %5078 = vmatprep.subr.bf16.mxu0 %v15991_v0 }
 0xf38   : > { %12723 = vmatpush1.bf16.msk.msra.mxu0 %vm12722_vm3, %v15993_v47  ;;  %vm12730_vm3 = vmpackc.low %vm5021_vm7, %vm5020_vm6  ;;  %vm5028_vm6 = vcmp.eq.s32.totalorder %v16409_v3, %v18511_v24  ;;  %vm5029_vm7 = vcmp.eq.s32.totalorder %v16412_v4, %v18511_v24 }
 0xf39   : > { %5080 = vmatprep.subr.bf16.mxu0 %v15991_v0 }
 0xf3b   : > { %14386 = vmatmul.mubr.msk.bf16.gmra.mrb[20].mxu0 %vm1042_vm11, %v15749_v29  ;;  %v15765_v29 = vld [vmem:[%s20025_s4 + $0x280] ss:$0 sps:$4 sm:$0x11]  }
 0xf3c   : > { %12725 = vmatpush1.bf16.msk.msra.mxu0 %vm12724_vm2, %v15993_v47  ;;  %12744 = vmatprep.mubr.msk.bf16.mxu0 %vm845_vm5, %v16498_v23  ;;  %vm12732_vm2 = vmpackc.low %vm5023_vm10, %vm5022_vm8  ;;  %vm5030_vm8 = vcmp.eq.s32.totalorder %v16427_v5, %v18511_v24  ;;  %vm5031_vm10 = vcmp.eq.s32.totalorder %v16430_v6, %v18511_v24 }
 0xf3d   : > { %5082 = vmatprep.subr.bf16.mxu0 %v15991_v0 }
 0xf40   : > { %12727 = vmatpush1.bf16.msk.msra.mxu0 %vm12726_vm14, %v15993_v47  ;;  %vm12734_vm14 = vmpackc.low %vm5025_vm13, %vm5024_vm9  ;;  %vm5032_vm13 = vcmp.eq.s32.totalorder %v16445_v7, %v18511_v24 }
 0xf41   : > { %5084 = vmatprep.subr.bf16.mxu0 %v15991_v0  ;;  %vm12740_vm9 = vmpackc.low %vm5031_vm10, %vm5030_vm8  ;;  %vm5683_vm10 = vcmp.eq.s32.totalorder %v16162_v38, %v18648_v63 }
 0xf44   : > { %12729 = vmatpush1.bf16.msk.msra.mxu0 %vm12728_vm12, %v15993_v47  ;;  %vm12736_vm12 = vmpackc.low %vm5027_vm4, %vm5026_vm15  ;;  %vm5679_vm4 = vcmp.eq.s32.totalorder %v16118_v11, %v18648_v63 }
 0xf45   : > { %5086 = vmatprep.subr.bf16.mxu0 %v15991_v0 }
 0xf48   : > { %12731 = vmatpush1.bf16.msk.msra.mxu0 %vm12730_vm3, %v15993_v47  ;;  %vm12738_vm3 = vmpackc.low %vm5029_vm7, %vm5028_vm6  ;;  %vm5681_vm7 = vcmp.eq.s32.totalorder %v16151_v33, %v18648_v63 }
 0xf49   : > { %5088 = vmatprep.subr.bf16.mxu0 %v15991_v0 }
 0xf4c   : > { %12733 = vmatpush1.bf16.msk.msra.mxu0 %vm12732_vm2, %v15993_v47  ;;  %vm5034_vm2 = vcmp.eq.s32.totalorder %v16453_v9, %v18511_v24 }
 0xf4d   : > { %5090 = vmatprep.subr.bf16.mxu0 %v15991_v0  ;;  %v5059_v30 = vsel %vm5034_vm2, 1.0, %v15994_v10  ;;  %vm5684_vm2 = vcmp.eq.s32.totalorder %v16165_v39, %v18648_v63 }
 0xf4e   : > { %v5072_v31 = vpack.c.bf16 %v5059_v30, %v5059_v30  ;;  %v15766_v30 = vld [vmem:[%s20025_s4 + $0x284] sm:$0xff]  }
 0xf50   : > { %12735 = vmatpush1.bf16.msk.msra.mxu0 %vm12734_vm14, %v15993_v47  ;;  %vm5033_vm14 = vcmp.eq.s32.totalorder %v16448_v8, %v18511_v24  ;;  %v5074_v35 = vsel %vm849_vm1, %v5072_v31, 0  ;;  %v18767_v31 = vld [vmem:[%s20022_s1 + $0x18] ss:$0 sm:$0xff] }
 0xf51   : > { %5092 = vmatprep.subr.bf16.mxu0 %v15991_v0  ;;  %vm12742_vm15 = vmpackc.low %vm5033_vm14, %vm5032_vm13  ;;  %vm5685_vm13 = vcmp.eq.s32.totalorder %v16177_v40, %v18648_v63  ;;  %vm5686_vm14 = vcmp.eq.s32.totalorder %v16180_v41, %v18648_v63 }
 0xf54   : > { %12737 = vmatpush1.bf16.msk.msra.mxu0 %vm12736_vm12, %v15993_v47  ;;  %vm5680_vm12 = vcmp.eq.s32.totalorder %v16132_v25, %v18648_v63 }
 0xf55   : > { %5094 = vmatprep.subr.bf16.mxu0 %v15991_v0  ;;  %vm12846_vm6 = vmpackc.low %vm5680_vm12, %vm5679_vm4  ;;  %vm5687_vm4 = vcmp.eq.s32.totalorder %v16197_v43, %v18648_v63  ;;  %vm5688_vm12 = vcmp.eq.s32.totalorder %v16200_v44, %v18648_v63 }
 0xf58   : > { %12739 = vmatpush1.bf16.msk.msra.mxu0 %vm12738_vm3, %v15993_v47  ;;  %vm5682_vm3 = vcmp.eq.s32.totalorder %v16154_v34, %v18648_v63 }
 0xf59   : > { %5096 = vmatprep.subr.bf16.mxu0 %v15991_v0  ;;  %vm12848_vm8 = vmpackc.low %vm5682_vm3, %vm5681_vm7  ;;  %vm5689_vm7 = vcmp.eq.s32.totalorder %v16255_v50, %v18648_v63  ;;  %vm5690_vm3 = vcmp.eq.s32.totalorder %v16258_v51, %v18648_v63 }
 0xf5c   : > { %12741 = vmatpush1.bf16.msk.msra.mxu0 %vm12740_vm9, %v15993_v47  ;;  %vm12850_vm9 = vmpackc.low %vm5684_vm2, %vm5683_vm10  ;;  %vm5691_vm10 = vcmp.eq.s32.totalorder %v16272_v53, %v18648_v63  ;;  %vm5692_vm2 = vcmp.eq.s32.totalorder %v16275_v54, %v18648_v63 }
 0xf5d   : > { %5098 = vmatprep.subr.bf16.mxu0 %v15991_v0 }
 0xf60   : > { %12743 = vmatpush1.bf16.msk.msra.mxu0 %vm12742_vm15, %v15993_v47  ;;  %vm12852_vm15 = vmpackc.low %vm5686_vm14, %vm5685_vm13  ;;  %vm5693_vm13 = vcmp.eq.s32.totalorder %v16282_v56, %v18648_v63  ;;  %vm5694_vm14 = vcmp.eq.s32.totalorder %v16285_v57, %v18648_v63 }
 0xf61   : > { %5100 = vmatprep.subr.bf16.mxu0 %v15991_v0 }
 0xf64   : > { %5101 = vmatpush1.bf16.msra.mxu0 %v5074_v35  ;;  %v15768_v35 = vld [vmem:[%s20025_s4 + $0x294] sm:$0xff]  }
 0xf67   : > { %5109 = vmatmul.mubr.bf16.vlgmr.msra.gmra.mrb[72].mxu0 %v16496_v22 }
 0xf68   : > { %14391 = vmatprep.mubr.msk.bf16.mxu0 %vm1042_vm11, %v15750_v37 }
0x103a   : > { %v5110_v42 = vpop.f32.mrb[72].mxu0 }
0x103b   : > { %v5112_v45 = vpop.f32.mrb[73].mxu0 }
0x103c   : > { %v5113_v46 = vpop.f32.mrb[74].mxu0 }
0x103d   : > { %v5117_v13 = vpack.c.bf16 %v5113_v46, %v5110_v42  ;;  %v5115_v48 = vpop.f32.mrb[75].mxu0 }
0x103f   : > { %14389 = vmatprep.subr.bf16.mxu0 %v5117_v13 }
0x1040   : > { %14390 = vmatpush3.bf16.msra.mxu0 %v5117_v13  ;;  %v6418_v13 = vld [vmem:[%s20026_s5 + $0x30] sm:$0x3] }
0x1041   : > { %14399 = vmatprep.subr.bf16.mxu0 %v17301_v49 }
0x1043   : > { %14392 = vmatmul.mubr.msk.bf16.vlgmr.msra.gmra.mrb[16].mxu0 %vm1042_vm11, %v15751_v52 }
0x1044   : > { %14400 = vmatpush3.bf16.msra.mxu0 %v17301_v49  ;;  %14395 = vmatprep.mubr.msk.bf16.mxu0 %vm1042_vm11, %v15752_v55  ;;  %v15755_v49 = vld [vmem:[%s20025_s4 + $0x238] sm:$0xff]  }
0x1045   : > { %14409 = vmatprep.subr.bf16.mxu0 %v17303_v60 }
0x104b   : > { %14396 = vmatmul.mubr.msk.bf16.gmra.mrb[20].mxu0 %vm1042_vm11, %v15753_v58 }
0x104c   : > { %14401 = vmatprep.mubr.msk.bf16.mxu0 %vm1042_vm11, %v15754_v59 }
0x1053   : > { %14402 = vmatmul.mubr.msk.bf16.vlgmr.msra.gmra.mrb[16].mxu0 %vm1042_vm11, %v15755_v49 }
0x1054   : > { %14410 = vmatpush3.bf16.msra.mxu0 %v17303_v60  ;;  %14405 = vmatprep.mubr.msk.bf16.mxu0 %vm1042_vm11, %v15756_v61  ;;  %v15759_v60 = vld [vmem:[%s20025_s4 + $0x254] sm:$0xff]  }
0x1055   : > { %5745 = vmatprep.subr.bf16.mxu0 %v15991_v0 }
0x105b   : > { %14406 = vmatmul.mubr.msk.bf16.gmra.mrb[20].mxu0 %vm1042_vm11, %v15757_v15 }
0x105c   : > { %14411 = vmatprep.mubr.msk.bf16.mxu0 %vm1042_vm11, %v15758_v62 }
0x1063   : > { %14412 = vmatmul.mubr.msk.bf16.vlgmr.msra.gmra.mrb[16].mxu0 %vm1042_vm11, %v15759_v60 }
0x1064   : > { %12847 = vmatpush1.bf16.msk.msra.mxu0 %vm12846_vm6, %v15993_v47  ;;  %14415 = vmatprep.mubr.msk.bf16.mxu0 %vm1042_vm11, %v15760_v12  ;;  %vm12854_vm6 = vmpackc.low %vm5688_vm12, %vm5687_vm4  ;;  %vm5695_vm4 = vcmp.eq.s32.totalorder %v16394_v1, %v18648_v63  ;;  %vm5696_vm12 = vcmp.eq.s32.totalorder %v16397_v2, %v18648_v63 }
0x1065   : > { %5747 = vmatprep.subr.bf16.mxu0 %v15991_v0 }
0x1068   : > { %12849 = vmatpush1.bf16.msk.msra.mxu0 %vm12848_vm8, %v15993_v47  ;;  %vm12856_vm8 = vmpackc.low %vm5690_vm3, %vm5689_vm7  ;;  %vm5697_vm7 = vcmp.eq.s32.totalorder %v16409_v3, %v18648_v63  ;;  %vm5698_vm3 = vcmp.eq.s32.totalorder %v16412_v4, %v18648_v63 }
0x1069   : > { %5749 = vmatprep.subr.bf16.mxu0 %v15991_v0 }
0x106b   : > { %14416 = vmatmul.mubr.msk.bf16.gmra.mrb[20].mxu0 %vm1042_vm11, %v15761_v14 }
0x106c   : > { %12851 = vmatpush1.bf16.msk.msra.mxu0 %vm12850_vm9, %v15993_v47  ;;  %12870 = vmatprep.mubr.msk.bf16.mxu0 %vm845_vm5, %v16498_v23  ;;  %vm12858_vm9 = vmpackc.low %vm5692_vm2, %vm5691_vm10  ;;  %vm5699_vm10 = vcmp.eq.s32.totalorder %v16427_v5, %v18648_v63  ;;  %vm5700_vm2 = vcmp.eq.s32.totalorder %v16430_v6, %v18648_v63 }
0x106d   : > { %5751 = vmatprep.subr.bf16.mxu0 %v15991_v0 }
0x1070   : > { %12853 = vmatpush1.bf16.msk.msra.mxu0 %vm12852_vm15, %v15993_v47  ;;  %vm12860_vm15 = vmpackc.low %vm5694_vm14, %vm5693_vm13  ;;  %vm5701_vm14 = vcmp.eq.s32.totalorder %v16445_v7, %v18648_v63 }
0x1071   : > { %5753 = vmatprep.subr.bf16.mxu0 %v15991_v0  ;;  %vm12866_vm13 = vmpackc.low %vm5700_vm2, %vm5699_vm10  ;;  %vm6129_vm2 = vcmp.eq.s32.totalorder %v16162_v38, %v18767_v31  ;;  %v15770_v38 = vld [vmem:[%s20025_s4 + $0x2a0] sm:$0xff]  }
0x1074   : > { %12855 = vmatpush1.bf16.msk.msra.mxu0 %vm12854_vm6, %v15993_v47  ;;  %vm12862_vm6 = vmpackc.low %vm5696_vm12, %vm5695_vm4  ;;  %vm6125_vm12 = vcmp.eq.s32.totalorder %v16118_v11, %v18767_v31  ;;  %v15769_v11 = vld [vmem:[%s20025_s4 + $0x29c] ss:$0 sps:$4 sm:$0x11]  }
0x1075   : > { %5755 = vmatprep.subr.bf16.mxu0 %v15991_v0 }
0x1078   : > { %12857 = vmatpush1.bf16.msk.msra.mxu0 %vm12856_vm8, %v15993_v47  ;;  %vm12864_vm8 = vmpackc.low %vm5698_vm3, %vm5697_vm7  ;;  %vm6127_vm3 = vcmp.eq.s32.totalorder %v16151_v33, %v18767_v31 }
0x1079   : > { %5757 = vmatprep.subr.bf16.mxu0 %v15991_v0 }
0x107c   : > { %12859 = vmatpush1.bf16.msk.msra.mxu0 %vm12858_vm9, %v15993_v47  ;;  %vm5703_vm9 = vcmp.eq.s32.totalorder %v16453_v9, %v18648_v63 }
0x107d   : > { %5759 = vmatprep.subr.bf16.mxu0 %v15991_v0  ;;  %v5728_v32 = vsel %vm5703_vm9, 1.0, %v15994_v10  ;;  %vm6130_vm9 = vcmp.eq.s32.totalorder %v16165_v39, %v18767_v31 }
0x107e   : > { %v5741_v16 = vpack.c.bf16 %v5728_v32, %v5728_v32 }
0x1080   : > { %12861 = vmatpush1.bf16.msk.msra.mxu0 %vm12860_vm15, %v15993_v47  ;;  %vm5702_vm15 = vcmp.eq.s32.totalorder %v16448_v8, %v18648_v63  ;;  %v5743_v17 = vsel %vm849_vm1, %v5741_v16, 0 }
0x1081   : > { %5761 = vmatprep.subr.bf16.mxu0 %v15991_v0  ;;  %vm12868_vm4 = vmpackc.low %vm5702_vm15, %vm5701_vm14  ;;  %vm6131_vm14 = vcmp.eq.s32.totalorder %v16177_v40, %v18767_v31  ;;  %vm6132_vm15 = vcmp.eq.s32.totalorder %v16180_v41, %v18767_v31 }
0x1084   : > { %12863 = vmatpush1.bf16.msk.msra.mxu0 %vm12862_vm6, %v15993_v47  ;;  %vm6126_vm6 = vcmp.eq.s32.totalorder %v16132_v25, %v18767_v31 }
0x1085   : > { %5763 = vmatprep.subr.bf16.mxu0 %v15991_v0  ;;  %vm12930_vm7 = vmpackc.low %vm6126_vm6, %vm6125_vm12  ;;  %vm6133_vm12 = vcmp.eq.s32.totalorder %v16197_v43, %v18767_v31  ;;  %vm6134_vm6 = vcmp.eq.s32.totalorder %v16200_v44, %v18767_v31 }
0x1088   : > { %12865 = vmatpush1.bf16.msk.msra.mxu0 %vm12864_vm8, %v15993_v47  ;;  %vm6128_vm8 = vcmp.eq.s32.totalorder %v16154_v34, %v18767_v31 }
0x1089   : > { %5765 = vmatprep.subr.bf16.mxu0 %v15991_v0  ;;  %vm12932_vm10 = vmpackc.low %vm6128_vm8, %vm6127_vm3  ;;  %vm6135_vm3 = vcmp.eq.s32.totalorder %v16255_v50, %v18767_v31  ;;  %v15773_v50 = vld [vmem:[%s20025_s4 + $0x2b8] ss:$0 sps:$4 sm:$0x11]  }
0x108c   : > { %12867 = vmatpush1.bf16.msk.msra.mxu0 %vm12866_vm13, %v15993_v47  ;;  %vm12934_vm13 = vmpackc.low %vm6130_vm9, %vm6129_vm2  ;;  %vm6138_vm2 = vcmp.eq.s32.totalorder %v16275_v54, %v18767_v31 }
0x108d   : > { %5767 = vmatprep.subr.bf16.mxu0 %v15991_v0 }
0x1090   : > { %12869 = vmatpush1.bf16.msk.msra.mxu0 %vm12868_vm4, %v15993_v47  ;;  %vm12936_vm4 = vmpackc.low %vm6132_vm15, %vm6131_vm14  ;;  %vm6140_vm14 = vcmp.eq.s32.totalorder %v16285_v57, %v18767_v31 }
0x1091   : > { %5769 = vmatprep.subr.bf16.mxu0 %v15991_v0 }
0x1094   : > { %5770 = vmatpush1.bf16.msra.mxu0 %v5743_v17 }
0x1097   : > { %5778 = vmatmul.mubr.bf16.vlgmr.msra.gmra.mrb[76].mxu0 %v16496_v22 }
0x1098   : > { %14421 = vmatprep.mubr.msk.bf16.mxu0 %vm1042_vm11, %v15762_v18 }
0x116a   : > { %v5779_v28 = vpop.f32.mrb[76].mxu0 }
0x116b   : > { %v5781_v19 = vpop.f32.mrb[77].mxu0 }
0x116c   : > { %v5782_v20 = vpop.f32.mrb[78].mxu0 }
0x116d   : > { %v5786_v21 = vpack.c.bf16 %v5782_v20, %v5779_v28  ;;  %v5784_v24 = vpop.f32.mrb[79].mxu0 }
0x116f   : > { %14419 = vmatprep.subr.bf16.mxu0 %v5786_v21 }
0x1170   : > { %14420 = vmatpush3.bf16.msra.mxu0 %v5786_v21 }
0x1171   : > { %14429 = vmatprep.subr.bf16.mxu0 %v17359_v27 }
0x1173   : > { %14422 = vmatmul.mubr.msk.bf16.vlgmr.msra.gmra.mrb[16].mxu0 %vm1042_vm11, %v15763_v36 }
0x1174   : > { %14430 = vmatpush3.bf16.msra.mxu0 %v17359_v27  ;;  %14425 = vmatprep.mubr.msk.bf16.mxu0 %vm1042_vm11, %v15764_v26  ;;  %v15767_v27 = vld [vmem:[%s20025_s4 + $0x28c] sm:$0xff]  }
0x1175   : > { %6191 = vmatprep.subr.bf16.mxu0 %v15991_v0 }
0x117b   : > { %14426 = vmatmul.mubr.msk.bf16.gmra.mrb[20].mxu0 %vm1042_vm11, %v15765_v29 }
0x117c   : > { %14431 = vmatprep.mubr.msk.bf16.mxu0 %vm1042_vm11, %v15766_v30 }
0x1183   : > { %14432 = vmatmul.mubr.msk.bf16.vlgmr.msra.gmra.mrb[16].mxu0 %vm1042_vm11, %v15767_v27 }
0x1184   : > { %12931 = vmatpush1.bf16.msk.msra.mxu0 %vm12930_vm7, %v15993_v47  ;;  %14435 = vmatprep.mubr.msk.bf16.mxu0 %vm1042_vm11, %v15768_v35  ;;  %vm12938_vm7 = vmpackc.low %vm6134_vm6, %vm6133_vm12  ;;  %vm6142_vm12 = vcmp.eq.s32.totalorder %v16397_v2, %v18767_v31 }
0x1185   : > { %6193 = vmatprep.subr.bf16.mxu0 %v15991_v0 }
0x1188   : > { %12933 = vmatpush1.bf16.msk.msra.mxu0 %vm12932_vm10, %v15993_v47  ;;  %vm6137_vm10 = vcmp.eq.s32.totalorder %v16272_v53, %v18767_v31 }
0x1189   : > { %6195 = vmatprep.subr.bf16.mxu0 %v15991_v0  ;;  %vm12942_vm9 = vmpackc.low %vm6138_vm2, %vm6137_vm10  ;;  %vm6146_vm10 = vcmp.eq.s32.totalorder %v16430_v6, %v18767_v31  ;;  %vm6149_vm2 = vcmp.eq.s32.totalorder %v16453_v9, %v18767_v31  ;;  %v6415_v6 = vld [vmem:[%s20026_s5 + $0x18] sm:$0xff]  ;;  %v6416_v9 = vld [vmem:[%s20026_s5 + $0x20] sm:$0xff] }
0x118a   : > { %v6174_v25 = vsel %vm6149_vm2, 1.0, %v15994_v10 }
0x118b   : > { %14436 = vmatmul.mubr.msk.bf16.gmra.mrb[20].mxu0 %vm1042_vm11, %v15769_v11  ;;  %v6187_v33 = vpack.c.bf16 %v6174_v25, %v6174_v25 }
0x118c   : > { %12935 = vmatpush1.bf16.msk.msra.mxu0 %vm12934_vm13, %v15993_v47  ;;  %12954 = vmatprep.mubr.msk.bf16.mxu0 %vm845_vm5, %v16498_v23  ;;  %vm6136_vm5 = vcmp.eq.s32.totalorder %v16258_v51, %v18767_v31  ;;  %vm6139_vm13 = vcmp.eq.s32.totalorder %v16282_v56, %v18767_v31 }
0x118d   : > { %6197 = vmatprep.subr.bf16.mxu0 %v15991_v0  ;;  %vm12940_vm8 = vmpackc.low %vm6136_vm5, %vm6135_vm3  ;;  %vm6144_vm3 = vcmp.eq.s32.totalorder %v16412_v4, %v18767_v31  ;;  %v6189_v34 = vsel %vm849_vm1, %v6187_v33, 0  ;;  %v6413_v4 = vld [vmem:[%s20026_s5 + $0x8] sm:$0xff] }
0x118e   : > { %vm12944_vm15 = vmpackc.low %vm6140_vm14, %vm6139_vm13  ;;  %vm6147_vm13 = vcmp.eq.s32.totalorder %v16445_v7, %v18767_v31  ;;  %vm6148_vm14 = vcmp.eq.s32.totalorder %v16448_v8, %v18767_v31  ;;  %v6414_v7 = vld [vmem:[%s20026_s5 + $0x10] sm:$0xff]  ;;  %v6417_v8 = vld [vmem:[%s20026_s5 + $0x28] sm:$0xff] }
0x1190   : > { %12937 = vmatpush1.bf16.msk.msra.mxu0 %vm12936_vm4, %v15993_v47  ;;  %vm6141_vm4 = vcmp.eq.s32.totalorder %v16394_v1, %v18767_v31 }
0x1191   : > { %6199 = vmatprep.subr.bf16.mxu0 %v15991_v0  ;;  %vm12946_vm6 = vmpackc.low %vm6142_vm12, %vm6141_vm4  ;;  %vm6581_vm4 = vcmask 1040384   ;;  %vm11614_vm12 = vcmask 982016  }
0x1194   : > { %12939 = vmatpush1.bf16.msk.msra.mxu0 %vm12938_vm7, %v15993_v47  ;;  %vm6143_vm7 = vcmp.eq.s32.totalorder %v16409_v3, %v18767_v31 }
0x1195   : > { %6201 = vmatprep.subr.bf16.mxu0 %v15991_v0  ;;  %vm12948_vm5 = vmpackc.low %vm6144_vm3, %vm6143_vm7  ;;  %vm11830_vm7 = vcmask 1024  }
0x1198   : > { %12941 = vmatpush1.bf16.msk.msra.mxu0 %vm12940_vm8, %v15993_v47  ;;  %vm6145_vm8 = vcmp.eq.s32.totalorder %v16427_v5, %v18767_v31  ;;  %v6412_v5 = vld [vmem:[%s20026_s5] sm:$0xff] }
0x1199   : > { %6203 = vmatprep.subr.bf16.mxu0 %v15991_v0 }
0x119c   : > { %12943 = vmatpush1.bf16.msk.msra.mxu0 %vm12942_vm9, %v15993_v47  ;;  %vm12950_vm9 = vmpackc.low %vm6146_vm10, %vm6145_vm8 }
0x119d   : > { %6205 = vmatprep.subr.bf16.mxu0 %v15991_v0 }
0x11a0   : > { %12945 = vmatpush1.bf16.msk.msra.mxu0 %vm12944_vm15, %v15993_v47  ;;  %vm12952_vm15 = vmpackc.low %vm6148_vm14, %vm6147_vm13 }
0x11a1   : > { %6207 = vmatprep.subr.bf16.mxu0 %v15991_v0 }
0x11a4   : > { %12947 = vmatpush1.bf16.msk.msra.mxu0 %vm12946_vm6, %v15993_v47  ;;  %vm11756_vm6 = vcmask 687104  }
0x11a5   : > { %6209 = vmatprep.subr.bf16.mxu0 %v15991_v0 }
0x11a8   : > { %12949 = vmatpush1.bf16.msk.msra.mxu0 %vm12948_vm5, %v15993_v47 }
0x11a9   : > { %6211 = vmatprep.subr.bf16.mxu0 %v15991_v0 }
0x11ac   : > { %12951 = vmatpush1.bf16.msk.msra.mxu0 %vm12950_vm9, %v15993_v47 }
0x11ad   : > { %6213 = vmatprep.subr.bf16.mxu0 %v15991_v0 }
0x11b0   : > { %12953 = vmatpush1.bf16.msk.msra.mxu0 %vm12952_vm15, %v15993_v47  ;;  %v15772_v47 = vld [vmem:[%s20025_s4 + $0x2b0] sm:$0xff]  }
0x11b1   : > { %6215 = vmatprep.subr.bf16.mxu0 %v15991_v0  ;;  %v15771_v0 = vld [vmem:[%s20025_s4 + $0x2a8] sm:$0xff]  }
0x11b4   : > { %6216 = vmatpush1.bf16.msra.mxu0 %v6189_v34 }
0x11b7   : > { %6224 = vmatmul.mubr.bf16.vlgmr.msra.gmra.mrb[80].mxu0 %v16496_v22 }
0x11b8   : > { %14441 = vmatprep.mubr.msk.bf16.mxu0 %vm1042_vm11, %v15770_v38 }
0x128a   : > { %v6225_v39 = vpop.f32.mrb[80].mxu0 }
0x128b   : > { %v6227_v40 = vpop.f32.mrb[81].mxu0 }
0x128c   : > { %v6228_v41 = vpop.f32.mrb[82].mxu0 }
0x128d   : > { %v6232_v43 = vpack.c.bf16 %v6228_v41, %v6225_v39  ;;  %v6230_v44 = vpop.f32.mrb[83].mxu0 }
0x128f   : > { %14439 = vmatprep.subr.bf16.mxu0 %v6232_v43 }
0x1290   : > { %14440 = vmatpush3.bf16.msra.mxu0 %v6232_v43 }
0x1293   : > { %14442 = vmatmul.mubr.msk.bf16.vlgmr.msra.gmra.mrb[16].mxu0 %vm1042_vm11, %v15771_v0 }
0x1294   : > { %14445 = vmatprep.mubr.msk.bf16.mxu0 %vm1042_vm11, %v15772_v47 }
0x129b   : > { %14446 = vmatmul.mubr.msk.bf16.gmra.mrb[20].mxu0 %vm1042_vm11, %v15773_v50  ;;  %vm6556_vm11 = vcmask 408576  }
0x1366   : > { %v14443_v51 = vpop.f32.mrb[16].mxu0 }
0x1367   : > { %6353 = vrot.lane.b32.xlu0 %v14443_v51, %s15995_s27  ;;  %v6305_v53 = vpop.f32.mrb[17].mxu0 }
0x1368   : > { %6349 = vrot.lane.b32.xlu1 %v6305_v53, %s15995_s27  ;;  %v14444_v54 = vpop.f32.mrb[18].mxu0 }
0x1369   : > { %v6308_v56 = vpop.f32.mrb[19].mxu0 }
0x136c   : > { %6351 = vrot.lane.b32.xlu1 %v6308_v56, %s15995_s27 }
0x136e   : > { %v14447_v57 = vpop.f32.mrb[20].mxu0 }
0x136f   : > { %v6321_v1 = vpop.f32.mrb[21].mxu0 }
0x1370   : > { %6355 = vrot.lane.b32.xlu1 %v14444_v54, %s15995_s27  ;;  %6357 = vrot.lane.b32.xlu0 %v6321_v1, %s15995_s27  ;;  %v14448_v2 = vpop.f32.mrb[22].mxu0 }
0x1371   : > { %v6324_v3 = vpop.f32.mrb[23].mxu0 }
0x1374   : > { %6361 = vrot.lane.b32.xlu0 %v14447_v57, %s15995_s27  ;;  %6359 = vrot.lane.b32.xlu1 %v6324_v3, %s15995_s27  ;;  %s15997_s27 = smov 127  }
0x1378   : > { %6426 = vperm.xlu0 %15647, %v6413_v4   ;;  %6421 = vperm.xlu1 %15648, %v6412_v5  }
0x137c   : > { %6436 = vperm.xlu0 %15647, %v6415_v6   ;;  %6431 = vperm.xlu1 %15648, %v6414_v7   ;;  %v15775_v7 = vld [vmem:[%s20027_s6 + $0x44] sm:$0xff]  }
0x1380   : > { %6446 = vperm.xlu0 %15647, %v6417_v8   ;;  %6441 = vperm.xlu1 %15648, %v6416_v9   ;;  %v15776_v8 = vld [vmem:[%s20027_s6 + $0x4c] sm:$0xff]   ;;  %v15777_v9 = vld [vmem:[%s20027_s6 + $0x54] sm:$0xff]  }
0x13d9   : > { %v6354_v22 = vpop.permute.xlu0 %6353 }
0x13da   : > { %v6372_v23 = vmax.f32 %v14443_v51, %v6354_v22  ;;  %v6350_v37 = vpop.permute.xlu1 %6349  ;;  %v15778_v22 = vld [vmem:[%s20027_s6 + $0x5c] sm:$0xff]  }
0x13db   : > { %v6370_v42 = vmax.f32 %v6305_v53, %v6350_v37  ;;  %v15774_v53 = vld [vmem:[%s20027_s6 + $0x3c] sm:$0xff]   ;;  %v15779_v37 = vld [vmem:[%s20027_s6 + $0x64] sm:$0xff]  }
0x13dc   : > { %6388 = vrot.lane.b32.xlu1 %v6372_v23, %s15996_s24  ;;  %14457 = vmatprep.mubr.msk.bf16.mxu1 %vm6556_vm11, %v15774_v53 }
0x13de   : > { %v6352_v45 = vpop.permute.xlu1 %6351 }
0x13df   : > { %v6371_v46 = vmax.f32 %v6308_v56, %v6352_v45  ;;  %v15780_v45 = vld [vmem:[%s20027_s6 + $0x6c] sm:$0xff]  }
0x13e0   : > { %6384 = vrot.lane.b32.xlu1 %v6370_v42, %s15996_s24 }
0x13e1   : > { %6386 = vrot.lane.b32.xlu0 %v6371_v46, %s15996_s24 }
0x13e2   : > { %v6356_v48 = vpop.permute.xlu1 %6355  ;;  %v6358_v52 = vpop.permute.xlu0 %6357 }
0x13e3   : > { %v6373_v55 = vmax.f32 %v14444_v54, %v6356_v48  ;;  %v6374_v59 = vmax.f32 %v6321_v1, %v6358_v52  ;;  %v15783_v48 = vld [vmem:[%s20027_s6 + $0x8] sm:$0xff]   ;;  %v15784_v52 = vld [vmem:[%s20027_s6 + $0x10] sm:$0xff]  }
0x13e4   : > { %6451 = vperm.xlu1 %15648, %v6418_v13   ;;  %v15782_v13 = vld [vmem:[%s20027_s6] sm:$0xff]  }
0x13e5   : > { %6390 = vrot.lane.b32.xlu0 %v6373_v55, %s15996_s24 }
0x13e6   : > { %v6360_v58 = vpop.permute.xlu1 %6359  ;;  %v6362_v61 = vpop.permute.xlu0 %6361 }
0x13e7   : > { %v6375_v49 = vmax.f32 %v6324_v3, %v6360_v58  ;;  %v6376_v15 = vmax.f32 %v14447_v57, %v6362_v61  ;;  %v15785_v58 = vld [vmem:[%s20027_s6 + $0x18] sm:$0xff]  }
0x13e9   : > { %6392 = vrot.lane.b32.xlu0 %v6374_v59, %s15996_s24  ;;  %6394 = vrot.lane.b32.xlu1 %v6375_v49, %s15996_s24 }
0x13ed   : > { %6396 = vrot.lane.b32.xlu0 %v6376_v15, %s15996_s24  ;;  %s16008_s24 = smov 116  }
0x13f7   : > { %v6422_v62 = vpop.permute.xlu1 %6421  ;;  %v6427_v60 = vpop.permute.xlu0 %6426 }
0x13fb   : > { %v6432_v63 = vpop.permute.xlu1 %6431  ;;  %v6437_v14 = vpop.permute.xlu0 %6436 }
0x13ff   : > { %v6442_v12 = vpop.permute.xlu1 %6441  ;;  %v6447_v16 = vpop.permute.xlu0 %6446 }
0x144e   : > { %v6389_v32 = vpop.permute.xlu1 %6388 }
0x144f   : > { %v6407_v19 = vmax.f32 %v6372_v23, %v6389_v32  ;;  %v15791_v32 = vld [vmem:[%s20027_s6 + $0x80] sm:$0xff]  }
0x1451   : > { %v6456_v29 = vadd.f32 %v6432_v63, %v6407_v19  ;;  %v15794_v19 = vld [vmem:[%s20027_s6 + $0x98] sm:$0xff]  }
0x1452   : > { %v6385_v17 = vpop.permute.xlu1 %6384 }
0x1453   : > { %v6405_v18 = vmax.f32 %v6370_v42, %v6385_v17  ;;  %v6387_v28 = vpop.permute.xlu0 %6386  ;;  %v6463_v25 = vmax.f32 %v6456_v29, 0.0  ;;  %v15797_v29 = vld [vmem:[%s20027_s6 + $0xb0] ss:$0 sps:$4 sm:$0xff]  }
0x1454   : > { %v6406_v20 = vmax.f32 %v6371_v46, %v6387_v28  ;;  %v15781_v46 = vld [vmem:[%s20027_s6 + $0x74] ss:$0 sps:$4 sm:$0xff]  }
0x1455   : > { %v6454_v21 = vadd.f32 %v6422_v62, %v6405_v18  ;;  %v15787_v62 = vld [vmem:[%s20027_s6 + $0x28] sm:$0xff]   ;;  %v15793_v18 = vld [vmem:[%s20027_s6 + $0x90] sm:$0xff]  }
0x1456   : > { %v6455_v24 = vadd.f32 %v6427_v60, %v6406_v20  ;;  %v15788_v60 = vld [vmem:[%s20027_s6 + $0x30] sm:$0xff]  }
0x1457   : > { %v6461_v36 = vmax.f32 %v6454_v21, 0.0  ;;  %v6391_v26 = vpop.permute.xlu0 %6390 }
0x1458   : > { %v6462_v30 = vmax.f32 %v6455_v24, 0.0  ;;  %v6408_v31 = vmax.f32 %v6373_v55, %v6391_v26  ;;  %v15795_v24 = vld [vmem:[%s20027_s6 + $0xa0] sm:$0xff]   ;;  %v15796_v26 = vld [vmem:[%s20027_s6 + $0xa8] sm:$0xff]  }
0x145a   : > { %v18898_v27 = vpack.c.bf16 %v6462_v30, %v6461_v36  ;;  %v6457_v35 = vadd.f32 %v6437_v14, %v6408_v31  ;;  %v15790_v14 = vld [vmem:[%s20027_s6 + $0x78] sm:$0xff]  }
0x145b   : > { %v6393_v11 = vpop.permute.xlu0 %6392  ;;  %v15798_v30 = vld [vmem:[%s20027_s6 + $0xb4] sm:$0xff]   ;;  %v15799_v31 = vld [vmem:[%s20027_s6 + $0xbc] sm:$0xff]  }
0x145c   : > { %v6464_v33 = vmax.f32 %v6457_v35, 0.0  ;;  %6545 = vrot.lane.b32.xlu1 %v18898_v27, %s15997_s27  ;;  %v6409_v41 = vmax.f32 %v6374_v59, %v6393_v11  ;;  %v15801_v11 = vld [vmem:[%s20027_s6 + $0xcc] sm:$0xff]  }
0x145e   : > { %v18901_v34 = vpack.c.bf16 %v6464_v33, %v6463_v25  ;;  %v6458_v47 = vadd.f32 %v6442_v12, %v6409_v41  ;;  %v15789_v12 = vld [vmem:[%s20027_s6 + $0x38] ss:$0 sps:$4 sm:$0xff]   ;;  %v15804_v41 = vld [vmem:[%s20027_s6 + $0xe4] sm:$0xff]  }
0x145f   : > { %v6397_v38 = vpop.permute.xlu0 %6396  ;;  %v15802_v33 = vld [vmem:[%s20027_s6 + $0xd4] sm:$0xff]  }
0x1460   : > { %6547 = vrot.lane.b32.xlu0 %v18901_v34, %s15997_s27  ;;  %v6411_v39 = vmax.f32 %v6376_v15, %v6397_v38  ;;  %v6465_v56 = vmax.f32 %v6458_v47, 0.0  ;;  %v15808_v47 = vld [vmem:[%s20027_s6 + $0x100] sm:$0xff]  }
0x1463   : > { %v6452_v40 = vpop.permute.xlu1 %6451 }
0x1464   : > { %v6460_v43 = vadd.f32 %v6452_v40, %v6411_v39  ;;  %v15803_v39 = vld [vmem:[%s20027_s6 + $0xdc] sm:$0xff]  }
0x1466   : > { %v6467_v44 = vmax.f32 %v6460_v43, 0.0  ;;  %v15805_v43 = vld [vmem:[%s20027_s6 + $0xec] ss:$0 sps:$4 sm:$0xff]  }
0x1467   : > { %v6395_v0 = vpop.permute.xlu1 %6394 }
0x1468   : > { %v18904_v50 = vpack.c.bf16 %v6467_v44, %v6467_v44  ;;  %v6410_v51 = vmax.f32 %v6375_v49, %v6395_v0  ;;  %v15786_v49 = vld [vmem:[%s20027_s6 + $0x20] sm:$0xff]   ;;  %v15806_v44 = vld [vmem:[%s20027_s6 + $0xf0] sm:$0xff]   ;;  %v15807_v0 = vld [vmem:[%s20027_s6 + $0xf8] sm:$0xff]  }
0x146a   : > { %v6459_v54 = vadd.f32 %v6447_v16, %v6410_v51  ;;  %6551 = vrot.lane.b32.xlu0 %v18904_v50, %s15997_s27  ;;  %v6744_v23 = vsel %vm6581_vm4, %v18904_v50, 0  ;;  %v15792_v16 = vld [vmem:[%s20027_s6 + $0x88] sm:$0xff]  }
0x146b   : > { %v15809_v51 = vld [vmem:[%s20027_s6 + $0x108] sm:$0xff]  }
0x146c   : > { %v6466_v57 = vmax.f32 %v6459_v54, 0.0  ;;  %v15810_v54 = vld [vmem:[%s20027_s6 + $0x110] sm:$0xff]  }
0x146e   : > { %v18911_v1 = vpack.c.bf16 %v6466_v57, %v6465_v56  ;;  %6898 = vrot.lane.b32.xlu0 %v18901_v34, %s15998_s30 }
0x1470   : > { %6549 = vrot.lane.b32.xlu1 %v18911_v1, %s15997_s27  ;;  %s16011_s27 = smov 113  }
0x1472   : > { %6902 = vrot.lane.b32.xlu0 %v18904_v50, %s15998_s30 }
0x1474   : > { %6896 = vrot.lane.b32.xlu1 %v18898_v27, %s15998_s30 }
0x1476   : > { %7101 = vrot.lane.b32.xlu0 %v18901_v34, %s15999_s13 }
0x1478   : > { %6900 = vrot.lane.b32.xlu1 %v18911_v1, %s15998_s30 }
0x147a   : > { %7105 = vrot.lane.b32.xlu0 %v18904_v50, %s15999_s13 }
0x147c   : > { %7099 = vrot.lane.b32.xlu1 %v18898_v27, %s15999_s13 }
0x147e   : > { %7304 = vrot.lane.b32.xlu0 %v18901_v34, %s16000_s14 }
0x1480   : > { %7103 = vrot.lane.b32.xlu1 %v18911_v1, %s15999_s13 }
0x1482   : > { %7308 = vrot.lane.b32.xlu0 %v18904_v50, %s16000_s14 }
0x1484   : > { %7302 = vrot.lane.b32.xlu1 %v18898_v27, %s16000_s14 }
0x1486   : > { %7507 = vrot.lane.b32.xlu0 %v18901_v34, %s16001_s15 }
0x1488   : > { %7306 = vrot.lane.b32.xlu1 %v18911_v1, %s16000_s14  ;;  %s16020_s14 = smov 104  }
0x148a   : > { %7511 = vrot.lane.b32.xlu0 %v18904_v50, %s16001_s15 }
0x148c   : > { %7505 = vrot.lane.b32.xlu1 %v18898_v27, %s16001_s15 }
0x148e   : > { %7710 = vrot.lane.b32.xlu0 %v18901_v34, %s16002_s16 }
0x1490   : > { %7509 = vrot.lane.b32.xlu1 %v18911_v1, %s16001_s15  ;;  %s16017_s15 = smov 107  }
0x1492   : > { %7714 = vrot.lane.b32.xlu0 %v18904_v50, %s16002_s16 }
0x1494   : > { %7708 = vrot.lane.b32.xlu1 %v18898_v27, %s16002_s16 }
0x1496   : > { %7913 = vrot.lane.b32.xlu0 %v18901_v34, %s16003_s17 }
0x1498   : > { %7712 = vrot.lane.b32.xlu1 %v18911_v1, %s16002_s16  ;;  %s16014_s16 = smov 110  }
0x149a   : > { %7917 = vrot.lane.b32.xlu0 %v18904_v50, %s16003_s17 }
0x149c   : > { %7911 = vrot.lane.b32.xlu1 %v18898_v27, %s16003_s17 }
0x149e   : > { %8116 = vrot.lane.b32.xlu0 %v18901_v34, %s16004_s18 }
0x14a0   : > { %7915 = vrot.lane.b32.xlu1 %v18911_v1, %s16003_s17 }
0x14a2   : > { %8120 = vrot.lane.b32.xlu0 %v18904_v50, %s16004_s18 }
0x14a4   : > { %8114 = vrot.lane.b32.xlu1 %v18898_v27, %s16004_s18 }
0x14a6   : > { %8319 = vrot.lane.b32.xlu0 %v18901_v34, %s16005_s19 }
0x14a8   : > { %8118 = vrot.lane.b32.xlu1 %v18911_v1, %s16004_s18 }
0x14aa   : > { %8323 = vrot.lane.b32.xlu0 %v18904_v50, %s16005_s19 }
0x14ac   : > { %8317 = vrot.lane.b32.xlu1 %v18898_v27, %s16005_s19 }
0x14ae   : > { %8522 = vrot.lane.b32.xlu0 %v18901_v34, %s16006_s20 }
0x14b0   : > { %8321 = vrot.lane.b32.xlu1 %v18911_v1, %s16005_s19 }
0x14b2   : > { %8526 = vrot.lane.b32.xlu0 %v18904_v50, %s16006_s20 }
0x14b4   : > { %8520 = vrot.lane.b32.xlu1 %v18898_v27, %s16006_s20 }
0x14b6   : > { %8725 = vrot.lane.b32.xlu0 %v18901_v34, %s16007_s23 }
0x14b8   : > { %8524 = vrot.lane.b32.xlu1 %v18911_v1, %s16006_s20  ;;  %s16018_s20 = smov 106  }
0x14ba   : > { %8729 = vrot.lane.b32.xlu0 %v18904_v50, %s16007_s23 }
0x14bc   : > { %8723 = vrot.lane.b32.xlu1 %v18898_v27, %s16007_s23 }
0x14be   : > { %8928 = vrot.lane.b32.xlu0 %v18901_v34, %s16008_s24 }
0x14c0   : > { %8727 = vrot.lane.b32.xlu1 %v18911_v1, %s16007_s23  ;;  %s16015_s23 = smov 109  }
0x14c2   : > { %8932 = vrot.lane.b32.xlu0 %v18904_v50, %s16008_s24 }
0x14c4   : > { %8926 = vrot.lane.b32.xlu1 %v18898_v27, %s16008_s24 }
0x14c6   : > { %9131 = vrot.lane.b32.xlu0 %v18901_v34, %s16009_s25 }
0x14c8   : > { %8930 = vrot.lane.b32.xlu1 %v18911_v1, %s16008_s24 }
0x14ca   : > { %9135 = vrot.lane.b32.xlu0 %v18904_v50, %s16009_s25 }
0x14cc   : > { %9129 = vrot.lane.b32.xlu1 %v18898_v27, %s16009_s25 }
0x14ce   : > { %9334 = vrot.lane.b32.xlu0 %v18901_v34, %s16010_s26  ;;  %v6546_v2 = vpop.permute.xlu1 %6545 }
0x14cf   : > { %14449 = vmatprep.subr.bf16.mxu1 %v6546_v2 }
0x14d0   : > { %9133 = vrot.lane.b32.xlu1 %v18911_v1, %s16009_s25  ;;  %14450 = vmatpush3.bf16.msra.mxu1 %v6546_v2  ;;  %s15607_s25 = smul.u32 40, %s20061_s22 }
0x14d2   : > { %v6548_v3 = vpop.permute.xlu0 %6547  ;;  %9338 = vrot.lane.b32.xlu0 %v18904_v50, %s16010_s26  ;;  %s413_s30 = scalar_lea.vmem %s20033_s12, %s15607_s25 }
0x14d3   : > { %14451 = vmatprep.subr.bf16.mxu1 %v6548_v3 }
0x14d4   : > { %9332 = vrot.lane.b32.xlu1 %v18898_v27, %s16010_s26  ;;  %14452 = vmatpush3.bf16.msra.mxu1 %v6548_v3  ;;  %v15812_v3 = vld [vmem:[%s20027_s6 + $0x120] sm:$0xff]  }
0x14d6   : > { %9537 = vrot.lane.b32.xlu0 %v18901_v34, %s16011_s27 }
0x14d8   : > { %9336 = vrot.lane.b32.xlu1 %v18911_v1, %s16010_s26 }
0x14da   : > { %9541 = vrot.lane.b32.xlu0 %v18904_v50, %s16011_s27 }
0x14dc   : > { %9535 = vrot.lane.b32.xlu1 %v18898_v27, %s16011_s27  ;;  %v6552_v5 = vpop.permute.xlu0 %6551 }
0x14dd   : > { %v6583_v6 = vsel %vm6581_vm4, %v6552_v5, 0 }
0x14de   : > { %9740 = vrot.lane.b32.xlu0 %v18901_v34, %s16012_s28 }
0x14e0   : > { %9539 = vrot.lane.b32.xlu1 %v18911_v1, %s16011_s27  ;;  %v6899_v55 = vpop.permute.xlu0 %6898  ;;  %s16019_s27 = smov 105  }
0x14e2   : > { %9744 = vrot.lane.b32.xlu0 %v18904_v50, %s16012_s28  ;;  %v6550_v4 = vpop.permute.xlu1 %6549 }
0x14e3   : > { %14453 = vmatprep.subr.bf16.mxu1 %v6550_v4 }
0x14e4   : > { %9738 = vrot.lane.b32.xlu1 %v18898_v27, %s16012_s28  ;;  %14454 = vmatpush3.bf16.msra.mxu1 %v6550_v4  ;;  %v6903_v61 = vpop.permute.xlu0 %6902  ;;  %v15813_v4 = vld [vmem:[%s20027_s6 + $0x128] ss:$0 sps:$4 sm:$0xff]  }
0x14e5   : > { %15581 = vmatprep.subr.msk.bf16.mxu1 %vm6581_vm4, %v6552_v5  ;;  %v6932_v15 = vsel %vm6581_vm4, %v6903_v61, 0  ;;  %v15814_v5 = vld [vmem:[%s20027_s6 + $0x12c] sm:$0xff]  }
0x14e6   : > { %9943 = vrot.lane.b32.xlu0 %v18901_v34, %s16013_s29  ;;  %v6897_v42 = vpop.permute.xlu1 %6896 }
0x14e8   : > { %9742 = vrot.lane.b32.xlu1 %v18911_v1, %s16012_s28  ;;  %14456 = vmatpush3.bf16.msra.mxu1 %v6583_v6  ;;  %s16016_s28 = smov 108   ;;  %v7102_v17 = vpop.permute.xlu0 %7101  ;;  %v15815_v6 = vld [vmem:[%s20027_s6 + $0x134] sm:$0xff]  }
0x14e9   : > { %14473 = vmatprep.subr.bf16.mxu1 %v18898_v27 }
0x14ea   : > { %9947 = vrot.lane.b32.xlu0 %v18904_v50, %s16013_s29  ;;  %v6901_v59 = vpop.permute.xlu1 %6900 }
0x14eb   : > { %14458 = vmatmul.mubr.msk.bf16.vlgmr.msra.gmra.mrb[40].mxu1 %vm6556_vm11, %v15775_v7  ;;  %v15816_v7 = vld [vmem:[%s20027_s6 + $0x13c] sm:$0xff]  }
0x14ec   : > { %9941 = vrot.lane.b32.xlu1 %v18898_v27, %s16013_s29  ;;  %14474 = vmatpush3.bf16.msra.mxu1 %v18898_v27  ;;  %v7106_v20 = vpop.permute.xlu0 %7105 }
0x14ed   : > { %14475 = vmatprep.subr.bf16.mxu1 %v18901_v34  ;;  %14461 = vmatprep.mubr.msk.bf16.mxu1 %vm6556_vm11, %v15776_v8  ;;  %v7135_v21 = vsel %vm6581_vm4, %v7106_v20, 0 }
0x14ee   : > { %10146 = vrot.lane.b32.xlu0 %v18901_v34, %s16014_s16  ;;  %v7100_v63 = vpop.permute.xlu1 %7099 }
0x14f0   : > { %9945 = vrot.lane.b32.xlu1 %v18911_v1, %s16013_s29  ;;  %14476 = vmatpush3.bf16.msra.mxu1 %v18901_v34  ;;  %v7305_v35 = vpop.permute.xlu0 %7304 }
0x14f1   : > { %14477 = vmatprep.subr.bf16.mxu1 %v18911_v1 }
0x14f2   : > { %10150 = vrot.lane.b32.xlu0 %v18904_v50, %s16014_s16  ;;  %v7104_v28 = vpop.permute.xlu1 %7103 }
0x14f3   : > { %14462 = vmatmul.mubr.msk.bf16.gmra.mrb[44].mxu1 %vm6556_vm11, %v15777_v9  ;;  %v15817_v9 = vld [vmem:[%s20027_s6 + $0x144] sm:$0xff]  }
0x14f4   : > { %10144 = vrot.lane.b32.xlu1 %v18898_v27, %s16014_s16  ;;  %14478 = vmatpush3.bf16.msra.mxu1 %v18911_v1 }
0x14f5   : > { %15582 = vmatprep.subr.msk.bf16.mxu1 %vm6581_vm4, %v18904_v50  ;;  %14465 = vmatprep.mubr.msk.bf16.mxu1 %vm6556_vm11, %v15778_v22 }
0x14f6   : > { %10349 = vrot.lane.b32.xlu0 %v18901_v34, %s16015_s23  ;;  %v7303_v36 = vpop.permute.xlu1 %7302 }
0x14f8   : > { %10148 = vrot.lane.b32.xlu1 %v18911_v1, %s16014_s16  ;;  %14480 = vmatpush3.bf16.msra.mxu1 %v6744_v23  ;;  %v15818_v23 = vld [vmem:[%s20027_s6 + $0x14c] sm:$0xff]  }
0x14f9   : > { %14497 = vmatprep.subr.bf16.mxu1 %v6897_v42 }
0x14fa   : > { %10353 = vrot.lane.b32.xlu0 %v18904_v50, %s16015_s23  ;;  %v7307_v25 = vpop.permute.xlu1 %7306 }
0x14fb   : > { %14466 = vmatmul.mubr.msk.bf16.gmra.mrb[48].mxu1 %vm6556_vm11, %v15779_v37 }
0x14fc   : > { %10347 = vrot.lane.b32.xlu1 %v18898_v27, %s16015_s23  ;;  %14469 = vmatprep.mubr.msk.bf16.mxu1 %vm6556_vm11, %v15780_v45  ;;  %v15819_v45 = vld [vmem:[%s20027_s6 + $0x154] sm:$0xff]  }
0x14fe   : > { %10552 = vrot.lane.b32.xlu0 %v18901_v34, %s16016_s28  ;;  %v7506_v40 = vpop.permute.xlu1 %7505 }
0x1500   : > { %10351 = vrot.lane.b32.xlu1 %v18911_v1, %s16015_s23 }
0x1502   : > { %10556 = vrot.lane.b32.xlu0 %v18904_v50, %s16016_s28  ;;  %v7510_v53 = vpop.permute.xlu1 %7509 }
0x1503   : > { %14470 = vmatmul.mubr.msk.bf16.gmra.mrb[52].mxu1 %vm6556_vm11, %v15781_v46 }
0x1504   : > { %10550 = vrot.lane.b32.xlu1 %v18898_v27, %s16016_s28  ;;  %14481 = vmatprep.mubr.msk.bf16.mxu1 %vm6556_vm11, %v15782_v13  ;;  %v15820_v13 = vld [vmem:[%s20027_s6 + $0x15c] sm:$0xff]  }
0x1506   : > { %10755 = vrot.lane.b32.xlu0 %v18901_v34, %s16017_s15  ;;  %v7709_v2 = vpop.permute.xlu1 %7708 }
0x1508   : > { %10554 = vrot.lane.b32.xlu1 %v18911_v1, %s16016_s28 }
0x150a   : > { %10759 = vrot.lane.b32.xlu0 %v18904_v50, %s16017_s15  ;;  %v7713_v22 = vpop.permute.xlu1 %7712 }
0x150b   : > { %14482 = vmatmul.mubr.msk.bf16.vlgmr.msra.gmra.mrb[40].mxu1 %vm6556_vm11, %v15783_v48  ;;  %v15821_v48 = vld [vmem:[%s20027_s6 + $0x164] ss:$0 sps:$4 sm:$0xff]  }
0x150c   : > { %14498 = vmatpush3.bf16.msra.mxu1 %v6897_v42  ;;  %10753 = vrot.lane.b32.xlu1 %v18898_v27, %s16017_s15 }
0x150d   : > { %14499 = vmatprep.subr.bf16.mxu1 %v6899_v55  ;;  %14485 = vmatprep.mubr.msk.bf16.mxu1 %vm6556_vm11, %v15784_v52  ;;  %v15822_v52 = vld [vmem:[%s20027_s6 + $0x168] sm:$0xff]  }
0x150e   : > { %10958 = vrot.lane.b32.xlu0 %v18901_v34, %s16018_s20  ;;  %v7912_v46 = vpop.permute.xlu1 %7911 }
0x1510   : > { %14500 = vmatpush3.bf16.msra.mxu1 %v6899_v55  ;;  %10757 = vrot.lane.b32.xlu1 %v18911_v1, %s16017_s15  ;;  %v15823_v55 = vld [vmem:[%s20027_s6 + $0x170] sm:$0xff]  }
0x1511   : > { %14501 = vmatprep.subr.bf16.mxu1 %v6901_v59 }
0x1512   : > { %10962 = vrot.lane.b32.xlu0 %v18904_v50, %s16018_s20 }
0x1513   : > { %14486 = vmatmul.mubr.msk.bf16.gmra.mrb[44].mxu1 %vm6556_vm11, %v15785_v58  ;;  %v15824_v58 = vld [vmem:[%s20027_s6 + $0x178] sm:$0xff]  }
0x1514   : > { %14502 = vmatpush3.bf16.msra.mxu1 %v6901_v59  ;;  %10956 = vrot.lane.b32.xlu1 %v18898_v27, %s16018_s20 }
0x1515   : > { %15583 = vmatprep.subr.msk.bf16.mxu1 %vm6581_vm4, %v6903_v61  ;;  %14489 = vmatprep.mubr.msk.bf16.mxu1 %vm6556_vm11, %v15786_v49  ;;  %v15825_v49 = vld [vmem:[%s20027_s6 + $0x180] sm:$0xff]   ;;  %v7916_v61 = vpop.permute.xlu1 %7915 }
0x1516   : > { %11161 = vrot.lane.b32.xlu0 %v18901_v34, %s16019_s27 }
0x1518   : > { %14504 = vmatpush3.bf16.msra.mxu1 %v6932_v15  ;;  %10960 = vrot.lane.b32.xlu1 %v18911_v1, %s16018_s20  ;;  %v15826_v15 = vld [vmem:[%s20027_s6 + $0x188] sm:$0xff]  }
0x1519   : > { %14521 = vmatprep.subr.bf16.mxu1 %v7100_v63 }
0x151a   : > { %11165 = vrot.lane.b32.xlu0 %v18904_v50, %s16019_s27 }
0x151b   : > { %14490 = vmatmul.mubr.msk.bf16.gmra.mrb[48].mxu1 %vm6556_vm11, %v15787_v62 }
0x151c   : > { %11159 = vrot.lane.b32.xlu1 %v18898_v27, %s16019_s27  ;;  %14493 = vmatprep.mubr.msk.bf16.mxu1 %vm6556_vm11, %v15788_v60  ;;  %v15827_v60 = vld [vmem:[%s20027_s6 + $0x190] sm:$0xff]  }
0x151e   : > { %11364 = vrot.lane.b32.xlu0 %v18901_v34, %s16020_s14  ;;  %v7309_v34 = vpop.permute.xlu0 %7308 }
0x151f   : > { %v7338_v38 = vsel %vm6581_vm4, %v7309_v34, 0 }
0x1520   : > { %11163 = vrot.lane.b32.xlu1 %v18911_v1, %s16019_s27 }
0x1522   : > { %11368 = vrot.lane.b32.xlu0 %v18904_v50, %s16020_s14  ;;  %v7508_v50 = vpop.permute.xlu0 %7507 }
0x1523   : > { %14494 = vmatmul.mubr.msk.bf16.gmra.mrb[56].mxu1 %vm6556_vm11, %v15789_v12  ;;  %v8115_v12 = vpop.permute.xlu1 %8114 }
0x1524   : > { %11362 = vrot.lane.b32.xlu1 %v18898_v27, %s16020_s14  ;;  %14505 = vmatprep.mubr.msk.bf16.mxu1 %vm6556_vm11, %v15790_v14  ;;  %v15800_v27 = vld [vmem:[%s20027_s6 + $0xc4] sm:$0xff]   ;;  %v15828_v14 = vld [vmem:[%s20027_s6 + $0x198] sm:$0xff]  }
0x1526   : > { %v7512_v56 = vpop.permute.xlu0 %7511 }
0x1527   : > { %v7541_v57 = vsel %vm6581_vm4, %v7512_v56, 0 }
0x1528   : > { %11366 = vrot.lane.b32.xlu1 %v18911_v1, %s16020_s14  ;;  %v15811_v1 = vld [vmem:[%s20027_s6 + $0x118] sm:$0xff]  }
0x152a   : > { %v7711_v8 = vpop.permute.xlu0 %7710 }
0x152b   : > { %14506 = vmatmul.mubr.msk.bf16.vlgmr.msra.gmra.mrb[40].mxu1 %vm6556_vm11, %v15791_v32  ;;  %v15829_v32 = vld [vmem:[%s20027_s6 + $0x1a0] ss:$0 sps:$4 sm:$0xff]  }
0x152c   : > { %14522 = vmatpush3.bf16.msra.mxu1 %v7100_v63  ;;  %14509 = vmatprep.mubr.msk.bf16.mxu1 %vm6556_vm11, %v15792_v16  ;;  %v15830_v16 = vld [vmem:[%s20027_s6 + $0x1a4] sm:$0xff]  }
0x152d   : > { %14523 = vmatprep.subr.bf16.mxu1 %v7102_v17 }
0x152e   : > { %v7715_v37 = vpop.permute.xlu0 %7714 }
0x152f   : > { %v7744_v42 = vsel %vm6581_vm4, %v7715_v37, 0 }
0x1530   : > { %14524 = vmatpush3.bf16.msra.mxu1 %v7102_v17  ;;  %v15831_v17 = vld [vmem:[%s20027_s6 + $0x1ac] sm:$0xff]  }
0x1531   : > { %14525 = vmatprep.subr.bf16.mxu1 %v7104_v28 }
0x1532   : > { %v7914_v59 = vpop.permute.xlu0 %7913 }
0x1533   : > { %14510 = vmatmul.mubr.msk.bf16.gmra.mrb[44].mxu1 %vm6556_vm11, %v15793_v18  ;;  %v15832_v18 = vld [vmem:[%s20027_s6 + $0x1b4] sm:$0xff]  }
0x1534   : > { %14526 = vmatpush3.bf16.msra.mxu1 %v7104_v28  ;;  %14513 = vmatprep.mubr.msk.bf16.mxu1 %vm6556_vm11, %v15794_v19  ;;  %v15833_v19 = vld [vmem:[%s20027_s6 + $0x1bc] sm:$0xff]  }
0x1535   : > { %15584 = vmatprep.subr.msk.bf16.mxu1 %vm6581_vm4, %v7106_v20  ;;  %v8119_v20 = vpop.permute.xlu1 %8118 }
0x1536   : > { %v7918_v62 = vpop.permute.xlu0 %7917 }
0x1537   : > { %v7947_v63 = vsel %vm6581_vm4, %v7918_v62, 0 }
0x1538   : > { %14528 = vmatpush3.bf16.msra.mxu1 %v7135_v21  ;;  %v15834_v21 = vld [vmem:[%s20027_s6 + $0x1c4] sm:$0xff]  }
0x1539   : > { %14545 = vmatprep.subr.bf16.mxu1 %v7303_v36 }
0x153a   : > { %v8117_v28 = vpop.permute.xlu0 %8116 }
0x153b   : > { %14514 = vmatmul.mubr.msk.bf16.gmra.mrb[48].mxu1 %vm6556_vm11, %v15795_v24 }
0x153c   : > { %14517 = vmatprep.mubr.msk.bf16.mxu1 %vm6556_vm11, %v15796_v26 }
0x153e   : > { %v8121_v24 = vpop.permute.xlu0 %8120 }
0x153f   : > { %v8150_v26 = vsel %vm6581_vm4, %v8121_v24, 0 }
0x1543   : > { %14518 = vmatmul.mubr.msk.bf16.gmra.mrb[60].mxu1 %vm6556_vm11, %v15797_v29 }
0x1544   : > { %14529 = vmatprep.mubr.msk.bf16.mxu1 %vm6556_vm11, %v15798_v30  ;;  %v15835_v30 = vld [vmem:[%s20027_s6 + $0x1cc] sm:$0xff]  }
0x154b   : > { %14530 = vmatmul.mubr.msk.bf16.vlgmr.msra.gmra.mrb[40].mxu1 %vm6556_vm11, %v15799_v31  ;;  %v8318_v31 = vpop.permute.xlu1 %8317 }
0x154c   : > { %14546 = vmatpush3.bf16.msra.mxu1 %v7303_v36  ;;  %14533 = vmatprep.mubr.msk.bf16.mxu1 %vm6556_vm11, %v15800_v27 }
0x154d   : > { %14547 = vmatprep.subr.bf16.mxu1 %v7305_v35 }
0x1550   : > { %14548 = vmatpush3.bf16.msra.mxu1 %v7305_v35  ;;  %v15836_v35 = vld [vmem:[%s20027_s6 + $0x1d4] sm:$0xff]  }
0x1551   : > { %14549 = vmatprep.subr.bf16.mxu1 %v7307_v25 }
0x1553   : > { %14534 = vmatmul.mubr.msk.bf16.gmra.mrb[44].mxu1 %vm6556_vm11, %v15801_v11 }
0x1554   : > { %14550 = vmatpush3.bf16.msra.mxu1 %v7307_v25  ;;  %14537 = vmatprep.mubr.msk.bf16.mxu1 %vm6556_vm11, %v15802_v33  ;;  %v15837_v25 = vld [vmem:[%s20027_s6 + $0x1dc] ss:$0 sps:$4 sm:$0xff]   ;;  %v15838_v33 = vld [vmem:[%s20027_s6 + $0x1e0] sm:$0xff]  }
0x1555   : > { %15585 = vmatprep.subr.msk.bf16.mxu1 %vm6581_vm4, %v7309_v34  ;;  %v15839_v34 = vld [vmem:[%s20027_s6 + $0x1e8] sm:$0xff]  }
0x1558   : > { %14552 = vmatpush3.bf16.msra.mxu1 %v7338_v38  ;;  %v15840_v38 = vld [vmem:[%s20027_s6 + $0x1f0] sm:$0xff]  }
0x1559   : > { %14569 = vmatprep.subr.bf16.mxu1 %v7506_v40 }
0x155b   : > { %14538 = vmatmul.mubr.msk.bf16.gmra.mrb[48].mxu1 %vm6556_vm11, %v15803_v39  ;;  %v8320_v39 = vpop.permute.xlu0 %8319 }
0x155c   : > { %14541 = vmatprep.mubr.msk.bf16.mxu1 %vm6556_vm11, %v15804_v41  ;;  %v8322_v41 = vpop.permute.xlu1 %8321 }
0x1563   : > { %14542 = vmatmul.mubr.msk.bf16.gmra.mrb[64].mxu1 %vm6556_vm11, %v15805_v43  ;;  %v15842_v43 = vld [vmem:[%s20027_s6 + $0x200] sm:$0xff]  }
0x1564   : > { %14553 = vmatprep.mubr.msk.bf16.mxu1 %vm6556_vm11, %v15806_v44  ;;  %v8324_v44 = vpop.permute.xlu0 %8323 }
0x156b   : > { %14554 = vmatmul.mubr.msk.bf16.vlgmr.msra.gmra.mrb[40].mxu1 %vm6556_vm11, %v15807_v0 }
0x156c   : > { %14570 = vmatpush3.bf16.msra.mxu1 %v7506_v40  ;;  %14557 = vmatprep.mubr.msk.bf16.mxu1 %vm6556_vm11, %v15808_v47  ;;  %v15841_v40 = vld [vmem:[%s20027_s6 + $0x1f8] sm:$0xff]   ;;  %v8353_v47 = vsel %vm6581_vm4, %v8324_v44, 0 }
0x156d   : > { %14571 = vmatprep.subr.bf16.mxu1 %v7508_v50 }
0x1570   : > { %14572 = vmatpush3.bf16.msra.mxu1 %v7508_v50 }
0x1571   : > { %14573 = vmatprep.subr.bf16.mxu1 %v7510_v53 }
0x1573   : > { %14558 = vmatmul.mubr.msk.bf16.gmra.mrb[44].mxu1 %vm6556_vm11, %v15809_v51 }
0x1574   : > { %14574 = vmatpush3.bf16.msra.mxu1 %v7510_v53  ;;  %14561 = vmatprep.mubr.msk.bf16.mxu1 %vm6556_vm11, %v15810_v54  ;;  %v15843_v53 = vld [vmem:[%s20027_s6 + $0x208] sm:$0xff]   ;;  %v8521_v54 = vpop.permute.xlu1 %8520 }
0x1575   : > { %15586 = vmatprep.subr.msk.bf16.mxu1 %vm6581_vm4, %v7512_v56 }
0x1578   : > { %14576 = vmatpush3.bf16.msra.mxu1 %v7541_v57 }
0x1579   : > { %14593 = vmatprep.subr.bf16.mxu1 %v7709_v2 }
0x157b   : > { %14562 = vmatmul.mubr.msk.bf16.gmra.mrb[48].mxu1 %vm6556_vm11, %v15811_v1  ;;  %v15844_v1 = vld [vmem:[%s20027_s6 + $0x210] sm:$0xff]  }
0x157c   : > { %14565 = vmatprep.mubr.msk.bf16.mxu1 %vm6556_vm11, %v15812_v3 }
0x1583   : > { %14566 = vmatmul.mubr.msk.bf16.gmra.mrb[68].mxu1 %vm6556_vm11, %v15813_v4  ;;  %v15845_v4 = vld [vmem:[%s20027_s6 + $0x218] ss:$0 sps:$4 sm:$0xff]  }
0x1584   : > { %14577 = vmatprep.mubr.msk.bf16.mxu1 %vm6556_vm11, %v15814_v5  ;;  %v15846_v5 = vld [vmem:[%s20027_s6 + $0x21c] sm:$0xff]  }
0x158b   : > { %14578 = vmatmul.mubr.msk.bf16.vlgmr.msra.gmra.mrb[40].mxu1 %vm6556_vm11, %v15815_v6  ;;  %v15847_v6 = vld [vmem:[%s20027_s6 + $0x224] sm:$0xff]  }
0x158c   : > { %14594 = vmatpush3.bf16.msra.mxu1 %v7709_v2  ;;  %14581 = vmatprep.mubr.msk.bf16.mxu1 %vm6556_vm11, %v15816_v7  ;;  %v15848_v7 = vld [vmem:[%s20027_s6 + $0x22c] sm:$0xff]  }
0x158d   : > { %14595 = vmatprep.subr.bf16.mxu1 %v7711_v8 }
0x1590   : > { %14596 = vmatpush3.bf16.msra.mxu1 %v7711_v8  ;;  %v8523_v8 = vpop.permute.xlu0 %8522 }
0x1591   : > { %14597 = vmatprep.subr.bf16.mxu1 %v7713_v22 }
0x1593   : > { %14582 = vmatmul.mubr.msk.bf16.gmra.mrb[44].mxu1 %vm6556_vm11, %v15817_v9  ;;  %v15849_v9 = vld [vmem:[%s20027_s6 + $0x234] sm:$0xff]  }
0x1594   : > { %14598 = vmatpush3.bf16.msra.mxu1 %v7713_v22  ;;  %14585 = vmatprep.mubr.msk.bf16.mxu1 %vm6556_vm11, %v15818_v23  ;;  %v8525_v22 = vpop.permute.xlu1 %8524  ;;  %v15850_v23 = vld [vmem:[%s20027_s6 + $0x23c] sm:$0xff]  }
0x1595   : > { %15587 = vmatprep.subr.msk.bf16.mxu1 %vm6581_vm4, %v7715_v37  ;;  %v8527_v37 = vpop.permute.xlu0 %8526 }
0x1598   : > { %14600 = vmatpush3.bf16.msra.mxu1 %v7744_v42 }
0x1599   : > { %14617 = vmatprep.subr.bf16.mxu1 %v7912_v46 }
0x159b   : > { %14586 = vmatmul.mubr.msk.bf16.gmra.mrb[48].mxu1 %vm6556_vm11, %v15819_v45  ;;  %v8556_v45 = vsel %vm6581_vm4, %v8527_v37, 0 }
0x159c   : > { %14589 = vmatprep.mubr.msk.bf16.mxu1 %vm6556_vm11, %v15820_v13 }
0x15a3   : > { %14590 = vmatmul.mubr.msk.bf16.gmra.mrb[72].mxu1 %vm6556_vm11, %v15821_v48  ;;  %v15851_v48 = vld [vmem:[%s20027_s6 + $0x244] sm:$0xff]  }
0x15a4   : > { %14601 = vmatprep.mubr.msk.bf16.mxu1 %vm6556_vm11, %v15822_v52  ;;  %v8724_v52 = vpop.permute.xlu1 %8723 }
0x15ab   : > { %14602 = vmatmul.mubr.msk.bf16.vlgmr.msra.gmra.mrb[40].mxu1 %vm6556_vm11, %v15823_v55 }
0x15ac   : > { %14618 = vmatpush3.bf16.msra.mxu1 %v7912_v46  ;;  %14605 = vmatprep.mubr.msk.bf16.mxu1 %vm6556_vm11, %v15824_v58 }
0x15ad   : > { %14619 = vmatprep.subr.bf16.mxu1 %v7914_v59 }
0x15b0   : > { %14620 = vmatpush3.bf16.msra.mxu1 %v7914_v59  ;;  %v15852_v59 = vld [vmem:[%s20027_s6 + $0x24c] sm:$0xff]  }
0x15b1   : > { %14621 = vmatprep.subr.bf16.mxu1 %v7916_v61 }
0x15b3   : > { %14606 = vmatmul.mubr.msk.bf16.gmra.mrb[44].mxu1 %vm6556_vm11, %v15825_v49 }
0x15b4   : > { %14622 = vmatpush3.bf16.msra.mxu1 %v7916_v61  ;;  %14609 = vmatprep.mubr.msk.bf16.mxu1 %vm6556_vm11, %v15826_v15  ;;  %v15853_v15 = vld [vmem:[%s20027_s6 + $0x254] ss:$0 sps:$4 sm:$0xff]  }
0x15b5   : > { %15588 = vmatprep.subr.msk.bf16.mxu1 %vm6581_vm4, %v7918_v62  ;;  %v15854_v62 = vld [vmem:[%s20027_s6 + $0x258] sm:$0xff]  }
0x15b8   : > { %14624 = vmatpush3.bf16.msra.mxu1 %v7947_v63  ;;  %v15855_v63 = vld [vmem:[%s20027_s6 + $0x260] sm:$0xff]  }
0x15b9   : > { %14641 = vmatprep.subr.bf16.mxu1 %v8115_v12 }
0x15bb   : > { %14610 = vmatmul.mubr.msk.bf16.gmra.mrb[48].mxu1 %vm6556_vm11, %v15827_v60  ;;  %v15856_v60 = vld [vmem:[%s20027_s6 + $0x268] sm:$0xff]  }
0x15bc   : > { %14613 = vmatprep.mubr.msk.bf16.mxu1 %vm6556_vm11, %v15828_v14  ;;  %v15857_v14 = vld [vmem:[%s20027_s6 + $0x270] sm:$0xff]  }
0x15c3   : > { %14614 = vmatmul.mubr.msk.bf16.gmra.mrb[76].mxu1 %vm6556_vm11, %v15829_v32  ;;  %v8728_v32 = vpop.permute.xlu1 %8727 }
0x15c4   : > { %14625 = vmatprep.mubr.msk.bf16.mxu1 %vm6556_vm11, %v15830_v16  ;;  %v15858_v16 = vld [vmem:[%s20027_s6 + $0x278] sm:$0xff]  }
0x15cb   : > { %14626 = vmatmul.mubr.msk.bf16.vlgmr.msra.gmra.mrb[40].mxu1 %vm6556_vm11, %v15831_v17 }
0x15cc   : > { %14642 = vmatpush3.bf16.msra.mxu1 %v8115_v12  ;;  %14629 = vmatprep.mubr.msk.bf16.mxu1 %vm6556_vm11, %v15832_v18  ;;  %v8726_v12 = vpop.permute.xlu0 %8725 }
0x15cd   : > { %14643 = vmatprep.subr.bf16.mxu1 %v8117_v28 }
0x15d0   : > { %14644 = vmatpush3.bf16.msra.mxu1 %v8117_v28  ;;  %v8730_v17 = vpop.permute.xlu0 %8729 }
0x15d1   : > { %14645 = vmatprep.subr.bf16.mxu1 %v8119_v20  ;;  %v8759_v28 = vsel %vm6581_vm4, %v8730_v17, 0 }
0x15d3   : > { %14630 = vmatmul.mubr.msk.bf16.gmra.mrb[44].mxu1 %vm6556_vm11, %v15833_v19 }
0x15d4   : > { %14646 = vmatpush3.bf16.msra.mxu1 %v8119_v20  ;;  %14633 = vmatprep.mubr.msk.bf16.mxu1 %vm6556_vm11, %v15834_v21  ;;  %v15859_v21 = vld [vmem:[%s20027_s6 + $0x280] sm:$0xff]  }
0x15d5   : > { %15589 = vmatprep.subr.msk.bf16.mxu1 %vm6581_vm4, %v8121_v24  ;;  %v8927_v24 = vpop.permute.xlu1 %8926 }
0x15d6   : > { %v14471_v36 = vpop.f32.mrb[52].mxu1 }
0x15d7   : > { %v6667_v29 = vpop.f32.mrb[53].mxu1 }
0x15d8   : > { %14648 = vmatpush3.bf16.msra.mxu1 %v8150_v26  ;;  %v14472_v27 = vpop.f32.mrb[54].mxu1 }
0x15d9   : > { %14665 = vmatprep.subr.bf16.mxu1 %v8318_v31  ;;  %v6670_v11 = vpop.f32.mrb[55].mxu1  ;;  %v15861_v27 = vld [vmem:[%s20027_s6 + $0x290] ss:$0 sps:$4 sm:$0xff]  }
0x15db   : > { %14634 = vmatmul.mubr.msk.bf16.gmra.mrb[48].mxu1 %vm6556_vm11, %v15835_v30 }
0x15dc   : > { %14637 = vmatprep.mubr.msk.bf16.mxu1 %vm6556_vm11, %v15836_v35  ;;  %v15862_v35 = vld [vmem:[%s20027_s6 + $0x294] sm:$0xff]  }
0x15e3   : > { %14638 = vmatmul.mubr.msk.bf16.gmra.mrb[80].mxu1 %vm6556_vm11, %v15837_v25  ;;  %v15864_v25 = vld [vmem:[%s20027_s6 + $0x2a4] sm:$0xff]  }
0x15e4   : > { %14649 = vmatprep.mubr.msk.bf16.mxu1 %vm6556_vm11, %v15838_v33  ;;  %v8929_v33 = vpop.permute.xlu0 %8928 }
0x15eb   : > { %14650 = vmatmul.mubr.msk.bf16.vlgmr.msra.gmra.mrb[40].mxu1 %vm6556_vm11, %v15839_v34  ;;  %v15865_v34 = vld [vmem:[%s20027_s6 + $0x2ac] sm:$0xff]  }
0x15ec   : > { %14666 = vmatpush3.bf16.msra.mxu1 %v8318_v31  ;;  %14653 = vmatprep.mubr.msk.bf16.mxu1 %vm6556_vm11, %v15840_v38  ;;  %v8931_v38 = vpop.permute.xlu1 %8930 }
0x15ed   : > { %14667 = vmatprep.subr.bf16.mxu1 %v8320_v39 }
0x15f0   : > { %14668 = vmatpush3.bf16.msra.mxu1 %v8320_v39  ;;  %v15866_v39 = vld [vmem:[%s20027_s6 + $0x2b4] sm:$0xff]  }
0x15f1   : > { %14669 = vmatprep.subr.bf16.mxu1 %v8322_v41 }
0x15f3   : > { %14654 = vmatmul.mubr.msk.bf16.gmra.mrb[44].mxu1 %vm6556_vm11, %v15841_v40  ;;  %v8933_v40 = vpop.permute.xlu0 %8932 }
0x15f4   : > { %14670 = vmatpush3.bf16.msra.mxu1 %v8322_v41  ;;  %14657 = vmatprep.mubr.msk.bf16.mxu1 %vm6556_vm11, %v15842_v43  ;;  %v8962_v43 = vsel %vm6581_vm4, %v8933_v40, 0 }
0x15f5   : > { %15590 = vmatprep.subr.msk.bf16.mxu1 %vm6581_vm4, %v8324_v44 }
0x15f6   : > { %v14495_v0 = vpop.f32.mrb[56].mxu1 }
0x15f7   : > { %v6837_v50 = vadd.f32 %v14495_v0, %v14471_v36  ;;  %v6828_v51 = vpop.f32.mrb[57].mxu1 }
0x15f8   : > { %v6829_v56 = vadd.f32 %v6828_v51, %v6667_v29  ;;  %14672 = vmatpush3.bf16.msra.mxu1 %v8353_v47  ;;  %v14496_v57 = vpop.f32.mrb[58].mxu1  ;;  %v15860_v29 = vld [vmem:[%s20027_s6 + $0x288] sm:$0xff]   ;;  %v15867_v47 = vld [vmem:[%s20027_s6 + $0x2bc] sm:$0xff]  }
0x15f9   : > { %14689 = vmatprep.subr.bf16.mxu1 %v8521_v54  ;;  %v6831_v2 = vpop.f32.mrb[59].mxu1 }
0x15fa   : > { %v6832_v3 = vadd.f32 %v6831_v2, %v6670_v11  ;;  %v15863_v11 = vld [vmem:[%s20027_s6 + $0x29c] sm:$0xff]   ;;  %v15870_v2 = vld [vmem:[%s20027_s6 + $0x2d0] sm:$0xff]  }
0x15fb   : > { %14658 = vmatmul.mubr.msk.bf16.gmra.mrb[48].mxu1 %vm6556_vm11, %v15843_v53 }
0x15fc   : > { %14661 = vmatprep.mubr.msk.bf16.mxu1 %vm6556_vm11, %v15844_v1  ;;  %v15869_v1 = vld [vmem:[%s20027_s6 + $0x2cc] ss:$0 sps:$4 sm:$0xff]  }
0x1603   : > { %14662 = vmatmul.mubr.msk.bf16.gmra.mrb[84].mxu1 %vm6556_vm11, %v15845_v4  ;;  %v15872_v4 = vld [vmem:[%s20027_s6 + $0x2e0] sm:$0xff]  }
0x1604   : > { %14673 = vmatprep.mubr.msk.bf16.mxu1 %vm6556_vm11, %v15846_v5  ;;  %v9132_v5 = vpop.permute.xlu0 %9131 }
0x160b   : > { %14674 = vmatmul.mubr.msk.bf16.vlgmr.msra.gmra.mrb[40].mxu1 %vm6556_vm11, %v15847_v6  ;;  %v15873_v6 = vld [vmem:[%s20027_s6 + $0x2e8] sm:$0xff]  }
0x160c   : > { %14690 = vmatpush3.bf16.msra.mxu1 %v8521_v54  ;;  %14677 = vmatprep.mubr.msk.bf16.mxu1 %vm6556_vm11, %v15848_v7  ;;  %v15868_v54 = vld [vmem:[%s20027_s6 + $0x2c4] sm:$0xff]  }
0x160d   : > { %14691 = vmatprep.subr.bf16.mxu1 %v8523_v8 }
0x1610   : > { %14692 = vmatpush3.bf16.msra.mxu1 %v8523_v8  ;;  %v15874_v8 = vld [vmem:[%s20027_s6 + $0x2f0] sm:$0xff]  }
0x1611   : > { %14693 = vmatprep.subr.bf16.mxu1 %v8525_v22 }
0x1613   : > { %14678 = vmatmul.mubr.msk.bf16.gmra.mrb[44].mxu1 %vm6556_vm11, %v15849_v9  ;;  %v9136_v9 = vpop.permute.xlu0 %9135 }
0x1614   : > { %14694 = vmatpush3.bf16.msra.mxu1 %v8525_v22  ;;  %14681 = vmatprep.mubr.msk.bf16.mxu1 %vm6556_vm11, %v15850_v23  ;;  %v9165_v23 = vsel %vm6581_vm4, %v9136_v9, 0 }
0x1615   : > { %15591 = vmatprep.subr.msk.bf16.mxu1 %vm6581_vm4, %v8527_v37 }
0x1616   : > { %v14519_v42 = vpop.f32.mrb[60].mxu1 }
0x1617   : > { %v7044_v46 = vadd.f32 %v14519_v42, %v6837_v50  ;;  %v7016_v13 = vpop.f32.mrb[61].mxu1  ;;  %v9130_v50 = vpop.permute.xlu1 %9129 }
0x1618   : > { %v7042_v55 = vadd.f32 %v7016_v13, %v6829_v56  ;;  %14696 = vmatpush3.bf16.msra.mxu1 %v8556_v45  ;;  %v14520_v58 = vpop.f32.mrb[62].mxu1  ;;  %v15875_v45 = vld [vmem:[%s20027_s6 + $0x2f8] sm:$0xff]  }
0x1619   : > { %14713 = vmatprep.subr.bf16.mxu1 %v8724_v52  ;;  %v7019_v49 = vpop.f32.mrb[63].mxu1 }
0x161a   : > { %v7043_v61 = vadd.f32 %v7019_v49, %v6832_v3  ;;  %v15871_v3 = vld [vmem:[%s20027_s6 + $0x2d8] sm:$0xff]   ;;  %v15878_v49 = vld [vmem:[%s20027_s6 + $0x30c] sm:$0xff]  }
0x161b   : > { %14682 = vmatmul.mubr.msk.bf16.gmra.mrb[48].mxu1 %vm6556_vm11, %v15851_v48  ;;  %v9134_v7 = vpop.permute.xlu1 %9133 }
0x161c   : > { %14685 = vmatprep.mubr.msk.bf16.mxu1 %vm6556_vm11, %v15852_v59  ;;  %v15877_v59 = vld [vmem:[%s20027_s6 + $0x308] ss:$0 sps:$4 sm:$0xff]  }
0x1623   : > { %14686 = vmatmul.mubr.msk.bf16.gmra.mrb[88].mxu1 %vm6556_vm11, %v15853_v15  ;;  %v15880_v15 = vld [vmem:[%s20027_s6 + $0x31c] sm:$0xff]  }
0x1624   : > { %14697 = vmatprep.mubr.msk.bf16.mxu1 %vm6556_vm11, %v15854_v62  ;;  %v9335_v62 = vpop.permute.xlu0 %9334 }
0x162b   : > { %14698 = vmatmul.mubr.msk.bf16.vlgmr.msra.gmra.mrb[40].mxu1 %vm6556_vm11, %v15855_v63  ;;  %v15881_v63 = vld [vmem:[%s20027_s6 + $0x324] sm:$0xff]  }
0x162c   : > { %14714 = vmatpush3.bf16.msra.mxu1 %v8724_v52  ;;  %14701 = vmatprep.mubr.msk.bf16.mxu1 %vm6556_vm11, %v15856_v60  ;;  %v15876_v52 = vld [vmem:[%s20027_s6 + $0x300] sm:$0xff]  }
0x162d   : > { %14715 = vmatprep.subr.bf16.mxu1 %v8726_v12 }
0x1630   : > { %14716 = vmatpush3.bf16.msra.mxu1 %v8726_v12  ;;  %v15882_v12 = vld [vmem:[%s20027_s6 + $0x32c] sm:$0xff]  }
0x1631   : > { %14717 = vmatprep.subr.bf16.mxu1 %v8728_v32 }
0x1633   : > { %14702 = vmatmul.mubr.msk.bf16.gmra.mrb[44].mxu1 %vm6556_vm11, %v15857_v14  ;;  %v9339_v14 = vpop.permute.xlu0 %9338 }
0x1634   : > { %14718 = vmatpush3.bf16.msra.mxu1 %v8728_v32  ;;  %14705 = vmatprep.mubr.msk.bf16.mxu1 %vm6556_vm11, %v15858_v16  ;;  %v9368_v16 = vsel %vm6581_vm4, %v9339_v14, 0 }
0x1635   : > { %15592 = vmatprep.subr.msk.bf16.mxu1 %vm6581_vm4, %v8730_v17 }
0x1636   : > { %v14543_v18 = vpop.f32.mrb[64].mxu1 }
0x1637   : > { %v7247_v19 = vadd.f32 %v14543_v18, %v7044_v46  ;;  %v7219_v20 = vpop.f32.mrb[65].mxu1  ;;  %v9333_v46 = vpop.permute.xlu1 %9332 }
0x1638   : > { %v7245_v36 = vadd.f32 %v7219_v20, %v7042_v55  ;;  %14720 = vmatpush3.bf16.msra.mxu1 %v8759_v28  ;;  %v14544_v26 = vpop.f32.mrb[66].mxu1  ;;  %v15883_v28 = vld [vmem:[%s20027_s6 + $0x334] sm:$0xff]  }
0x1639   : > { %14737 = vmatprep.subr.bf16.mxu1 %v8927_v24  ;;  %v7222_v30 = vpop.f32.mrb[67].mxu1 }
0x163a   : > { %v7246_v31 = vadd.f32 %v7222_v30, %v7043_v61  ;;  %v15879_v61 = vld [vmem:[%s20027_s6 + $0x314] sm:$0xff]   ;;  %v15886_v30 = vld [vmem:[%s20027_s6 + $0x348] sm:$0xff]  }
0x163b   : > { %14706 = vmatmul.mubr.msk.bf16.gmra.mrb[48].mxu1 %vm6556_vm11, %v15859_v21  ;;  %v9337_v60 = vpop.permute.xlu1 %9336 }
0x163c   : > { %14709 = vmatprep.mubr.msk.bf16.mxu1 %vm6556_vm11, %v15860_v29  ;;  %v15885_v29 = vld [vmem:[%s20027_s6 + $0x344] ss:$0 sps:$4 sm:$0xff]  }
0x1643   : > { %14710 = vmatmul.mubr.msk.bf16.gmra.mrb[92].mxu1 %vm6556_vm11, %v15861_v27  ;;  %v15888_v27 = vld [vmem:[%s20027_s6 + $0x358] sm:$0xff]  }
0x1644   : > { %14721 = vmatprep.mubr.msk.bf16.mxu1 %vm6556_vm11, %v15862_v35  ;;  %v9538_v35 = vpop.permute.xlu0 %9537 }
0x164b   : > { %14722 = vmatmul.mubr.msk.bf16.vlgmr.msra.gmra.mrb[40].mxu1 %vm6556_vm11, %v15863_v11  ;;  %v15889_v11 = vld [vmem:[%s20027_s6 + $0x360] sm:$0xff]  }
0x164c   : > { %14738 = vmatpush3.bf16.msra.mxu1 %v8927_v24  ;;  %14725 = vmatprep.mubr.msk.bf16.mxu1 %vm6556_vm11, %v15864_v25  ;;  %v15884_v24 = vld [vmem:[%s20027_s6 + $0x33c] sm:$0xff]  }
0x164d   : > { %14739 = vmatprep.subr.bf16.mxu1 %v8929_v33 }
0x1650   : > { %14740 = vmatpush3.bf16.msra.mxu1 %v8929_v33  ;;  %v15890_v33 = vld [vmem:[%s20027_s6 + $0x368] sm:$0xff]  }
0x1651   : > { %14741 = vmatprep.subr.bf16.mxu1 %v8931_v38 }
0x1653   : > { %14726 = vmatmul.mubr.msk.bf16.gmra.mrb[44].mxu1 %vm6556_vm11, %v15865_v34  ;;  %v9542_v34 = vpop.permute.xlu0 %9541 }
0x1654   : > { %14742 = vmatpush3.bf16.msra.mxu1 %v8931_v38  ;;  %14729 = vmatprep.mubr.msk.bf16.mxu1 %vm6556_vm11, %v15866_v39  ;;  %v9571_v39 = vsel %vm6581_vm4, %v9542_v34, 0 }
0x1655   : > { %15593 = vmatprep.subr.msk.bf16.mxu1 %vm6581_vm4, %v8933_v40 }
0x1656   : > { %v14567_v41 = vpop.f32.mrb[68].mxu1 }
0x1657   : > { %v7450_v44 = vadd.f32 %v14567_v41, %v7247_v19  ;;  %v7422_v0 = vpop.f32.mrb[69].mxu1  ;;  %v9536_v19 = vpop.permute.xlu1 %9535 }
0x1658   : > { %v7448_v51 = vadd.f32 %v7422_v0, %v7245_v36  ;;  %14744 = vmatpush3.bf16.msra.mxu1 %v8962_v43  ;;  %v14568_v53 = vpop.f32.mrb[70].mxu1  ;;  %v15891_v43 = vld [vmem:[%s20027_s6 + $0x370] sm:$0xff]  }
0x1659   : > { %14761 = vmatprep.subr.bf16.mxu1 %v9130_v50  ;;  %v7425_v56 = vpop.f32.mrb[71].mxu1 }
0x165a   : > { %v7449_v57 = vadd.f32 %v7425_v56, %v7246_v31  ;;  %v15887_v31 = vld [vmem:[%s20027_s6 + $0x350] sm:$0xff]   ;;  %v15894_v56 = vld [vmem:[%s20027_s6 + $0x384] sm:$0xff]  }
0x165b   : > { %14730 = vmatmul.mubr.msk.bf16.gmra.mrb[48].mxu1 %vm6556_vm11, %v15867_v47  ;;  %v9540_v25 = vpop.permute.xlu1 %9539 }
0x165c   : > { %14733 = vmatprep.mubr.msk.bf16.mxu1 %vm6556_vm11, %v15868_v54  ;;  %v15893_v54 = vld [vmem:[%s20027_s6 + $0x380] ss:$0 sps:$4 sm:$0xff]  }
0x1663   : > { %14734 = vmatmul.mubr.msk.bf16.gmra.mrb[96].mxu1 %vm6556_vm11, %v15869_v1  ;;  %v15896_v1 = vld [vmem:[%s20027_s6 + $0x394] sm:$0xff]  }
0x1664   : > { %14745 = vmatprep.mubr.msk.bf16.mxu1 %vm6556_vm11, %v15870_v2  ;;  %v9741_v2 = vpop.permute.xlu0 %9740 }
0x166b   : > { %14746 = vmatmul.mubr.msk.bf16.vlgmr.msra.gmra.mrb[40].mxu1 %vm6556_vm11, %v15871_v3  ;;  %v15897_v3 = vld [vmem:[%s20027_s6 + $0x39c] sm:$0xff]  }
0x166c   : > { %14762 = vmatpush3.bf16.msra.mxu1 %v9130_v50  ;;  %14749 = vmatprep.mubr.msk.bf16.mxu1 %vm6556_vm11, %v15872_v4  ;;  %v15892_v50 = vld [vmem:[%s20027_s6 + $0x378] sm:$0xff]  }
0x166d   : > { %14763 = vmatprep.subr.bf16.mxu1 %v9132_v5 }
0x1670   : > { %14764 = vmatpush3.bf16.msra.mxu1 %v9132_v5  ;;  %v15898_v5 = vld [vmem:[%s20027_s6 + $0x3a4] sm:$0xff]  }
0x1671   : > { %14765 = vmatprep.subr.bf16.mxu1 %v9134_v7 }
0x1673   : > { %14750 = vmatmul.mubr.msk.bf16.gmra.mrb[44].mxu1 %vm6556_vm11, %v15873_v6  ;;  %v9745_v6 = vpop.permute.xlu0 %9744 }
0x1674   : > { %14766 = vmatpush3.bf16.msra.mxu1 %v9134_v7  ;;  %14753 = vmatprep.mubr.msk.bf16.mxu1 %vm6556_vm11, %v15874_v8  ;;  %v9774_v8 = vsel %vm6581_vm4, %v9745_v6, 0 }
0x1675   : > { %15594 = vmatprep.subr.msk.bf16.mxu1 %vm6581_vm4, %v9136_v9 }
0x1676   : > { %v14591_v22 = vpop.f32.mrb[72].mxu1 }
0x1677   : > { %v7653_v37 = vadd.f32 %v14591_v22, %v7450_v44  ;;  %v7625_v42 = vpop.f32.mrb[73].mxu1  ;;  %v9739_v44 = vpop.permute.xlu1 %9738 }
0x1678   : > { %v7651_v13 = vadd.f32 %v7625_v42, %v7448_v51  ;;  %14768 = vmatpush3.bf16.msra.mxu1 %v9165_v23  ;;  %v14592_v48 = vpop.f32.mrb[74].mxu1  ;;  %v15899_v23 = vld [vmem:[%s20027_s6 + $0x3ac] sm:$0xff]  }
0x1679   : > { %14785 = vmatprep.subr.bf16.mxu1 %v9333_v46  ;;  %v7628_v55 = vpop.f32.mrb[75].mxu1 }
0x167a   : > { %v7652_v58 = vadd.f32 %v7628_v55, %v7449_v57  ;;  %v15895_v57 = vld [vmem:[%s20027_s6 + $0x38c] sm:$0xff]   ;;  %v15902_v55 = vld [vmem:[%s20027_s6 + $0x3c0] sm:$0xff]  }
0x167b   : > { %14754 = vmatmul.mubr.msk.bf16.gmra.mrb[48].mxu1 %vm6556_vm11, %v15875_v45  ;;  %v9743_v4 = vpop.permute.xlu1 %9742 }
0x167c   : > { %14757 = vmatprep.mubr.msk.bf16.mxu1 %vm6556_vm11, %v15876_v52  ;;  %v15901_v52 = vld [vmem:[%s20027_s6 + $0x3bc] ss:$0 sps:$4 sm:$0xff]  }
0x1683   : > { %14758 = vmatmul.mubr.msk.bf16.gmra.mrb[100].mxu1 %vm6556_vm11, %v15877_v59  ;;  %v15904_v59 = vld [vmem:[%s20027_s6 + $0x3d0] sm:$0xff]  }
0x1684   : > { %14769 = vmatprep.mubr.msk.bf16.mxu1 %vm6556_vm11, %v15878_v49  ;;  %v9944_v49 = vpop.permute.xlu0 %9943 }
0x168b   : > { %14770 = vmatmul.mubr.msk.bf16.vlgmr.msra.gmra.mrb[40].mxu1 %vm6556_vm11, %v15879_v61  ;;  %v15905_v61 = vld [vmem:[%s20027_s6 + $0x3d8] sm:$0xff]  }
0x168c   : > { %14786 = vmatpush3.bf16.msra.mxu1 %v9333_v46  ;;  %14773 = vmatprep.mubr.msk.bf16.mxu1 %vm6556_vm11, %v15880_v15  ;;  %v15900_v46 = vld [vmem:[%s20027_s6 + $0x3b4] sm:$0xff]  }
0x168d   : > { %14787 = vmatprep.subr.bf16.mxu1 %v9335_v62 }
0x1690   : > { %14788 = vmatpush3.bf16.msra.mxu1 %v9335_v62  ;;  %v15906_v62 = vld [vmem:[%s20027_s6 + $0x3e0] sm:$0xff]  }
0x1691   : > { %14789 = vmatprep.subr.bf16.mxu1 %v9337_v60 }
0x1693   : > { %14774 = vmatmul.mubr.msk.bf16.gmra.mrb[44].mxu1 %vm6556_vm11, %v15881_v63  ;;  %v9948_v63 = vpop.permute.xlu0 %9947 }
0x1694   : > { %14790 = vmatpush3.bf16.msra.mxu1 %v9337_v60  ;;  %14777 = vmatprep.mubr.msk.bf16.mxu1 %vm6556_vm11, %v15882_v12  ;;  %v9977_v12 = vsel %vm6581_vm4, %v9948_v63, 0 }
0x1695   : > { %15595 = vmatprep.subr.msk.bf16.mxu1 %vm6581_vm4, %v9339_v14 }
0x1696   : > { %v14615_v32 = vpop.f32.mrb[76].mxu1 }
0x1697   : > { %v7856_v17 = vadd.f32 %v14615_v32, %v7653_v37  ;;  %v7828_v18 = vpop.f32.mrb[77].mxu1  ;;  %v9942_v37 = vpop.permute.xlu1 %9941 }
0x1698   : > { %v7854_v20 = vadd.f32 %v7828_v18, %v7651_v13  ;;  %14792 = vmatpush3.bf16.msra.mxu1 %v9368_v16  ;;  %v14616_v21 = vpop.f32.mrb[78].mxu1  ;;  %v15907_v16 = vld [vmem:[%s20027_s6 + $0x3e8] sm:$0xff]  }
0x1699   : > { %14809 = vmatprep.subr.bf16.mxu1 %v9536_v19  ;;  %v7831_v36 = vpop.f32.mrb[79].mxu1 }
0x169a   : > { %v7855_v26 = vadd.f32 %v7831_v36, %v7652_v58  ;;  %v15903_v58 = vld [vmem:[%s20027_s6 + $0x3c8] sm:$0xff]   ;;  %v15910_v36 = vld [vmem:[%s20027_s6 + $0x3fc] sm:$0xff]  }
0x169b   : > { %14778 = vmatmul.mubr.msk.bf16.gmra.mrb[48].mxu1 %vm6556_vm11, %v15883_v28  ;;  %v9946_v15 = vpop.permute.xlu1 %9945 }
0x169c   : > { %14781 = vmatprep.mubr.msk.bf16.mxu1 %vm6556_vm11, %v15884_v24  ;;  %v15909_v24 = vld [vmem:[%s20027_s6 + $0x3f8] ss:$0 sps:$4 sm:$0xff]  }
0x16a3   : > { %14782 = vmatmul.mubr.msk.bf16.gmra.mrb[104].mxu1 %vm6556_vm11, %v15885_v29  ;;  %v15912_v29 = vld [vmem:[%s20027_s6 + $0x40c] sm:$0xff]  }
0x16a4   : > { %14793 = vmatprep.mubr.msk.bf16.mxu1 %vm6556_vm11, %v15886_v30  ;;  %v10147_v30 = vpop.permute.xlu0 %10146 }
0x16ab   : > { %14794 = vmatmul.mubr.msk.bf16.vlgmr.msra.gmra.mrb[40].mxu1 %vm6556_vm11, %v15887_v31  ;;  %v15913_v31 = vld [vmem:[%s20027_s6 + $0x414] sm:$0xff]  }
0x16ac   : > { %14810 = vmatpush3.bf16.msra.mxu1 %v9536_v19  ;;  %14797 = vmatprep.mubr.msk.bf16.mxu1 %vm6556_vm11, %v15888_v27  ;;  %v15908_v19 = vld [vmem:[%s20027_s6 + $0x3f0] sm:$0xff]  }
0x16ad   : > { %14811 = vmatprep.subr.bf16.mxu1 %v9538_v35 }
0x16b0   : > { %14812 = vmatpush3.bf16.msra.mxu1 %v9538_v35  ;;  %v15914_v35 = vld [vmem:[%s20027_s6 + $0x41c] sm:$0xff]  }
0x16b1   : > { %14813 = vmatprep.subr.bf16.mxu1 %v9540_v25 }
0x16b3   : > { %14798 = vmatmul.mubr.msk.bf16.gmra.mrb[44].mxu1 %vm6556_vm11, %v15889_v11  ;;  %v10151_v11 = vpop.permute.xlu0 %10150 }
0x16b4   : > { %14814 = vmatpush3.bf16.msra.mxu1 %v9540_v25  ;;  %14801 = vmatprep.mubr.msk.bf16.mxu1 %vm6556_vm11, %v15890_v33  ;;  %v10180_v33 = vsel %vm6581_vm4, %v10151_v11, 0 }
0x16b5   : > { %15596 = vmatprep.subr.msk.bf16.mxu1 %vm6581_vm4, %v9542_v34 }
0x16b6   : > { %v14639_v38 = vpop.f32.mrb[80].mxu1 }
0x16b7   : > { %v8059_v40 = vadd.f32 %v14639_v38, %v7856_v17  ;;  %v8031_v41 = vpop.f32.mrb[81].mxu1  ;;  %v10145_v17 = vpop.permute.xlu1 %10144 }
0x16b8   : > { %v8057_v0 = vadd.f32 %v8031_v41, %v7854_v20  ;;  %14816 = vmatpush3.bf16.msra.mxu1 %v9571_v39  ;;  %v14640_v47 = vpop.f32.mrb[82].mxu1  ;;  %v15915_v39 = vld [vmem:[%s20027_s6 + $0x424] sm:$0xff]  }
0x16b9   : > { %14833 = vmatprep.subr.bf16.mxu1 %v9739_v44  ;;  %v8034_v51 = vpop.f32.mrb[83].mxu1 }
0x16ba   : > { %v8058_v53 = vadd.f32 %v8034_v51, %v7855_v26  ;;  %v15911_v26 = vld [vmem:[%s20027_s6 + $0x404] sm:$0xff]   ;;  %v15918_v51 = vld [vmem:[%s20027_s6 + $0x438] sm:$0xff]  }
0x16bb   : > { %14802 = vmatmul.mubr.msk.bf16.gmra.mrb[48].mxu1 %vm6556_vm11, %v15891_v43  ;;  %v10149_v27 = vpop.permute.xlu1 %10148 }
0x16bc   : > { %14805 = vmatprep.mubr.msk.bf16.mxu1 %vm6556_vm11, %v15892_v50  ;;  %v15917_v50 = vld [vmem:[%s20027_s6 + $0x434] ss:$0 sps:$4 sm:$0xff]  }
0x16c3   : > { %14806 = vmatmul.mubr.msk.bf16.gmra.mrb[108].mxu1 %vm6556_vm11, %v15893_v54  ;;  %v15920_v54 = vld [vmem:[%s20027_s6 + $0x448] sm:$0xff]  }
0x16c4   : > { %14817 = vmatprep.mubr.msk.bf16.mxu1 %vm6556_vm11, %v15894_v56  ;;  %v10350_v56 = vpop.permute.xlu0 %10349 }
0x16cb   : > { %14818 = vmatmul.mubr.msk.bf16.vlgmr.msra.gmra.mrb[40].mxu1 %vm6556_vm11, %v15895_v57  ;;  %v15921_v57 = vld [vmem:[%s20027_s6 + $0x450] sm:$0xff]  }
0x16cc   : > { %14834 = vmatpush3.bf16.msra.mxu1 %v9739_v44  ;;  %14821 = vmatprep.mubr.msk.bf16.mxu1 %vm6556_vm11, %v15896_v1  ;;  %v15916_v44 = vld [vmem:[%s20027_s6 + $0x42c] sm:$0xff]  }
0x16cd   : > { %14835 = vmatprep.subr.bf16.mxu1 %v9741_v2 }
0x16d0   : > { %14836 = vmatpush3.bf16.msra.mxu1 %v9741_v2  ;;  %v15922_v2 = vld [vmem:[%s20027_s6 + $0x458] sm:$0xff]  }
0x16d1   : > { %14837 = vmatprep.subr.bf16.mxu1 %v9743_v4 }
0x16d3   : > { %14822 = vmatmul.mubr.msk.bf16.gmra.mrb[44].mxu1 %vm6556_vm11, %v15897_v3  ;;  %v10354_v3 = vpop.permute.xlu0 %10353 }
0x16d4   : > { %14838 = vmatpush3.bf16.msra.mxu1 %v9743_v4  ;;  %14825 = vmatprep.mubr.msk.bf16.mxu1 %vm6556_vm11, %v15898_v5  ;;  %v10383_v5 = vsel %vm6581_vm4, %v10354_v3, 0 }
0x16d5   : > { %15597 = vmatprep.subr.msk.bf16.mxu1 %vm6581_vm4, %v9745_v6 }
0x16d6   : > { %v14663_v7 = vpop.f32.mrb[84].mxu1 }
0x16d7   : > { %v8262_v9 = vadd.f32 %v14663_v7, %v8059_v40  ;;  %v8234_v22 = vpop.f32.mrb[85].mxu1  ;;  %v10348_v40 = vpop.permute.xlu1 %10347 }
0x16d8   : > { %v8260_v42 = vadd.f32 %v8234_v22, %v8057_v0  ;;  %14840 = vmatpush3.bf16.msra.mxu1 %v9774_v8  ;;  %v14664_v45 = vpop.f32.mrb[86].mxu1  ;;  %v15923_v8 = vld [vmem:[%s20027_s6 + $0x460] sm:$0xff]  }
0x16d9   : > { %14857 = vmatprep.subr.bf16.mxu1 %v9942_v37  ;;  %v8237_v13 = vpop.f32.mrb[87].mxu1 }
0x16da   : > { %v8261_v48 = vadd.f32 %v8237_v13, %v8058_v53  ;;  %v15919_v53 = vld [vmem:[%s20027_s6 + $0x440] sm:$0xff]   ;;  %v15926_v13 = vld [vmem:[%s20027_s6 + $0x474] sm:$0xff]  }
0x16db   : > { %14826 = vmatmul.mubr.msk.bf16.gmra.mrb[48].mxu1 %vm6556_vm11, %v15899_v23  ;;  %v10352_v1 = vpop.permute.xlu1 %10351 }
0x16dc   : > { %14829 = vmatprep.mubr.msk.bf16.mxu1 %vm6556_vm11, %v15900_v46  ;;  %v15925_v46 = vld [vmem:[%s20027_s6 + $0x470] ss:$0 sps:$4 sm:$0xff]  }
0x16e3   : > { %14830 = vmatmul.mubr.msk.bf16.gmra.mrb[112].mxu1 %vm6556_vm11, %v15901_v52  ;;  %v15928_v52 = vld [vmem:[%s20027_s6 + $0x484] sm:$0xff]  }
0x16e4   : > { %14841 = vmatprep.mubr.msk.bf16.mxu1 %vm6556_vm11, %v15902_v55  ;;  %v10553_v55 = vpop.permute.xlu0 %10552 }
0x16eb   : > { %14842 = vmatmul.mubr.msk.bf16.vlgmr.msra.gmra.mrb[40].mxu1 %vm6556_vm11, %v15903_v58  ;;  %v15929_v58 = vld [vmem:[%s20027_s6 + $0x48c] sm:$0xff]  }
0x16ec   : > { %14858 = vmatpush3.bf16.msra.mxu1 %v9942_v37  ;;  %14845 = vmatprep.mubr.msk.bf16.mxu1 %vm6556_vm11, %v15904_v59  ;;  %v15924_v37 = vld [vmem:[%s20027_s6 + $0x468] sm:$0xff]  }
0x16ed   : > { %14859 = vmatprep.subr.bf16.mxu1 %v9944_v49 }
0x16f0   : > { %14860 = vmatpush3.bf16.msra.mxu1 %v9944_v49  ;;  %v15930_v49 = vld [vmem:[%s20027_s6 + $0x494] sm:$0xff]  }
0x16f1   : > { %14861 = vmatprep.subr.bf16.mxu1 %v9946_v15 }
0x16f3   : > { %14846 = vmatmul.mubr.msk.bf16.gmra.mrb[44].mxu1 %vm6556_vm11, %v15905_v61  ;;  %v10557_v61 = vpop.permute.xlu0 %10556 }
0x16f4   : > { %14862 = vmatpush3.bf16.msra.mxu1 %v9946_v15  ;;  %14849 = vmatprep.mubr.msk.bf16.mxu1 %vm6556_vm11, %v15906_v62  ;;  %v10586_v62 = vsel %vm6581_vm4, %v10557_v61, 0 }
0x16f5   : > { %15598 = vmatprep.subr.msk.bf16.mxu1 %vm6581_vm4, %v9948_v63 }
0x16f6   : > { %v14687_v60 = vpop.f32.mrb[88].mxu1 }
0x16f7   : > { %v8465_v14 = vadd.f32 %v14687_v60, %v8262_v9  ;;  %v8437_v32 = vpop.f32.mrb[89].mxu1  ;;  %v10551_v9 = vpop.permute.xlu1 %10550 }
0x16f8   : > { %v8463_v18 = vadd.f32 %v8437_v32, %v8260_v42  ;;  %14864 = vmatpush3.bf16.msra.mxu1 %v9977_v12  ;;  %v14688_v28 = vpop.f32.mrb[90].mxu1  ;;  %v15931_v12 = vld [vmem:[%s20027_s6 + $0x49c] sm:$0xff]  }
0x16f9   : > { %14881 = vmatprep.subr.bf16.mxu1 %v10145_v17  ;;  %v8440_v20 = vpop.f32.mrb[91].mxu1 }
0x16fa   : > { %v8464_v21 = vadd.f32 %v8440_v20, %v8261_v48  ;;  %v15927_v48 = vld [vmem:[%s20027_s6 + $0x47c] sm:$0xff]   ;;  %v15934_v20 = vld [vmem:[%s20027_s6 + $0x4b0] sm:$0xff]  }
0x16fb   : > { %14850 = vmatmul.mubr.msk.bf16.gmra.mrb[48].mxu1 %vm6556_vm11, %v15907_v16  ;;  %v10555_v59 = vpop.permute.xlu1 %10554 }
0x16fc   : > { %14853 = vmatprep.mubr.msk.bf16.mxu1 %vm6556_vm11, %v15908_v19  ;;  %v15933_v19 = vld [vmem:[%s20027_s6 + $0x4ac] ss:$0 sps:$4 sm:$0xff]  }
0x1703   : > { %14854 = vmatmul.mubr.msk.bf16.gmra.mrb[116].mxu1 %vm6556_vm11, %v15909_v24  ;;  %v15936_v24 = vld [vmem:[%s20027_s6 + $0x4c0] sm:$0xff]  }
0x1704   : > { %14865 = vmatprep.mubr.msk.bf16.mxu1 %vm6556_vm11, %v15910_v36  ;;  %v10756_v36 = vpop.permute.xlu0 %10755 }
0x170b   : > { %14866 = vmatmul.mubr.msk.bf16.vlgmr.msra.gmra.mrb[40].mxu1 %vm6556_vm11, %v15911_v26  ;;  %v15937_v26 = vld [vmem:[%s20027_s6 + $0x4c8] sm:$0xff]  }
0x170c   : > { %14882 = vmatpush3.bf16.msra.mxu1 %v10145_v17  ;;  %14869 = vmatprep.mubr.msk.bf16.mxu1 %vm6556_vm11, %v15912_v29  ;;  %v15932_v17 = vld [vmem:[%s20027_s6 + $0x4a4] sm:$0xff]  }
0x170d   : > { %14883 = vmatprep.subr.bf16.mxu1 %v10147_v30 }
0x1710   : > { %14884 = vmatpush3.bf16.msra.mxu1 %v10147_v30  ;;  %v15938_v30 = vld [vmem:[%s20027_s6 + $0x4d0] sm:$0xff]  }
0x1711   : > { %14885 = vmatprep.subr.bf16.mxu1 %v10149_v27 }
0x1713   : > { %14870 = vmatmul.mubr.msk.bf16.gmra.mrb[44].mxu1 %vm6556_vm11, %v15913_v31  ;;  %v10760_v31 = vpop.permute.xlu0 %10759 }
0x1714   : > { %14886 = vmatpush3.bf16.msra.mxu1 %v10149_v27  ;;  %14873 = vmatprep.mubr.msk.bf16.mxu1 %vm6556_vm11, %v15914_v35  ;;  %v10789_v35 = vsel %vm6581_vm4, %v10760_v31, 0 }
0x1715   : > { %15599 = vmatprep.subr.msk.bf16.mxu1 %vm6581_vm4, %v10151_v11 }
0x1716   : > { %v14711_v25 = vpop.f32.mrb[92].mxu1 }
0x1717   : > { %v8668_v34 = vadd.f32 %v14711_v25, %v8465_v14  ;;  %v8640_v38 = vpop.f32.mrb[93].mxu1  ;;  %v10754_v14 = vpop.permute.xlu1 %10753 }
0x1718   : > { %v8666_v41 = vadd.f32 %v8640_v38, %v8463_v18  ;;  %14888 = vmatpush3.bf16.msra.mxu1 %v10180_v33  ;;  %v14712_v43 = vpop.f32.mrb[94].mxu1  ;;  %v15939_v33 = vld [vmem:[%s20027_s6 + $0x4d8] sm:$0xff]  }
0x1719   : > { %14905 = vmatprep.subr.bf16.mxu1 %v10348_v40  ;;  %v8643_v0 = vpop.f32.mrb[95].mxu1 }
0x171a   : > { %v8667_v47 = vadd.f32 %v8643_v0, %v8464_v21  ;;  %v15935_v21 = vld [vmem:[%s20027_s6 + $0x4b8] sm:$0xff]   ;;  %v15942_v0 = vld [vmem:[%s20027_s6 + $0x4ec] sm:$0xff]  }
0x171b   : > { %14874 = vmatmul.mubr.msk.bf16.gmra.mrb[48].mxu1 %vm6556_vm11, %v15915_v39  ;;  %v10758_v29 = vpop.permute.xlu1 %10757 }
0x171c   : > { %14877 = vmatprep.mubr.msk.bf16.mxu1 %vm6556_vm11, %v15916_v44  ;;  %v15941_v44 = vld [vmem:[%s20027_s6 + $0x4e8] ss:$0 sps:$4 sm:$0xff]  }
0x1723   : > { %14878 = vmatmul.mubr.msk.bf16.gmra.mrb[120].mxu1 %vm6556_vm11, %v15917_v50  ;;  %v15944_v50 = vld [vmem:[%s20027_s6 + $0x4fc] sm:$0xff]  }
0x1724   : > { %14889 = vmatprep.mubr.msk.bf16.mxu1 %vm6556_vm11, %v15918_v51  ;;  %v10959_v51 = vpop.permute.xlu0 %10958 }
0x172b   : > { %14890 = vmatmul.mubr.msk.bf16.vlgmr.msra.gmra.mrb[40].mxu1 %vm6556_vm11, %v15919_v53  ;;  %v15945_v53 = vld [vmem:[%s20027_s6 + $0x504] sm:$0xff]  }
0x172c   : > { %14906 = vmatpush3.bf16.msra.mxu1 %v10348_v40  ;;  %14893 = vmatprep.mubr.msk.bf16.mxu1 %vm6556_vm11, %v15920_v54  ;;  %v15940_v40 = vld [vmem:[%s20027_s6 + $0x4e0] sm:$0xff]  }
0x172d   : > { %14907 = vmatprep.subr.bf16.mxu1 %v10350_v56 }
0x1730   : > { %14908 = vmatpush3.bf16.msra.mxu1 %v10350_v56  ;;  %v15946_v56 = vld [vmem:[%s20027_s6 + $0x50c] sm:$0xff]  }
0x1731   : > { %14909 = vmatprep.subr.bf16.mxu1 %v10352_v1 }
0x1733   : > { %14894 = vmatmul.mubr.msk.bf16.gmra.mrb[44].mxu1 %vm6556_vm11, %v15921_v57  ;;  %v10963_v57 = vpop.permute.xlu0 %10962 }
0x1734   : > { %14910 = vmatpush3.bf16.msra.mxu1 %v10352_v1  ;;  %14897 = vmatprep.mubr.msk.bf16.mxu1 %vm6556_vm11, %v15922_v2  ;;  %v10992_v2 = vsel %vm6581_vm4, %v10963_v57, 0 }
0x1735   : > { %15600 = vmatprep.subr.msk.bf16.mxu1 %vm6581_vm4, %v10354_v3 }
0x1736   : > { %v14735_v4 = vpop.f32.mrb[96].mxu1 }
0x1737   : > { %v8871_v6 = vadd.f32 %v14735_v4, %v8668_v34  ;;  %v8843_v7 = vpop.f32.mrb[97].mxu1  ;;  %v10957_v34 = vpop.permute.xlu1 %10956 }
0x1738   : > { %v8869_v22 = vadd.f32 %v8843_v7, %v8666_v41  ;;  %14912 = vmatpush3.bf16.msra.mxu1 %v10383_v5  ;;  %v14736_v23 = vpop.f32.mrb[98].mxu1  ;;  %v15947_v5 = vld [vmem:[%s20027_s6 + $0x514] sm:$0xff]  }
0x1739   : > { %14929 = vmatprep.subr.bf16.mxu1 %v10551_v9  ;;  %v8846_v42 = vpop.f32.mrb[99].mxu1 }
0x173a   : > { %v8870_v45 = vadd.f32 %v8846_v42, %v8667_v47  ;;  %v15943_v47 = vld [vmem:[%s20027_s6 + $0x4f4] sm:$0xff]   ;;  %v15950_v42 = vld [vmem:[%s20027_s6 + $0x528] sm:$0xff]  }
0x173b   : > { %14898 = vmatmul.mubr.msk.bf16.gmra.mrb[48].mxu1 %vm6556_vm11, %v15923_v8  ;;  %v10961_v54 = vpop.permute.xlu1 %10960 }
0x173c   : > { %14901 = vmatprep.mubr.msk.bf16.mxu1 %vm6556_vm11, %v15924_v37  ;;  %v15949_v37 = vld [vmem:[%s20027_s6 + $0x524] ss:$0 sps:$4 sm:$0xff]  }
0x1743   : > { %14902 = vmatmul.mubr.msk.bf16.gmra.mrb[124].mxu1 %vm6556_vm11, %v15925_v46  ;;  %v15952_v46 = vld [vmem:[%s20027_s6 + $0x538] sm:$0xff]  }
0x1744   : > { %14913 = vmatprep.mubr.msk.bf16.mxu1 %vm6556_vm11, %v15926_v13  ;;  %v11162_v13 = vpop.permute.xlu0 %11161 }
0x174b   : > { %14914 = vmatmul.mubr.msk.bf16.vlgmr.msra.gmra.mrb[40].mxu1 %vm6556_vm11, %v15927_v48  ;;  %v15953_v48 = vld [vmem:[%s20027_s6 + $0x540] sm:$0xff]  }
0x174c   : > { %14930 = vmatpush3.bf16.msra.mxu1 %v10551_v9  ;;  %14917 = vmatprep.mubr.msk.bf16.mxu1 %vm6556_vm11, %v15928_v52  ;;  %v15948_v9 = vld [vmem:[%s20027_s6 + $0x51c] sm:$0xff]  }
0x174d   : > { %14931 = vmatprep.subr.bf16.mxu1 %v10553_v55 }
0x1750   : > { %14932 = vmatpush3.bf16.msra.mxu1 %v10553_v55  ;;  %v15954_v55 = vld [vmem:[%s20027_s6 + $0x548] sm:$0xff]  }
0x1751   : > { %14933 = vmatprep.subr.bf16.mxu1 %v10555_v59 }
0x1753   : > { %14918 = vmatmul.mubr.msk.bf16.gmra.mrb[44].mxu1 %vm6556_vm11, %v15929_v58  ;;  %v11166_v58 = vpop.permute.xlu0 %11165 }
0x1754   : > { %14934 = vmatpush3.bf16.msra.mxu1 %v10555_v59  ;;  %14921 = vmatprep.mubr.msk.bf16.mxu1 %vm6556_vm11, %v15930_v49  ;;  %v11195_v49 = vsel %vm6581_vm4, %v11166_v58, 0 }
0x1755   : > { %15601 = vmatprep.subr.msk.bf16.mxu1 %vm6581_vm4, %v10557_v61 }
0x1756   : > { %v14759_v15 = vpop.f32.mrb[100].mxu1 }
0x1757   : > { %v9074_v63 = vadd.f32 %v14759_v15, %v8871_v6  ;;  %v9046_v60 = vpop.f32.mrb[101].mxu1  ;;  %v11160_v6 = vpop.permute.xlu1 %11159 }
0x1758   : > { %v9072_v32 = vadd.f32 %v9046_v60, %v8869_v22  ;;  %14936 = vmatpush3.bf16.msra.mxu1 %v10586_v62  ;;  %v14760_v16 = vpop.f32.mrb[102].mxu1  ;;  %v15955_v62 = vld [vmem:[%s20027_s6 + $0x550] sm:$0xff]  }
0x1759   : > { %14953 = vmatprep.subr.bf16.mxu1 %v10754_v14  ;;  %v9049_v18 = vpop.f32.mrb[103].mxu1 }
0x175a   : > { %v9073_v28 = vadd.f32 %v9049_v18, %v8870_v45  ;;  %v15951_v45 = vld [vmem:[%s20027_s6 + $0x530] sm:$0xff]   ;;  %v15958_v18 = vld [vmem:[%s20027_s6 + $0x564] sm:$0xff]  }
0x175b   : > { %14922 = vmatmul.mubr.msk.bf16.gmra.mrb[48].mxu1 %vm6556_vm11, %v15931_v12  ;;  %v11164_v52 = vpop.permute.xlu1 %11163 }
0x175c   : > { %14925 = vmatprep.mubr.msk.bf16.mxu1 %vm6556_vm11, %v15932_v17  ;;  %v15957_v17 = vld [vmem:[%s20027_s6 + $0x560] ss:$0 sps:$4 sm:$0xff]  }
0x1763   : > { %14926 = vmatmul.mubr.msk.bf16.gmra.mrb[128].mxu1 %vm6556_vm11, %v15933_v19  ;;  %v15960_v19 = vld [vmem:[%s20027_s6 + $0x574] sm:$0xff]  }
0x1764   : > { %14937 = vmatprep.mubr.msk.bf16.mxu1 %vm6556_vm11, %v15934_v20  ;;  %v11365_v20 = vpop.permute.xlu0 %11364 }
0x176b   : > { %14938 = vmatmul.mubr.msk.bf16.vlgmr.msra.gmra.mrb[40].mxu1 %vm6556_vm11, %v15935_v21  ;;  %v15961_v21 = vld [vmem:[%s20027_s6 + $0x57c] sm:$0xff]  }
0x176c   : > { %14954 = vmatpush3.bf16.msra.mxu1 %v10754_v14  ;;  %14941 = vmatprep.mubr.msk.bf16.mxu1 %vm6556_vm11, %v15936_v24  ;;  %v15956_v14 = vld [vmem:[%s20027_s6 + $0x558] sm:$0xff]  }
0x176d   : > { %14955 = vmatprep.subr.bf16.mxu1 %v10756_v36 }
0x1770   : > { %14956 = vmatpush3.bf16.msra.mxu1 %v10756_v36  ;;  %v15962_v36 = vld [vmem:[%s20027_s6 + $0x584] sm:$0xff]  }
0x1771   : > { %14957 = vmatprep.subr.bf16.mxu1 %v10758_v29 }
0x1773   : > { %14942 = vmatmul.mubr.msk.bf16.gmra.mrb[44].mxu1 %vm6556_vm11, %v15937_v26  ;;  %v11369_v26 = vpop.permute.xlu0 %11368 }
0x1774   : > { %14958 = vmatpush3.bf16.msra.mxu1 %v10758_v29  ;;  %14945 = vmatprep.mubr.msk.bf16.mxu1 %vm6556_vm11, %v15938_v30  ;;  %v11398_v30 = vsel %vm6581_vm4, %v11369_v26, 0 }
0x1775   : > { %15602 = vmatprep.subr.msk.bf16.mxu1 %vm6581_vm4, %v10760_v31 }
0x1776   : > { %v14783_v27 = vpop.f32.mrb[104].mxu1 }
0x1777   : > { %v9277_v11 = vadd.f32 %v14783_v27, %v9074_v63  ;;  %v9249_v25 = vpop.f32.mrb[105].mxu1  ;;  %v11363_v63 = vpop.permute.xlu1 %11362 }
0x1778   : > { %v9275_v38 = vadd.f32 %v9249_v25, %v9072_v32  ;;  %14960 = vmatpush3.bf16.msra.mxu1 %v10789_v35  ;;  %v14784_v39 = vpop.f32.mrb[106].mxu1  ;;  %v15963_v35 = vld [vmem:[%s20027_s6 + $0x58c] sm:$0xff]  }
0x1779   : > { %14977 = vmatprep.subr.bf16.mxu1 %v10957_v34  ;;  %v9252_v41 = vpop.f32.mrb[107].mxu1  ;;  %v15965_v39 = vld [vmem:[%s20027_s6 + $0x59c] ss:$0 sps:$4 sm:$0xff]  }
0x177a   : > { %v9276_v43 = vadd.f32 %v9252_v41, %v9073_v28  ;;  %v15959_v28 = vld [vmem:[%s20027_s6 + $0x56c] sm:$0xff]  }
0x177b   : > { %14946 = vmatmul.mubr.msk.bf16.gmra.mrb[48].mxu1 %vm6556_vm11, %v15939_v33  ;;  %v11367_v24 = vpop.permute.xlu1 %11366  ;;  %v15964_v33 = vld [vmem:[%s20027_s6 + $0x594] sm:$0xff]   ;;  %v15967_v41 = vld [vmem:[%s20027_s6 + $0x5a8] sm:$0xff]  }
0x177c   : > { %14949 = vmatprep.mubr.msk.bf16.mxu1 %vm6556_vm11, %v15940_v40  ;;  %v15966_v40 = vld [vmem:[%s20027_s6 + $0x5a0] sm:$0xff]  }
0x1783   : > { %14950 = vmatmul.mubr.msk.bf16.gmra.mrb[132].mxu1 %vm6556_vm11, %v15941_v44  ;;  %v15969_v44 = vld [vmem:[%s20027_s6 + $0x5b8] sm:$0xff]  }
0x1784   : > { %14961 = vmatprep.mubr.msk.bf16.mxu1 %vm6556_vm11, %v15942_v0  ;;  %v15970_v0 = vld [vmem:[%s20027_s6 + $0x5c0] sm:$0xff]  }
0x178b   : > { %14962 = vmatmul.mubr.msk.bf16.vlgmr.msra.gmra.mrb[40].mxu1 %vm6556_vm11, %v15943_v47 }
0x178c   : > { %14978 = vmatpush3.bf16.msra.mxu1 %v10957_v34  ;;  %14965 = vmatprep.mubr.msk.bf16.mxu1 %vm6556_vm11, %v15944_v50 }
0x178d   : > { %14979 = vmatprep.subr.bf16.mxu1 %v10959_v51 }
0x1790   : > { %14980 = vmatpush3.bf16.msra.mxu1 %v10959_v51 }
0x1791   : > { %14981 = vmatprep.subr.bf16.mxu1 %v10961_v54 }
0x1793   : > { %14966 = vmatmul.mubr.msk.bf16.gmra.mrb[44].mxu1 %vm6556_vm11, %v15945_v53  ;;  %v15971_v53 = vld [vmem:[%s20027_s6 + $0x5c8] sm:$0xff]  }
0x1794   : > { %14982 = vmatpush3.bf16.msra.mxu1 %v10961_v54  ;;  %14969 = vmatprep.mubr.msk.bf16.mxu1 %vm6556_vm11, %v15946_v56 }
0x1795   : > { %15603 = vmatprep.subr.msk.bf16.mxu1 %vm6581_vm4, %v10963_v57  ;;  %v15972_v57 = vld [vmem:[%s20027_s6 + $0x5d0] sm:$0xff]  }
0x1796   : > { %v14807_v1 = vpop.f32.mrb[108].mxu1 }
0x1797   : > { %v9480_v3 = vadd.f32 %v14807_v1, %v9277_v11  ;;  %v9452_v4 = vpop.f32.mrb[109].mxu1 }
0x1798   : > { %v9478_v7 = vadd.f32 %v9452_v4, %v9275_v38  ;;  %14984 = vmatpush3.bf16.msra.mxu1 %v10992_v2  ;;  %v14808_v8 = vpop.f32.mrb[110].mxu1 }
0x1799   : > { %15001 = vmatprep.subr.bf16.mxu1 %v11160_v6  ;;  %v9455_v22 = vpop.f32.mrb[111].mxu1 }
0x179a   : > { %v9479_v23 = vadd.f32 %v9455_v22, %v9276_v43  ;;  %v15968_v43 = vld [vmem:[%s20027_s6 + $0x5b0] sm:$0xff]  }
0x179b   : > { %14970 = vmatmul.mubr.msk.bf16.gmra.mrb[48].mxu1 %vm6556_vm11, %v15947_v5 }
0x179c   : > { %14973 = vmatprep.mubr.msk.bf16.mxu1 %vm6556_vm11, %v15948_v9 }
0x17a3   : > { %14974 = vmatmul.mubr.msk.bf16.gmra.mrb[136].mxu1 %vm6556_vm11, %v15949_v37 }
0x17a4   : > { %14985 = vmatprep.mubr.msk.bf16.mxu1 %vm6556_vm11, %v15950_v42 }
0x17ab   : > { %14986 = vmatmul.mubr.msk.bf16.vlgmr.msra.gmra.mrb[40].mxu1 %vm6556_vm11, %v15951_v45 }
0x17ac   : > { %15002 = vmatpush3.bf16.msra.mxu1 %v11160_v6  ;;  %14989 = vmatprep.mubr.msk.bf16.mxu1 %vm6556_vm11, %v15952_v46 }
0x17ad   : > { %15003 = vmatprep.subr.bf16.mxu1 %v11162_v13 }
0x17b0   : > { %15004 = vmatpush3.bf16.msra.mxu1 %v11162_v13 }
0x17b1   : > { %15005 = vmatprep.subr.bf16.mxu1 %v11164_v52 }
0x17b3   : > { %14990 = vmatmul.mubr.msk.bf16.gmra.mrb[44].mxu1 %vm6556_vm11, %v15953_v48 }
0x17b4   : > { %15006 = vmatpush3.bf16.msra.mxu1 %v11164_v52  ;;  %14993 = vmatprep.mubr.msk.bf16.mxu1 %vm6556_vm11, %v15954_v55 }
0x17b5   : > { %15604 = vmatprep.subr.msk.bf16.mxu1 %vm6581_vm4, %v11166_v58 }
0x17b6   : > { %v14831_v59 = vpop.f32.mrb[112].mxu1 }
0x17b7   : > { %v9683_v61 = vadd.f32 %v14831_v59, %v9480_v3  ;;  %v9655_v15 = vpop.f32.mrb[113].mxu1  ;;  %v15973_v3 = vld [vmem:[%s20027_s6 + $0x5d8] ss:$0 sps:$4 sm:$0xff]  }
0x17b8   : > { %v9681_v60 = vadd.f32 %v9655_v15, %v9478_v7  ;;  %15008 = vmatpush3.bf16.msra.mxu1 %v11195_v49  ;;  %v14832_v12 = vpop.f32.mrb[114].mxu1 }
0x17b9   : > { %15025 = vmatprep.subr.bf16.mxu1 %v11363_v63  ;;  %v9658_v32 = vpop.f32.mrb[115].mxu1 }
0x17ba   : > { %v9682_v16 = vadd.f32 %v9658_v32, %v9479_v23 }
0x17bb   : > { %14994 = vmatmul.mubr.msk.bf16.gmra.mrb[48].mxu1 %vm6556_vm11, %v15955_v62  ;;  %v15974_v62 = vld [vmem:[%s20029_s8] sm:$0xff]  }
0x17bc   : > { %14997 = vmatprep.mubr.msk.bf16.mxu1 %vm6556_vm11, %v15956_v14  ;;  %15065 = vmatprep.mubr.msk.bf16.mxu0 %vm11614_vm12, %v15974_v62 }
0x17c3   : > { %14998 = vmatmul.mubr.msk.bf16.gmra.mrb[140].mxu1 %vm6556_vm11, %v15957_v17 }
0x17c4   : > { %15009 = vmatprep.mubr.msk.bf16.mxu1 %vm6556_vm11, %v15958_v18 }
0x17cb   : > { %15010 = vmatmul.mubr.msk.bf16.vlgmr.msra.gmra.mrb[40].mxu1 %vm6556_vm11, %v15959_v28 }
0x17cc   : > { %15026 = vmatpush3.bf16.msra.mxu1 %v11363_v63  ;;  %15013 = vmatprep.mubr.msk.bf16.mxu1 %vm6556_vm11, %v15960_v19 }
0x17cd   : > { %15027 = vmatprep.subr.bf16.mxu1 %v11365_v20 }
0x17d0   : > { %15028 = vmatpush3.bf16.msra.mxu1 %v11365_v20 }
0x17d1   : > { %15029 = vmatprep.subr.bf16.mxu1 %v11367_v24 }
0x17d3   : > { %15014 = vmatmul.mubr.msk.bf16.gmra.mrb[44].mxu1 %vm6556_vm11, %v15961_v21 }
0x17d4   : > { %15030 = vmatpush3.bf16.msra.mxu1 %v11367_v24  ;;  %15017 = vmatprep.mubr.msk.bf16.mxu1 %vm6556_vm11, %v15962_v36 }
0x17d5   : > { %15605 = vmatprep.subr.msk.bf16.mxu1 %vm6581_vm4, %v11369_v26 }
0x17d6   : > { %v14855_v29 = vpop.f32.mrb[116].mxu1 }
0x17d7   : > { %v9886_v31 = vadd.f32 %v14855_v29, %v9683_v61  ;;  %v9858_v27 = vpop.f32.mrb[117].mxu1 }
0x17d8   : > { %v9884_v11 = vadd.f32 %v9858_v27, %v9681_v60  ;;  %15032 = vmatpush3.bf16.msra.mxu1 %v11398_v30  ;;  %v14856_v25 = vpop.f32.mrb[118].mxu1 }
0x17d9   : > { %v9861_v34 = vpop.f32.mrb[119].mxu1  ;;  %v11513_v25 = vld [vmem:[%s20028_s7 + $0x10] sm:$0xff] }
0x17da   : > { %v9885_v38 = vadd.f32 %v9861_v34, %v9682_v16 }
0x17db   : > { %15018 = vmatmul.mubr.msk.bf16.gmra.mrb[48].mxu1 %vm6556_vm11, %v15963_v35 }
0x17dc   : > { %15021 = vmatprep.mubr.msk.bf16.mxu1 %vm6556_vm11, %v15964_v33  ;;  %v11511_v33 = vld [vmem:[%s20028_s7] sm:$0xff] }
0x17e3   : > { %15022 = vmatmul.mubr.msk.bf16.gmra.mrb[144].mxu1 %vm6556_vm11, %v15965_v39 }
0x17e4   : > { %15033 = vmatprep.mubr.msk.bf16.mxu1 %vm6556_vm11, %v15966_v40 }
0x17eb   : > { %15034 = vmatmul.mubr.msk.bf16.vlgmr.msra.gmra.mrb[40].mxu1 %vm6556_vm11, %v15967_v41  ;;  %v11512_v41 = vld [vmem:[%s20028_s7 + $0x8] sm:$0xff] }
0x17ec   : > { %15037 = vmatprep.mubr.msk.bf16.mxu1 %vm6556_vm11, %v15968_v43 }
0x17f3   : > { %15038 = vmatmul.mubr.msk.bf16.gmra.mrb[44].mxu1 %vm6556_vm11, %v15969_v44 }
0x17f4   : > { %15041 = vmatprep.mubr.msk.bf16.mxu1 %vm6556_vm11, %v15970_v0 }
0x17f6   : > { %v14879_v47 = vpop.f32.mrb[120].mxu1 }
0x17f7   : > { %v10089_v50 = vadd.f32 %v14879_v47, %v9886_v31  ;;  %v10061_v51 = vpop.f32.mrb[121].mxu1 }
0x17f8   : > { %v10087_v54 = vadd.f32 %v10061_v51, %v9884_v11  ;;  %v14880_v56 = vpop.f32.mrb[122].mxu1 }
0x17f9   : > { %v10064_v1 = vpop.f32.mrb[123].mxu1 }
0x17fa   : > { %v10088_v2 = vadd.f32 %v10064_v1, %v9885_v38  ;;  %v11514_v38 = vld [vmem:[%s20028_s7 + $0x18] sm:$0xff] }
0x17fb   : > { %15042 = vmatmul.mubr.msk.bf16.gmra.mrb[48].mxu1 %vm6556_vm11, %v15971_v53 }
0x17fc   : > { %15045 = vmatprep.mubr.msk.bf16.mxu1 %vm6556_vm11, %v15972_v57  ;;  %v11517_v57 = vld [vmem:[%s20028_s7 + $0x30] sm:$0xff] }
0x1803   : > { %15046 = vmatmul.mubr.msk.bf16.gmra.mrb[148].mxu1 %vm6556_vm11, %v15973_v3 }
0x1816   : > { %v14903_v4 = vpop.f32.mrb[124].mxu1 }
0x1817   : > { %v10292_v5 = vadd.f32 %v14903_v4, %v10089_v50  ;;  %v10264_v6 = vpop.f32.mrb[125].mxu1 }
0x1818   : > { %v10290_v7 = vadd.f32 %v10264_v6, %v10087_v54  ;;  %v14904_v8 = vpop.f32.mrb[126].mxu1 }
0x1819   : > { %v10267_v9 = vpop.f32.mrb[127].mxu1  ;;  %v11516_v8 = vld [vmem:[%s20028_s7 + $0x28] sm:$0xff] }
0x181a   : > { %v10291_v22 = vadd.f32 %v10267_v9, %v10088_v2  ;;  %v11515_v2 = vld [vmem:[%s20028_s7 + $0x20] sm:$0xff] }
0x1836   : > { %v14927_v23 = vpop.f32.mrb[128].mxu1 }
0x1837   : > { %v10495_v37 = vadd.f32 %v14927_v23, %v10292_v5  ;;  %v10467_v42 = vpop.f32.mrb[129].mxu1  ;;  %v11518_v5 = vld [vmem:[%s20028_s7 + $0x38] sm:$0xff] }
0x1838   : > { %v10493_v45 = vadd.f32 %v10467_v42, %v10290_v7  ;;  %v14928_v46 = vpop.f32.mrb[130].mxu1 }
0x1839   : > { %v10470_v13 = vpop.f32.mrb[131].mxu1 }
0x183a   : > { %v10494_v48 = vadd.f32 %v10470_v13, %v10291_v22 }
0x1856   : > { %v14951_v52 = vpop.f32.mrb[132].mxu1 }
0x1857   : > { %v10698_v55 = vadd.f32 %v14951_v52, %v10495_v37  ;;  %v10670_v58 = vpop.f32.mrb[133].mxu1  ;;  %v11521_v52 = vld [vmem:[%s20028_s7 + $0x50] sm:$0xff] }
0x1858   : > { %v10696_v59 = vadd.f32 %v10670_v58, %v10493_v45  ;;  %v14952_v49 = vpop.f32.mrb[134].mxu1  ;;  %v11519_v58 = vld [vmem:[%s20028_s7 + $0x40] sm:$0xff] }
0x1859   : > { %v10673_v61 = vpop.f32.mrb[135].mxu1 }
0x185a   : > { %v10697_v15 = vadd.f32 %v10673_v61, %v10494_v48  ;;  %v11522_v61 = vld [vmem:[%s20028_s7 + $0x58] sm:$0xff] }
0x1876   : > { %v14975_v63 = vpop.f32.mrb[136].mxu1 }
0x1877   : > { %v10901_v60 = vadd.f32 %v14975_v63, %v10698_v55  ;;  %v10873_v12 = vpop.f32.mrb[137].mxu1  ;;  %v11520_v63 = vld [vmem:[%s20028_s7 + $0x48] sm:$0xff] }
0x1878   : > { %v10899_v14 = vadd.f32 %v10873_v12, %v10696_v59  ;;  %v14976_v32 = vpop.f32.mrb[138].mxu1 }
0x1879   : > { %v10876_v16 = vpop.f32.mrb[139].mxu1 }
0x187a   : > { %v10900_v17 = vadd.f32 %v10876_v16, %v10697_v15 }
0x1896   : > { %v14999_v18 = vpop.f32.mrb[140].mxu1 }
0x1897   : > { %v11104_v28 = vadd.f32 %v14999_v18, %v10901_v60  ;;  %v11076_v19 = vpop.f32.mrb[141].mxu1 }
0x1898   : > { %v11102_v20 = vadd.f32 %v11076_v19, %v10899_v14  ;;  %v15000_v21 = vpop.f32.mrb[142].mxu1 }
0x1899   : > { %v11079_v24 = vpop.f32.mrb[143].mxu1 }
0x189a   : > { %v11103_v36 = vadd.f32 %v11079_v24, %v10900_v17 }
0x18b6   : > { %v15023_v26 = vpop.f32.mrb[144].mxu1 }
0x18b7   : > { %v19864_v29 = vadd.f32 %v15023_v26, %v11104_v28  ;;  %v11279_v30 = vpop.f32.mrb[145].mxu1  ;;  %v11525_v26 = vld [vmem:[%s20028_s7 + $0x70] sm:$0xff] }
0x18b8   : > { %v19866_v31 = vadd.f32 %v11279_v30, %v11102_v20  ;;  %v15024_v27 = vpop.f32.mrb[146].mxu1 }
0x18b9   : > { %v11282_v35 = vpop.f32.mrb[147].mxu1  ;;  %v11523_v27 = vld [vmem:[%s20028_s7 + $0x60] sm:$0xff] }
0x18ba   : > { %v19868_v11 = vadd.f32 %v11282_v35, %v11103_v36 }
0x18be   : > { %v15035_v34 = vpop.f32.mrb[40].mxu1 }
0x18bf   : > { %v11528_v39 = vadd.f32 %v15035_v34, %v11513_v25  ;;  %v11434_v40 = vpop.f32.mrb[41].mxu1  ;;  %v11524_v34 = vld [vmem:[%s20028_s7 + $0x68] sm:$0xff] }
0x18c0   : > { %v11526_v43 = vadd.f32 %v11511_v33, %v11434_v40  ;;  %v15036_v44 = vpop.f32.mrb[42].mxu1 }
0x18c1   : > { %v11529_v0 = vadd.f32 %v15036_v44, %v11514_v38  ;;  %v11437_v47 = vpop.f32.mrb[43].mxu1  ;;  %v11543_v51 = vmax.f32 %v11528_v39, 0.0 }
0x18c2   : > { %v11527_v50 = vadd.f32 %v11512_v41, %v11437_v47  ;;  %v11541_v54 = vmax.f32 %v11526_v43, 0.0 }
0x18c3   : > { %v11544_v53 = vmax.f32 %v11529_v0, 0.0 }
0x18c4   : > { %v11542_v56 = vmax.f32 %v11527_v50, 0.0  ;;  %v15975_v50 = vld [vmem:[%s20029_s8 + $0x8] sm:$0xff]  }
0x18c5   : > { %v11568_v1 = vpack.c.bf16 %v11544_v53, %v11543_v51  ;;  %v15977_v51 = vld [vmem:[%s20029_s8 + $0x18] sm:$0xff]   ;;  %v15978_v53 = vld [vmem:[%s20029_s8 + $0x20] sm:$0xff]  }
0x18c6   : > { %v11567_v3 = vpack.c.bf16 %v11542_v56, %v11541_v54  ;;  %v15039_v4 = vpop.f32.mrb[44].mxu1  ;;  %v15979_v54 = vld [vmem:[%s20029_s8 + $0x28] ss:$0 sps:$4 sm:$0x33]   ;;  %v11577_v56 = vld [vmem:[%s20030_s9 + $0x10] sm:$0xff] }
0x18c7   : > { %v11532_v6 = vadd.f32 %v15039_v4, %v11517_v57  ;;  %v11450_v7 = vpop.f32.mrb[45].mxu1  ;;  %v11575_v57 = vld [vmem:[%s20030_s9] sm:$0xff] }
0x18c8   : > { %v11530_v9 = vadd.f32 %v11515_v2, %v11450_v7  ;;  %v15040_v22 = vpop.f32.mrb[46].mxu1  ;;  %15049 = vmatprep.subr.bf16.mxu0 %v11567_v3  ;;  %v11578_v2 = vld [vmem:[%s20030_s9 + $0x18] sm:$0xff] }
0x18c9   : > { %v11533_v23 = vadd.f32 %v15040_v22, %v11518_v5  ;;  %v11453_v37 = vpop.f32.mrb[47].mxu1  ;;  %15050 = vmatpush3.bf16.msra.mxu0 %v11567_v3  ;;  %v11547_v45 = vmax.f32 %v11532_v6, 0.0  ;;  %v11576_v5 = vld [vmem:[%s20030_s9 + $0x8] sm:$0xff] }
0x18ca   : > { %v11531_v42 = vadd.f32 %v11516_v8, %v11453_v37  ;;  %15051 = vmatprep.subr.bf16.mxu0 %v11568_v1  ;;  %v11545_v13 = vmax.f32 %v11530_v9, 0.0 }
0x18cb   : > { %v11548_v46 = vmax.f32 %v11533_v23, 0.0 }
0x18cc   : > { %v11546_v48 = vmax.f32 %v11531_v42, 0.0 }
0x18cd   : > { %v11570_v55 = vpack.c.bf16 %v11548_v46, %v11547_v45  ;;  %15052 = vmatpush3.bf16.msra.mxu0 %v11568_v1  ;;  %v11581_v46 = vld [vmem:[%s20030_s9 + $0x30] sm:$0xff] }
0x18ce   : > { %v11569_v59 = vpack.c.bf16 %v11546_v48, %v11545_v13  ;;  %v15043_v49 = vpop.f32.mrb[48].mxu1  ;;  %v11579_v48 = vld [vmem:[%s20030_s9 + $0x20] sm:$0xff] }
0x18cf   : > { %v11536_v15 = vadd.f32 %v15043_v49, %v11521_v52  ;;  %v11466_v62 = vpop.f32.mrb[49].mxu1 }
0x18d0   : > { %v11534_v60 = vadd.f32 %v11519_v58, %v11466_v62  ;;  %v15044_v12 = vpop.f32.mrb[50].mxu1  ;;  %15053 = vmatprep.subr.bf16.mxu0 %v11569_v59  ;;  %v11582_v58 = vld [vmem:[%s20030_s9 + $0x38] sm:$0xff] }
0x18d1   : > { %v11537_v14 = vadd.f32 %v15044_v12, %v11522_v61  ;;  %v11469_v32 = vpop.f32.mrb[51].mxu1  ;;  %15054 = vmatpush3.bf16.msra.mxu0 %v11569_v59  ;;  %v11551_v17 = vmax.f32 %v11536_v15, 0.0  ;;  %v11580_v61 = vld [vmem:[%s20030_s9 + $0x28] sm:$0xff] }
0x18d2   : > { %v11535_v16 = vadd.f32 %v11520_v63, %v11469_v32  ;;  %15055 = vmatprep.subr.bf16.mxu0 %v11570_v55  ;;  %v11549_v28 = vmax.f32 %v11534_v60, 0.0 }
0x18d3   : > { %v11552_v18 = vmax.f32 %v11537_v14, 0.0 }
0x18d4   : > { %v11550_v19 = vmax.f32 %v11535_v16, 0.0 }
0x18d5   : > { %v11572_v20 = vpack.c.bf16 %v11552_v18, %v11551_v17  ;;  %15056 = vmatpush3.bf16.msra.mxu0 %v11570_v55  ;;  %v11585_v18 = vld [vmem:[%s20030_s9 + $0x50] sm:$0xf] }
0x18d6   : > { %v11571_v21 = vpack.c.bf16 %v11550_v19, %v11549_v28  ;;  %v15047_v24 = vpop.f32.mrb[148].mxu1  ;;  %v11583_v19 = vld [vmem:[%s20030_s9 + $0x40] sm:$0xff] }
0x18d7   : > { %v11510_v36 = vadd.f32 %v15047_v24, %v19864_v29  ;;  %v11482_v30 = vpop.f32.mrb[149].mxu1 }
0x18d8   : > { %v11508_v35 = vadd.f32 %v11482_v30, %v19866_v31  ;;  %v15048_v25 = vpop.f32.mrb[150].mxu1  ;;  %15057 = vmatprep.subr.bf16.mxu0 %v11571_v21 }
0x18d9   : > { %v11485_v33 = vpop.f32.mrb[151].mxu1  ;;  %15058 = vmatpush3.bf16.msra.mxu0 %v11571_v21  ;;  %v11540_v29 = vadd.f32 %v11525_v26, %v11510_v36  ;;  %v11584_v26 = vld [vmem:[%s20030_s9 + $0x48] sm:$0xff] }
0x18da   : > { %v11538_v38 = vadd.f32 %v11523_v27, %v11508_v35  ;;  %v11509_v39 = vadd.f32 %v11485_v33, %v19868_v11  ;;  %15059 = vmatprep.subr.bf16.mxu0 %v11572_v20  ;;  %v15976_v11 = vld [vmem:[%s20029_s8 + $0x10] sm:$0xff]  }
0x18db   : > { %v11555_v41 = vmax.f32 %v11540_v29, 0.0 }
0x18dc   : > { %v11539_v40 = vadd.f32 %v11524_v34, %v11509_v39  ;;  %v11553_v43 = vmax.f32 %v11538_v38, 0.0 }
0x18dd   : > { %15060 = vmatpush3.bf16.msra.mxu0 %v11572_v20  ;;  %v11574_v31 = vpack.c.bf16 %v11555_v41, %v11555_v41  ;;  %v15980_v41 = vld [vmem:[%s20031_s10] sm:$0xff]  }
0x18de   : > { %v11554_v44 = vmax.f32 %v11539_v40, 0.0 }
0x18df   : > { %v11634_v47 = vsel %vm448_vm0, %v11574_v31, 0 }
0x18e0   : > { %v11573_v0 = vpack.c.bf16 %v11554_v44, %v11553_v43  ;;  %v15981_v43 = vld [vmem:[%s20031_s10 + $0x8] sm:$0xff]   ;;  %v15982_v44 = vld [vmem:[%s20031_s10 + $0x10] ss:$0 sps:$4 sm:$0x11]  }
0x18e2   : > { %15061 = vmatprep.subr.bf16.mxu0 %v11573_v0 }
0x18e3   : > { %15062 = vmatpush3.bf16.msra.mxu0 %v11573_v0  ;;  %v11738_v0 = vld [vmem:[%s20032_s11] sm:$0xff] }
0x18e4   : > { %15606 = vmatprep.subr.msk.bf16.mxu0 %vm448_vm0, %v11574_v31  ;;  %vm16021_vm0 = vmmov 0  }
0x18e7   : > { %15064 = vmatpush3.bf16.msra.mxu0 %v11634_v47 }
0x18e8   : > { %15077 = vmatprep.subr.bf16.mxu0 %v15994_v10 }
0x18ea   : > { %15066 = vmatmul.mubr.msk.bf16.vlgmr.msra.gmra.mrb[84].mxu0 %vm11614_vm12, %v15975_v50 }
0x18eb   : > { %15069 = vmatprep.mubr.msk.bf16.mxu0 %vm11614_vm12, %v15976_v11 }
0x18f2   : > { %15070 = vmatmul.mubr.msk.bf16.gmra.mrb[88].mxu0 %vm11614_vm12, %v15977_v51 }
0x18f3   : > { %15073 = vmatprep.mubr.msk.bf16.mxu0 %vm11614_vm12, %v15978_v53 }
0x18fa   : > { %15074 = vmatmul.mubr.msk.bf16.gmra.mrb[92].mxu0 %vm11614_vm12, %v15979_v54  ;;  %v11740_v54 = vld [vmem:[%s20032_s11 + $0x10] sm:$0xff] }
0x18fb   : > { %15089 = vmatprep.mubr.msk.bf16.mxu0 %vm16021_vm0, %v15994_v10 }
0x19bd   : > { %v15067_v1 = vpop.f32.mrb[84].mxu0 }
0x19be   : > { %v11679_v3 = vadd.f32 %v15067_v1, %v11577_v56  ;;  %v11670_v4 = vpop.f32.mrb[85].mxu0 }
0x19bf   : > { %v11671_v6 = vadd.f32 %v11670_v4, %v11575_v57  ;;  %v15068_v7 = vpop.f32.mrb[86].mxu0  ;;  %v11741_v57 = vld [vmem:[%s20032_s11 + $0x18] sm:$0xff] }
0x19c0   : > { %v11682_v8 = vadd.f32 %v15068_v7, %v11578_v2  ;;  %v11673_v9 = vpop.f32.mrb[87].mxu0  ;;  %v11718_v23 = vmax.f32 %v11679_v3, 0.0 }
0x19c1   : > { %v11674_v22 = vadd.f32 %v11673_v9, %v11576_v5  ;;  %v11716_v42 = vmax.f32 %v11671_v6, 0.0  ;;  %v11742_v6 = vld [vmem:[%s20032_s11 + $0x20] sm:$0x3] }
0x19c2   : > { %v11719_v37 = vmax.f32 %v11682_v8, 0.0 }
0x19c3   : > { %v11717_v45 = vmax.f32 %v11674_v22, 0.0 }
0x19c4   : > { %v11733_v13 = vpack.c.bf16 %v11719_v37, %v11718_v23 }
0x19c5   : > { %v11732_v52 = vpack.c.bf16 %v11717_v45, %v11716_v42  ;;  %v15071_v55 = vpop.f32.mrb[88].mxu0 }
0x19c6   : > { %v11695_v59 = vadd.f32 %v15071_v55, %v11581_v46  ;;  %v11686_v49 = vpop.f32.mrb[89].mxu0 }
0x19c7   : > { %v11687_v15 = vadd.f32 %v11686_v49, %v11579_v48  ;;  %v15072_v62 = vpop.f32.mrb[90].mxu0  ;;  %15078 = vmatpush3.bf16.msra.mxu0 %v11732_v52 }
0x19c8   : > { %v11698_v63 = vadd.f32 %v15072_v62, %v11582_v58  ;;  %v11689_v60 = vpop.f32.mrb[91].mxu0  ;;  %15079 = vmatprep.subr.bf16.mxu0 %v15994_v10  ;;  %v11722_v14 = vmax.f32 %v11695_v59, 0.0 }
0x19c9   : > { %v11690_v12 = vadd.f32 %v11689_v60, %v11580_v61  ;;  %v11720_v16 = vmax.f32 %v11687_v15, 0.0 }
0x19ca   : > { %v11723_v32 = vmax.f32 %v11698_v63, 0.0 }
0x19cb   : > { %v11721_v17 = vmax.f32 %v11690_v12, 0.0  ;;  %15080 = vmatpush3.bf16.msra.mxu0 %v11733_v13 }
0x19cc   : > { %v11735_v28 = vpack.c.bf16 %v11723_v32, %v11722_v14  ;;  %15081 = vmatprep.subr.bf16.mxu0 %v15994_v10 }
0x19cd   : > { %v11734_v20 = vpack.c.bf16 %v11721_v17, %v11720_v16  ;;  %v15075_v21 = vpop.f32.mrb[92].mxu0 }
0x19ce   : > { %v11711_v24 = vadd.f32 %v15075_v21, %v11585_v18  ;;  %v11702_v36 = vpop.f32.mrb[93].mxu0 }
0x19cf   : > { %v11703_v30 = vadd.f32 %v11702_v36, %v11583_v19  ;;  %v15076_v27 = vpop.f32.mrb[94].mxu0  ;;  %15082 = vmatpush3.bf16.msra.mxu0 %v11734_v20 }
0x19d0   : > { %v11705_v35 = vpop.f32.mrb[95].mxu0  ;;  %15083 = vmatprep.subr.bf16.mxu0 %v15994_v10  ;;  %v11726_v33 = vmax.f32 %v11711_v24, 0.0 }
0x19d1   : > { %v11706_v25 = vadd.f32 %v11705_v35, %v11584_v26  ;;  %v11724_v34 = vmax.f32 %v11703_v30, 0.0 }
0x19d2   : > { %v11737_v39 = vpack.c.bf16 %v11726_v33, %v11726_v33 }
0x19d3   : > { %v11725_v29 = vmax.f32 %v11706_v25, 0.0  ;;  %15084 = vmatpush3.bf16.msra.mxu0 %v11735_v28 }
0x19d4   : > { %15085 = vmatprep.subr.bf16.mxu0 %v15994_v10  ;;  %v11767_v40 = vsel %vm849_vm1, %v11737_v39, 0  ;;  %vm11825_vm1 = vcmask 7168  }
0x19d5   : > { %v11736_v38 = vpack.c.bf16 %v11725_v29, %v11724_v34 }
0x19d7   : > { %15086 = vmatpush3.bf16.msra.mxu0 %v11736_v38 }
0x19d8   : > { %15087 = vmatprep.subr.bf16.mxu0 %v15994_v10 }
0x19db   : > { %15088 = vmatpush3.bf16.msra.mxu0 %v11767_v40 }
0x19de   : > { %15090 = vmatmul.mubr.msk.bf16.vlgmr.msra.gmra.mrb[96].mxu0 %vm11756_vm6, %v15980_v41 }
0x19df   : > { %15093 = vmatprep.mubr.msk.bf16.mxu0 %vm16021_vm0, %v15994_v10 }
0x19e6   : > { %15094 = vmatmul.mubr.msk.bf16.gmra.mrb[100].mxu0 %vm11756_vm6, %v15981_v43 }
0x19e7   : > { %15097 = vmatprep.mubr.msk.bf16.mxu0 %vm16021_vm0, %v15994_v10  ;;  %v11739_v10 = vld [vmem:[%s20032_s11 + $0x8] sm:$0xff] }
0x19ee   : > { %15098 = vmatmul.mubr.msk.bf16.gmra.mrb[104].mxu0 %vm11756_vm6, %v15982_v44 }
0x1ab1   : > { %v11803_v31 = vpop.f32.mrb[96].mxu0 }
0x1ab2   : > { %v11804_v47 = vadd.f32 %v11803_v31, %v11738_v0  ;;  %v15091_v50 = vpop.f32.mrb[97].mxu0 }
0x1ab3   : > { %v11806_v11 = vpop.f32.mrb[98].mxu0 }
0x1ab4   : > { %11826 = vst.msk [vmem:[%s413_s30] sm:$0xff] %vm11825_vm1, %v11804_v47  ;;  %v11807_v51 = vadd.f32 %v11806_v11, %v11739_v10  ;;  %v15092_v53 = vpop.f32.mrb[99].mxu0 }
0x1ab6   : > { %11827 = vst.msk [vmem:[%s413_s30 + $0x8] sm:$0xff] %vm11825_vm1, %v11807_v51 }
0x1ab9   : > { %v11811_v56 = vpop.f32.mrb[100].mxu0 }
0x1aba   : > { %v11812_v1 = vadd.f32 %v11811_v56, %v11740_v54  ;;  %v15095_v2 = vpop.f32.mrb[101].mxu0 }
0x1abb   : > { %v11814_v3 = vpop.f32.mrb[102].mxu0 }
0x1abc   : > { %11828 = vst.msk [vmem:[%s413_s30 + $0x10] sm:$0xff] %vm11825_vm1, %v11812_v1  ;;  %v11815_v4 = vadd.f32 %v11814_v3, %v11741_v57  ;;  %v15096_v5 = vpop.f32.mrb[103].mxu0 }
0x1abe   : > { %11829 = vst.msk [vmem:[%s413_s30 + $0x18] sm:$0xff] %vm11825_vm1, %v11815_v4 }
0x1ac1   : > { %v11819_v7 = vpop.f32.mrb[104].mxu0 }
0x1ac2   : > { %v11820_v8 = vadd.f32 %v11819_v7, %v11742_v6  ;;  %v15099_v9 = vpop.f32.mrb[105].mxu0 }
0x1ac3   : > { %v11822_v22 = vpop.f32.mrb[106].mxu0 }
0x1ac4   : > { %11831 = vst.msk [vmem:[%s413_s30 + $0x20] sm:$0x3] %vm11830_vm7, %v11820_v8  ;;  %v15100_v23 = vpop.f32.mrb[107].mxu0 }
0x1ac5 PF: > { %s22_s21 = sadd.s32 1, %s15989_s21  }
0x1ac6   : > { %p19_p4 = scmp.ge.s32.totalorder %s22_s21, 4  }
0x1ac8   :  { %21 = sbr.rel (!%p19_p4) target bundleno = 1 (0x1), region = 173 }

</bundles_post_ra>
